<compile_context>
chip_gen: v6e
topology: v6e:2x2x1
jax: 0.10.0
libtpu: 0.0.40
codegen_flags: <defaults>
</compile_context>

<pallas_src>
import jax
import jax.numpy as jnp
from jax.experimental import pallas as pl
from jax.experimental.pallas import tpu as pltpu

# Geometry implied by the module (fc1 expects 16*28*28 -> input is 1x32x32).
H = W = 32
C1, C1P = 6, 8               # conv1 out channels (padded to 8 sublanes)
C2 = 16                      # conv2 out channels
KH = KW = 3
PIX = H * W                  # 1024 padded pixels per channel (32-pitch grid)
OH2 = OW2 = 28               # conv2 valid output size
VALID = OH2 * W              # 896 lanes kept per channel (rows 0..27, pitch 32)
KPAD = C2 * VALID            # 14336 = 112*128 padded fc1 reduction length
N1, N2, N3 = 512, 64, 2      # fc widths
CPB = 4                      # conv2 channels per fc1 K tile
BLOCK_K = CPB * VALID        # 3584
NSTEPS = KPAD // BLOCK_K     # 4
TAP_OFFS = tuple(kh * W + kw for kh in range(KH) for kw in range(KW))


def _make_kernel(n_batch):
    def kernel(x_ref, w1_ref, b1_ref, w2_ref, b2_ref,
               w1q_ref, s1_ref, fb1_ref, fw2_ref, fb2_ref, fw3_ref, fb3_ref,
               o_ref, act_ref, acc_ref):
        k = pl.program_id(0)

        # ---- step 0: conv1+relu+conv2+relu on the padded 32-pitch lane grid
        @pl.when(k == 0)
        def _conv_front():
            acc_ref[...] = jnp.zeros_like(acc_ref)
            w1 = w1_ref[...]                # (8, 9)
            b1 = b1_ref[...]                # (8, 1)
            w2 = w2_ref[...]                # (16, 72)
            b2 = b2_ref[...]                # (16, 1)
            for n in range(n_batch):
                xf = x_ref[pl.ds(n, 1), :]                        # (1, 1024)
                # 3x3 taps = lane rolls (roll by PIX-off == grab x[i+off]).
                p1 = jnp.concatenate(
                    [xf if off == 0 else pltpu.roll(xf, PIX - off, 1)
                     for off in TAP_OFFS], axis=0)                # (9, 1024)
                h1 = jnp.maximum(
                    jnp.dot(w1, p1, preferred_element_type=jnp.float32) + b1,
                    0.0)                                          # (8, 1024)
                p2 = jnp.concatenate(
                    [h1 if off == 0 else pltpu.roll(h1, PIX - off, 1)
                     for off in TAP_OFFS], axis=0)                # (72, 1024)
                h2 = jnp.maximum(
                    jnp.dot(w2, p2, preferred_element_type=jnp.float32) + b2,
                    0.0)                                          # (16, 1024)
                # Keep rows 0..27 (aligned lane slice).  Columns 28..31 of
                # each image row are garbage but match exact-zero fc1 rows.
                for c in range(C2):
                    seg = h2[c:c + 1, :VALID].astype(jnp.bfloat16)  # (1, 896)
                    act_ref[c // CPB, pl.ds(n, 1),
                            pl.ds((c % CPB) * VALID, VALID)] = seg

        # ---- every step: stream one int8 fc1 weight tile, f32-accumulate.
        xb = act_ref[k]                                   # (N, 3584) bf16
        wb = w1q_ref[...].astype(jnp.bfloat16)            # (3584, 512), exact
        acc_ref[...] += jnp.dot(xb, wb, preferred_element_type=jnp.float32)

        # ---- last step: fc1 scale+bias+relu, fc2+relu, fc3 epilogue.
        @pl.when(k == pl.num_programs(0) - 1)
        def _fc_tail():
            h = jnp.maximum(acc_ref[...] * s1_ref[...] + fb1_ref[...], 0.0)
            h = jnp.maximum(
                jnp.dot(h, fw2_ref[...], preferred_element_type=jnp.float32)
                + fb2_ref[...], 0.0)
            y = (jnp.dot(h, fw3_ref[...], preferred_element_type=jnp.float32)
                 + fb3_ref[...])
            o_ref[...] = y.astype(o_ref.dtype)

    return kernel


def net_forward(x_nchw, packed):
    n = x_nchw.shape[0]
    x_flat = x_nchw.reshape(n, PIX).astype(jnp.float32)

    flops = n * (2 * C1P * (KH * KW) * PIX + 2 * C2 * (KH * KW * C1P) * PIX
                 + 2 * (KPAD * N1 + N1 * N2 + N2 * N3))
    bytes_accessed = (KPAD * N1                          # int8 fc1 stream
                      + n * PIX * 4 + n * N3 * 4
                      + (N1 * N2 + N2 * N3 + 3 * N1 + N2 + N3) * 4
                      + (C1P * 9 + C1P + C2 * 72 + C2) * 4)

    grid_spec = pltpu.PrefetchScalarGridSpec(
        num_scalar_prefetch=0,
        grid=(NSTEPS,),
        in_specs=[
            pl.BlockSpec((n, PIX), lambda k: (0, 0)),            # x
            pl.BlockSpec((C1P, KH * KW), lambda k: (0, 0)),      # conv1 w
            pl.BlockSpec((C1P, 1), lambda k: (0, 0)),            # conv1 b
            pl.BlockSpec((C2, KH * KW * C1P), lambda k: (0, 0)),  # conv2 w
            pl.BlockSpec((C2, 1), lambda k: (0, 0)),             # conv2 b
            pl.BlockSpec((BLOCK_K, N1), lambda k: (k, 0)),       # fc1 int8
            pl.BlockSpec((1, N1), lambda k: (0, 0)),             # fc1 scale
            pl.BlockSpec((1, N1), lambda k: (0, 0)),             # fc1 b
            pl.BlockSpec((N1, N2), lambda k: (0, 0)),            # fc2 w
            pl.BlockSpec((1, N2), lambda k: (0, 0)),             # fc2 b
            pl.BlockSpec((N2, N3), lambda k: (0, 0)),            # fc3 w
            pl.BlockSpec((1, N3), lambda k: (0, 0)),             # fc3 b
        ],
        out_specs=pl.BlockSpec((n, N3), lambda k: (0, 0)),
        scratch_shapes=[
            pltpu.VMEM((NSTEPS, n, BLOCK_K), jnp.bfloat16),      # conv acts
            pltpu.VMEM((n, N1), jnp.float32),                    # fc1 acc
        ],
    )
    return pl.pallas_call(
        _make_kernel(n),
        out_shape=jax.ShapeDtypeStruct((n, N3), jnp.float32),
        grid_spec=grid_spec,
        compiler_params=pltpu.CompilerParams(
            dimension_semantics=("arbitrary",)),
        cost_estimate=pl.CostEstimate(flops=flops, transcendentals=0,
                                      bytes_accessed=bytes_accessed),
    )(x_flat, packed["conv1_w"], packed["conv1_b"],
      packed["conv2_w"], packed["conv2_b"],
      packed["fc1_q"], packed["fc1_scale"], packed["fc1_b"],
      packed["fc2_w"], packed["fc2_b"], packed["fc3_w"], packed["fc3_b"])


# ---------------------------------------------------------------------------
# Host-side parameter packing (done once, not per forward call).
# ---------------------------------------------------------------------------
def pack_params(p):
    f32 = jnp.float32
    w1 = p["conv1_w"].reshape(C1, KH * KW)                        # (6,9)
    w1p = jnp.zeros((C1P, KH * KW), f32).at[:C1].set(w1)
    b1p = jnp.zeros((C1P, 1), f32).at[:C1, 0].set(p["conv1_b"])
    w2 = jnp.transpose(p["conv2_w"], (0, 2, 3, 1))                # (16,3,3,6)
    w2p = jnp.zeros((C2, KH, KW, C1P), f32).at[..., :C1].set(w2)
    w2p = w2p.reshape(C2, KH * KW * C1P)                          # (16,72)
    b2p = p["conv2_b"].reshape(C2, 1)

    # fc1: permute rows from the dense NCHW flatten (16*28*28) to the padded
    # 32-pitch conv layout (16*28*32); padded columns get exact-zero rows.
    wfc = p["fc1_w"].reshape(C2, OH2, OW2, N1)
    wexp = jnp.zeros((C2, OH2, W, N1), f32).at[:, :, :OW2, :].set(wfc)
    wexp = wexp.reshape(KPAD, N1)
    amax = jnp.max(jnp.abs(wexp), axis=0)
    scale = jnp.where(amax > 0, amax / 127.0, 1.0)
    q = jnp.clip(jnp.round(wexp / scale), -127.0, 127.0).astype(jnp.int8)

    return {
        "conv1_w": w1p, "conv1_b": b1p, "conv2_w": w2p, "conv2_b": b2p,
        "fc1_q": q, "fc1_scale": scale.reshape(1, N1).astype(f32),
        "fc1_b": p["fc1_b"].reshape(1, N1),
        "fc2_w": p["fc2_w"], "fc2_b": p["fc2_b"].reshape(1, N2),
        "fc3_w": p["fc3_w"], "fc3_b": p["fc3_b"].reshape(1, N3),
    }


def init_params(key):
    ks = jax.random.split(key, 10)

    def conv_w(k, cout, cin, kh, kw):
        fan_in = cin * kh * kw
        return jax.random.normal(k, (cout, cin, kh, kw), jnp.float32) / jnp.sqrt(fan_in)

    def fc_w(k, fin, fout):
        return jax.random.normal(k, (fin, fout), jnp.float32) / jnp.sqrt(fin)

    return {
        "conv1_w": conv_w(ks[0], C1, 1, KH, KW),
        "conv1_b": 0.01 * jax.random.normal(ks[1], (C1,), jnp.float32),
        "conv2_w": conv_w(ks[2], C2, C1, KH, KW),
        "conv2_b": 0.01 * jax.random.normal(ks[3], (C2,), jnp.float32),
        "fc1_w": fc_w(ks[4], C2 * OH2 * OW2, N1),
        "fc1_b": 0.01 * jax.random.normal(ks[5], (N1,), jnp.float32),
        "fc2_w": fc_w(ks[6], N1, N2),
        "fc2_b": 0.01 * jax.random.normal(ks[7], (N2,), jnp.float32),
        "fc3_w": fc_w(ks[8], N2, N3),
        "fc3_b": 0.01 * jax.random.normal(ks[9], (N3,), jnp.float32),
    }


def net_reference(x_nchw, params):
    """Pure-JAX f32 reference matching the PyTorch forward semantics."""
    dn = ("NCHW", "OIHW", "NCHW")
    x = jax.lax.conv_general_dilated(x_nchw, params["conv1_w"], (1, 1), "VALID",
                                     dimension_numbers=dn)
    x = jnp.maximum(x + params["conv1_b"][None, :, None, None], 0.0)
    x = jax.lax.conv_general_dilated(x, params["conv2_w"], (1, 1), "VALID",
                                     dimension_numbers=dn)
    x = jnp.maximum(x + params["conv2_b"][None, :, None, None], 0.0)
    x = x.reshape(x.shape[0], C2 * OH2 * OW2)
    x = jnp.maximum(x @ params["fc1_w"] + params["fc1_b"], 0.0)
    x = jnp.maximum(x @ params["fc2_w"] + params["fc2_b"], 0.0)
    return x @ params["fc3_w"] + params["fc3_b"]


if __name__ == "__main__":
    key = jax.random.PRNGKey(0)
    k_x, k_p = jax.random.split(key)
    # Input shape implied by the module: two valid 3x3 convs -> 28x28, so
    # the input is (N, 1, 32, 32); batch 2 for the smoke test.
    x = jax.random.normal(k_x, (2, 1, H, W), jnp.float32)
    params = init_params(k_p)
    packed = pack_params(params)

    out = net_forward(x, packed)
    out = jax.block_until_ready(out)
    assert out.shape == (2, N3), out.shape

    ref = net_reference(x, params)
    assert jnp.allclose(out, ref, rtol=2e-2, atol=2e-2), (out, ref)

    print("KERNEL_OK")
</pallas_src>

<mosaic_0001>
module attributes {stable_mosaic.version = 11 : i64} {
  func.func @kernel(%arg0: i32, %arg1: memref<2x1024xf32, #tpu.memory_space<vmem>>, %arg2: memref<8x9xf32, #tpu.memory_space<vmem>>, %arg3: memref<8x1xf32, #tpu.memory_space<vmem>>, %arg4: memref<16x72xf32, #tpu.memory_space<vmem>>, %arg5: memref<16x1xf32, #tpu.memory_space<vmem>>, %arg6: memref<3584x512xi8, #tpu.memory_space<vmem>>, %arg7: memref<1x512xf32, #tpu.memory_space<vmem>>, %arg8: memref<1x512xf32, #tpu.memory_space<vmem>>, %arg9: memref<512x64xf32, #tpu.memory_space<vmem>>, %arg10: memref<1x64xf32, #tpu.memory_space<vmem>>, %arg11: memref<64x2xf32, #tpu.memory_space<vmem>>, %arg12: memref<1x2xf32, #tpu.memory_space<vmem>>, %arg13: memref<2x2xf32, #tpu.memory_space<vmem>>, %arg14: memref<4x2x3584xbf16, #tpu.memory_space<vmem>>, %arg15: memref<2x512xf32, #tpu.memory_space<vmem>>) attributes {dimension_semantics = [#tpu.dimension_semantics<arbitrary>], iteration_bounds = array<i64: 4>, scalar_prefetch = 0 : i64, scratch_operands = 2 : i64, tpu.core_type = #tpu.core_type<tc>, window_params = [{pipeline_mode = #tpu.pipeline_mode<synchronous>, transform_indices = @transform_0, window_bounds = array<i64: 2, 1024>}, {pipeline_mode = #tpu.pipeline_mode<synchronous>, transform_indices = @transform_1, window_bounds = array<i64: 8, 9>}, {pipeline_mode = #tpu.pipeline_mode<synchronous>, transform_indices = @transform_2, window_bounds = array<i64: 8, 1>}, {pipeline_mode = #tpu.pipeline_mode<synchronous>, transform_indices = @transform_3, window_bounds = array<i64: 16, 72>}, {pipeline_mode = #tpu.pipeline_mode<synchronous>, transform_indices = @transform_4, window_bounds = array<i64: 16, 1>}, {transform_indices = @transform_5, window_bounds = array<i64: 3584, 512>}, {pipeline_mode = #tpu.pipeline_mode<synchronous>, transform_indices = @transform_6, window_bounds = array<i64: 1, 512>}, {pipeline_mode = #tpu.pipeline_mode<synchronous>, transform_indices = @transform_7, window_bounds = array<i64: 1, 512>}, {pipeline_mode = #tpu.pipeline_mode<synchronous>, transform_indices = @transform_8, window_bounds = array<i64: 512, 64>}, {pipeline_mode = #tpu.pipeline_mode<synchronous>, transform_indices = @transform_9, window_bounds = array<i64: 1, 64>}, {pipeline_mode = #tpu.pipeline_mode<synchronous>, transform_indices = @transform_10, window_bounds = array<i64: 64, 2>}, {pipeline_mode = #tpu.pipeline_mode<synchronous>, transform_indices = @transform_11, window_bounds = array<i64: 1, 2>}, {pipeline_mode = #tpu.pipeline_mode<synchronous>, transform_indices = @transform_12, window_bounds = array<i64: 2, 2>}]} {
    %c0_i32 = arith.constant 0 : i32
    %0 = arith.cmpi eq, %arg0, %c0_i32 : i32
    %1 = arith.extui %0 : i1 to i32
    %c0_i32_0 = arith.constant 0 : i32
    %2 = arith.cmpi ne, %1, %c0_i32_0 : i32
    scf.if %2 {
      %cst_9 = arith.constant 0.000000e+00 : f32
      %15 = vector.broadcast %cst_9 : f32 to vector<2x512xf32>
      %c0_10 = arith.constant 0 : index
      %c0_11 = arith.constant 0 : index
      %16 = vector.load %arg15[%c0_10, %c0_11] : memref<2x512xf32, #tpu.memory_space<vmem>>, vector<2x512xf32>
      tpu.vector_store %arg15[%c0_10, %c0_11], %15 {strides = array<i32>} : memref<2x512xf32, #tpu.memory_space<vmem>>, vector<2x512xf32>,
      %c0_12 = arith.constant 0 : index
      %c0_13 = arith.constant 0 : index
      %17 = vector.load %arg2[%c0_12, %c0_13] : memref<8x9xf32, #tpu.memory_space<vmem>>, vector<8x9xf32>
      %c0_14 = arith.constant 0 : index
      %c0_15 = arith.constant 0 : index
      %18 = vector.load %arg3[%c0_14, %c0_15] : memref<8x1xf32, #tpu.memory_space<vmem>>, vector<8x1xf32>
      %c0_16 = arith.constant 0 : index
      %c0_17 = arith.constant 0 : index
      %19 = vector.load %arg4[%c0_16, %c0_17] : memref<16x72xf32, #tpu.memory_space<vmem>>, vector<16x72xf32>
      %c0_18 = arith.constant 0 : index
      %c0_19 = arith.constant 0 : index
      %20 = vector.load %arg5[%c0_18, %c0_19] : memref<16x1xf32, #tpu.memory_space<vmem>>, vector<16x1xf32>
      %c0_20 = arith.constant 0 : index
      %c0_21 = arith.constant 0 : index
      %21 = vector.load %arg1[%c0_20, %c0_21] : memref<2x1024xf32, #tpu.memory_space<vmem>>, vector<1x1024xf32>
      %c1023_i32 = arith.constant 1023 : i32
      %22 = tpu.dynamic_rotate %21 by %c1023_i32 dim 1 : vector<1x1024xf32>, i32 -> vector<1x1024xf32>
      %c1022_i32 = arith.constant 1022 : i32
      %23 = tpu.dynamic_rotate %21 by %c1022_i32 dim 1 : vector<1x1024xf32>, i32 -> vector<1x1024xf32>
      %c992_i32 = arith.constant 992 : i32
      %24 = tpu.dynamic_rotate %21 by %c992_i32 dim 1 : vector<1x1024xf32>, i32 -> vector<1x1024xf32>
      %c991_i32 = arith.constant 991 : i32
      %25 = tpu.dynamic_rotate %21 by %c991_i32 dim 1 : vector<1x1024xf32>, i32 -> vector<1x1024xf32>
      %c990_i32 = arith.constant 990 : i32
      %26 = tpu.dynamic_rotate %21 by %c990_i32 dim 1 : vector<1x1024xf32>, i32 -> vector<1x1024xf32>
      %c960_i32 = arith.constant 960 : i32
      %27 = tpu.dynamic_rotate %21 by %c960_i32 dim 1 : vector<1x1024xf32>, i32 -> vector<1x1024xf32>
      %c959_i32 = arith.constant 959 : i32
      %28 = tpu.dynamic_rotate %21 by %c959_i32 dim 1 : vector<1x1024xf32>, i32 -> vector<1x1024xf32>
      %c958_i32 = arith.constant 958 : i32
      %29 = tpu.dynamic_rotate %21 by %c958_i32 dim 1 : vector<1x1024xf32>, i32 -> vector<1x1024xf32>
      %30 = tpu.concatenate %21, %22, %23, %24, %25, %26, %27, %28, %29 in 0 : vector<1x1024xf32>, vector<1x1024xf32>, vector<1x1024xf32>, vector<1x1024xf32>, vector<1x1024xf32>, vector<1x1024xf32>, vector<1x1024xf32>, vector<1x1024xf32>, vector<1x1024xf32> -> vector<9x1024xf32>
      %cst_22 = arith.constant dense<0.000000e+00> : vector<8x1024xf32>
      %31 = tpu.matmul %17, %30, %cst_22 {dimension_numbers = #tpu.dot_dimension_numbers<[1], [0], [0], [1], [0, 0, 1, 1], [], []>} : vector<8x9xf32>, vector<9x1024xf32>, vector<8x1024xf32> -> vector<8x1024xf32>
      %32 = vector.broadcast %18 : vector<8x1xf32> to vector<8x1024xf32>
      %33 = arith.addf %31, %32 : vector<8x1024xf32>
      %cst_23 = arith.constant 0.000000e+00 : f32
      %34 = vector.broadcast %cst_23 : f32 to vector<8x1024xf32>
      %35 = arith.maximumf %33, %34 : vector<8x1024xf32>
      %c1023_i32_24 = arith.constant 1023 : i32
      %36 = tpu.dynamic_rotate %35 by %c1023_i32_24 dim 1 : vector<8x1024xf32>, i32 -> vector<8x1024xf32>
      %c1022_i32_25 = arith.constant 1022 : i32
      %37 = tpu.dynamic_rotate %35 by %c1022_i32_25 dim 1 : vector<8x1024xf32>, i32 -> vector<8x1024xf32>
      %c992_i32_26 = arith.constant 992 : i32
      %38 = tpu.dynamic_rotate %35 by %c992_i32_26 dim 1 : vector<8x1024xf32>, i32 -> vector<8x1024xf32>
      %c991_i32_27 = arith.constant 991 : i32
      %39 = tpu.dynamic_rotate %35 by %c991_i32_27 dim 1 : vector<8x1024xf32>, i32 -> vector<8x1024xf32>
      %c990_i32_28 = arith.constant 990 : i32
      %40 = tpu.dynamic_rotate %35 by %c990_i32_28 dim 1 : vector<8x1024xf32>, i32 -> vector<8x1024xf32>
      %c960_i32_29 = arith.constant 960 : i32
      %41 = tpu.dynamic_rotate %35 by %c960_i32_29 dim 1 : vector<8x1024xf32>, i32 -> vector<8x1024xf32>
      %c959_i32_30 = arith.constant 959 : i32
      %42 = tpu.dynamic_rotate %35 by %c959_i32_30 dim 1 : vector<8x1024xf32>, i32 -> vector<8x1024xf32>
      %c958_i32_31 = arith.constant 958 : i32
      %43 = tpu.dynamic_rotate %35 by %c958_i32_31 dim 1 : vector<8x1024xf32>, i32 -> vector<8x1024xf32>
      %44 = tpu.concatenate %35, %36, %37, %38, %39, %40, %41, %42, %43 in 0 : vector<8x1024xf32>, vector<8x1024xf32>, vector<8x1024xf32>, vector<8x1024xf32>, vector<8x1024xf32>, vector<8x1024xf32>, vector<8x1024xf32>, vector<8x1024xf32>, vector<8x1024xf32> -> vector<72x1024xf32>
      %cst_32 = arith.constant dense<0.000000e+00> : vector<16x1024xf32>
      %45 = tpu.matmul %19, %44, %cst_32 {dimension_numbers = #tpu.dot_dimension_numbers<[1], [0], [0], [1], [0, 0, 1, 1], [], []>} : vector<16x72xf32>, vector<72x1024xf32>, vector<16x1024xf32> -> vector<16x1024xf32>
      %46 = vector.broadcast %20 : vector<16x1xf32> to vector<16x1024xf32>
      %47 = arith.addf %45, %46 : vector<16x1024xf32>
      %cst_33 = arith.constant 0.000000e+00 : f32
      %48 = vector.broadcast %cst_33 : f32 to vector<16x1024xf32>
      %49 = arith.maximumf %47, %48 : vector<16x1024xf32>
      %50 = vector.extract_strided_slice %49 {offsets = [0, 0], sizes = [1, 896], strides = [1, 1]} : vector<16x1024xf32> to vector<1x896xf32>
      %51 = arith.truncf %50 : vector<1x896xf32> to vector<1x896xbf16>
      %c0_34 = arith.constant 0 : index
      %c0_35 = arith.constant 0 : index
      %c0_36 = arith.constant 0 : index
      %52 = vector.load %arg14[%c0_34, %c0_35, %c0_36] : memref<4x2x3584xbf16, #tpu.memory_space<vmem>>, vector<1x1x896xbf16>
      %53 = vector.shape_cast %52 : vector<1x1x896xbf16> to vector<1x896xbf16>
      %54 = vector.shape_cast %51 : vector<1x896xbf16> to vector<1x1x896xbf16>
      tpu.vector_store %arg14[%c0_34, %c0_35, %c0_36], %54 {strides = array<i32>} : memref<4x2x3584xbf16, #tpu.memory_space<vmem>>, vector<1x1x896xbf16>,
      %55 = vector.extract_strided_slice %49 {offsets = [1, 0], sizes = [1, 896], strides = [1, 1]} : vector<16x1024xf32> to vector<1x896xf32>
      %56 = arith.truncf %55 : vector<1x896xf32> to vector<1x896xbf16>
      %c0_37 = arith.constant 0 : index
      %c0_38 = arith.constant 0 : index
      %c896 = arith.constant 896 : index
      %57 = vector.load %arg14[%c0_37, %c0_38, %c896] : memref<4x2x3584xbf16, #tpu.memory_space<vmem>>, vector<1x1x896xbf16>
      %58 = vector.shape_cast %57 : vector<1x1x896xbf16> to vector<1x896xbf16>
      %59 = vector.shape_cast %56 : vector<1x896xbf16> to vector<1x1x896xbf16>
      tpu.vector_store %arg14[%c0_37, %c0_38, %c896], %59 {strides = array<i32>} : memref<4x2x3584xbf16, #tpu.memory_space<vmem>>, vector<1x1x896xbf16>,
      %60 = vector.extract_strided_slice %49 {offsets = [2, 0], sizes = [1, 896], strides = [1, 1]} : vector<16x1024xf32> to vector<1x896xf32>
      %61 = arith.truncf %60 : vector<1x896xf32> to vector<1x896xbf16>
      %c0_39 = arith.constant 0 : index
      %c0_40 = arith.constant 0 : index
      %c1792 = arith.constant 1792 : index
      %62 = vector.load %arg14[%c0_39, %c0_40, %c1792] : memref<4x2x3584xbf16, #tpu.memory_space<vmem>>, vector<1x1x896xbf16>
      %63 = vector.shape_cast %62 : vector<1x1x896xbf16> to vector<1x896xbf16>
      %64 = vector.shape_cast %61 : vector<1x896xbf16> to vector<1x1x896xbf16>
      tpu.vector_store %arg14[%c0_39, %c0_40, %c1792], %64 {strides = array<i32>} : memref<4x2x3584xbf16, #tpu.memory_space<vmem>>, vector<1x1x896xbf16>,
      %65 = vector.extract_strided_slice %49 {offsets = [3, 0], sizes = [1, 896], strides = [1, 1]} : vector<16x1024xf32> to vector<1x896xf32>
      %66 = arith.truncf %65 : vector<1x896xf32> to vector<1x896xbf16>
      %c0_41 = arith.constant 0 : index
      %c0_42 = arith.constant 0 : index
      %c2688 = arith.constant 2688 : index
      %67 = vector.load %arg14[%c0_41, %c0_42, %c2688] : memref<4x2x3584xbf16, #tpu.memory_space<vmem>>, vector<1x1x896xbf16>
      %68 = vector.shape_cast %67 : vector<1x1x896xbf16> to vector<1x896xbf16>
      %69 = vector.shape_cast %66 : vector<1x896xbf16> to vector<1x1x896xbf16>
      tpu.vector_store %arg14[%c0_41, %c0_42, %c2688], %69 {strides = array<i32>} : memref<4x2x3584xbf16, #tpu.memory_space<vmem>>, vector<1x1x896xbf16>,
      %70 = vector.extract_strided_slice %49 {offsets = [4, 0], sizes = [1, 896], strides = [1, 1]} : vector<16x1024xf32> to vector<1x896xf32>
      %71 = arith.truncf %70 : vector<1x896xf32> to vector<1x896xbf16>
      %c1 = arith.constant 1 : index
      %c0_43 = arith.constant 0 : index
      %c0_44 = arith.constant 0 : index
      %72 = vector.load %arg14[%c1, %c0_43, %c0_44] : memref<4x2x3584xbf16, #tpu.memory_space<vmem>>, vector<1x1x896xbf16>
      %73 = vector.shape_cast %72 : vector<1x1x896xbf16> to vector<1x896xbf16>
      %74 = vector.shape_cast %71 : vector<1x896xbf16> to vector<1x1x896xbf16>
      tpu.vector_store %arg14[%c1, %c0_43, %c0_44], %74 {strides = array<i32>} : memref<4x2x3584xbf16, #tpu.memory_space<vmem>>, vector<1x1x896xbf16>,
      %75 = vector.extract_strided_slice %49 {offsets = [5, 0], sizes = [1, 896], strides = [1, 1]} : vector<16x1024xf32> to vector<1x896xf32>
      %76 = arith.truncf %75 : vector<1x896xf32> to vector<1x896xbf16>
      %c1_45 = arith.constant 1 : index
      %c0_46 = arith.constant 0 : index
      %c896_47 = arith.constant 896 : index
      %77 = vector.load %arg14[%c1_45, %c0_46, %c896_47] : memref<4x2x3584xbf16, #tpu.memory_space<vmem>>, vector<1x1x896xbf16>
      %78 = vector.shape_cast %77 : vector<1x1x896xbf16> to vector<1x896xbf16>
      %79 = vector.shape_cast %76 : vector<1x896xbf16> to vector<1x1x896xbf16>
      tpu.vector_store %arg14[%c1_45, %c0_46, %c896_47], %79 {strides = array<i32>} : memref<4x2x3584xbf16, #tpu.memory_space<vmem>>, vector<1x1x896xbf16>,
      %80 = vector.extract_strided_slice %49 {offsets = [6, 0], sizes = [1, 896], strides = [1, 1]} : vector<16x1024xf32> to vector<1x896xf32>
      %81 = arith.truncf %80 : vector<1x896xf32> to vector<1x896xbf16>
      %c1_48 = arith.constant 1 : index
      %c0_49 = arith.constant 0 : index
      %c1792_50 = arith.constant 1792 : index
      %82 = vector.load %arg14[%c1_48, %c0_49, %c1792_50] : memref<4x2x3584xbf16, #tpu.memory_space<vmem>>, vector<1x1x896xbf16>
      %83 = vector.shape_cast %82 : vector<1x1x896xbf16> to vector<1x896xbf16>
      %84 = vector.shape_cast %81 : vector<1x896xbf16> to vector<1x1x896xbf16>
      tpu.vector_store %arg14[%c1_48, %c0_49, %c1792_50], %84 {strides = array<i32>} : memref<4x2x3584xbf16, #tpu.memory_space<vmem>>, vector<1x1x896xbf16>,
      %85 = vector.extract_strided_slice %49 {offsets = [7, 0], sizes = [1, 896], strides = [1, 1]} : vector<16x1024xf32> to vector<1x896xf32>
      %86 = arith.truncf %85 : vector<1x896xf32> to vector<1x896xbf16>
      %c1_51 = arith.constant 1 : index
      %c0_52 = arith.constant 0 : index
      %c2688_53 = arith.constant 2688 : index
      %87 = vector.load %arg14[%c1_51, %c0_52, %c2688_53] : memref<4x2x3584xbf16, #tpu.memory_space<vmem>>, vector<1x1x896xbf16>
      %88 = vector.shape_cast %87 : vector<1x1x896xbf16> to vector<1x896xbf16>
      %89 = vector.shape_cast %86 : vector<1x896xbf16> to vector<1x1x896xbf16>
      tpu.vector_store %arg14[%c1_51, %c0_52, %c2688_53], %89 {strides = array<i32>} : memref<4x2x3584xbf16, #tpu.memory_space<vmem>>, vector<1x1x896xbf16>,
      %90 = vector.extract_strided_slice %49 {offsets = [8, 0], sizes = [1, 896], strides = [1, 1]} : vector<16x1024xf32> to vector<1x896xf32>
      %91 = arith.truncf %90 : vector<1x896xf32> to vector<1x896xbf16>
      %c2 = arith.constant 2 : index
      %c0_54 = arith.constant 0 : index
      %c0_55 = arith.constant 0 : index
      %92 = vector.load %arg14[%c2, %c0_54, %c0_55] : memref<4x2x3584xbf16, #tpu.memory_space<vmem>>, vector<1x1x896xbf16>
      %93 = vector.shape_cast %92 : vector<1x1x896xbf16> to vector<1x896xbf16>
      %94 = vector.shape_cast %91 : vector<1x896xbf16> to vector<1x1x896xbf16>
      tpu.vector_store %arg14[%c2, %c0_54, %c0_55], %94 {strides = array<i32>} : memref<4x2x3584xbf16, #tpu.memory_space<vmem>>, vector<1x1x896xbf16>,
      %95 = vector.extract_strided_slice %49 {offsets = [9, 0], sizes = [1, 896], strides = [1, 1]} : vector<16x1024xf32> to vector<1x896xf32>
      %96 = arith.truncf %95 : vector<1x896xf32> to vector<1x896xbf16>
      %c2_56 = arith.constant 2 : index
      %c0_57 = arith.constant 0 : index
      %c896_58 = arith.constant 896 : index
      %97 = vector.load %arg14[%c2_56, %c0_57, %c896_58] : memref<4x2x3584xbf16, #tpu.memory_space<vmem>>, vector<1x1x896xbf16>
      %98 = vector.shape_cast %97 : vector<1x1x896xbf16> to vector<1x896xbf16>
      %99 = vector.shape_cast %96 : vector<1x896xbf16> to vector<1x1x896xbf16>
      tpu.vector_store %arg14[%c2_56, %c0_57, %c896_58], %99 {strides = array<i32>} : memref<4x2x3584xbf16, #tpu.memory_space<vmem>>, vector<1x1x896xbf16>,
      %100 = vector.extract_strided_slice %49 {offsets = [10, 0], sizes = [1, 896], strides = [1, 1]} : vector<16x1024xf32> to vector<1x896xf32>
      %101 = arith.truncf %100 : vector<1x896xf32> to vector<1x896xbf16>
      %c2_59 = arith.constant 2 : index
      %c0_60 = arith.constant 0 : index
      %c1792_61 = arith.constant 1792 : index
      %102 = vector.load %arg14[%c2_59, %c0_60, %c1792_61] : memref<4x2x3584xbf16, #tpu.memory_space<vmem>>, vector<1x1x896xbf16>
      %103 = vector.shape_cast %102 : vector<1x1x896xbf16> to vector<1x896xbf16>
      %104 = vector.shape_cast %101 : vector<1x896xbf16> to vector<1x1x896xbf16>
      tpu.vector_store %arg14[%c2_59, %c0_60, %c1792_61], %104 {strides = array<i32>} : memref<4x2x3584xbf16, #tpu.memory_space<vmem>>, vector<1x1x896xbf16>,
      %105 = vector.extract_strided_slice %49 {offsets = [11, 0], sizes = [1, 896], strides = [1, 1]} : vector<16x1024xf32> to vector<1x896xf32>
      %106 = arith.truncf %105 : vector<1x896xf32> to vector<1x896xbf16>
      %c2_62 = arith.constant 2 : index
      %c0_63 = arith.constant 0 : index
      %c2688_64 = arith.constant 2688 : index
      %107 = vector.load %arg14[%c2_62, %c0_63, %c2688_64] : memref<4x2x3584xbf16, #tpu.memory_space<vmem>>, vector<1x1x896xbf16>
      %108 = vector.shape_cast %107 : vector<1x1x896xbf16> to vector<1x896xbf16>
      %109 = vector.shape_cast %106 : vector<1x896xbf16> to vector<1x1x896xbf16>
      tpu.vector_store %arg14[%c2_62, %c0_63, %c2688_64], %109 {strides = array<i32>} : memref<4x2x3584xbf16, #tpu.memory_space<vmem>>, vector<1x1x896xbf16>,
      %110 = vector.extract_strided_slice %49 {offsets = [12, 0], sizes = [1, 896], strides = [1, 1]} : vector<16x1024xf32> to vector<1x896xf32>
      %111 = arith.truncf %110 : vector<1x896xf32> to vector<1x896xbf16>
      %c3 = arith.constant 3 : index
      %c0_65 = arith.constant 0 : index
      %c0_66 = arith.constant 0 : index
      %112 = vector.load %arg14[%c3, %c0_65, %c0_66] : memref<4x2x3584xbf16, #tpu.memory_space<vmem>>, vector<1x1x896xbf16>
      %113 = vector.shape_cast %112 : vector<1x1x896xbf16> to vector<1x896xbf16>
      %114 = vector.shape_cast %111 : vector<1x896xbf16> to vector<1x1x896xbf16>
      tpu.vector_store %arg14[%c3, %c0_65, %c0_66], %114 {strides = array<i32>} : memref<4x2x3584xbf16, #tpu.memory_space<vmem>>, vector<1x1x896xbf16>,
      %115 = vector.extract_strided_slice %49 {offsets = [13, 0], sizes = [1, 896], strides = [1, 1]} : vector<16x1024xf32> to vector<1x896xf32>
      %116 = arith.truncf %115 : vector<1x896xf32> to vector<1x896xbf16>
      %c3_67 = arith.constant 3 : index
      %c0_68 = arith.constant 0 : index
      %c896_69 = arith.constant 896 : index
      %117 = vector.load %arg14[%c3_67, %c0_68, %c896_69] : memref<4x2x3584xbf16, #tpu.memory_space<vmem>>, vector<1x1x896xbf16>
      %118 = vector.shape_cast %117 : vector<1x1x896xbf16> to vector<1x896xbf16>
      %119 = vector.shape_cast %116 : vector<1x896xbf16> to vector<1x1x896xbf16>
      tpu.vector_store %arg14[%c3_67, %c0_68, %c896_69], %119 {strides = array<i32>} : memref<4x2x3584xbf16, #tpu.memory_space<vmem>>, vector<1x1x896xbf16>,
      %120 = vector.extract_strided_slice %49 {offsets = [14, 0], sizes = [1, 896], strides = [1, 1]} : vector<16x1024xf32> to vector<1x896xf32>
      %121 = arith.truncf %120 : vector<1x896xf32> to vector<1x896xbf16>
      %c3_70 = arith.constant 3 : index
      %c0_71 = arith.constant 0 : index
      %c1792_72 = arith.constant 1792 : index
      %122 = vector.load %arg14[%c3_70, %c0_71, %c1792_72] : memref<4x2x3584xbf16, #tpu.memory_space<vmem>>, vector<1x1x896xbf16>
      %123 = vector.shape_cast %122 : vector<1x1x896xbf16> to vector<1x896xbf16>
      %124 = vector.shape_cast %121 : vector<1x896xbf16> to vector<1x1x896xbf16>
      tpu.vector_store %arg14[%c3_70, %c0_71, %c1792_72], %124 {strides = array<i32>} : memref<4x2x3584xbf16, #tpu.memory_space<vmem>>, vector<1x1x896xbf16>,
      %125 = vector.extract_strided_slice %49 {offsets = [15, 0], sizes = [1, 896], strides = [1, 1]} : vector<16x1024xf32> to vector<1x896xf32>
      %126 = arith.truncf %125 : vector<1x896xf32> to vector<1x896xbf16>
      %c3_73 = arith.constant 3 : index
      %c0_74 = arith.constant 0 : index
      %c2688_75 = arith.constant 2688 : index
      %127 = vector.load %arg14[%c3_73, %c0_74, %c2688_75] : memref<4x2x3584xbf16, #tpu.memory_space<vmem>>, vector<1x1x896xbf16>
      %128 = vector.shape_cast %127 : vector<1x1x896xbf16> to vector<1x896xbf16>
      %129 = vector.shape_cast %126 : vector<1x896xbf16> to vector<1x1x896xbf16>
      tpu.vector_store %arg14[%c3_73, %c0_74, %c2688_75], %129 {strides = array<i32>} : memref<4x2x3584xbf16, #tpu.memory_space<vmem>>, vector<1x1x896xbf16>,
      %c1_76 = arith.constant 1 : index
      %c0_77 = arith.constant 0 : index
      %130 = vector.load %arg1[%c1_76, %c0_77] : memref<2x1024xf32, #tpu.memory_space<vmem>>, vector<1x1024xf32>
      %c1023_i32_78 = arith.constant 1023 : i32
      %131 = tpu.dynamic_rotate %130 by %c1023_i32_78 dim 1 : vector<1x1024xf32>, i32 -> vector<1x1024xf32>
      %c1022_i32_79 = arith.constant 1022 : i32
      %132 = tpu.dynamic_rotate %130 by %c1022_i32_79 dim 1 : vector<1x1024xf32>, i32 -> vector<1x1024xf32>
      %c992_i32_80 = arith.constant 992 : i32
      %133 = tpu.dynamic_rotate %130 by %c992_i32_80 dim 1 : vector<1x1024xf32>, i32 -> vector<1x1024xf32>
      %c991_i32_81 = arith.constant 991 : i32
      %134 = tpu.dynamic_rotate %130 by %c991_i32_81 dim 1 : vector<1x1024xf32>, i32 -> vector<1x1024xf32>
      %c990_i32_82 = arith.constant 990 : i32
      %135 = tpu.dynamic_rotate %130 by %c990_i32_82 dim 1 : vector<1x1024xf32>, i32 -> vector<1x1024xf32>
      %c960_i32_83 = arith.constant 960 : i32
      %136 = tpu.dynamic_rotate %130 by %c960_i32_83 dim 1 : vector<1x1024xf32>, i32 -> vector<1x1024xf32>
      %c959_i32_84 = arith.constant 959 : i32
      %137 = tpu.dynamic_rotate %130 by %c959_i32_84 dim 1 : vector<1x1024xf32>, i32 -> vector<1x1024xf32>
      %c958_i32_85 = arith.constant 958 : i32
      %138 = tpu.dynamic_rotate %130 by %c958_i32_85 dim 1 : vector<1x1024xf32>, i32 -> vector<1x1024xf32>
      %139 = tpu.concatenate %130, %131, %132, %133, %134, %135, %136, %137, %138 in 0 : vector<1x1024xf32>, vector<1x1024xf32>, vector<1x1024xf32>, vector<1x1024xf32>, vector<1x1024xf32>, vector<1x1024xf32>, vector<1x1024xf32>, vector<1x1024xf32>, vector<1x1024xf32> -> vector<9x1024xf32>
      %cst_86 = arith.constant dense<0.000000e+00> : vector<8x1024xf32>
      %140 = tpu.matmul %17, %139, %cst_86 {dimension_numbers = #tpu.dot_dimension_numbers<[1], [0], [0], [1], [0, 0, 1, 1], [], []>} : vector<8x9xf32>, vector<9x1024xf32>, vector<8x1024xf32> -> vector<8x1024xf32>
      %141 = vector.broadcast %18 : vector<8x1xf32> to vector<8x1024xf32>
      %142 = arith.addf %140, %141 : vector<8x1024xf32>
      %cst_87 = arith.constant 0.000000e+00 : f32
      %143 = vector.broadcast %cst_87 : f32 to vector<8x1024xf32>
      %144 = arith.maximumf %142, %143 : vector<8x1024xf32>
      %c1023_i32_88 = arith.constant 1023 : i32
      %145 = tpu.dynamic_rotate %144 by %c1023_i32_88 dim 1 : vector<8x1024xf32>, i32 -> vector<8x1024xf32>
      %c1022_i32_89 = arith.constant 1022 : i32
      %146 = tpu.dynamic_rotate %144 by %c1022_i32_89 dim 1 : vector<8x1024xf32>, i32 -> vector<8x1024xf32>
      %c992_i32_90 = arith.constant 992 : i32
      %147 = tpu.dynamic_rotate %144 by %c992_i32_90 dim 1 : vector<8x1024xf32>, i32 -> vector<8x1024xf32>
      %c991_i32_91 = arith.constant 991 : i32
      %148 = tpu.dynamic_rotate %144 by %c991_i32_91 dim 1 : vector<8x1024xf32>, i32 -> vector<8x1024xf32>
      %c990_i32_92 = arith.constant 990 : i32
      %149 = tpu.dynamic_rotate %144 by %c990_i32_92 dim 1 : vector<8x1024xf32>, i32 -> vector<8x1024xf32>
      %c960_i32_93 = arith.constant 960 : i32
      %150 = tpu.dynamic_rotate %144 by %c960_i32_93 dim 1 : vector<8x1024xf32>, i32 -> vector<8x1024xf32>
      %c959_i32_94 = arith.constant 959 : i32
      %151 = tpu.dynamic_rotate %144 by %c959_i32_94 dim 1 : vector<8x1024xf32>, i32 -> vector<8x1024xf32>
      %c958_i32_95 = arith.constant 958 : i32
      %152 = tpu.dynamic_rotate %144 by %c958_i32_95 dim 1 : vector<8x1024xf32>, i32 -> vector<8x1024xf32>
      %153 = tpu.concatenate %144, %145, %146, %147, %148, %149, %150, %151, %152 in 0 : vector<8x1024xf32>, vector<8x1024xf32>, vector<8x1024xf32>, vector<8x1024xf32>, vector<8x1024xf32>, vector<8x1024xf32>, vector<8x1024xf32>, vector<8x1024xf32>, vector<8x1024xf32> -> vector<72x1024xf32>
      %cst_96 = arith.constant dense<0.000000e+00> : vector<16x1024xf32>
      %154 = tpu.matmul %19, %153, %cst_96 {dimension_numbers = #tpu.dot_dimension_numbers<[1], [0], [0], [1], [0, 0, 1, 1], [], []>} : vector<16x72xf32>, vector<72x1024xf32>, vector<16x1024xf32> -> vector<16x1024xf32>
      %155 = vector.broadcast %20 : vector<16x1xf32> to vector<16x1024xf32>
      %156 = arith.addf %154, %155 : vector<16x1024xf32>
      %cst_97 = arith.constant 0.000000e+00 : f32
      %157 = vector.broadcast %cst_97 : f32 to vector<16x1024xf32>
      %158 = arith.maximumf %156, %157 : vector<16x1024xf32>
      %159 = vector.extract_strided_slice %158 {offsets = [0, 0], sizes = [1, 896], strides = [1, 1]} : vector<16x1024xf32> to vector<1x896xf32>
      %160 = arith.truncf %159 : vector<1x896xf32> to vector<1x896xbf16>
      %c0_98 = arith.constant 0 : index
      %c1_99 = arith.constant 1 : index
      %c0_100 = arith.constant 0 : index
      %161 = vector.load %arg14[%c0_98, %c1_99, %c0_100] : memref<4x2x3584xbf16, #tpu.memory_space<vmem>>, vector<1x1x896xbf16>
      %162 = vector.shape_cast %161 : vector<1x1x896xbf16> to vector<1x896xbf16>
      %163 = vector.shape_cast %160 : vector<1x896xbf16> to vector<1x1x896xbf16>
      tpu.vector_store %arg14[%c0_98, %c1_99, %c0_100], %163 {strides = array<i32>} : memref<4x2x3584xbf16, #tpu.memory_space<vmem>>, vector<1x1x896xbf16>,
      %164 = vector.extract_strided_slice %158 {offsets = [1, 0], sizes = [1, 896], strides = [1, 1]} : vector<16x1024xf32> to vector<1x896xf32>
      %165 = arith.truncf %164 : vector<1x896xf32> to vector<1x896xbf16>
      %c0_101 = arith.constant 0 : index
      %c1_102 = arith.constant 1 : index
      %c896_103 = arith.constant 896 : index
      %166 = vector.load %arg14[%c0_101, %c1_102, %c896_103] : memref<4x2x3584xbf16, #tpu.memory_space<vmem>>, vector<1x1x896xbf16>
      %167 = vector.shape_cast %166 : vector<1x1x896xbf16> to vector<1x896xbf16>
      %168 = vector.shape_cast %165 : vector<1x896xbf16> to vector<1x1x896xbf16>
      tpu.vector_store %arg14[%c0_101, %c1_102, %c896_103], %168 {strides = array<i32>} : memref<4x2x3584xbf16, #tpu.memory_space<vmem>>, vector<1x1x896xbf16>,
      %169 = vector.extract_strided_slice %158 {offsets = [2, 0], sizes = [1, 896], strides = [1, 1]} : vector<16x1024xf32> to vector<1x896xf32>
      %170 = arith.truncf %169 : vector<1x896xf32> to vector<1x896xbf16>
      %c0_104 = arith.constant 0 : index
      %c1_105 = arith.constant 1 : index
      %c1792_106 = arith.constant 1792 : index
      %171 = vector.load %arg14[%c0_104, %c1_105, %c1792_106] : memref<4x2x3584xbf16, #tpu.memory_space<vmem>>, vector<1x1x896xbf16>
      %172 = vector.shape_cast %171 : vector<1x1x896xbf16> to vector<1x896xbf16>
      %173 = vector.shape_cast %170 : vector<1x896xbf16> to vector<1x1x896xbf16>
      tpu.vector_store %arg14[%c0_104, %c1_105, %c1792_106], %173 {strides = array<i32>} : memref<4x2x3584xbf16, #tpu.memory_space<vmem>>, vector<1x1x896xbf16>,
      %174 = vector.extract_strided_slice %158 {offsets = [3, 0], sizes = [1, 896], strides = [1, 1]} : vector<16x1024xf32> to vector<1x896xf32>
      %175 = arith.truncf %174 : vector<1x896xf32> to vector<1x896xbf16>
      %c0_107 = arith.constant 0 : index
      %c1_108 = arith.constant 1 : index
      %c2688_109 = arith.constant 2688 : index
      %176 = vector.load %arg14[%c0_107, %c1_108, %c2688_109] : memref<4x2x3584xbf16, #tpu.memory_space<vmem>>, vector<1x1x896xbf16>
      %177 = vector.shape_cast %176 : vector<1x1x896xbf16> to vector<1x896xbf16>
      %178 = vector.shape_cast %175 : vector<1x896xbf16> to vector<1x1x896xbf16>
      tpu.vector_store %arg14[%c0_107, %c1_108, %c2688_109], %178 {strides = array<i32>} : memref<4x2x3584xbf16, #tpu.memory_space<vmem>>, vector<1x1x896xbf16>,
      %179 = vector.extract_strided_slice %158 {offsets = [4, 0], sizes = [1, 896], strides = [1, 1]} : vector<16x1024xf32> to vector<1x896xf32>
      %180 = arith.truncf %179 : vector<1x896xf32> to vector<1x896xbf16>
      %c1_110 = arith.constant 1 : index
      %c1_111 = arith.constant 1 : index
      %c0_112 = arith.constant 0 : index
      %181 = vector.load %arg14[%c1_110, %c1_111, %c0_112] : memref<4x2x3584xbf16, #tpu.memory_space<vmem>>, vector<1x1x896xbf16>
      %182 = vector.shape_cast %181 : vector<1x1x896xbf16> to vector<1x896xbf16>
      %183 = vector.shape_cast %180 : vector<1x896xbf16> to vector<1x1x896xbf16>
      tpu.vector_store %arg14[%c1_110, %c1_111, %c0_112], %183 {strides = array<i32>} : memref<4x2x3584xbf16, #tpu.memory_space<vmem>>, vector<1x1x896xbf16>,
      %184 = vector.extract_strided_slice %158 {offsets = [5, 0], sizes = [1, 896], strides = [1, 1]} : vector<16x1024xf32> to vector<1x896xf32>
      %185 = arith.truncf %184 : vector<1x896xf32> to vector<1x896xbf16>
      %c1_113 = arith.constant 1 : index
      %c1_114 = arith.constant 1 : index
      %c896_115 = arith.constant 896 : index
      %186 = vector.load %arg14[%c1_113, %c1_114, %c896_115] : memref<4x2x3584xbf16, #tpu.memory_space<vmem>>, vector<1x1x896xbf16>
      %187 = vector.shape_cast %186 : vector<1x1x896xbf16> to vector<1x896xbf16>
      %188 = vector.shape_cast %185 : vector<1x896xbf16> to vector<1x1x896xbf16>
      tpu.vector_store %arg14[%c1_113, %c1_114, %c896_115], %188 {strides = array<i32>} : memref<4x2x3584xbf16, #tpu.memory_space<vmem>>, vector<1x1x896xbf16>,
      %189 = vector.extract_strided_slice %158 {offsets = [6, 0], sizes = [1, 896], strides = [1, 1]} : vector<16x1024xf32> to vector<1x896xf32>
      %190 = arith.truncf %189 : vector<1x896xf32> to vector<1x896xbf16>
      %c1_116 = arith.constant 1 : index
      %c1_117 = arith.constant 1 : index
      %c1792_118 = arith.constant 1792 : index
      %191 = vector.load %arg14[%c1_116, %c1_117, %c1792_118] : memref<4x2x3584xbf16, #tpu.memory_space<vmem>>, vector<1x1x896xbf16>
      %192 = vector.shape_cast %191 : vector<1x1x896xbf16> to vector<1x896xbf16>
      %193 = vector.shape_cast %190 : vector<1x896xbf16> to vector<1x1x896xbf16>
      tpu.vector_store %arg14[%c1_116, %c1_117, %c1792_118], %193 {strides = array<i32>} : memref<4x2x3584xbf16, #tpu.memory_space<vmem>>, vector<1x1x896xbf16>,
      %194 = vector.extract_strided_slice %158 {offsets = [7, 0], sizes = [1, 896], strides = [1, 1]} : vector<16x1024xf32> to vector<1x896xf32>
      %195 = arith.truncf %194 : vector<1x896xf32> to vector<1x896xbf16>
      %c1_119 = arith.constant 1 : index
      %c1_120 = arith.constant 1 : index
      %c2688_121 = arith.constant 2688 : index
      %196 = vector.load %arg14[%c1_119, %c1_120, %c2688_121] : memref<4x2x3584xbf16, #tpu.memory_space<vmem>>, vector<1x1x896xbf16>
      %197 = vector.shape_cast %196 : vector<1x1x896xbf16> to vector<1x896xbf16>
      %198 = vector.shape_cast %195 : vector<1x896xbf16> to vector<1x1x896xbf16>
      tpu.vector_store %arg14[%c1_119, %c1_120, %c2688_121], %198 {strides = array<i32>} : memref<4x2x3584xbf16, #tpu.memory_space<vmem>>, vector<1x1x896xbf16>,
      %199 = vector.extract_strided_slice %158 {offsets = [8, 0], sizes = [1, 896], strides = [1, 1]} : vector<16x1024xf32> to vector<1x896xf32>
      %200 = arith.truncf %199 : vector<1x896xf32> to vector<1x896xbf16>
      %c2_122 = arith.constant 2 : index
      %c1_123 = arith.constant 1 : index
      %c0_124 = arith.constant 0 : index
      %201 = vector.load %arg14[%c2_122, %c1_123, %c0_124] : memref<4x2x3584xbf16, #tpu.memory_space<vmem>>, vector<1x1x896xbf16>
      %202 = vector.shape_cast %201 : vector<1x1x896xbf16> to vector<1x896xbf16>
      %203 = vector.shape_cast %200 : vector<1x896xbf16> to vector<1x1x896xbf16>
      tpu.vector_store %arg14[%c2_122, %c1_123, %c0_124], %203 {strides = array<i32>} : memref<4x2x3584xbf16, #tpu.memory_space<vmem>>, vector<1x1x896xbf16>,
      %204 = vector.extract_strided_slice %158 {offsets = [9, 0], sizes = [1, 896], strides = [1, 1]} : vector<16x1024xf32> to vector<1x896xf32>
      %205 = arith.truncf %204 : vector<1x896xf32> to vector<1x896xbf16>
      %c2_125 = arith.constant 2 : index
      %c1_126 = arith.constant 1 : index
      %c896_127 = arith.constant 896 : index
      %206 = vector.load %arg14[%c2_125, %c1_126, %c896_127] : memref<4x2x3584xbf16, #tpu.memory_space<vmem>>, vector<1x1x896xbf16>
      %207 = vector.shape_cast %206 : vector<1x1x896xbf16> to vector<1x896xbf16>
      %208 = vector.shape_cast %205 : vector<1x896xbf16> to vector<1x1x896xbf16>
      tpu.vector_store %arg14[%c2_125, %c1_126, %c896_127], %208 {strides = array<i32>} : memref<4x2x3584xbf16, #tpu.memory_space<vmem>>, vector<1x1x896xbf16>,
      %209 = vector.extract_strided_slice %158 {offsets = [10, 0], sizes = [1, 896], strides = [1, 1]} : vector<16x1024xf32> to vector<1x896xf32>
      %210 = arith.truncf %209 : vector<1x896xf32> to vector<1x896xbf16>
      %c2_128 = arith.constant 2 : index
      %c1_129 = arith.constant 1 : index
      %c1792_130 = arith.constant 1792 : index
      %211 = vector.load %arg14[%c2_128, %c1_129, %c1792_130] : memref<4x2x3584xbf16, #tpu.memory_space<vmem>>, vector<1x1x896xbf16>
      %212 = vector.shape_cast %211 : vector<1x1x896xbf16> to vector<1x896xbf16>
      %213 = vector.shape_cast %210 : vector<1x896xbf16> to vector<1x1x896xbf16>
      tpu.vector_store %arg14[%c2_128, %c1_129, %c1792_130], %213 {strides = array<i32>} : memref<4x2x3584xbf16, #tpu.memory_space<vmem>>, vector<1x1x896xbf16>,
      %214 = vector.extract_strided_slice %158 {offsets = [11, 0], sizes = [1, 896], strides = [1, 1]} : vector<16x1024xf32> to vector<1x896xf32>
      %215 = arith.truncf %214 : vector<1x896xf32> to vector<1x896xbf16>
      %c2_131 = arith.constant 2 : index
      %c1_132 = arith.constant 1 : index
      %c2688_133 = arith.constant 2688 : index
      %216 = vector.load %arg14[%c2_131, %c1_132, %c2688_133] : memref<4x2x3584xbf16, #tpu.memory_space<vmem>>, vector<1x1x896xbf16>
      %217 = vector.shape_cast %216 : vector<1x1x896xbf16> to vector<1x896xbf16>
      %218 = vector.shape_cast %215 : vector<1x896xbf16> to vector<1x1x896xbf16>
      tpu.vector_store %arg14[%c2_131, %c1_132, %c2688_133], %218 {strides = array<i32>} : memref<4x2x3584xbf16, #tpu.memory_space<vmem>>, vector<1x1x896xbf16>,
      %219 = vector.extract_strided_slice %158 {offsets = [12, 0], sizes = [1, 896], strides = [1, 1]} : vector<16x1024xf32> to vector<1x896xf32>
      %220 = arith.truncf %219 : vector<1x896xf32> to vector<1x896xbf16>
      %c3_134 = arith.constant 3 : index
      %c1_135 = arith.constant 1 : index
      %c0_136 = arith.constant 0 : index
      %221 = vector.load %arg14[%c3_134, %c1_135, %c0_136] : memref<4x2x3584xbf16, #tpu.memory_space<vmem>>, vector<1x1x896xbf16>
      %222 = vector.shape_cast %221 : vector<1x1x896xbf16> to vector<1x896xbf16>
      %223 = vector.shape_cast %220 : vector<1x896xbf16> to vector<1x1x896xbf16>
      tpu.vector_store %arg14[%c3_134, %c1_135, %c0_136], %223 {strides = array<i32>} : memref<4x2x3584xbf16, #tpu.memory_space<vmem>>, vector<1x1x896xbf16>,
      %224 = vector.extract_strided_slice %158 {offsets = [13, 0], sizes = [1, 896], strides = [1, 1]} : vector<16x1024xf32> to vector<1x896xf32>
      %225 = arith.truncf %224 : vector<1x896xf32> to vector<1x896xbf16>
      %c3_137 = arith.constant 3 : index
      %c1_138 = arith.constant 1 : index
      %c896_139 = arith.constant 896 : index
      %226 = vector.load %arg14[%c3_137, %c1_138, %c896_139] : memref<4x2x3584xbf16, #tpu.memory_space<vmem>>, vector<1x1x896xbf16>
      %227 = vector.shape_cast %226 : vector<1x1x896xbf16> to vector<1x896xbf16>
      %228 = vector.shape_cast %225 : vector<1x896xbf16> to vector<1x1x896xbf16>
      tpu.vector_store %arg14[%c3_137, %c1_138, %c896_139], %228 {strides = array<i32>} : memref<4x2x3584xbf16, #tpu.memory_space<vmem>>, vector<1x1x896xbf16>,
      %229 = vector.extract_strided_slice %158 {offsets = [14, 0], sizes = [1, 896], strides = [1, 1]} : vector<16x1024xf32> to vector<1x896xf32>
      %230 = arith.truncf %229 : vector<1x896xf32> to vector<1x896xbf16>
      %c3_140 = arith.constant 3 : index
      %c1_141 = arith.constant 1 : index
      %c1792_142 = arith.constant 1792 : index
      %231 = vector.load %arg14[%c3_140, %c1_141, %c1792_142] : memref<4x2x3584xbf16, #tpu.memory_space<vmem>>, vector<1x1x896xbf16>
      %232 = vector.shape_cast %231 : vector<1x1x896xbf16> to vector<1x896xbf16>
      %233 = vector.shape_cast %230 : vector<1x896xbf16> to vector<1x1x896xbf16>
      tpu.vector_store %arg14[%c3_140, %c1_141, %c1792_142], %233 {strides = array<i32>} : memref<4x2x3584xbf16, #tpu.memory_space<vmem>>, vector<1x1x896xbf16>,
      %234 = vector.extract_strided_slice %158 {offsets = [15, 0], sizes = [1, 896], strides = [1, 1]} : vector<16x1024xf32> to vector<1x896xf32>
      %235 = arith.truncf %234 : vector<1x896xf32> to vector<1x896xbf16>
      %c3_143 = arith.constant 3 : index
      %c1_144 = arith.constant 1 : index
      %c2688_145 = arith.constant 2688 : index
      %236 = vector.load %arg14[%c3_143, %c1_144, %c2688_145] : memref<4x2x3584xbf16, #tpu.memory_space<vmem>>, vector<1x1x896xbf16>
      %237 = vector.shape_cast %236 : vector<1x1x896xbf16> to vector<1x896xbf16>
      %238 = vector.shape_cast %235 : vector<1x896xbf16> to vector<1x1x896xbf16>
      tpu.vector_store %arg14[%c3_143, %c1_144, %c2688_145], %238 {strides = array<i32>} : memref<4x2x3584xbf16, #tpu.memory_space<vmem>>, vector<1x1x896xbf16>,
    } else {
    }
    %3 = arith.index_cast %arg0 : i32 to index
    %c0 = arith.constant 0 : index
    %c0_1 = arith.constant 0 : index
    %4 = vector.load %arg14[%3, %c0, %c0_1] : memref<4x2x3584xbf16, #tpu.memory_space<vmem>>, vector<1x2x3584xbf16>
    %5 = vector.shape_cast %4 : vector<1x2x3584xbf16> to vector<2x3584xbf16>
    %c0_2 = arith.constant 0 : index
    %c0_3 = arith.constant 0 : index
    %6 = vector.load %arg6[%c0_2, %c0_3] : memref<3584x512xi8, #tpu.memory_space<vmem>>, vector<3584x512xi8>
    %7 = arith.sitofp %6 : vector<3584x512xi8> to vector<3584x512xbf16>
    %c0_4 = arith.constant 0 : index
    %c0_5 = arith.constant 0 : index
    %8 = vector.load %arg15[%c0_4, %c0_5] : memref<2x512xf32, #tpu.memory_space<vmem>>, vector<2x512xf32>
    %cst = arith.constant dense<0.000000e+00> : vector<2x512xf32>
    %9 = tpu.matmul %5, %7, %cst {dimension_numbers = #tpu.dot_dimension_numbers<[1], [0], [0], [1], [0, 0, 1, 1], [], []>} : vector<2x3584xbf16>, vector<3584x512xbf16>, vector<2x512xf32> -> vector<2x512xf32>
    %10 = arith.addf %8, %9 : vector<2x512xf32>
    %c0_6 = arith.constant 0 : index
    %c0_7 = arith.constant 0 : index
    %11 = vector.load %arg15[%c0_6, %c0_7] : memref<2x512xf32, #tpu.memory_space<vmem>>, vector<2x512xf32>
    tpu.vector_store %arg15[%c0_6, %c0_7], %10 {strides = array<i32>} : memref<2x512xf32, #tpu.memory_space<vmem>>, vector<2x512xf32>,
    %c3_i32 = arith.constant 3 : i32
    %12 = arith.cmpi eq, %arg0, %c3_i32 : i32
    %13 = arith.extui %12 : i1 to i32
    %c0_i32_8 = arith.constant 0 : i32
    %14 = arith.cmpi ne, %13, %c0_i32_8 : i32
    scf.if %14 {
      %c0_9 = arith.constant 0 : index
      %c0_10 = arith.constant 0 : index
      %15 = vector.load %arg15[%c0_9, %c0_10] : memref<2x512xf32, #tpu.memory_space<vmem>>, vector<2x512xf32>
      %c0_11 = arith.constant 0 : index
      %c0_12 = arith.constant 0 : index
      %16 = vector.load %arg7[%c0_11, %c0_12] : memref<1x512xf32, #tpu.memory_space<vmem>>, vector<1x512xf32>
      %17 = vector.broadcast %16 : vector<1x512xf32> to vector<2x512xf32>
      %18 = arith.mulf %15, %17 : vector<2x512xf32>
      %c0_13 = arith.constant 0 : index
      %c0_14 = arith.constant 0 : index
      %19 = vector.load %arg8[%c0_13, %c0_14] : memref<1x512xf32, #tpu.memory_space<vmem>>, vector<1x512xf32>
      %20 = vector.broadcast %19 : vector<1x512xf32> to vector<2x512xf32>
      %21 = arith.addf %18, %20 : vector<2x512xf32>
      %cst_15 = arith.constant 0.000000e+00 : f32
      %22 = vector.broadcast %cst_15 : f32 to vector<2x512xf32>
      %23 = arith.maximumf %21, %22 : vector<2x512xf32>
      %c0_16 = arith.constant 0 : index
      %c0_17 = arith.constant 0 : index
      %24 = vector.load %arg9[%c0_16, %c0_17] : memref<512x64xf32, #tpu.memory_space<vmem>>, vector<512x64xf32>
      %cst_18 = arith.constant dense<0.000000e+00> : vector<2x64xf32>
      %25 = tpu.matmul %23, %24, %cst_18 {dimension_numbers = #tpu.dot_dimension_numbers<[1], [0], [0], [1], [0, 0, 1, 1], [], []>} : vector<2x512xf32>, vector<512x64xf32>, vector<2x64xf32> -> vector<2x64xf32>
      %c0_19 = arith.constant 0 : index
      %c0_20 = arith.constant 0 : index
      %26 = vector.load %arg10[%c0_19, %c0_20] : memref<1x64xf32, #tpu.memory_space<vmem>>, vector<1x64xf32>
      %27 = vector.broadcast %26 : vector<1x64xf32> to vector<2x64xf32>
      %28 = arith.addf %25, %27 : vector<2x64xf32>
      %cst_21 = arith.constant 0.000000e+00 : f32
      %29 = vector.broadcast %cst_21 : f32 to vector<2x64xf32>
      %30 = arith.maximumf %28, %29 : vector<2x64xf32>
      %c0_22 = arith.constant 0 : index
      %c0_23 = arith.constant 0 : index
      %31 = vector.load %arg11[%c0_22, %c0_23] : memref<64x2xf32, #tpu.memory_space<vmem>>, vector<64x2xf32>
      %cst_24 = arith.constant dense<0.000000e+00> : vector<2x2xf32>
      %32 = tpu.matmul %30, %31, %cst_24 {dimension_numbers = #tpu.dot_dimension_numbers<[1], [0], [0], [1], [0, 0, 1, 1], [], []>} : vector<2x64xf32>, vector<64x2xf32>, vector<2x2xf32> -> vector<2x2xf32>
      %c0_25 = arith.constant 0 : index
      %c0_26 = arith.constant 0 : index
      %33 = vector.load %arg12[%c0_25, %c0_26] : memref<1x2xf32, #tpu.memory_space<vmem>>, vector<1x2xf32>
      %34 = vector.broadcast %33 : vector<1x2xf32> to vector<2x2xf32>
      %35 = arith.addf %32, %34 : vector<2x2xf32>
      %c0_27 = arith.constant 0 : index
      %c0_28 = arith.constant 0 : index
      %36 = vector.load %arg13[%c0_27, %c0_28] : memref<2x2xf32, #tpu.memory_space<vmem>>, vector<2x2xf32>
      tpu.vector_store %arg13[%c0_27, %c0_28], %35 {strides = array<i32>} : memref<2x2xf32, #tpu.memory_space<vmem>>, vector<2x2xf32>,
    } else {
    }
    return
  }
  func.func @transform_0(%arg0: i32) -> (i32, i32) {
    %c0_i32 = arith.constant 0 : i32
    %c0_i32_0 = arith.constant 0 : i32
    %c0_i32_1 = arith.constant 0 : i32
    return %c0_i32, %c0_i32_0 : i32, i32
  }
  func.func @transform_1(%arg0: i32) -> (i32, i32) {
    %c0_i32 = arith.constant 0 : i32
    %c0_i32_0 = arith.constant 0 : i32
    %c0_i32_1 = arith.constant 0 : i32
    return %c0_i32, %c0_i32_0 : i32, i32
  }
  func.func @transform_2(%arg0: i32) -> (i32, i32) {
    %c0_i32 = arith.constant 0 : i32
    %c0_i32_0 = arith.constant 0 : i32
    %c0_i32_1 = arith.constant 0 : i32
    return %c0_i32, %c0_i32_0 : i32, i32
  }
  func.func @transform_3(%arg0: i32) -> (i32, i32) {
    %c0_i32 = arith.constant 0 : i32
    %c0_i32_0 = arith.constant 0 : i32
    %c0_i32_1 = arith.constant 0 : i32
    return %c0_i32, %c0_i32_0 : i32, i32
  }
  func.func @transform_4(%arg0: i32) -> (i32, i32) {
    %c0_i32 = arith.constant 0 : i32
    %c0_i32_0 = arith.constant 0 : i32
    %c0_i32_1 = arith.constant 0 : i32
    return %c0_i32, %c0_i32_0 : i32, i32
  }
  func.func @transform_5(%arg0: i32) -> (i32, i32) {
    %c0_i32 = arith.constant 0 : i32
    %c0_i32_0 = arith.constant 0 : i32
    return %arg0, %c0_i32 : i32, i32
  }
  func.func @transform_6(%arg0: i32) -> (i32, i32) {
    %c0_i32 = arith.constant 0 : i32
    %c0_i32_0 = arith.constant 0 : i32
    %c0_i32_1 = arith.constant 0 : i32
    return %c0_i32, %c0_i32_0 : i32, i32
  }
  func.func @transform_7(%arg0: i32) -> (i32, i32) {
    %c0_i32 = arith.constant 0 : i32
    %c0_i32_0 = arith.constant 0 : i32
    %c0_i32_1 = arith.constant 0 : i32
    return %c0_i32, %c0_i32_0 : i32, i32
  }
  func.func @transform_8(%arg0: i32) -> (i32, i32) {
    %c0_i32 = arith.constant 0 : i32
    %c0_i32_0 = arith.constant 0 : i32
    %c0_i32_1 = arith.constant 0 : i32
    return %c0_i32, %c0_i32_0 : i32, i32
  }
  func.func @transform_9(%arg0: i32) -> (i32, i32) {
    %c0_i32 = arith.constant 0 : i32
    %c0_i32_0 = arith.constant 0 : i32
    %c0_i32_1 = arith.constant 0 : i32
    return %c0_i32, %c0_i32_0 : i32, i32
  }
  func.func @transform_10(%arg0: i32) -> (i32, i32) {
    %c0_i32 = arith.constant 0 : i32
    %c0_i32_0 = arith.constant 0 : i32
    %c0_i32_1 = arith.constant 0 : i32
    return %c0_i32, %c0_i32_0 : i32, i32
  }
  func.func @transform_11(%arg0: i32) -> (i32, i32) {
    %c0_i32 = arith.constant 0 : i32
    %c0_i32_0 = arith.constant 0 : i32
    %c0_i32_1 = arith.constant 0 : i32
    return %c0_i32, %c0_i32_0 : i32, i32
  }
  func.func @transform_12(%arg0: i32) -> (i32, i32) {
    %c0_i32 = arith.constant 0 : i32
    %c0_i32_0 = arith.constant 0 : i32
    %c0_i32_1 = arith.constant 0 : i32
    return %c0_i32, %c0_i32_0 : i32, i32
  }
}

</mosaic_0001>

<bundles_post_ra>
// kernel: tpu_custom_call.1
= control target key start
LH: loop header
LB: loop body
LE: loop exit
PB: predicated region body
PF: predicated region fallthrough
CT: control target
= control target key end

     0   :  { %s11164_s0 = inlined_call_operand.hbm [shape: f32[2,1024], index: 0, kind: input, shape index: {}]   ;;  %s11165_s1 = inlined_call_operand.hbm [shape: f32[8,9], index: 1, kind: input, shape index: {}]   ;;  %s11166_s2 = inlined_call_operand.vmem [shape: f32[8,1], index: 2, kind: input, shape index: {}]   ;;  %s11167_s3 = inlined_call_operand.hbm [shape: f32[16,72], index: 3, kind: input, shape index: {}]   ;;  %s11168_s4 = inlined_call_operand.vmem [shape: f32[16,1], index: 4, kind: input, shape index: {}]   ;;  %s11169_s5 = inlined_call_operand.hbm [shape: s8[14336,512], index: 5, kind: input, shape index: {}]   ;;  %s11170_s6 = inlined_call_operand.hbm [shape: f32[1,512], index: 6, kind: input, shape index: {}]   ;;  %s11171_s7 = inlined_call_operand.hbm [shape: f32[1,512], index: 7, kind: input, shape index: {}]   ;;  %s11172_s8 = inlined_call_operand.vmem [shape: f32[512,64], index: 8, kind: input, shape index: {}]   ;;  %s11173_s9 = inlined_call_operand.hbm [shape: f32[1,64], index: 9, kind: input, shape index: {}]   ;;  %s11174_s10 = inlined_call_operand.vmem [shape: f32[64,2], index: 10, kind: input, shape index: {}]   ;;  %s11175_s11 = inlined_call_operand.hbm [shape: f32[1,2], index: 11, kind: input, shape index: {}]   ;;  %s11176_s12 = inlined_call_operand.hbm [shape: f32[2,2], index: 12, kind: output, shape index: {}]  }
   0x1   :  { %11225 = sst [smem:[#allocation56_spill]] %s11164_s0 }
   0x2   :  { %11226 = sst [smem:[#allocation57_spill]] %s11165_s1 }
   0x3   :  { %17 = vsyncpa [#allocation5], 0 }
   0x4   :  { %18 = vsyncpa [#allocation8], 0 }
   0x5   :  { %19 = vsyncpa [#allocation11], 0 }
   0x6   :  { %21 = vsyncpa [#allocation11 + $0x1], 0 }
   0x7   :  { %22 = vsyncpa [#allocation14], 0 }
   0x8   :  { %23 = vsyncpa [#allocation17], 0 }
   0x9   :  { %24 = vsyncpa [#allocation6], 0  ;;  %s7690_s21 = smov 0   ;;  %s7692_s22 = smov 0  }
   0xa   :  { %s7694_s23 = smov 0   ;;  %s7696_s24 = smov 0  }
   0xb LB: > { %s7597_s25 = smov [#allocation7]   ;;  %s7711_s27 = sadd.s32 4294967295, %s7595_s24   ;;  %s7595_s24 = sphi %s7696_s24, %s11360_s24   ;;  %s7591_s23 = sphi %s7694_s23, %s11359_s23   ;;  %s7587_s22 = sphi %s7692_s22, %s11358_s22   ;;  %s7583_s21 = sphi %s7690_s21, %s11357_s21  }
   0xc   : > { %s337_s26 = sshll.u32 %s7597_s25, 4  ;;  %p6965_p0 = scmp.ge.s32.totalorder %s7595_s24, 1  ;;  %s338_s26 = int_to_ptr.vmem [resolvable:$true] %s337_s26 }
   0xd   : > { %p11177_p1 = scmp.eq.s32.totalorder %s7711_s27, 0  ;;  %p313_p2 = scmp.lt.s32.totalorder %s7595_s24, 5 }
   0xe   : > { %s7598_s29 = smov [#allocation12]   ;;  %s7599_s13 = smov [#allocation13]  }
   0xf   : > { %p7717_p4 = pnand %p6965_p0, %p313_p2  ;;  %s367_s30 = sshll.u32 %s7598_s29, 4  ;;  %s368_s30 = int_to_ptr.vmem [resolvable:$true] %s367_s30 }
  0x10   : > { %s378_s14 = sshll.u32 %s7599_s13, 4  ;;  %s7600_s16 = smov [#allocation4]   ;;  %s7729_s14 = int_to_ptr.vmem [resolvable:$true] %s378_s14 }
  0x11   : > { %s11227_s28 = scalar_select %p7717_p4, 1, 0 }
  0x12   : > { %p7191_p5 = pneg %p7717_p4  ;;  %s7731_s17 = sshll.u32 %s7600_s16, 4  ;;  %s327_s17 = int_to_ptr.vmem [resolvable:$true] %s7731_s17 }
  0x13   : > { %s7314_s19 = scalar_lea.vmem %s338_s26, 128  ;;  %p7322_p11 = scmp.lt.s32.totalorder %s338_s26, %s338_s26 }
  0x14   : > { %p7725_p6 = pnand %p7191_p5, %p11177_p1  ;;  %p7315_p8 = scmp.ne.s32.totalorder %s338_s26, %s7314_s19 }
  0x15   : > { %p7323_p12 = scmp.lt.s32.totalorder %s7314_s19, %s7314_s19 }
  0x16   : > { %p7735_p7 = pneg %p7725_p6 }
  0x17   : > { %p7324_p13 = por %p7323_p12, %p7322_p11 }
  0x18   : > { %p7317_p9 = pnand %p7315_p8, %p7735_p7 }
  0x1a   : > { %p7318_p10 = pneg %p7317_p9 }
  0x1c   : > { %p7325_p0 = pnand %p7324_p13, %p7318_p10 }
  0x1e   : > { %7328 = shalt.err (!%p7325_p0)
}
  0x1f   : > { %s11230_s1 = sld [smem:[#allocation57_spill]]  ;;  %s7340_s29 = scalar_lea.vmem %s368_s30, 64 }
  0x20   : > { %p7341_p2 = scmp.ne.s32.totalorder %s368_s30, %s7340_s29  ;;  %p7348_p1 = scmp.lt.s32.totalorder %s368_s30, %s368_s30 }
  0x21   : > { %p7349_p8 = scmp.lt.s32.totalorder %s7340_s29, %s7340_s29 }
  0x22   : > { %p7343_p5 = pnand %p7341_p2, %p7735_p7 }
  0x23   : > { %p7350_p9 = por %p7349_p8, %p7348_p1 }
  0x24   : > { %p7344_p3 = pneg %p7343_p5 }
  0x25   : > { %7197 = dma.hbm_to_vmem [thread:$0]  (!%p7725_p6), %s11230_s1, 128, %s338_s26, [#allocation8]  }
  0x26   : > { %p7351_p4 = pnand %p7350_p9, %p7344_p3 }
  0x28   : > { %7354 = shalt.err (!%p7351_p4)
}
  0x29   : > { %7203 = dma.hbm_to_vmem [thread:$0]  (!%p7725_p6), %s11170_s6, 64, %s368_s30, [#allocation11]  }
  0x2a   : > { %s7366_s26 = scalar_lea.vmem %s7729_s14, 64  ;;  %p7374_p13 = scmp.lt.s32.totalorder %s7729_s14, %s7729_s14 }
  0x2b   : > { %p7367_p10 = scmp.ne.s32.totalorder %s7729_s14, %s7366_s26  ;;  %p7375_p1 = scmp.lt.s32.totalorder %s7366_s26, %s7366_s26 }
  0x2d   : > { %p7369_p11 = pnand %p7367_p10, %p7735_p7  ;;  %p7376_p3 = por %p7375_p1, %p7374_p13 }
  0x2f   : > { %p7370_p12 = pneg %p7369_p11 }
  0x31   : > { %p7377_p4 = pnand %p7376_p3, %p7370_p12 }
  0x33   : > { %7380 = shalt.err (!%p7377_p4)
}
  0x34   : > { %7206 = dma.hbm_to_vmem [thread:$0]  (!%p7725_p6), %s11171_s7, 64, %s7729_s14, [#allocation14]  }
  0x35   : > { %s7601_s30 = smov [#allocation9]   ;;  %s7392_s29 = scalar_lea.vmem %s327_s17, 256 }
  0x36   : > { %s350_s25 = sshll.u32 %s7601_s30, 4  ;;  %p7393_p0 = scmp.ne.s32.totalorder %s327_s17, %s7392_s29  ;;  %s351_s25 = int_to_ptr.vmem [resolvable:$true] %s350_s25 }
  0x37   : > { %p7400_p8 = scmp.lt.s32.totalorder %s327_s17, %s327_s17  ;;  %p7401_p9 = scmp.lt.s32.totalorder %s7392_s29, %s7392_s29 }
  0x38   : > { %p7395_p2 = pnand %p7393_p0, %p7735_p7 }
  0x39   : > { %p7402_p10 = por %p7401_p9, %p7400_p8 }
  0x3a   : > { %p7396_p5 = pneg %p7395_p2 }
  0x3c   : > { %p7403_p11 = pnand %p7402_p10, %p7396_p5 }
  0x3e   : > { %7406 = shalt.err (!%p7403_p11)
}
  0x3f   : > { %s11231_s0 = sld [smem:[#allocation56_spill]]  ;;  %s7418_s14 = scalar_lea.vmem %s351_s25, 256 }
  0x40   : > { %p7419_p12 = scmp.ne.s32.totalorder %s351_s25, %s7418_s14  ;;  %p7426_p3 = scmp.lt.s32.totalorder %s351_s25, %s351_s25 }
  0x41   : > { %p7427_p4 = scmp.lt.s32.totalorder %s7418_s14, %s7418_s14 }
  0x42   : > { %p7421_p13 = pnand %p7419_p12, %p7735_p7 }
  0x43   : > { %p7428_p0 = por %p7427_p4, %p7426_p3 }
  0x44   : > { %p7422_p1 = pneg %p7421_p13 }
  0x45   : > { %7194 = dma.hbm_to_vmem [thread:$0]  (!%p7725_p6), %s11231_s0, 256, %s327_s17, [#allocation5]  }
  0x46   : > { %p7429_p2 = pnand %p7428_p0, %p7422_p1 }
  0x48   : > { %7432 = shalt.err (!%p7429_p2)
}
  0x49   : > { %s7602_s26 = smov 128   ;;  %s7603_s19 = smov 8  }
  0x4a   : > { %7200 = dma.hbm_to_vmem [thread:$0]  (!%p7725_p6), %s11167_s3, 256, %s351_s25, [#allocation8], %s7602_s26, %s7602_s26, %s7603_s19  }
  0x4b   : > { %s7604_s17 = smov [#allocation15]   ;;  %s7605_s13 = smov [#allocation16]  }
  0x4c   : > { %s392_s29 = sshll.u32 %s7604_s17, 4  ;;  %s406_s16 = sshll.u32 %s7605_s13, 4  ;;  %s393_s29 = int_to_ptr.vmem [resolvable:$true] %s392_s29  ;;  %s407_s16 = int_to_ptr.vmem [resolvable:$true] %s406_s16 }
  0x4d   : > { %s7444_s0 = scalar_lea.vmem %s393_s29, 16  ;;  %s7451_s14 = scalar_lea.vmem %s393_s29, 32 }
  0x4e   : > { %p7445_p5 = scmp.ne.s32.totalorder %s393_s29, %s7444_s0  ;;  %p7452_p10 = scmp.lt.s32.totalorder %s393_s29, %s393_s29 }
  0x4f   : > { %p7453_p11 = scmp.lt.s32.totalorder %s7451_s14, %s7444_s0 }
  0x50   : > { %p7447_p8 = pnand %p7445_p5, %p7735_p7 }
  0x51   : > { %p7454_p12 = por %p7453_p11, %p7452_p10 }
  0x52   : > { %p7448_p9 = pneg %p7447_p8 }
  0x54   : > { %p7455_p13 = pnand %p7454_p12, %p7448_p9 }
  0x56   : > { %7458 = shalt.err (!%p7455_p13)
}
  0x57   : > { %7209 = dma.hbm_to_vmem [thread:$0]  (!%p7725_p6), %s11173_s9, 16, %s393_s29, [#allocation14]  }
  0x58   : > { %s7470_s26 = scalar_lea.vmem %s407_s16, 16  ;;  %s7477_s19 = scalar_lea.vmem %s407_s16, 32 }
  0x59   : > { %p7471_p1 = scmp.ne.s32.totalorder %s407_s16, %s7470_s26  ;;  %p7478_p0 = scmp.lt.s32.totalorder %s407_s16, %s407_s16 }
  0x5a   : > { %p7479_p2 = scmp.lt.s32.totalorder %s7477_s19, %s7470_s26 }
  0x5b   : > { %p7473_p3 = pnand %p7471_p1, %p7735_p7 }
  0x5c   : > { %p7480_p5 = por %p7479_p2, %p7478_p0 }
  0x5d   : > { %p7474_p4 = pneg %p7473_p3 }
  0x5f   : > { %p7481_p8 = pnand %p7480_p5, %p7474_p4 }
  0x61   : > { %7484 = shalt.err (!%p7481_p8)
}
  0x62   : > { %7212 = dma.hbm_to_vmem [thread:$0]  (!%p7725_p6), %s11175_s11, 16, %s407_s16, [#allocation17]  }
  0x63   : > { %s7795_s18 = sadd.s32 1, %s7595_s24   ;;  %s142_s17 = sadd.s32 1, %s7591_s23 }
  0x64   : > { %s139_s15 = ssub.s32 %s7595_s24, %s7795_s18  ;;  %p149_p9 = scmp.ne.s32.totalorder %s7591_s23, %s7587_s22 }
  0x65   : > { %p140_p7 = scmp.eq.s32.totalorder %s139_s15, 0  ;;  %p150_p10 = scmp.eq.s32.totalorder %s7595_s24, 0 }
  0x66   : > { %p155_p11 = scmp.ne.s32.totalorder %s7587_s22, %s7583_s21  ;;  %p11232_p13 = scmp.eq.s32.totalorder %s7711_s27, 0 }
  0x67   : > { %s7806_s29 = scalar_select %p140_p7, %s7591_s23, %s142_s17  }
  0x68   : > { %p151_p12 = por %p150_p10, %p149_p9  ;;  %p7810_p1 = por %p11232_p13, %p155_p11 }
  0x69   : > { %p7224_p3 = scmp.lt.s32.totalorder %s7595_s24, 4  ;;  %s417_s16 = sand.u32 1, %s7595_s24  }
  0x6a   : > { %s11233_s13 = scalar_select %p7810_p1, 1, 0 }
  0x6b   : > { %s419_s14 = sand.u32 1, %s7591_s23   ;;  %p7817_p6 = pnand %p7224_p3, %p151_p12 }
  0x6c   : > { %s7155_s20 = smul.u32 3584, %s419_s14  ;;  %s7829_s17 = scalar_lea.sflag [#allocation11], %s417_s16 }
  0x6d   : > { %s7056_s26 = smul.u32 57344, %s7595_s24  ;;  %p7487_p0 = pneg %p7817_p6 }
  0x6e   : > { %s421_s30 = scalar_lea.vmem [#allocation10], %s7155_s20 }
  0x6f   : > { %s7825_s0 = scalar_lea.hbm %s11169_s5, %s7056_s26  ;;  %s429_s15 = sshll.u32 %s421_s30, 4  ;;  %s7827_s15 = int_to_ptr.vmem [resolvable:$true] %s429_s15 }
  0x70   : > { %s7485_s14 = scalar_lea.hbm %s7825_s0, 57344  ;;  %s7490_s26 = scalar_lea.hbm %s11169_s5, 229376 }
  0x71   : > { %p7486_p4 = scmp.ne.s32.totalorder %s7825_s0, %s7485_s14  ;;  %p7491_p8 = scmp.lt.s32.totalorder %s7825_s0, %s11169_s5 }
  0x72   : > { %p7492_p7 = scmp.lt.s32.totalorder %s7490_s26, %s7485_s14 }
  0x73   : > { %p7488_p2 = pnand %p7487_p0, %p7486_p4 }
  0x74   : > { %p7493_p9 = por %p7492_p7, %p7491_p8 }
  0x75   : > { %p7489_p5 = pneg %p7488_p2 }
  0x77   : > { %p7494_p10 = pnand %p7493_p9, %p7489_p5 }
  0x79   : > { %7497 = shalt.err (!%p7494_p10)
}
  0x7a   : > { %s7498_s16 = scalar_lea.vmem %s7827_s15, 57344  ;;  %s7606_s20 = smov [#allocation10]  }
  0x7b   : > { %p7499_p11 = scmp.ne.s32.totalorder %s7827_s15, %s7498_s16  ;;  %s7503_s30 = sshll.u32 %s7606_s20, 4  ;;  %s7504_s30 = int_to_ptr.vmem [resolvable:$false] %s7503_s30 }
  0x7c   : > { %s7505_s1 = scalar_lea.vmem %s7504_s30, 114688  ;;  %p7506_p3 = scmp.lt.s32.totalorder %s7827_s15, %s7504_s30 }
  0x7d   : > { %p7501_p12 = pnand %p7499_p11, %p7487_p0  ;;  %p7507_p4 = scmp.lt.s32.totalorder %s7505_s1, %s7498_s16 }
  0x7f   : > { %p7502_p13 = pneg %p7501_p12  ;;  %p7508_p2 = por %p7507_p4, %p7506_p3 }
  0x81   : > { %p7509_p1 = pnand %p7508_p2, %p7502_p13 }
  0x83   : > { %7512 = shalt.err (!%p7509_p1)
}
  0x84   : > { %s7607_s14 = smov 512   ;;  %s7608_s24 = smov 32  }
  0x85   : > { %7216 = dma.hbm_to_vmem [thread:$0]  (!%p7817_p6), %s7825_s0, 57344, %s7827_s15, %s7829_s17, %s7607_s14, %s7607_s14, %s7608_s24  }
  0x86   : > { %p11235_p0 = scmp.ne.s32.totalorder %s11227_s28, 0 }
  0x87   : > { %p11236_p5 = scmp.eq.s32.totalorder (!%p11235_p0), %s7711_s27, 0 }
  0x88   : > { %441 = sbr.rel (%p11235_p0) target bundleno = 3073 (0xc01), region = 68 }
  0x8d   : > { %7554 = dma.done.wait (%p11236_p5), [#allocation5], 256   ;;  %p11237_p8 = pmov %p11236_p5 }
  0x8e   : > { %p11238_p7 = pmov %p11236_p5 }
  0x8f   : > { %7556 = vsyncadd (%p11237_p8), [#allocation5], 4294967040 }
  0x90   : > { %7558 = dma.done.wait (%p11238_p7), [#allocation8], 384   ;;  %p11239_p1 = pmov %p11236_p5 }
  0x91   : > { %s455_s25 = sand.u32 1, %s7711_s27   ;;  %s457_s0 = sand.u32 1, %s7587_s22  }
  0x92   : > { %7560 = vsyncadd (%p11239_p1), [#allocation8], 4294966912  ;;  %s7156_s15 = smul.u32 3584, %s457_s0  ;;  %s456_s28 = scalar_lea.sflag [#allocation11], %s455_s25 }
  0x93   : > { %p11240_p6 = scmp.ne.s32.totalorder %s11233_s13, 0 }
  0x94   : > { %s7862_s17 = scalar_lea.vmem [#allocation10], %s7156_s15 }
  0x95   : > { %7562 = dma.done.wait (%p11240_p6), %s456_s28, 57344  }
  0x96   : > { %7564 = vsyncadd (%p11240_p6), %s456_s28, 4294909952  ;;  %p11241_p9 = pmov %p11239_p1 }
  0x97   : > { %p11242_p10 = pmov %p11239_p1 }
  0x98   : > { %7566 = dma.done.wait (%p11241_p9), [#allocation11], 64  }
  0x99   : > { %7568 = vsyncadd (%p11242_p10), [#allocation11], 4294967232  ;;  %p11243_p11 = pmov %p11239_p1 }
  0x9a   : > { %p11244_p12 = pmov %p11239_p1 }
  0x9b   : > { %7570 = dma.done.wait (%p11243_p11), [#allocation14], 80  }
  0x9c   : > { %7572 = vsyncadd (%p11244_p12), [#allocation14], 4294967216  ;;  %p11245_p13 = pmov %p11239_p1 }
  0x9d   : > { %p11246_p3 = pmov %p11239_p1 }
  0x9e   : > { %7574 = dma.done.wait (%p11245_p13), [#allocation17], 16  }
  0x9f   : > { %7576 = vsyncadd (%p11246_p3), [#allocation17], 4294967280  ;;  %p11247_p4 = scmp.ne.s32.totalorder %s7711_s27, 0 }
  0xa1   : > { %515 = sbr.rel (%p11247_p4) target bundleno = 1515 (0x5eb), region = 104 }
  0xa6   : > { %v525_v0 = vlaneseq  ;;  %v7885_v2 = vld [vmem:[#allocation4] ss:$2 sm:$0xff]  ;;  %s7609_s13 = smov 127   ;;  %s7610_s26 = smov 126   ;;  %v11181_v17 = vmov 0.0   ;;  %v7618_v23 = vmov 0  }
  0xa7   : > { %s7611_s19 = smov 96   ;;  %s7612_s21 = smov 95   ;;  %516 = vst [vmem:[#allocation3] sm:$0xff] %v11181_v17  ;;  %1095 = vmatprep.mubr.f32.mxu0 %v11181_v17  ;;  %1166 = vmatprep.mubr.f32.mxu1 %v11181_v17  ;;  %v8072_v26 = vld [vmem:[#allocation4 + $0x1] ss:$2 sm:$0xff]  ;;  %vm935_vm3 = vcmask 1040384  }
  0xa8   : > { %v7883_v1 = vshrl.u32 %v525_v0, 7  ;;  %s7613_s16 = smov 94   ;;  %s7614_s20 = smov 64   ;;  %7293 = vset.pattern.permute.xlu0 %v7618_v23  ;;  %7294 = vset.pattern.permute.xlu1 %v7618_v23  ;;  %11251 = vst [vmem:[#allocation29_spill] sm:$0xff] %v8072_v26  ;;  %v518_v28 = vld [vmem:[%s11166_s2] sm:$0xff]  ;;  %vm944_vm4 = vcmask 1041408  }
  0xa9   : > { %s7615_s30 = smov 63   ;;  %s7616_s1 = smov 62   ;;  %vm953_vm10 = vcmask 1042432   ;;  %vm962_vm11 = vcmask 1043456   ;;  %vm971_vm12 = vcmask 1044480   ;;  %vm980_vm13 = vcmask 1045504  }
  0xaa   : > { %11248 = vst [vmem:[#allocation26_spill] sm:$0xff] %v7883_v1  ;;  %v531_v3 = vsub.s32 1, %v7883_v1  ;;  %v527_v5 = vsub.s32 0, %v7883_v1  ;;  %v535_v6 = vsub.s32 2, %v7883_v1  ;;  %v539_v9 = vsub.s32 3, %v7883_v1 }
  0xab   : > { %v543_v10 = vsub.s32 4, %v7883_v1  ;;  %v547_v13 = vsub.s32 5, %v7883_v1  ;;  %v551_v14 = vsub.s32 6, %v7883_v1  ;;  %v11180_v18 = vsub.s32 7, %v7883_v1 }
  0xac   : > { %v7891_v4 = vrot.slane %v7885_v2, %v531_v3  ;;  %v7900_v7 = vrot.slane %v7885_v2, %v527_v5  ;;  %v7905_v8 = vrot.slane %v7885_v2, %v535_v6  ;;  %v7918_v11 = vrot.slane %v7885_v2, %v539_v9 }
  0xad   : > { %v7925_v12 = vrot.slane %v7885_v2, %v543_v10  ;;  %v7950_v15 = vrot.slane %v7885_v2, %v547_v13  ;;  %v7957_v16 = vrot.slane %v7885_v2, %v551_v14  ;;  %v8046_v19 = vrot.slane %v7885_v2, %v11180_v18 }
  0xae   : > { %567 = vrot.lane.b32.xlu0 %v7891_v4, %s7609_s13  ;;  %565 = vrot.lane.b32.xlu1 %v7900_v7, %s7609_s13  ;;  %v8088_v30 = vrot.slane %v8072_v26, %v531_v3  ;;  %v8095_v32 = vrot.slane %v8072_v26, %v535_v6  ;;  %v8108_v35 = vrot.slane %v8072_v26, %v527_v5  ;;  %v8231_v3 = vand.u32 127, %v525_v0 }
  0xaf   : > { %11249 = vst [vmem:[#allocation27_spill] sm:$0xff] %v7957_v16  ;;  %11250 = vst [vmem:[#allocation28_spill] sm:$0xff] %v8046_v19  ;;  %v8117_v37 = vrot.slane %v8072_v26, %v539_v9  ;;  %v8134_v41 = vrot.slane %v8072_v26, %v543_v10  ;;  %v8167_v49 = vrot.slane %v8072_v26, %v547_v13  ;;  %vm989_vm14 = vcmask 1046528  }
  0xb0   : > { %11252 = vst [vmem:[#allocation30_spill] sm:$0xff] %v8088_v30  ;;  %11254 = vst [vmem:[#allocation32_spill] sm:$0xff] %v8108_v35  ;;  %v8184_v53 = vrot.slane %v8072_v26, %v551_v14  ;;  %vm583_vm0 = vcmp.lt.s32.totalorder %v8231_v3, 127  ;;  %vm608_vm1 = vcmp.lt.s32.totalorder %v8231_v3, 126  ;;  %vm633_vm2 = vcmp.lt.s32.totalorder %v8231_v3, 96 }
  0xb1   : > { %11255 = vst [vmem:[#allocation33_spill] sm:$0xff] %v8117_v37  ;;  %11256 = vst [vmem:[#allocation34_spill] sm:$0xff] %v8134_v41  ;;  %vm658_vm5 = vcmp.lt.s32.totalorder %v8231_v3, 95  ;;  %vm683_vm6 = vcmp.lt.s32.totalorder %v8231_v3, 94  ;;  %vm708_vm7 = vcmp.lt.s32.totalorder %v8231_v3, 64  ;;  %vm733_vm8 = vcmp.lt.s32.totalorder %v8231_v3, 63 }
  0xb2   : > { %569 = vrot.lane.b32.xlu0 %v7905_v8, %s7609_s13  ;;  %594 = vrot.lane.b32.xlu1 %v7891_v4, %s7610_s26  ;;  %11257 = vst [vmem:[#allocation35_spill] sm:$0xff] %v8167_v49  ;;  %11258 = vst [vmem:[#allocation36_spill] sm:$0xff] %v8184_v53  ;;  %vm758_vm9 = vcmp.lt.s32.totalorder %v8231_v3, 62  ;;  %vm11220_vm15 = vcmask 72704   ;;  %v1987_v3 = vld [vmem:[#allocation2 + $0x1c] sm:$0x7f] }
  0xb6   : > { %596 = vrot.lane.b32.xlu0 %v7905_v8, %s7610_s26  ;;  %571 = vrot.lane.b32.xlu1 %v7918_v11, %s7609_s13 }
  0xba   : > { %573 = vrot.lane.b32.xlu0 %v7925_v12, %s7609_s13  ;;  %592 = vrot.lane.b32.xlu1 %v7900_v7, %s7610_s26 }
  0xbe   : > { %619 = vrot.lane.b32.xlu0 %v7891_v4, %s7611_s19  ;;  %621 = vrot.lane.b32.xlu1 %v7905_v8, %s7611_s19 }
  0xc2   : > { %598 = vrot.lane.b32.xlu0 %v7918_v11, %s7610_s26  ;;  %600 = vrot.lane.b32.xlu1 %v7925_v12, %s7610_s26 }
  0xc6   : > { %617 = vrot.lane.b32.xlu0 %v7900_v7, %s7611_s19  ;;  %644 = vrot.lane.b32.xlu1 %v7891_v4, %s7612_s21 }
  0xca   : > { %646 = vrot.lane.b32.xlu0 %v7905_v8, %s7612_s21  ;;  %575 = vrot.lane.b32.xlu1 %v7950_v15, %s7609_s13 }
  0xce   : > { %577 = vrot.lane.b32.xlu0 %v7957_v16, %s7609_s13  ;;  %623 = vrot.lane.b32.xlu1 %v7918_v11, %s7611_s19 }
  0xd2   : > { %625 = vrot.lane.b32.xlu0 %v7925_v12, %s7611_s19  ;;  %642 = vrot.lane.b32.xlu1 %v7900_v7, %s7612_s21 }
  0xd6   : > { %669 = vrot.lane.b32.xlu0 %v7891_v4, %s7613_s16  ;;  %671 = vrot.lane.b32.xlu1 %v7905_v8, %s7613_s16 }
  0xda   : > { %602 = vrot.lane.b32.xlu0 %v7950_v15, %s7610_s26  ;;  %604 = vrot.lane.b32.xlu1 %v7957_v16, %s7610_s26 }
  0xde   : > { %648 = vrot.lane.b32.xlu0 %v7918_v11, %s7612_s21  ;;  %650 = vrot.lane.b32.xlu1 %v7925_v12, %s7612_s21 }
  0xe2   : > { %667 = vrot.lane.b32.xlu0 %v7900_v7, %s7613_s16  ;;  %694 = vrot.lane.b32.xlu1 %v7891_v4, %s7614_s20 }
  0xe6   : > { %696 = vrot.lane.b32.xlu0 %v7905_v8, %s7614_s20  ;;  %627 = vrot.lane.b32.xlu1 %v7950_v15, %s7611_s19 }
  0xea   : > { %629 = vrot.lane.b32.xlu0 %v7957_v16, %s7611_s19  ;;  %673 = vrot.lane.b32.xlu1 %v7918_v11, %s7613_s16 }
  0xee   : > { %675 = vrot.lane.b32.xlu0 %v7925_v12, %s7613_s16  ;;  %692 = vrot.lane.b32.xlu1 %v7900_v7, %s7614_s20 }
  0xf2   : > { %719 = vrot.lane.b32.xlu0 %v7891_v4, %s7615_s30  ;;  %721 = vrot.lane.b32.xlu1 %v7905_v8, %s7615_s30 }
  0xf6   : > { %652 = vrot.lane.b32.xlu0 %v7950_v15, %s7612_s21  ;;  %654 = vrot.lane.b32.xlu1 %v7957_v16, %s7612_s21 }
  0xfa   : > { %698 = vrot.lane.b32.xlu0 %v7918_v11, %s7614_s20  ;;  %700 = vrot.lane.b32.xlu1 %v7925_v12, %s7614_s20 }
  0xfe   : > { %717 = vrot.lane.b32.xlu0 %v7900_v7, %s7615_s30  ;;  %744 = vrot.lane.b32.xlu1 %v7891_v4, %s7616_s1 }
 0x102   : > { %746 = vrot.lane.b32.xlu0 %v7905_v8, %s7616_s1  ;;  %677 = vrot.lane.b32.xlu1 %v7950_v15, %s7613_s16 }
 0x106   : > { %679 = vrot.lane.b32.xlu0 %v7957_v16, %s7613_s16  ;;  %723 = vrot.lane.b32.xlu1 %v7918_v11, %s7615_s30 }
 0x10a   : > { %725 = vrot.lane.b32.xlu0 %v7925_v12, %s7615_s30  ;;  %742 = vrot.lane.b32.xlu1 %v7900_v7, %s7616_s1 }
 0x10e   : > { %702 = vrot.lane.b32.xlu0 %v7950_v15, %s7614_s20  ;;  %704 = vrot.lane.b32.xlu1 %v7957_v16, %s7614_s20 }
 0x112   : > { %748 = vrot.lane.b32.xlu0 %v7918_v11, %s7616_s1  ;;  %750 = vrot.lane.b32.xlu1 %v7925_v12, %s7616_s1 }
 0x116   : > { %727 = vrot.lane.b32.xlu0 %v7950_v15, %s7615_s30  ;;  %729 = vrot.lane.b32.xlu1 %v7957_v16, %s7615_s30 }
 0x11a   : > { %752 = vrot.lane.b32.xlu0 %v7950_v15, %s7616_s1  ;;  %754 = vrot.lane.b32.xlu1 %v7957_v16, %s7616_s1 }
 0x11e   : > { %579 = vrot.lane.b32.xlu0 %v8046_v19, %s7609_s13  ;;  %606 = vrot.lane.b32.xlu1 %v8046_v19, %s7610_s26 }
 0x120   : > { %v8054_v20 = vpop.permute.xlu0 %567  ;;  %v8056_v21 = vpop.permute.xlu1 %565 }
 0x121   : > { %v590_v13 = vsel %vm583_vm0, %v8056_v21, %v8054_v20 }
 0x122   : > { %631 = vrot.lane.b32.xlu0 %v8046_v19, %s7611_s19  ;;  %656 = vrot.lane.b32.xlu1 %v8046_v19, %s7612_s21  ;;  %v775_v26 = vrot.slane %v590_v13, 7 }
 0x124   : > { %v8062_v22 = vpop.permute.xlu0 %569  ;;  %v8064_v24 = vpop.permute.xlu1 %594 }
 0x125   : > { %v589_v0 = vsel %vm583_vm0, %v8054_v20, %v8062_v22 }
 0x126   : > { %681 = vrot.lane.b32.xlu0 %v8046_v19, %s7613_s16  ;;  %706 = vrot.lane.b32.xlu1 %v8046_v19, %s7614_s20  ;;  %v776_v20 = vrot.slane %v589_v0, 7 }
 0x128   : > { %v8070_v25 = vpop.permute.xlu0 %596  ;;  %v8074_v27 = vpop.permute.xlu1 %571 }
 0x129   : > { %v614_v14 = vsel %vm608_vm1, %v8064_v24, %v8070_v25  ;;  %v588_v23 = vsel %vm583_vm0, %v8062_v22, %v8074_v27 }
 0x12a   : > { %731 = vrot.lane.b32.xlu0 %v8046_v19, %s7615_s30  ;;  %756 = vrot.lane.b32.xlu1 %v8046_v19, %s7616_s1  ;;  %v777_v1 = vrot.slane %v588_v23, 7 }
 0x12c   : > { %v8083_v29 = vpop.permute.xlu0 %573  ;;  %v8090_v31 = vpop.permute.xlu1 %592 }
 0x12d   : > { %11253 = vst [vmem:[#allocation31_spill] sm:$0xff] %v8090_v31  ;;  %v615_v22 = vsel %vm608_vm1, %v8090_v31, %v8064_v24 }
 0x12e   : > { %1000 = vperm.xlu0 %7293, %v518_v28   ;;  %2193 = vrot.lane.b32.xlu1 %v8088_v30, %s7609_s13  ;;  %v587_v28 = vsel %vm583_vm0, %v8074_v27, %v8083_v29  ;;  %v800_v27 = vrot.slane %v614_v14, 6  ;;  %v799_v0 = vrot.slane %v615_v22, 6  ;;  %v938_v22 = vsel %vm935_vm3, %v7905_v8, %v777_v1 }
 0x12f   : > { %v778_v24 = vrot.slane %v587_v28, 7 }
 0x130   : > { %v8097_v33 = vpop.permute.xlu0 %619  ;;  %v8101_v34 = vpop.permute.xlu1 %621 }
 0x131   : > { %v639_v17 = vsel %vm633_vm2, %v8097_v33, %v8101_v34 }
 0x132   : > { %2195 = vrot.lane.b32.xlu0 %v8095_v32, %s7609_s13  ;;  %2217 = vrot.lane.b32.xlu1 %v8088_v30, %s7610_s26  ;;  %v824_v13 = vrot.slane %v639_v17, 5 }
 0x134   : > { %v8110_v36 = vpop.permute.xlu0 %598  ;;  %v8119_v38 = vpop.permute.xlu1 %600 }
 0x135   : > { %v613_v19 = vsel %vm608_vm1, %v8070_v25, %v8110_v36  ;;  %v937_v25 = vsel %vm935_vm3, %v7891_v4, %v776_v20  ;;  %v612_v17 = vsel %vm608_vm1, %v8110_v36, %v8119_v38  ;;  %v939_v4 = vsel %vm935_vm3, %v7918_v11, %v778_v24 }
 0x136   : > { %2191 = vrot.lane.b32.xlu0 %v8108_v35, %s7609_s13  ;;  %2197 = vrot.lane.b32.xlu1 %v8117_v37, %s7609_s13  ;;  %v801_v23 = vrot.slane %v613_v19, 6  ;;  %v946_v28 = vsel %vm944_vm4, %v937_v25, %v800_v27  ;;  %v802_v20 = vrot.slane %v612_v17, 6 }
 0x138   : > { %v8123_v39 = vpop.permute.xlu0 %617  ;;  %v8127_v40 = vpop.permute.xlu1 %644  ;;  %v8342_v36 = vsel %vm944_vm4, %v938_v22, %v801_v23 }
 0x13a   : > { %2219 = vrot.lane.b32.xlu0 %v8095_v32, %s7610_s26  ;;  %2215 = vrot.lane.b32.xlu1 %v8108_v35, %s7610_s26 }
 0x13c   : > { %v8136_v42 = vpop.permute.xlu0 %646  ;;  %v8140_v43 = vpop.permute.xlu1 %575 }
 0x13d   : > { %v664_v1 = vsel %vm658_vm5, %v8127_v40, %v8136_v42 }
 0x13e   : > { %2199 = vrot.lane.b32.xlu0 %v8134_v41, %s7609_s13  ;;  %2243 = vrot.lane.b32.xlu1 %v8095_v32, %s7611_s19 }
 0x140   : > { %v8144_v44 = vpop.permute.xlu0 %577  ;;  %v8148_v45 = vpop.permute.xlu1 %623 }
 0x141   : > { %v585_v11 = vsel %vm583_vm0, %v8140_v43, %v8144_v44  ;;  %v638_v17 = vsel %vm633_vm2, %v8101_v34, %v8148_v45 }
 0x142   : > { %2241 = vrot.lane.b32.xlu0 %v8088_v30, %s7611_s19  ;;  %2223 = vrot.lane.b32.xlu1 %v8134_v41, %s7610_s26 }
 0x144   : > { %v8152_v46 = vpop.permute.xlu0 %625  ;;  %v8156_v47 = vpop.permute.xlu1 %642 }
 0x146   : > { %2221 = vrot.lane.b32.xlu0 %v8117_v37, %s7610_s26  ;;  %2265 = vrot.lane.b32.xlu1 %v8088_v30, %s7612_s21 }
 0x148   : > { %v8160_v48 = vpop.permute.xlu0 %669  ;;  %v8169_v50 = vpop.permute.xlu1 %671 }
 0x149   : > { %v689_v27 = vsel %vm683_vm6, %v8160_v48, %v8169_v50 }
 0x14a   : > { %2239 = vrot.lane.b32.xlu0 %v8108_v35, %s7611_s19  ;;  %2201 = vrot.lane.b32.xlu1 %v8167_v49, %s7609_s13 }
 0x14c   : > { %v8173_v51 = vpop.permute.xlu0 %602  ;;  %v8177_v52 = vpop.permute.xlu1 %604 }
 0x14e   : > { %2267 = vrot.lane.b32.xlu0 %v8095_v32, %s7612_s21  ;;  %2245 = vrot.lane.b32.xlu1 %v8117_v37, %s7611_s19 }
 0x150   : > { %v8186_v54 = vpop.permute.xlu0 %648  ;;  %v8190_v55 = vpop.permute.xlu1 %650 }
 0x152   : > { %2203 = vrot.lane.b32.xlu0 %v8184_v53, %s7609_s13  ;;  %2263 = vrot.lane.b32.xlu1 %v8108_v35, %s7612_s21 }
 0x154   : > { %v8194_v56 = vpop.permute.xlu0 %667  ;;  %v8198_v57 = vpop.permute.xlu1 %694 }
 0x156   : > { %2247 = vrot.lane.b32.xlu0 %v8134_v41, %s7611_s19  ;;  %2291 = vrot.lane.b32.xlu1 %v8095_v32, %s7613_s16 }
 0x158   : > { %v8202_v58 = vpop.permute.xlu0 %696  ;;  %v8206_v59 = vpop.permute.xlu1 %627 }
 0x159   : > { %v714_v25 = vsel %vm708_vm7, %v8198_v57, %v8202_v58 }
 0x15a   : > { %2289 = vrot.lane.b32.xlu0 %v8088_v30, %s7613_s16  ;;  %2227 = vrot.lane.b32.xlu1 %v8184_v53, %s7610_s26  ;;  %v896_v34 = vrot.slane %v714_v25, 2 }
 0x15c   : > { %v8210_v60 = vpop.permute.xlu0 %629  ;;  %v8214_v61 = vpop.permute.xlu1 %673 }
 0x15e   : > { %2225 = vrot.lane.b32.xlu0 %v8167_v49, %s7610_s26  ;;  %2271 = vrot.lane.b32.xlu1 %v8134_v41, %s7612_s21 }
 0x160   : > { %v8218_v62 = vpop.permute.xlu0 %675  ;;  %v8222_v63 = vpop.permute.xlu1 %692 }
 0x162   : > { %2269 = vrot.lane.b32.xlu0 %v8117_v37, %s7612_s21  ;;  %2313 = vrot.lane.b32.xlu1 %v8088_v30, %s7614_s20 }
 0x164   : > { %v8226_v2 = vpop.permute.xlu0 %719  ;;  %v8233_v5 = vpop.permute.xlu1 %721 }
 0x165   : > { %v739_v22 = vsel %vm733_vm8, %v8226_v2, %v8233_v5 }
 0x166   : > { %2287 = vrot.lane.b32.xlu0 %v8108_v35, %s7613_s16  ;;  %2249 = vrot.lane.b32.xlu1 %v8167_v49, %s7611_s19 }
 0x168   : > { %v8237_v6 = vpop.permute.xlu0 %652  ;;  %v8243_v9 = vpop.permute.xlu1 %654 }
 0x16a   : > { %2315 = vrot.lane.b32.xlu0 %v8095_v32, %s7614_s20  ;;  %2293 = vrot.lane.b32.xlu1 %v8117_v37, %s7613_s16 }
 0x16c   : > { %v8252_v10 = vpop.permute.xlu0 %698  ;;  %v8272_v18 = vpop.permute.xlu1 %700 }
 0x16e   : > { %2251 = vrot.lane.b32.xlu0 %v8184_v53, %s7611_s19  ;;  %2311 = vrot.lane.b32.xlu1 %v8108_v35, %s7614_s20  ;;  %v936_v35 = vsel %vm935_vm3, %v7900_v7, %v775_v26  ;;  %v640_v7 = vsel %vm633_vm2, %v8123_v39, %v8097_v33  ;;  %v955_v26 = vsel %vm953_vm10, %v946_v28, %v824_v13  ;;  %v780_v28 = vrot.slane %v585_v11, 7 }
 0x16f   : > { %v945_v19 = vsel %vm944_vm4, %v936_v35, %v799_v0  ;;  %v665_v35 = vsel %vm658_vm5, %v8156_v47, %v8127_v40  ;;  %v823_v24 = vrot.slane %v640_v7, 5  ;;  %v848_v0 = vrot.slane %v664_v1, 4 }
 0x170   : > { %v8289_v16 = vpop.permute.xlu0 %717  ;;  %v8297_v14 = vpop.permute.xlu1 %744  ;;  %v690_v13 = vsel %vm683_vm6, %v8194_v56, %v8160_v48  ;;  %v8368_v40 = vsel %vm583_vm0, %v8083_v29, %v8140_v43  ;;  %v715_v48 = vsel %vm708_vm7, %v8222_v63, %v8198_v57  ;;  %v847_v7 = vrot.slane %v665_v35, 4 }
 0x171   : > { %v872_v1 = vrot.slane %v689_v27, 3  ;;  %v740_v29 = vsel %vm733_vm8, %v8289_v16, %v8226_v2  ;;  %v948_v57 = vsel %vm944_vm4, %v939_v4, %v802_v20  ;;  %v871_v11 = vrot.slane %v690_v13, 3 }
 0x172   : > { %2295 = vrot.lane.b32.xlu0 %v8134_v41, %s7613_s16  ;;  %2339 = vrot.lane.b32.xlu1 %v8095_v32, %s7615_s30  ;;  %v954_v35 = vsel %vm953_vm10, %v945_v19, %v823_v24  ;;  %v964_v27 = vsel %vm962_vm11, %v955_v26, %v848_v0  ;;  %v779_v4 = vrot.slane %v8368_v40, 7  ;;  %v8402_v20 = vsel %vm935_vm3, %v7950_v15, %v780_v28 }
 0x173   : > { %v919_v13 = vrot.slane %v740_v29, 1  ;;  %v963_v19 = vsel %vm962_vm11, %v954_v35, %v847_v7  ;;  %v663_v26 = vsel %vm658_vm5, %v8136_v42, %v8186_v54  ;;  %v973_v0 = vsel %vm971_vm12, %v964_v27, %v872_v1  ;;  %v8437_v1 = vld [vmem:[#allocation7] sm:$0xff] }
 0x174   : > { %v8312_v31 = vpop.permute.xlu0 %746  ;;  %v8336_v33 = vpop.permute.xlu1 %677  ;;  %v662_v15 = vsel %vm658_vm5, %v8186_v54, %v8190_v55  ;;  %v972_v42 = vsel %vm971_vm12, %v963_v19, %v871_v11  ;;  %v687_v54 = vsel %vm683_vm6, %v8214_v61, %v8218_v62  ;;  %v849_v29 = vrot.slane %v663_v26, 4 }
 0x175   : > { %v764_v8 = vsel %vm758_vm9, %v8297_v14, %v8312_v31 }
 0x176   : > { %6985 = vmatprep.subr.msk.mxu0 %vm935_vm3, %v764_v8  ;;  %2337 = vrot.lane.b32.xlu0 %v8088_v30, %s7615_s30  ;;  %v637_v8 = vsel %vm633_vm2, %v8148_v45, %v8152_v46  ;;  %v895_v30 = vrot.slane %v715_v48, 2  ;;  %v825_v45 = vrot.slane %v638_v17, 5  ;;  %v982_v48 = vsel %vm980_vm13, %v973_v0, %v896_v34 }
 0x177   : > { %2275 = vrot.lane.b32.xlu1 %v8184_v53, %s7612_s21  ;;  %v920_v53 = vrot.slane %v739_v22, 1  ;;  %v826_v25 = vrot.slane %v637_v8, 5  ;;  %v8428_v22 = vsel %vm608_vm1, %v8119_v38, %v8173_v51  ;;  %v688_v38 = vsel %vm683_vm6, %v8169_v50, %v8214_v61 }
 0x178   : > { %v8360_v23 = vpop.permute.xlu0 %679  ;;  %v724_v43 = vpop.permute.xlu1 %723  ;;  %v981_v7 = vsel %vm980_vm13, %v972_v42, %v895_v30  ;;  %v712_v8 = vsel %vm708_vm7, %v8252_v10, %v8272_v18  ;;  %v610_v30 = vsel %vm608_vm1, %v8173_v51, %v8177_v52  ;;  %v713_v34 = vsel %vm708_vm7, %v8202_v58, %v8252_v10 }
 0x179   : > { %v991_v17 = vsel %vm989_vm14, %v982_v48, %v920_v53  ;;  %v990_v11 = vsel %vm989_vm14, %v981_v7, %v919_v13  ;;  %v850_v53 = vrot.slane %v662_v15, 4  ;;  %v956_v35 = vsel %vm953_vm10, %v8342_v36, %v825_v45 }
 0x17a   : > { %2273 = vrot.lane.b32.xlu0 %v8167_v49, %s7612_s21  ;;  %v957_v27 = vsel %vm953_vm10, %v948_v57, %v826_v25  ;;  %v874_v13 = vrot.slane %v687_v54, 3  ;;  %v738_v51 = vsel %vm733_vm8, %v8233_v5, %v724_v43  ;;  %v803_v58 = vrot.slane %v8428_v22, 6 }
 0x17b   : > { %2319 = vrot.lane.b32.xlu1 %v8134_v41, %s7614_s20  ;;  %v635_v10 = vsel %vm633_vm2, %v8206_v59, %v8210_v60  ;;  %v873_v19 = vrot.slane %v688_v38, 3  ;;  %v898_v26 = vrot.slane %v712_v8, 2  ;;  %v11259_v45 = vmov 0.0  }
 0x17c   : > { %v8395_v2 = vpop.permute.xlu0 %725  ;;  %v8409_v24 = vpop.permute.xlu1 %742  ;;  %v804_v57 = vrot.slane %v610_v30, 6  ;;  %v965_v25 = vsel %vm962_vm11, %v956_v35, %v849_v29  ;;  %v897_v0 = vrot.slane %v713_v34, 2  ;;  %v636_v15 = vsel %vm633_vm2, %v8152_v46, %v8206_v59 }
 0x17d   : > { %v765_v28 = vsel %vm758_vm9, %v8409_v24, %v8297_v14  ;;  %v737_v50 = vsel %vm733_vm8, %v724_v43, %v8395_v2  ;;  %v966_v43 = vsel %vm962_vm11, %v957_v27, %v850_v53  ;;  %v828_v22 = vrot.slane %v635_v10, 5 }
 0x17e   : > { %2317 = vrot.lane.b32.xlu0 %v8117_v37, %s7614_s20  ;;  %6986 = vmatpush1.msk.msra.mxu0 %vm935_vm3, %v765_v28  ;;  %v922_v5 = vrot.slane %v737_v50, 1  ;;  %v921_v28 = vrot.slane %v738_v51, 1  ;;  %v660_v54 = vsel %vm658_vm5, %v8237_v6, %v8243_v9  ;;  %v975_v7 = vsel %vm971_vm12, %v966_v43, %v874_v13 }
 0x17f   : > { %1061 = vmatprep.subr.mxu0 %v991_v17  ;;  %v661_v46 = vsel %vm658_vm5, %v8190_v55, %v8237_v6  ;;  %v984_v29 = vsel %vm980_vm13, %v975_v7, %v898_v26  ;;  %v974_v38 = vsel %vm971_vm12, %v965_v25, %v873_v19  ;;  %v686_v8 = vsel %vm683_vm6, %v8218_v62, %v8336_v33 }
 0x180   : > { %v703_v14 = vpop.permute.xlu0 %702  ;;  %1062 = vmatpush1.msra.mxu0 %v990_v11  ;;  %v8459_v61 = vpop.permute.xlu1 %704  ;;  %v993_v6 = vsel %vm989_vm14, %v984_v29, %v922_v5  ;;  %v983_v11 = vsel %vm980_vm13, %v974_v38, %v897_v0  ;;  %v827_v30 = vrot.slane %v636_v15, 5  ;;  %v852_v53 = vrot.slane %v660_v54, 4  ;;  %v11260_v29 = vld [vmem:[#allocation31_spill] sm:$0xff] }
 0x181   : > { %6987 = vmatmul.mubr.msk.f32.vlgmr.msra.gmra.mxu0 %vm11220_vm15, %v8437_v1  ;;  %v710_v55 = vsel %vm708_vm7, %v703_v14, %v8459_v61  ;;  %v711_v34 = vsel %vm708_vm7, %v8272_v18, %v703_v14  ;;  %v992_v62 = vsel %vm989_vm14, %v983_v11, %v921_v28  ;;  %v940_v18 = vsel %vm935_vm3, %v7925_v12, %v779_v4 }
 0x182   : > { %1237 = vmatprep.mubr.f32.mxu0 %v11259_v45  ;;  %v950_v14 = vsel %vm944_vm4, %v8402_v20, %v804_v57  ;;  %v875_v51 = vrot.slane %v686_v8, 3  ;;  %v900_v10 = vrot.slane %v710_v55, 2  ;;  %v11262_v8 = vld [vmem:[#allocation28_spill] sm:$0xff] }
 0x183   : > { %v959_v26 = vsel %vm953_vm10, %v950_v14, %v828_v22 }
 0x184   : > { %v749_v36 = vpop.permute.xlu0 %748  ;;  %v751_v48 = vpop.permute.xlu1 %750  ;;  %v968_v12 = vsel %vm962_vm11, %v959_v26, %v852_v53 }
 0x185   : > { %v763_v42 = vsel %vm758_vm9, %v8312_v31, %v749_v36  ;;  %v762_v17 = vsel %vm758_vm9, %v749_v36, %v751_v48  ;;  %v685_v31 = vsel %vm683_vm6, %v8336_v33, %v8360_v23  ;;  %v851_v33 = vrot.slane %v661_v46, 4 }
 0x186   : > { %6988 = vmatprep.subr.msk.mxu1 %vm935_vm3, %v762_v17  ;;  %v876_v35 = vrot.slane %v685_v31, 3  ;;  %v899_v36 = vrot.slane %v711_v34, 2 }
 0x187   : > { %6989 = vmatpush1.msk.msra.mxu1 %vm935_vm3, %v763_v42 }
 0x188   : > { %v728_v59 = vpop.permute.xlu0 %727  ;;  %1132 = vmatprep.subr.mxu1 %v993_v6  ;;  %v8515_v50 = vpop.permute.xlu1 %729  ;;  %v977_v5 = vsel %vm971_vm12, %v968_v12, %v876_v35 }
 0x189   : > { %v736_v27 = vsel %vm733_vm8, %v8395_v2, %v728_v59  ;;  %v735_v13 = vsel %vm733_vm8, %v728_v59, %v8515_v50  ;;  %1133 = vmatpush1.msra.mxu1 %v992_v62  ;;  %v949_v2 = vsel %vm944_vm4, %v940_v18, %v803_v58  ;;  %v986_v15 = vsel %vm980_vm13, %v977_v5, %v900_v10 }
 0x18a   : > { %6990 = vmatmul.mubr.msk.f32.vlgmr.msra.gmra.mxu1 %vm11220_vm15, %v8437_v1  ;;  %v924_v25 = vrot.slane %v735_v13, 1  ;;  %v958_v40 = vsel %vm953_vm10, %v949_v2, %v827_v30  ;;  %v923_v4 = vrot.slane %v736_v27, 1 }
 0x18b   : > { %1308 = vmatprep.mubr.f32.mxu1 %v11259_v45  ;;  %v967_v0 = vsel %vm962_vm11, %v958_v40, %v851_v33 }
 0x18c   : > { %v753_v19 = vpop.permute.xlu0 %752  ;;  %v755_v57 = vpop.permute.xlu1 %754  ;;  %v976_v28 = vsel %vm971_vm12, %v967_v0, %v875_v51  ;;  %v995_v22 = vsel %vm989_vm14, %v986_v15, %v924_v25 }
 0x18d   : > { %v761_v20 = vsel %vm758_vm9, %v751_v48, %v753_v19  ;;  %v760_v58 = vsel %vm758_vm9, %v753_v19, %v755_v57  ;;  %v985_v54 = vsel %vm980_vm13, %v976_v28, %v899_v36 }
 0x18e   : > { %6991 = vmatprep.subr.msk.mxu0 %vm935_vm3, %v760_v58  ;;  %v994_v31 = vsel %vm989_vm14, %v985_v54, %v923_v4 }
 0x18f   : > { %6992 = vmatpush1.msk.msra.mxu0 %vm935_vm3, %v761_v20 }
 0x190   : > { %v580_v43 = vpop.permute.xlu0 %579  ;;  %v607_v46 = vpop.permute.xlu1 %606  ;;  %1203 = vmatprep.subr.mxu0 %v995_v22 }
 0x191   : > { %v584_v48 = vsel %vm583_vm0, %v8144_v44, %v580_v43  ;;  %v591_v42 = vsel %vm583_vm0, %v580_v43, %v8056_v21  ;;  %v609_v59 = vsel %vm608_vm1, %v8177_v52, %v607_v46  ;;  %v616_v44 = vsel %vm608_vm1, %v607_v46, %v11260_v29  ;;  %1204 = vmatpush1.msra.mxu0 %v994_v31  ;;  %v11261_v21 = vld [vmem:[#allocation27_spill] sm:$0xff] }
 0x192   : > { %v781_v17 = vrot.slane %v584_v48, 7  ;;  %v782_v7 = vrot.slane %v591_v42, 7  ;;  %v805_v6 = vrot.slane %v609_v59, 6  ;;  %v806_v11 = vrot.slane %v616_v44, 6  ;;  %6993 = vmatmul.mubr.msk.f32.vlgmr.msra.gmra.mxu0 %vm11220_vm15, %v8437_v1 }
 0x193   : > { %1596 = vmatprep.mubr.f32.mxu0 %v11259_v45 }
 0x194   : > { %v942_v38 = vsel %vm935_vm3, %v11261_v21, %v781_v17  ;;  %v943_v55 = vsel %vm935_vm3, %v11262_v8, %v782_v7  ;;  %v632_v30 = vpop.permute.xlu0 %631  ;;  %v657_v33 = vpop.permute.xlu1 %656 }
 0x195   : > { %v634_v52 = vsel %vm633_vm2, %v8210_v60, %v632_v30  ;;  %v641_v53 = vsel %vm633_vm2, %v632_v30, %v8123_v39  ;;  %v951_v35 = vsel %vm944_vm4, %v942_v38, %v805_v6  ;;  %v952_v27 = vsel %vm944_vm4, %v943_v55, %v806_v11 }
 0x196   : > { %v829_v34 = vrot.slane %v634_v52, 5  ;;  %v830_v62 = vrot.slane %v641_v53, 5  ;;  %v659_v13 = vsel %vm658_vm5, %v8243_v9, %v657_v33  ;;  %v666_v60 = vsel %vm658_vm5, %v657_v33, %v8156_v47 }
 0x197   : > { %v853_v14 = vrot.slane %v659_v13, 4  ;;  %v854_v51 = vrot.slane %v666_v60, 4 }
 0x198   : > { %v960_v18 = vsel %vm953_vm10, %v951_v35, %v829_v34  ;;  %v961_v39 = vsel %vm953_vm10, %v952_v27, %v830_v62  ;;  %v682_v10 = vpop.permute.xlu0 %681  ;;  %v707_v36 = vpop.permute.xlu1 %706 }
 0x199   : > { %v684_v19 = vsel %vm683_vm6, %v8360_v23, %v682_v10  ;;  %v691_v2 = vsel %vm683_vm6, %v682_v10, %v8194_v56  ;;  %v969_v47 = vsel %vm962_vm11, %v960_v18, %v853_v14  ;;  %v970_v25 = vsel %vm962_vm11, %v961_v39, %v854_v51 }
 0x19a   : > { %v877_v9 = vrot.slane %v684_v19, 3  ;;  %v878_v26 = vrot.slane %v691_v2, 3  ;;  %v709_v40 = vsel %vm708_vm7, %v8459_v61, %v707_v36  ;;  %v716_v12 = vsel %vm708_vm7, %v707_v36, %v8222_v63 }
 0x19b   : > { %v901_v23 = vrot.slane %v709_v40, 2  ;;  %v902_v4 = vrot.slane %v716_v12, 2 }
 0x19c   : > { %v732_v20 = vpop.permute.xlu0 %731  ;;  %v979_v56 = vsel %vm971_vm12, %v970_v25, %v878_v26  ;;  %v978_v0 = vsel %vm971_vm12, %v969_v47, %v877_v9  ;;  %v757_v15 = vpop.permute.xlu1 %756 }
 0x19d   : > { %v734_v58 = vsel %vm733_vm8, %v8515_v50, %v732_v20  ;;  %v741_v5 = vsel %vm733_vm8, %v732_v20, %v8289_v16  ;;  %v759_v63 = vsel %vm758_vm9, %v755_v57, %v757_v15  ;;  %v766_v28 = vsel %vm758_vm9, %v757_v15, %v8409_v24 }
 0x19e   : > { %v925_v61 = vrot.slane %v734_v58, 1  ;;  %v926_v43 = vrot.slane %v741_v5, 1  ;;  %v988_v48 = vsel %vm980_vm13, %v979_v56, %v902_v4  ;;  %v987_v42 = vsel %vm980_vm13, %v978_v0, %v901_v23  ;;  %6994 = vmatprep.subr.msk.mxu1 %vm935_vm3, %v766_v28 }
 0x19f   : > { %6995 = vmatpush1.msk.msra.mxu1 %vm935_vm3, %v759_v63 }
 0x1a0   : > { %v997_v50 = vsel %vm989_vm14, %v988_v48, %v926_v43  ;;  %v996_v16 = vsel %vm989_vm14, %v987_v42, %v925_v61  ;;  %v8630_v46 = vpop.permute.xlu1 %2193 }
 0x1a1   : > { %1274 = vmatprep.subr.mxu1 %v997_v50 }
 0x1a2   : > { %1275 = vmatpush1.msra.mxu1 %v996_v16 }
 0x1a3   : > { %6996 = vmatmul.mubr.msk.f32.vlgmr.msra.gmra.mxu1 %vm11220_vm15, %v8437_v1  ;;  %vm11224_vm15 = vcmask 588800  }
 0x1a4   : > { %1673 = vmatprep.mubr.f32.mxu1 %v11259_v45  ;;  %v8641_v59 = vpop.permute.xlu1 %2217 }
 0x1a8   : > { %v8649_v44 = vpop.permute.xlu1 %2197 }
 0x1a9   : > { %v8621_v24 = vpop.permute.xlu0 %1000 }
 0x1aa   : > { %11263 = vst [vmem:[#allocation31_spill] sm:$0xff] %v8621_v24 }
 0x1ac   : > { %v8661_v38 = vpop.permute.xlu1 %2215 }
 0x1ad   : > { %v8626_v17 = vpop.permute.xlu0 %2195 }
 0x1b0   : > { %v8669_v6 = vpop.permute.xlu1 %2243 }
 0x1b1   : > { %v8632_v31 = vpop.permute.xlu0 %2191 }
 0x1b4   : > { %v8682_v53 = vpop.permute.xlu1 %2223 }
 0x1b5   : > { %v8643_v29 = vpop.permute.xlu0 %2219 }
 0x1b8   : > { %v8695_v27 = vpop.permute.xlu1 %2265 }
 0x1b9   : > { %v8651_v21 = vpop.permute.xlu0 %2199 }
 0x1bc   : > { %v8707_v60 = vpop.permute.xlu1 %2201 }
 0x1bd   : > { %v8663_v8 = vpop.permute.xlu0 %2241 }
 0x1c0   : > { %v8715_v39 = vpop.permute.xlu1 %2245 }
 0x1c1   : > { %v8671_v11 = vpop.permute.xlu0 %2221  ;;  %11265 = vst [vmem:[#allocation28_spill] sm:$0xff] %v8715_v39 }
 0x1c4   : > { %v8728_v19 = vpop.permute.xlu1 %2263 }
 0x1c5   : > { %v8684_v34 = vpop.permute.xlu0 %2239 }
 0x1c8   : > { %v8738_v26 = vpop.permute.xlu1 %2291 }
 0x1c9   : > { %v8697_v13 = vpop.permute.xlu0 %2267 }
 0x1cc   : > { %v8750_v47 = vpop.permute.xlu1 %2227 }
 0x1cd   : > { %v8709_v18 = vpop.permute.xlu0 %2203  ;;  %11268 = vst [vmem:[#allocation39_spill] sm:$0xff] %v8750_v47 }
 0x1ce   : > { %11264 = vst [vmem:[#allocation27_spill] sm:$0xff] %v8709_v18 }
 0x1d0   : > { %v8759_v23 = vpop.permute.xlu1 %2271 }
 0x1d1   : > { %v8717_v14 = vpop.permute.xlu0 %2247  ;;  %11270 = vst [vmem:[#allocation41_spill] sm:$0xff] %v8759_v23 }
 0x1d2   : > { %11266 = vst [vmem:[#allocation37_spill] sm:$0xff] %v8717_v14  ;;  %v11290_v14 = vld [vmem:[#allocation29_spill] sm:$0xff] }
 0x1d4   : > { %v8773_v56 = vpop.permute.xlu1 %2313 }
 0x1d5   : > { %v8730_v2 = vpop.permute.xlu0 %2289  ;;  %11272 = vst [vmem:[#allocation43_spill] sm:$0xff] %v8773_v56 }
 0x1d8   : > { %v8782_v61 = vpop.permute.xlu1 %2249 }
 0x1d9   : > { %v8740_v36 = vpop.permute.xlu0 %2225  ;;  %11274 = vst [vmem:[#allocation45_spill] sm:$0xff] %v8782_v61 }
 0x1da   : > { %11267 = vst [vmem:[#allocation38_spill] sm:$0xff] %v8740_v36 }
 0x1dc   : > { %v8797_v48 = vpop.permute.xlu1 %2293 }
 0x1dd   : > { %v8752_v25 = vpop.permute.xlu0 %2269  ;;  %11276 = vst [vmem:[#allocation47_spill] sm:$0xff] %v8797_v48 }
 0x1de   : > { %11269 = vst [vmem:[#allocation40_spill] sm:$0xff] %v8752_v25 }
 0x1e0   : > { %v8807_v16 = vpop.permute.xlu1 %2311 }
 0x1e1   : > { %v8761_v4 = vpop.permute.xlu0 %2287  ;;  %11278 = vst [vmem:[#allocation49_spill] sm:$0xff] %v8807_v16 }
 0x1e2   : > { %11271 = vst [vmem:[#allocation42_spill] sm:$0xff] %v8761_v4 }
 0x1e5   : > { %v8775_v0 = vpop.permute.xlu0 %2315 }
 0x1e6   : > { %11273 = vst [vmem:[#allocation44_spill] sm:$0xff] %v8775_v0 }
 0x1e9   : > { %v8784_v43 = vpop.permute.xlu0 %2251 }
 0x1ea   : > { %11275 = vst [vmem:[#allocation46_spill] sm:$0xff] %v8784_v43  ;;  %v11287_v43 = vld [vmem:[#allocation30_spill] sm:$0xff] }
 0x1ed   : > { %v8799_v42 = vpop.permute.xlu0 %2295 }
 0x1ee   : > { %11277 = vst [vmem:[#allocation48_spill] sm:$0xff] %v8799_v42 }
 0x241   : > { %v1097_v57 = vpop.f32.mrf.mxu0 }
 0x242   : > { %v1098_v22 = vadd.f32 %v1097_v57, %v8621_v24  ;;  %v8809_v57 = vpop.permute.xlu0 %2337 }
 0x243   : > { %v1099_v55 = vpop.f32.mrf.mxu0  ;;  %11279 = vst [vmem:[#allocation50_spill] sm:$0xff] %v8809_v57 }
 0x244   : > { %v8624_v54 = vmax.f32 %v1098_v22, 0.0  ;;  %v1100_v30 = vadd.f32 %v1099_v55, %v8621_v24  ;;  %v8819_v22 = vpop.permute.xlu1 %2339 }
 0x245   : > { %11280 = vst [vmem:[#allocation51_spill] sm:$0xff] %v8819_v22  ;;  %v11288_v22 = vld [vmem:[#allocation26_spill] sm:$0xff] }
 0x246   : > { %1491 = vrot.lane.b32.xlu0 %v8624_v54, %s7616_s1  ;;  %v8686_v62 = vmax.f32 %v1100_v30, 0.0  ;;  %v11289_v16 = vsub.s32 7, %v11288_v22 }
 0x248   : > { %v8924_v18 = vrot.slane %v11290_v14, %v11289_v16 }
 0x24a   : > { %v1168_v7 = vpop.f32.mrf.mxu1 }
 0x24b   : > { %v1169_v1 = vadd.f32 %v1168_v7, %v8621_v24  ;;  %v8821_v7 = vpop.permute.xlu0 %2273 }
 0x24c   : > { %v1170_v52 = vpop.f32.mrf.mxu1  ;;  %11281 = vst [vmem:[#allocation52_spill] sm:$0xff] %v8821_v7 }
 0x24d   : > { %v8635_v45 = vmax.f32 %v1169_v1, 0.0  ;;  %v1171_v33 = vadd.f32 %v1170_v52, %v8621_v24  ;;  %v8827_v1 = vpop.permute.xlu1 %2275 }
 0x24e   : > { %11282 = vst [vmem:[#allocation53_spill] sm:$0xff] %v8827_v1 }
 0x24f   : > { %1495 = vrot.lane.b32.xlu1 %v8635_v45, %s7616_s1  ;;  %1471 = vrot.lane.b32.xlu0 %v8635_v45, %s7615_s30  ;;  %v8693_v35 = vmax.f32 %v1171_v33, 0.0  ;;  %v8829_v55 = vpop.permute.xlu0 %2317 }
 0x250   : > { %11283 = vst [vmem:[#allocation54_spill] sm:$0xff] %v8829_v55 }
 0x251   : > { %v8841_v52 = vpop.permute.xlu1 %2319 }
 0x252   : > { %v1239_v51 = vpop.f32.mrf.mxu0  ;;  %11284 = vst [vmem:[#allocation55_spill] sm:$0xff] %v8841_v52 }
 0x253   : > { %1467 = vrot.lane.b32.xlu1 %v8624_v54, %s7615_s30  ;;  %1443 = vrot.lane.b32.xlu0 %v8624_v54, %s7614_s20  ;;  %v1240_v10 = vadd.f32 %v1239_v51, %v8621_v24 }
 0x254   : > { %v1241_v58 = vpop.f32.mrf.mxu0 }
 0x255   : > { %v8736_v9 = vmax.f32 %v1240_v10, 0.0  ;;  %v1242_v5 = vadd.f32 %v1241_v58, %v8621_v24 }
 0x257   : > { %1447 = vrot.lane.b32.xlu1 %v8635_v45, %s7614_s20  ;;  %1423 = vrot.lane.b32.xlu0 %v8635_v45, %s7613_s16  ;;  %v8790_v15 = vmax.f32 %v1242_v5, 0.0 }
 0x25b   : > { %1419 = vrot.lane.b32.xlu1 %v8624_v54, %s7613_s16  ;;  %1395 = vrot.lane.b32.xlu0 %v8624_v54, %s7612_s21 }
 0x25f   : > { %1399 = vrot.lane.b32.xlu1 %v8635_v45, %s7612_s21  ;;  %1375 = vrot.lane.b32.xlu0 %v8635_v45, %s7611_s19 }
 0x263   : > { %1371 = vrot.lane.b32.xlu1 %v8624_v54, %s7611_s19  ;;  %1347 = vrot.lane.b32.xlu0 %v8624_v54, %s7610_s26  ;;  %v1310_v40 = vpop.f32.mrf.mxu1 }
 0x264   : > { %v1311_v12 = vadd.f32 %v1310_v40, %v8621_v24 }
 0x265   : > { %v1312_v63 = vpop.f32.mrf.mxu1 }
 0x266   : > { %v8767_v20 = vmax.f32 %v1311_v12, 0.0  ;;  %v1313_v28 = vadd.f32 %v1312_v63, %v8621_v24  ;;  %v11285_v12 = vld [vmem:[#allocation32_spill] sm:$0xff] }
 0x267   : > { %1351 = vrot.lane.b32.xlu1 %v8635_v45, %s7610_s26  ;;  %1327 = vrot.lane.b32.xlu0 %v8635_v45, %s7609_s13  ;;  %v11286_v24 = vld [vmem:[#allocation36_spill] sm:$0xff]  ;;  %11291 = vst [vmem:[#allocation32_spill] sm:$0xff] %v8924_v18 }
 0x268   : > { %v8805_v50 = vmax.f32 %v1313_v28, 0.0 }
 0x26b   : > { %1323 = vrot.lane.b32.xlu1 %v8624_v54, %s7609_s13  ;;  %1445 = vrot.lane.b32.xlu0 %v8686_v62, %s7614_s20 }
 0x26f   : > { %1493 = vrot.lane.b32.xlu1 %v8686_v62, %s7616_s1  ;;  %1473 = vrot.lane.b32.xlu0 %v8693_v35, %s7615_s30 }
 0x273   : > { %1469 = vrot.lane.b32.xlu1 %v8686_v62, %s7615_s30  ;;  %1397 = vrot.lane.b32.xlu0 %v8686_v62, %s7612_s21 }
 0x277   : > { %1497 = vrot.lane.b32.xlu1 %v8693_v35, %s7616_s1  ;;  %1425 = vrot.lane.b32.xlu0 %v8693_v35, %s7613_s16 }
 0x27b   : > { %1421 = vrot.lane.b32.xlu1 %v8686_v62, %s7613_s16  ;;  %1349 = vrot.lane.b32.xlu0 %v8686_v62, %s7610_s26 }
 0x27f   : > { %1449 = vrot.lane.b32.xlu1 %v8693_v35, %s7614_s20  ;;  %1377 = vrot.lane.b32.xlu0 %v8693_v35, %s7611_s19 }
 0x283   : > { %1373 = vrot.lane.b32.xlu1 %v8686_v62, %s7611_s19  ;;  %1329 = vrot.lane.b32.xlu0 %v8693_v35, %s7609_s13 }
 0x287   : > { %1401 = vrot.lane.b32.xlu1 %v8693_v35, %s7612_s21  ;;  %1499 = vrot.lane.b32.xlu0 %v8736_v9, %s7616_s1 }
 0x28b   : > { %1325 = vrot.lane.b32.xlu1 %v8686_v62, %s7609_s13  ;;  %1451 = vrot.lane.b32.xlu0 %v8736_v9, %s7614_s20 }
 0x28f   : > { %1353 = vrot.lane.b32.xlu1 %v8693_v35, %s7610_s26  ;;  %1403 = vrot.lane.b32.xlu0 %v8736_v9, %s7612_s21 }
 0x293   : > { %1475 = vrot.lane.b32.xlu1 %v8736_v9, %s7615_s30  ;;  %1355 = vrot.lane.b32.xlu0 %v8736_v9, %s7610_s26 }
 0x297   : > { %1427 = vrot.lane.b32.xlu1 %v8736_v9, %s7613_s16  ;;  %1455 = vrot.lane.b32.xlu0 %v8767_v20, %s7614_s20 }
 0x29b   : > { %1379 = vrot.lane.b32.xlu1 %v8736_v9, %s7611_s19  ;;  %1407 = vrot.lane.b32.xlu0 %v8767_v20, %s7612_s21 }
 0x29f   : > { %1331 = vrot.lane.b32.xlu1 %v8736_v9, %s7609_s13  ;;  %1359 = vrot.lane.b32.xlu0 %v8767_v20, %s7610_s26 }
 0x2a3   : > { %1503 = vrot.lane.b32.xlu1 %v8767_v20, %s7616_s1  ;;  %1501 = vrot.lane.b32.xlu0 %v8790_v15, %s7616_s1 }
 0x2a7   : > { %1479 = vrot.lane.b32.xlu1 %v8767_v20, %s7615_s30  ;;  %1477 = vrot.lane.b32.xlu0 %v8790_v15, %s7615_s30 }
 0x2ab   : > { %1431 = vrot.lane.b32.xlu1 %v8767_v20, %s7613_s16  ;;  %1505 = vrot.lane.b32.xlu0 %v8805_v50, %s7616_s1 }
 0x2af   : > { %1383 = vrot.lane.b32.xlu1 %v8767_v20, %s7611_s19  ;;  %1429 = vrot.lane.b32.xlu0 %v8790_v15, %s7613_s16 }
 0x2b3   : > { %1335 = vrot.lane.b32.xlu1 %v8767_v20, %s7609_s13  ;;  %1457 = vrot.lane.b32.xlu0 %v8805_v50, %s7614_s20 }
 0x2b7   : > { %1453 = vrot.lane.b32.xlu1 %v8790_v15, %s7614_s20  ;;  %1381 = vrot.lane.b32.xlu0 %v8790_v15, %s7611_s19 }
 0x2b8   : > { %v8839_v30 = vpop.permute.xlu0 %1491 }
 0x2bb   : > { %1481 = vrot.lane.b32.xlu1 %v8805_v50, %s7615_s30  ;;  %1409 = vrot.lane.b32.xlu0 %v8805_v50, %s7612_s21 }
 0x2bf   : > { %1405 = vrot.lane.b32.xlu1 %v8790_v15, %s7612_s21  ;;  %1333 = vrot.lane.b32.xlu0 %v8790_v15, %s7609_s13 }
 0x2c1   : > { %v8847_v33 = vpop.permute.xlu1 %1495  ;;  %v8849_v51 = vpop.permute.xlu0 %1471 }
 0x2c3   : > { %1433 = vrot.lane.b32.xlu1 %v8805_v50, %s7613_s16  ;;  %1361 = vrot.lane.b32.xlu0 %v8805_v50, %s7610_s26 }
 0x2c5   : > { %v8855_v10 = vpop.permute.xlu1 %1467  ;;  %v8857_v40 = vpop.permute.xlu0 %1443 }
 0x2c7   : > { %1357 = vrot.lane.b32.xlu1 %v8790_v15, %s7610_s26  ;;  %2335 = vrot.lane.b32.xlu0 %v11285_v12, %s7615_s30 }
 0x2c9   : > { %v8863_v58 = vpop.permute.xlu1 %1447  ;;  %v8865_v5 = vpop.permute.xlu0 %1423 }
 0x2cb   : > { %1385 = vrot.lane.b32.xlu1 %v8805_v50, %s7611_s19  ;;  %2363 = vrot.lane.b32.xlu0 %v8095_v32, %s7616_s1 }
 0x2cd   : > { %v8871_v63 = vpop.permute.xlu1 %1419  ;;  %v8873_v28 = vpop.permute.xlu0 %1395 }
 0x2cf   : > { %1337 = vrot.lane.b32.xlu1 %v8805_v50, %s7609_s13  ;;  %2299 = vrot.lane.b32.xlu0 %v11286_v24, %s7613_s16 }
 0x2d1   : > { %v8879_v1 = vpop.permute.xlu1 %1399  ;;  %v8881_v7 = vpop.permute.xlu0 %1375 }
 0x2d3   : > { %2361 = vrot.lane.b32.xlu1 %v11287_v43, %s7616_s1  ;;  %2343 = vrot.lane.b32.xlu0 %v8134_v41, %s7615_s30 }
 0x2d5   : > { %v8887_v55 = vpop.permute.xlu1 %1371  ;;  %v8889_v52 = vpop.permute.xlu0 %1347 }
 0x2d7   : > { %2297 = vrot.lane.b32.xlu1 %v8167_v49, %s7613_s16  ;;  %2321 = vrot.lane.b32.xlu0 %v8167_v49, %s7614_s20 }
 0x2d9   : > { %v8895_v61 = vpop.permute.xlu1 %1351  ;;  %v8897_v48 = vpop.permute.xlu0 %1327 }
 0x2db   : > { %2341 = vrot.lane.b32.xlu1 %v8117_v37, %s7615_s30  ;;  %2365 = vrot.lane.b32.xlu0 %v8117_v37, %s7616_s1 }
 0x2dd   : > { %v8903_v42 = vpop.permute.xlu1 %1323  ;;  %v1446_v47 = vpop.permute.xlu0 %1445 }
 0x2de   : > { %v1464_v14 = vsel %vm708_vm7, %v1446_v47, %v8863_v58 }
 0x2df   : > { %2359 = vrot.lane.b32.xlu1 %v11285_v12, %s7616_s1  ;;  %2345 = vrot.lane.b32.xlu0 %v8167_v49, %s7615_s30 }
 0x2e1   : > { %v1494_v36 = vpop.permute.xlu1 %1493  ;;  %v8909_v25 = vpop.permute.xlu0 %1473 }
 0x2e2   : > { %v1512_v23 = vsel %vm758_vm9, %v1494_v36, %v8847_v33  ;;  %v1513_v57 = vsel %vm758_vm9, %v8839_v30, %v1494_v36 }
 0x2e3   : > { %2323 = vrot.lane.b32.xlu1 %v11286_v24, %s7614_s20  ;;  %1546 = vmatprep.subr.mxu0 %v1512_v23 }
 0x2e4   : > { %2369 = vrot.lane.b32.xlu0 %v8167_v49, %s7616_s1  ;;  %1547 = vmatpush1.msra.mxu0 %v1513_v57 }
 0x2e5   : > { %v1470_v37 = vpop.permute.xlu1 %1469  ;;  %v1398_v39 = vpop.permute.xlu0 %1397 }
 0x2e6   : > { %v1488_v56 = vsel %vm733_vm8, %v1470_v37, %v8849_v51  ;;  %v1489_v36 = vsel %vm733_vm8, %v8855_v10, %v1470_v37  ;;  %v1465_v37 = vsel %vm708_vm7, %v8857_v40, %v1446_v47  ;;  %v1416_v47 = vsel %vm658_vm5, %v1398_v39, %v8879_v1 }
 0x2e7   : > { %2367 = vrot.lane.b32.xlu1 %v8134_v41, %s7616_s1  ;;  %1548 = vmatprep.subr.mxu0 %v1488_v56 }
 0x2e8   : > { %2205 = vrot.lane.b32.xlu0 %v8924_v18, %s7609_s13  ;;  %1549 = vmatpush1.msra.mxu0 %v1489_v36 }
 0x2e9   : > { %v1498_v23 = vpop.permute.xlu1 %1497  ;;  %1550 = vmatprep.subr.mxu0 %v1464_v14  ;;  %v8939_v16 = vpop.permute.xlu0 %1425 }
 0x2ea   : > { %1551 = vmatpush1.msra.mxu0 %v1465_v37 }
 0x2eb   : > { %2347 = vrot.lane.b32.xlu1 %v11286_v24, %s7615_s30 }
 0x2ec   : > { %2253 = vrot.lane.b32.xlu0 %v8924_v18, %s7611_s19 }
 0x2ed   : > { %v1422_v56 = vpop.permute.xlu1 %1421  ;;  %v1350_v57 = vpop.permute.xlu0 %1349 }
 0x2ee   : > { %v1440_v36 = vsel %vm683_vm6, %v1422_v56, %v8865_v5  ;;  %v1441_v14 = vsel %vm683_vm6, %v8871_v63, %v1422_v56  ;;  %v1417_v56 = vsel %vm658_vm5, %v8873_v28, %v1398_v39  ;;  %v1368_v39 = vsel %vm608_vm1, %v1350_v57, %v8895_v61 }
 0x2ef   : > { %2371 = vrot.lane.b32.xlu1 %v11286_v24, %s7616_s1  ;;  %1552 = vmatprep.subr.mxu0 %v1440_v36  ;;  %v1369_v41 = vsel %vm608_vm1, %v8889_v52, %v1350_v57 }
 0x2f0   : > { %2301 = vrot.lane.b32.xlu0 %v8924_v18, %s7613_s16  ;;  %1553 = vmatpush1.msra.mxu0 %v1441_v14 }
 0x2f1   : > { %v1450_v37 = vpop.permute.xlu1 %1449  ;;  %1554 = vmatprep.subr.mxu0 %v1416_v47  ;;  %v8961_v22 = vpop.permute.xlu0 %1377 }
 0x2f2   : > { %1555 = vmatpush1.msra.mxu0 %v1417_v56 }
 0x2f3   : > { %2229 = vrot.lane.b32.xlu1 %v8924_v18, %s7610_s26 }
 0x2f4   : > { %2349 = vrot.lane.b32.xlu0 %v8924_v18, %s7615_s30 }
 0x2f5   : > { %v1374_v36 = vpop.permute.xlu1 %1373  ;;  %v8970_v14 = vpop.permute.xlu0 %1329 }
 0x2f6   : > { %v1392_v47 = vsel %vm633_vm2, %v1374_v36, %v8881_v7  ;;  %v1393_v24 = vsel %vm633_vm2, %v8887_v55, %v1374_v36 }
 0x2f7   : > { %2277 = vrot.lane.b32.xlu1 %v8924_v18, %s7612_s21  ;;  %1556 = vmatprep.subr.mxu0 %v1392_v47 }
 0x2f8   : > { %1557 = vmatpush1.msra.mxu0 %v1393_v24  ;;  %v1511_v24 = vsel %vm758_vm9, %v8847_v33, %v1498_v23 }
 0x2f9   : > { %v1402_v56 = vpop.permute.xlu1 %1401  ;;  %1558 = vmatprep.subr.mxu0 %v1368_v39  ;;  %v8983_v49 = vpop.permute.xlu0 %1499 }
 0x2fa   : > { %1559 = vmatpush1.msra.mxu0 %v1369_v41  ;;  %v1510_v36 = vsel %vm758_vm9, %v1498_v23, %v8983_v49 }
 0x2fb   : > { %2325 = vrot.lane.b32.xlu1 %v8924_v18, %s7614_s20  ;;  %1623 = vmatprep.subr.mxu1 %v1510_v36  ;;  %v9006_v36 = vld [vmem:[#allocation9] sm:$0xff] }
 0x2fc   : > { %1624 = vmatpush1.msra.mxu1 %v1511_v24  ;;  %v9014_v24 = vld [vmem:[#allocation3] sm:$0xff] }
 0x2fd   : > { %v1326_v47 = vpop.permute.xlu1 %1325  ;;  %v8996_v39 = vpop.permute.xlu0 %1451 }
 0x2fe   : > { %v1344_v41 = vsel %vm583_vm0, %v1326_v47, %v8897_v48  ;;  %v1345_v57 = vsel %vm583_vm0, %v8903_v42, %v1326_v47  ;;  %v9017_v47 = vld [vmem:[#allocation9 + $0x8] sm:$0xff] }
 0x2ff   : > { %2373 = vrot.lane.b32.xlu1 %v8924_v18, %s7616_s1  ;;  %1560 = vmatprep.subr.mxu0 %v1344_v41  ;;  %v1462_v18 = vsel %vm708_vm7, %v1450_v37, %v8996_v39 }
 0x300   : > { %1561 = vmatpush1.msra.mxu0 %v1345_v57 }
 0x301   : > { %v1354_v33 = vpop.permute.xlu1 %1353  ;;  %1562 = vmatprep.subr.mxu0 %v8686_v62  ;;  %v9009_v23 = vpop.permute.xlu0 %1403 }
 0x302   : > { %1563 = vmatpush1.msra.mxu0 %v8624_v54  ;;  %v1487_v54 = vsel %vm733_vm8, %v8849_v51, %v8909_v25  ;;  %v1439_v51 = vsel %vm683_vm6, %v8865_v5, %v8939_v16 }
 0x303   : > { %6997 = vmatmul.mubr.msk.f32.vlgmr.msra.gmra.mxu0 %vm11224_vm15, %v9006_v36 }
 0x304   : > { %1602 = vmatprep.mubr.f32.mxu0 %v9014_v24 }
 0x305   : > { %v1476_v41 = vpop.permute.xlu1 %1475  ;;  %v9019_v57 = vpop.permute.xlu0 %1355 }
 0x306   : > { %v1486_v62 = vsel %vm733_vm8, %v8909_v25, %v1476_v41 }
 0x307   : > { %1625 = vmatprep.subr.mxu1 %v1486_v62  ;;  %6998 = vmatmul.mubr.msk.f32.gmra.mxu0 %vm11224_vm15, %v9017_v47  ;;  %v1463_v62 = vsel %vm708_vm7, %v8863_v58, %v1450_v37  ;;  %v1415_v37 = vsel %vm658_vm5, %v8879_v1, %v1402_v56 }
 0x308   : > { %1626 = vmatpush1.msra.mxu1 %v1487_v54  ;;  %1750 = vmatprep.mubr.f32.mxu0 %v9014_v24 }
 0x309   : > { %v9034_v0 = vpop.permute.xlu1 %1427  ;;  %1627 = vmatprep.subr.mxu1 %v1462_v18  ;;  %v9036_v4 = vpop.permute.xlu0 %1455  ;;  %v1414_v18 = vsel %vm658_vm5, %v1402_v56, %v9009_v23  ;;  %v1367_v56 = vsel %vm608_vm1, %v8895_v61, %v1354_v33 }
 0x30a   : > { %1628 = vmatpush1.msra.mxu1 %v1463_v62  ;;  %v1438_v25 = vsel %vm683_vm6, %v8939_v16, %v9034_v0  ;;  %v1391_v16 = vsel %vm633_vm2, %v8881_v7, %v8961_v22  ;;  %v1366_v62 = vsel %vm608_vm1, %v1354_v33, %v9019_v57  ;;  %v1343_v7 = vsel %vm583_vm0, %v8897_v48, %v8970_v14 }
 0x30b   : > { %1629 = vmatprep.subr.mxu1 %v1438_v25 }
 0x30c   : > { %1630 = vmatpush1.msra.mxu1 %v1439_v51 }
 0x30d   : > { %v9052_v54 = vpop.permute.xlu1 %1379  ;;  %1631 = vmatprep.subr.mxu1 %v1414_v18  ;;  %v9054_v58 = vpop.permute.xlu0 %1407 }
 0x30e   : > { %1632 = vmatpush1.msra.mxu1 %v1415_v37  ;;  %v1390_v5 = vsel %vm633_vm2, %v8961_v22, %v9052_v54 }
 0x30f   : > { %1633 = vmatprep.subr.mxu1 %v1390_v5 }
 0x310   : > { %1634 = vmatpush1.msra.mxu1 %v1391_v16 }
 0x311   : > { %v9070_v25 = vpop.permute.xlu1 %1331  ;;  %1635 = vmatprep.subr.mxu1 %v1366_v62  ;;  %v9072_v1 = vpop.permute.xlu0 %1359 }
 0x312   : > { %1636 = vmatpush1.msra.mxu1 %v1367_v56  ;;  %v1342_v22 = vsel %vm583_vm0, %v8970_v14, %v9070_v25 }
 0x313   : > { %1637 = vmatprep.subr.mxu1 %v1342_v22 }
 0x314   : > { %1638 = vmatpush1.msra.mxu1 %v1343_v7 }
 0x315   : > { %v1504_v51 = vpop.permute.xlu1 %1503  ;;  %1639 = vmatprep.subr.mxu1 %v8693_v35  ;;  %v1502_v18 = vpop.permute.xlu0 %1501 }
 0x316   : > { %1640 = vmatpush1.msra.mxu1 %v8635_v45  ;;  %v1508_v61 = vsel %vm758_vm9, %v1502_v18, %v1504_v51  ;;  %v1509_v33 = vsel %vm758_vm9, %v8983_v49, %v1502_v18 }
 0x317   : > { %1700 = vmatprep.subr.mxu0 %v1508_v61  ;;  %6999 = vmatmul.mubr.msk.f32.vlgmr.msra.gmra.mxu1 %vm11224_vm15, %v9006_v36 }
 0x318   : > { %1701 = vmatpush1.msra.mxu0 %v1509_v33  ;;  %1679 = vmatprep.mubr.f32.mxu1 %v9014_v24 }
 0x319   : > { %v1480_v48 = vpop.permute.xlu1 %1479  ;;  %v1478_v14 = vpop.permute.xlu0 %1477 }
 0x31a   : > { %v1484_v35 = vsel %vm733_vm8, %v1478_v14, %v1480_v48  ;;  %v1485_v45 = vsel %vm733_vm8, %v1476_v41, %v1478_v14 }
 0x31b   : > { %1702 = vmatprep.subr.mxu0 %v1484_v35  ;;  %7000 = vmatmul.mubr.msk.f32.gmra.mxu1 %vm11224_vm15, %v9017_v47 }
 0x31c   : > { %1703 = vmatpush1.msra.mxu0 %v1485_v45  ;;  %1827 = vmatprep.mubr.f32.mxu1 %v9014_v24 }
 0x31d   : > { %v1432_v49 = vpop.permute.xlu1 %1431  ;;  %v1506_v37 = vpop.permute.xlu0 %1505 }
 0x31e   : > { %v1514_v5 = vsel %vm758_vm9, %v1506_v37, %v8839_v30  ;;  %v1507_v16 = vsel %vm758_vm9, %v1504_v51, %v1506_v37 }
 0x31f   : > { %1777 = vmatprep.subr.mxu1 %v1514_v5 }
 0x320   : > { %1778 = vmatpush1.msra.mxu1 %v1507_v16 }
 0x321   : > { %v1384_v62 = vpop.permute.xlu1 %1383  ;;  %v1430_v41 = vpop.permute.xlu0 %1429 }
 0x322   : > { %v1436_v51 = vsel %vm683_vm6, %v1430_v41, %v1432_v49  ;;  %v1437_v35 = vsel %vm683_vm6, %v9034_v0, %v1430_v41 }
 0x325   : > { %v9107_v56 = vpop.permute.xlu1 %1335  ;;  %v1458_v22 = vpop.permute.xlu0 %1457 }
 0x326   : > { %v1466_v37 = vsel %vm708_vm7, %v1458_v22, %v8857_v40  ;;  %v1459_v0 = vsel %vm708_vm7, %v9036_v4, %v1458_v22 }
 0x329   : > { %v1454_v7 = vpop.permute.xlu1 %1453  ;;  %v1382_v18 = vpop.permute.xlu0 %1381 }
 0x32a   : > { %v1460_v61 = vsel %vm708_vm7, %v1454_v7, %v9036_v4  ;;  %v1461_v30 = vsel %vm708_vm7, %v8996_v39, %v1454_v7  ;;  %v1388_v40 = vsel %vm633_vm2, %v1382_v18, %v1384_v62  ;;  %v1389_v41 = vsel %vm633_vm2, %v9052_v54, %v1382_v18 }
 0x32b   : > { %1704 = vmatprep.subr.mxu0 %v1460_v61 }
 0x32c   : > { %1705 = vmatpush1.msra.mxu0 %v1461_v30 }
 0x32d   : > { %v1482_v33 = vpop.permute.xlu1 %1481  ;;  %1706 = vmatprep.subr.mxu0 %v1436_v51  ;;  %v1410_v14 = vpop.permute.xlu0 %1409 }
 0x32e   : > { %1707 = vmatpush1.msra.mxu0 %v1437_v35  ;;  %v1490_v45 = vsel %vm733_vm8, %v1482_v33, %v8855_v10  ;;  %v1483_v39 = vsel %vm733_vm8, %v1480_v48, %v1482_v33  ;;  %v1418_v61 = vsel %vm658_vm5, %v1410_v14, %v8873_v28  ;;  %v1411_v54 = vsel %vm658_vm5, %v9054_v58, %v1410_v14 }
 0x32f   : > { %1779 = vmatprep.subr.mxu1 %v1490_v45 }
 0x330   : > { %1780 = vmatpush1.msra.mxu1 %v1483_v39  ;;  %v2237_v39 = vsel %vm608_vm1, %v8661_v38, %v8641_v59 }
 0x331   : > { %v1406_v5 = vpop.permute.xlu1 %1405  ;;  %1781 = vmatprep.subr.mxu1 %v1466_v37  ;;  %v1334_v16 = vpop.permute.xlu0 %1333 }
 0x332   : > { %1782 = vmatpush1.msra.mxu1 %v1459_v0  ;;  %v1412_v10 = vsel %vm658_vm5, %v1406_v5, %v9054_v58  ;;  %v1413_v48 = vsel %vm658_vm5, %v9009_v23, %v1406_v5  ;;  %v1340_v51 = vsel %vm583_vm0, %v1334_v16, %v9107_v56 }
 0x333   : > { %1708 = vmatprep.subr.mxu0 %v1412_v10 }
 0x334   : > { %1709 = vmatpush1.msra.mxu0 %v1413_v48 }
 0x335   : > { %v1434_v7 = vpop.permute.xlu1 %1433  ;;  %1710 = vmatprep.subr.mxu0 %v1388_v40  ;;  %v1362_v4 = vpop.permute.xlu0 %1361 }
 0x336   : > { %v1435_v22 = vsel %vm683_vm6, %v1432_v49, %v1434_v7  ;;  %1711 = vmatpush1.msra.mxu0 %v1389_v41  ;;  %v1442_v23 = vsel %vm683_vm6, %v1434_v7, %v8871_v63  ;;  %v2212_v49 = vsel %vm583_vm0, %v8630_v46, %v8626_v17  ;;  %v2213_v63 = vsel %vm583_vm0, %v8632_v31, %v8630_v46 }
 0x337   : > { %1783 = vmatprep.subr.mxu1 %v1442_v23  ;;  %v2392_v33 = vrot.slane %v2212_v49, 7  ;;  %v2391_v14 = vrot.slane %v2213_v63, 7  ;;  %v2236_v46 = vsel %vm608_vm1, %v8641_v59, %v8643_v29  ;;  %v2260_v59 = vsel %vm633_vm2, %v8663_v8, %v8669_v6 }
 0x338   : > { %1784 = vmatpush1.msra.mxu1 %v1435_v22  ;;  %v1363_v0 = vsel %vm608_vm1, %v9072_v1, %v1362_v4  ;;  %v2234_v7 = vsel %vm608_vm1, %v8671_v11, %v8682_v53 }
 0x339   : > { %v1358_v18 = vpop.permute.xlu1 %1357  ;;  %1785 = vmatprep.subr.mxu1 %v1418_v61  ;;  %v9153_v30 = vpop.permute.xlu0 %2335 }
 0x33a   : > { %v1365_v28 = vsel %vm608_vm1, %v9019_v57, %v1358_v18  ;;  %1786 = vmatpush1.msra.mxu1 %v1411_v54  ;;  %v1364_v58 = vsel %vm608_vm1, %v1358_v18, %v9072_v1  ;;  %v1341_v57 = vsel %vm583_vm0, %v9070_v25, %v1334_v16  ;;  %v2211_v25 = vsel %vm583_vm0, %v8626_v17, %v8649_v44 }
 0x33b   : > { %1712 = vmatprep.subr.mxu0 %v1364_v58  ;;  %v2416_v16 = vrot.slane %v2236_v46, 6  ;;  %v2415_v17 = vrot.slane %v2237_v39, 6  ;;  %v2284_v1 = vsel %vm658_vm5, %v8695_v27, %v8697_v13  ;;  %v2393_v40 = vrot.slane %v2211_v25, 7  ;;  %v11292_v58 = vld [vmem:[#allocation42_spill] sm:$0xff]  ;;  %v11295_v39 = vld [vmem:[#allocation28_spill] sm:$0xff] }
 0x33c   : > { %1713 = vmatpush1.msra.mxu0 %v1365_v28 }
 0x33d   : > { %v1386_v35 = vpop.permute.xlu1 %1385  ;;  %1714 = vmatprep.subr.mxu0 %v1340_v51  ;;  %v9179_v45 = vpop.permute.xlu0 %2363  ;;  %v2553_v49 = vsel %vm935_vm3, %v8095_v32, %v2393_v40  ;;  %v2309_v51 = vsel %vm683_vm6, %v11292_v58, %v8730_v2 }
 0x33e   : > { %v1387_v37 = vsel %vm633_vm2, %v1384_v62, %v1386_v35  ;;  %1715 = vmatpush1.msra.mxu0 %v1341_v57  ;;  %v1394_v5 = vsel %vm633_vm2, %v1386_v35, %v8887_v55  ;;  %v1370_v55 = vsel %vm608_vm1, %v1362_v4, %v8889_v52  ;;  %v2551_v62 = vsel %vm935_vm3, %v11285_v12, %v2391_v14 }
 0x33f   : > { %1716 = vmatprep.subr.mxu0 %v8790_v15  ;;  %1787 = vmatprep.subr.mxu1 %v1394_v5  ;;  %v2552_v15 = vsel %vm935_vm3, %v11287_v43, %v2392_v33  ;;  %v2440_v12 = vrot.slane %v2260_v59, 5  ;;  %v2559_v41 = vsel %vm944_vm4, %v2551_v62, %v2415_v17  ;;  %v11293_v33 = vld [vmem:[#allocation44_spill] sm:$0xff]  ;;  %v2487_v62 = vrot.slane %v2309_v51, 3  ;;  %v11299_v17 = vld [vmem:[#allocation49_spill] sm:$0xff] }
 0x340   : > { %1717 = vmatpush1.msra.mxu0 %v8736_v9  ;;  %1788 = vmatpush1.msra.mxu1 %v1387_v37  ;;  %v2261_v9 = vsel %vm633_vm2, %v8684_v34, %v8663_v8  ;;  %v2560_v8 = vsel %vm944_vm4, %v2552_v15, %v2416_v16  ;;  %v2259_v37 = vsel %vm633_vm2, %v8669_v6, %v11295_v39  ;;  %v11297_v16 = vld [vmem:[#allocation27_spill] sm:$0xff] }
 0x341   : > { %v1338_v10 = vpop.permute.xlu1 %1337  ;;  %1789 = vmatprep.subr.mxu1 %v1370_v55  ;;  %v9210_v48 = vpop.permute.xlu0 %2299  ;;  %7001 = vmatmul.mubr.msk.f32.vlgmr.msra.gmra.mxu0 %vm11224_vm15, %v9006_v36  ;;  %v2439_v4 = vrot.slane %v2261_v9, 5  ;;  %v2568_v54 = vsel %vm953_vm10, %v2560_v8, %v2440_v12  ;;  %v2208_v59 = vsel %vm583_vm0, %v8707_v60, %v11297_v16  ;;  %v11298_v55 = vld [vmem:[#allocation37_spill] sm:$0xff]  ;;  %v11301_v9 = vld [vmem:[#allocation50_spill] sm:$0xff] }
 0x342   : > { %v1339_v43 = vsel %vm583_vm0, %v9107_v56, %v1338_v10  ;;  %1790 = vmatpush1.msra.mxu1 %v1363_v0  ;;  %v1346_v52 = vsel %vm583_vm0, %v1338_v10, %v8903_v42  ;;  %1756 = vmatprep.mubr.f32.mxu0 %v9014_v24  ;;  %v2210_v56 = vsel %vm583_vm0, %v8649_v44, %v8651_v21  ;;  %v2464_v44 = vrot.slane %v2284_v1, 4  ;;  %v11300_v10 = vld [vmem:[#allocation51_spill] sm:$0xff] }
 0x343   : > { %1791 = vmatprep.subr.mxu1 %v1346_v52  ;;  %v2235_v42 = vsel %vm608_vm1, %v8643_v29, %v8671_v11  ;;  %v2285_v29 = vsel %vm658_vm5, %v8728_v19, %v8695_v27  ;;  %v2308_v11 = vsel %vm683_vm6, %v8730_v2, %v8738_v26  ;;  %v2394_v61 = vrot.slane %v2210_v56, 7  ;;  %v11296_v2 = vld [vmem:[#allocation33_spill] sm:$0xff]  ;;  %v11302_v56 = vld [vmem:[#allocation34_spill] sm:$0xff] }
 0x344   : > { %1792 = vmatpush1.msra.mxu1 %v1339_v43  ;;  %v2417_v18 = vrot.slane %v2235_v42, 6  ;;  %v2209_v27 = vsel %vm583_vm0, %v8651_v21, %v8707_v60  ;;  %v2463_v63 = vrot.slane %v2285_v29, 4  ;;  %v2488_v28 = vrot.slane %v2308_v11, 3  ;;  %v11294_v21 = vld [vmem:[#allocation43_spill] sm:$0xff] }
 0x345   : > { %v9243_v22 = vpop.permute.xlu1 %2361  ;;  %1793 = vmatprep.subr.mxu1 %v8805_v50  ;;  %v9246_v23 = vpop.permute.xlu0 %2343  ;;  %7002 = vmatmul.mubr.msk.f32.gmra.mxu0 %vm11224_vm15, %v9017_v47  ;;  %v2332_v14 = vsel %vm708_vm7, %v11294_v21, %v11293_v33  ;;  %v2567_v32 = vsel %vm953_vm10, %v2559_v41, %v2439_v4  ;;  %v2395_v57 = vrot.slane %v2209_v27, 7  ;;  %v2576_v35 = vsel %vm962_vm11, %v2568_v54, %v2464_v44  ;;  %v11304_v4 = vld [vmem:[#allocation40_spill] sm:$0xff]  ;;  %v11305_v54 = vld [vmem:[#allocation38_spill] sm:$0xff] }
 0x346   : > { %v2380_v50 = vsel %vm758_vm9, %v9243_v22, %v9179_v45  ;;  %1794 = vmatpush1.msra.mxu1 %v8767_v20  ;;  %2695 = vmatprep.mubr.f32.mxu0 %v9014_v24  ;;  %v2418_v20 = vrot.slane %v2234_v7, 6  ;;  %v2554_v5 = vsel %vm935_vm3, %v11296_v2, %v2394_v61  ;;  %v2561_v25 = vsel %vm944_vm4, %v2553_v49, %v2417_v18  ;;  %v11303_v7 = vld [vmem:[#allocation41_spill] sm:$0xff] }
 0x347   : > { %7019 = vmatprep.subr.msk.mxu0 %vm935_vm3, %v2380_v50  ;;  %7003 = vmatmul.mubr.msk.f32.vlgmr.msra.gmra.mxu1 %vm11224_vm15, %v9006_v36  ;;  %v2258_v15 = vsel %vm633_vm2, %v11295_v39, %v11298_v55  ;;  %v2512_v6 = vrot.slane %v2332_v14, 2  ;;  %v2333_v0 = vsel %vm708_vm7, %v11299_v17, %v11294_v21  ;;  %v2356_v60 = vsel %vm733_vm8, %v11301_v9, %v11300_v10  ;;  %v11307_v21 = vld [vmem:[#allocation48_spill] sm:$0xff]  ;;  %v11308_v14 = vld [vmem:[#allocation47_spill] sm:$0xff] }
 0x348   : > { %1832 = vmatprep.mubr.f32.mxu1 %v9014_v24  ;;  %v2441_v43 = vrot.slane %v2259_v37, 5  ;;  %v2575_v52 = vsel %vm962_vm11, %v2567_v32, %v2463_v63  ;;  %v2584_v40 = vsel %vm971_vm12, %v2576_v35, %v2488_v28  ;;  %v2562_v8 = vsel %vm944_vm4, %v2554_v5, %v2418_v20  ;;  %v11306_v28 = vld [vmem:[#allocation39_spill] sm:$0xff] }
 0x349   : > { %v9283_v46 = vpop.permute.xlu1 %2297  ;;  %v9285_v36 = vpop.permute.xlu0 %2321  ;;  %v2555_v42 = vsel %vm935_vm3, %v11302_v56, %v2395_v57  ;;  %v2442_v41 = vrot.slane %v2258_v15, 5  ;;  %v2282_v44 = vsel %vm658_vm5, %v11304_v4, %v11303_v7  ;;  %v2396_v29 = vrot.slane %v2208_v59, 7 }
 0x34a   : > { %v2283_v11 = vsel %vm658_vm5, %v8697_v13, %v11304_v4  ;;  %v2511_v50 = vrot.slane %v2333_v0, 2  ;;  %v2536_v61 = vrot.slane %v2356_v60, 1  ;;  %v2233_v18 = vsel %vm608_vm1, %v8682_v53, %v11305_v54 }
 0x34b   : > { %7004 = vmatmul.mubr.msk.f32.gmra.mxu1 %vm11224_vm15, %v9017_v47  ;;  %v2357_v47 = vsel %vm733_vm8, %v9153_v30, %v11301_v9  ;;  %v2592_v49 = vsel %vm980_vm13, %v2584_v40, %v2512_v6  ;;  %v2583_v20 = vsel %vm971_vm12, %v2575_v52, %v2487_v62  ;;  %v2569_v63 = vsel %vm953_vm10, %v2561_v25, %v2441_v43  ;;  %v11309_v25 = vld [vmem:[#allocation45_spill] sm:$0xff]  ;;  %v11311_v9 = vld [vmem:[#allocation54_spill] sm:$0xff] }
 0x34c   : > { %2766 = vmatprep.mubr.f32.mxu1 %v9014_v24  ;;  %v2535_v27 = vrot.slane %v2357_v47, 1  ;;  %v2232_v51 = vsel %vm608_vm1, %v11305_v54, %v11306_v28  ;;  %v2466_v13 = vrot.slane %v2282_v44, 4  ;;  %v2306_v32 = vsel %vm683_vm6, %v11308_v14, %v11307_v21 }
 0x34d   : > { %v2342_v12 = vpop.permute.xlu1 %2341  ;;  %v9320_v1 = vpop.permute.xlu0 %2365  ;;  %v2570_v35 = vsel %vm953_vm10, %v2562_v8, %v2442_v41  ;;  %v2465_v39 = vrot.slane %v2283_v11, 4  ;;  %v2307_v37 = vsel %vm683_vm6, %v8738_v26, %v11308_v14  ;;  %v2419_v5 = vrot.slane %v2233_v18, 6  ;;  %v11310_v26 = vld [vmem:[#allocation55_spill] sm:$0xff]  ;;  %v11312_v41 = vld [vmem:[#allocation46_spill] sm:$0xff] }
 0x34e   : > { %v2257_v59 = vsel %vm633_vm2, %v11298_v55, %v11309_v25  ;;  %v2600_v15 = vsel %vm989_vm14, %v2592_v49, %v2536_v61  ;;  %v2591_v62 = vsel %vm980_vm13, %v2583_v20, %v2511_v50  ;;  %v2420_v6 = vrot.slane %v2232_v51, 6  ;;  %v9392_v11 = vld [vmem:[#allocation7] sm:$0xff]  ;;  %v11314_v50 = vld [vmem:[#allocation35_spill] sm:$0xff] }
 0x34f   : > { %v2490_v0 = vrot.slane %v2306_v32, 3  ;;  %v2330_v60 = vsel %vm708_vm7, %v11311_v9, %v11310_v26  ;;  %v2578_v43 = vsel %vm962_vm11, %v2570_v35, %v2466_v13  ;;  %v2489_v52 = vrot.slane %v2307_v37, 3  ;;  %v11316_v51 = vld [vmem:[#allocation53_spill] sm:$0xff] }
 0x350   : > { %v2331_v55 = vsel %vm708_vm7, %v11293_v33, %v11311_v9  ;;  %v2354_v47 = vsel %vm733_vm8, %v2342_v12, %v9246_v23  ;;  %v2577_v8 = vsel %vm962_vm11, %v2569_v63, %v2465_v39  ;;  %v2443_v56 = vrot.slane %v2257_v59, 5 }
 0x351   : > { %v9349_v57 = vpop.permute.xlu1 %2359  ;;  %v9351_v53 = vpop.permute.xlu0 %2345  ;;  %v2256_v4 = vsel %vm633_vm2, %v11309_v25, %v11312_v41  ;;  %v2355_v44 = vsel %vm733_vm8, %v11300_v10, %v2342_v12  ;;  %vm11313_vm15 = vcmask 72704   ;;  %v2556_v61 = vsel %vm935_vm3, %v11314_v50, %v2396_v29 }
 0x352   : > { %v2381_v2 = vsel %vm758_vm9, %v9349_v57, %v9243_v22  ;;  %v2599_v22 = vsel %vm989_vm14, %v2591_v62, %v2535_v27  ;;  %v2563_v54 = vsel %vm944_vm4, %v2555_v42, %v2419_v5  ;;  %v2514_v18 = vrot.slane %v2330_v60, 2  ;;  %v11315_v27 = vld [vmem:[#allocation52_spill] sm:$0xff] }
 0x353   : > { %7020 = vmatpush1.msk.msra.mxu0 %vm935_vm3, %v2381_v2  ;;  %v2281_v49 = vsel %vm658_vm5, %v11303_v7, %v11315_v27  ;;  %v2513_v10 = vrot.slane %v2331_v55, 2  ;;  %v2538_v12 = vrot.slane %v2354_v47, 1  ;;  %v2586_v20 = vsel %vm971_vm12, %v2578_v43, %v2490_v0 }
 0x354   : > { %2661 = vmatprep.subr.mxu0 %v2600_v15  ;;  %v2444_v63 = vrot.slane %v2256_v4, 5  ;;  %v2280_v29 = vsel %vm658_vm5, %v11315_v27, %v11316_v51  ;;  %v2537_v13 = vrot.slane %v2355_v44, 1  ;;  %v2585_v14 = vsel %vm971_vm12, %v2577_v8, %v2489_v52 }
 0x355   : > { %v9382_v40 = vpop.permute.xlu1 %2323  ;;  %2662 = vmatpush1.msra.mxu0 %v2599_v22  ;;  %v2564_v32 = vsel %vm944_vm4, %v2556_v61, %v2420_v6  ;;  %v2571_v35 = vsel %vm953_vm10, %v2563_v54, %v2443_v56  ;;  %v2305_v7 = vsel %vm683_vm6, %v11307_v21, %v9283_v46  ;;  %v2467_v2 = vrot.slane %v2281_v49, 4 }
 0x356   : > { %v2370_v33 = vpop.permute.xlu0 %2369  ;;  %7021 = vmatmul.mubr.msk.f32.vlgmr.msra.gmra.mxu0 %vm11313_vm15, %v9392_v11  ;;  %v2304_v5 = vsel %vm683_vm6, %v9283_v46, %v9210_v48  ;;  %v2379_v25 = vsel %vm758_vm9, %v9179_v45, %v9320_v1  ;;  %v2594_v21 = vsel %vm980_vm13, %v2586_v20, %v2514_v18  ;;  %v2468_v59 = vrot.slane %v2280_v29, 4 }
 0x357   : > { %2837 = vmatprep.mubr.f32.mxu0 %v9014_v24  ;;  %v2328_v15 = vsel %vm708_vm7, %v9285_v36, %v9382_v40  ;;  %v2602_v62 = vsel %vm989_vm14, %v2594_v21, %v2538_v12  ;;  %v2593_v46 = vsel %vm980_vm13, %v2585_v14, %v2513_v10  ;;  %v2572_v6 = vsel %vm953_vm10, %v2564_v32, %v2444_v63  ;;  %v11317_v14 = vld [vmem:[#allocation32_spill] sm:$0xff] }
 0x358   : > { %v2491_v0 = vrot.slane %v2305_v7, 3  ;;  %v2329_v45 = vsel %vm708_vm7, %v11310_v26, %v9285_v36  ;;  %v2601_v9 = vsel %vm989_vm14, %v2593_v46, %v2537_v13  ;;  %v2492_v60 = vrot.slane %v2304_v5, 3 }
 0x359   : > { %v2368_v42 = vpop.permute.xlu1 %2367  ;;  %v2353_v22 = vsel %vm733_vm8, %v9246_v23, %v9351_v53  ;;  %v2516_v52 = vrot.slane %v2328_v15, 2  ;;  %v2579_v36 = vsel %vm962_vm11, %v2571_v35, %v2467_v2  ;;  %v2580_v26 = vsel %vm962_vm11, %v2572_v6, %v2468_v59 }
 0x35a   : > { %v2378_v39 = vsel %vm758_vm9, %v9320_v1, %v2368_v42  ;;  %v2206_v37 = vpop.permute.xlu0 %2205  ;;  %v2515_v55 = vrot.slane %v2329_v45, 2  ;;  %v2587_v23 = vsel %vm971_vm12, %v2579_v36, %v2491_v0  ;;  %v2539_v56 = vrot.slane %v2353_v22, 1 }
 0x35b   : > { %7022 = vmatprep.subr.msk.mxu1 %vm935_vm3, %v2378_v39  ;;  %v2214_v4 = vsel %vm583_vm0, %v2206_v37, %v8632_v31  ;;  %v2207_v50 = vsel %vm583_vm0, %v11297_v16, %v2206_v37  ;;  %v2588_v54 = vsel %vm971_vm12, %v2580_v26, %v2492_v60 }
 0x35c   : > { %7023 = vmatpush1.msk.msra.mxu1 %vm935_vm3, %v2379_v25  ;;  %v2596_v18 = vsel %vm980_vm13, %v2588_v54, %v2516_v52  ;;  %v2398_v27 = vrot.slane %v2214_v4, 7  ;;  %v2595_v31 = vsel %vm980_vm13, %v2587_v23, %v2515_v55  ;;  %v2397_v10 = vrot.slane %v2207_v50, 7 }
 0x35d   : > { %v9441_v1 = vpop.permute.xlu1 %2347  ;;  %2732 = vmatprep.subr.mxu1 %v2602_v62  ;;  %v2603_v16 = vsel %vm989_vm14, %v2595_v31, %v2539_v56 }
 0x35e   : > { %v2352_v43 = vsel %vm733_vm8, %v9351_v53, %v9441_v1  ;;  %2733 = vmatpush1.msra.mxu1 %v2601_v9  ;;  %v2254_v8 = vpop.permute.xlu0 %2253  ;;  %v2377_v53 = vsel %vm758_vm9, %v2368_v42, %v2370_v33  ;;  %v2558_v32 = vsel %vm935_vm3, %v11317_v14, %v2398_v27 }
 0x35f   : > { %7024 = vmatmul.mubr.msk.f32.vlgmr.msra.gmra.mxu1 %vm11313_vm15, %v9392_v11  ;;  %v2540_v47 = vrot.slane %v2352_v43, 1 }
 0x360   : > { %2908 = vmatprep.mubr.f32.mxu1 %v9014_v24 }
 0x361   : > { %v2372_v44 = vpop.permute.xlu1 %2371  ;;  %v2604_v49 = vsel %vm989_vm14, %v2596_v18, %v2540_v47 }
 0x362   : > { %v2376_v61 = vsel %vm758_vm9, %v2370_v33, %v2372_v44  ;;  %v2262_v33 = vsel %vm633_vm2, %v2254_v8, %v8684_v34  ;;  %v2302_v20 = vpop.permute.xlu0 %2301  ;;  %v2255_v34 = vsel %vm633_vm2, %v11312_v41, %v2254_v8 }
 0x363   : > { %7025 = vmatprep.subr.msk.mxu0 %vm935_vm3, %v2376_v61  ;;  %v2446_v7 = vrot.slane %v2262_v33, 5  ;;  %v2310_v37 = vsel %vm683_vm6, %v2302_v20, %v11292_v58  ;;  %v2445_v25 = vrot.slane %v2255_v34, 5  ;;  %v2303_v15 = vsel %vm683_vm6, %v9210_v48, %v2302_v20  ;;  %v11320_v20 = vld [vmem:[#allocation31_spill] sm:$0xff] }
 0x364   : > { %7026 = vmatpush1.msk.msra.mxu0 %vm935_vm3, %v2377_v53  ;;  %v2494_v46 = vrot.slane %v2310_v37, 3  ;;  %v2493_v60 = vrot.slane %v2303_v15, 3 }
 0x365   : > { %v2230_v12 = vpop.permute.xlu1 %2229  ;;  %2803 = vmatprep.subr.mxu0 %v2604_v49 }
 0x366   : > { %v2231_v63 = vsel %vm608_vm1, %v11306_v28, %v2230_v12  ;;  %v2238_v29 = vsel %vm608_vm1, %v2230_v12, %v8661_v38  ;;  %2804 = vmatpush1.msra.mxu0 %v2603_v16  ;;  %v11318_v28 = vld [vmem:[#allocation36_spill] sm:$0xff]  ;;  %v2350_v62 = vpop.permute.xlu0 %2349 }
 0x367   : > { %v2421_v13 = vrot.slane %v2231_v63, 6  ;;  %v2422_v42 = vrot.slane %v2238_v29, 6  ;;  %7027 = vmatmul.mubr.msk.f32.vlgmr.msra.gmra.mxu0 %vm11313_vm15, %v9392_v11  ;;  %v2557_v35 = vsel %vm935_vm3, %v11318_v28, %v2397_v10  ;;  %v2358_v22 = vsel %vm733_vm8, %v2350_v62, %v9153_v30 }
 0x368   : > { %3179 = vmatprep.mubr.f32.mxu0 %v9014_v24 }
 0x369   : > { %v2566_v38 = vsel %vm944_vm4, %v2558_v32, %v2422_v42  ;;  %v2278_v39 = vpop.permute.xlu1 %2277  ;;  %v2565_v2 = vsel %vm944_vm4, %v2557_v35, %v2421_v13  ;;  %vm11319_vm4 = vmmov %vm11313_vm15  ;;  %vm1923_vm15 = vsmask.f32 2304 }
 0x36a   : > { %v2279_v5 = vsel %vm658_vm5, %v11316_v51, %v2278_v39  ;;  %v2286_v41 = vsel %vm658_vm5, %v2278_v39, %v8728_v19  ;;  %v2574_v58 = vsel %vm953_vm10, %v2566_v38, %v2446_v7  ;;  %v2573_v6 = vsel %vm953_vm10, %v2565_v2, %v2445_v25 }
 0x36b   : > { %v2469_v21 = vrot.slane %v2279_v5, 4  ;;  %v2470_v59 = vrot.slane %v2286_v41, 4  ;;  %v2351_v19 = vsel %vm733_vm8, %v9441_v1, %v2350_v62  ;;  %vm11321_vm10 = vcmask 588800  }
 0x36c   : > { %v2541_v1 = vrot.slane %v2351_v19, 1 }
 0x36d   : > { %v2582_v0 = vsel %vm962_vm11, %v2574_v58, %v2470_v59  ;;  %v2326_v51 = vpop.permute.xlu1 %2325  ;;  %v2581_v45 = vsel %vm962_vm11, %v2573_v6, %v2469_v21  ;;  %vm11322_vm11 = vmmov %vm11321_vm10 }
 0x36e   : > { %v2327_v9 = vsel %vm708_vm7, %v9382_v40, %v2326_v51  ;;  %v2334_v48 = vsel %vm708_vm7, %v2326_v51, %v11299_v17  ;;  %v2590_v36 = vsel %vm971_vm12, %v2582_v0, %v2494_v46  ;;  %v2589_v47 = vsel %vm971_vm12, %v2581_v45, %v2493_v60  ;;  %v522_v60 = vld [vmem:[%s11168_s4 + $0x8] sm:$0xff]  ;;  %vm11323_vm12 = vmmov %vm11321_vm10 }
 0x36f   : > { %v2517_v43 = vrot.slane %v2327_v9, 2  ;;  %v2518_v52 = vrot.slane %v2334_v48, 2  ;;  %v2542_v40 = vrot.slane %v2358_v22, 1  ;;  %v521_v48 = vld [vmem:[%s11168_s4] sm:$0xff] }
 0x371   : > { %v2374_v26 = vpop.permute.xlu1 %2373  ;;  %v2598_v55 = vsel %vm980_vm13, %v2590_v36, %v2518_v52  ;;  %v2597_v30 = vsel %vm980_vm13, %v2589_v47, %v2517_v43  ;;  %vm11324_vm13 = vmmov %vm11321_vm10 }
 0x372   : > { %v2375_v8 = vsel %vm758_vm9, %v2372_v44, %v2374_v26  ;;  %v2382_v17 = vsel %vm758_vm9, %v2374_v26, %v9349_v57  ;;  %v2606_v23 = vsel %vm989_vm14, %v2598_v55, %v2542_v40  ;;  %v2605_v56 = vsel %vm989_vm14, %v2597_v30, %v2541_v1  ;;  %vm11325_vm14 = vmmov %vm11321_vm10 }
 0x373   : > { %7028 = vmatprep.subr.msk.mxu1 %vm935_vm3, %v2382_v17 }
 0x374   : > { %7029 = vmatpush1.msk.msra.mxu1 %vm935_vm3, %v2375_v8 }
 0x375   : > { %2874 = vmatprep.subr.mxu1 %v2606_v23 }
 0x376   : > { %2875 = vmatpush1.msra.mxu1 %v2605_v56 }
 0x377   : > { %7030 = vmatmul.mubr.msk.f32.vlgmr.msra.gmra.mxu1 %vm11319_vm4, %v9392_v11 }
 0x378   : > { %3256 = vmatprep.mubr.f32.mxu1 %v9014_v24 }
 0x3c3   : > { %v9542_v57 = vpop.f32.mrf.mxu0 }
 0x3c5   : > { %v9546_v44 = vpop.f32.mrf.mxu0 }
 0x3c7   : > { %v9550_v61 = vpop.f32.mrf.mxu0 }
 0x3c9   : > { %v9554_v18 = vpop.f32.mrf.mxu0 }
 0x3d7   : > { %v9540_v53 = vpop.f32.mrf.mxu1 }
 0x3d9   : > { %v9544_v4 = vpop.f32.mrf.mxu1 }
 0x3db   : > { %v9548_v50 = vpop.f32.mrf.mxu1 }
 0x3dd   : > { %v9552_v54 = vpop.f32.mrf.mxu1 }
 0x401   : > { %v9558_v11 = vpop.f32.mrf.mxu0 }
 0x403   : > { %v9562_v31 = vpop.f32.mrf.mxu0 }
 0x405   : > { %v9564_v12 = vpop.f32.mrf.mxu0 }
 0x407   : > { %v9556_v27 = vpop.f32.mrf.mxu1  ;;  %v9566_v16 = vpop.f32.mrf.mxu0 }
 0x409   : > { %v1831_v24 = vpop.f32.mrf.mxu1 }
 0x40b   : > { %v9560_v49 = vpop.f32.mrf.mxu1 }
 0x40d   : > { %v1836_v10 = vpop.f32.mrf.mxu1 }
 0x416   : > { %v2697_v33 = vpop.f32.mrf.mxu0 }
 0x417   : > { %v2698_v63 = vadd.f32 %v2697_v33, %v11320_v20 }
 0x418   : > { %v2699_v13 = vpop.f32.mrf.mxu0 }
 0x419   : > { %v9569_v29 = vmax.f32 %v2698_v63, 0.0  ;;  %v2700_v14 = vadd.f32 %v2699_v13, %v11320_v20 }
 0x41b   : > { %3067 = vrot.lane.b32.xlu1 %v9569_v29, %s7615_s30  ;;  %3091 = vrot.lane.b32.xlu0 %v9569_v29, %s7616_s1  ;;  %v9589_v34 = vmax.f32 %v2700_v14, 0.0 }
 0x41f   : > { %3019 = vrot.lane.b32.xlu1 %v9569_v29, %s7613_s16  ;;  %3043 = vrot.lane.b32.xlu0 %v9569_v29, %s7614_s20  ;;  %v2768_v42 = vpop.f32.mrf.mxu1 }
 0x420   : > { %v2769_v32 = vadd.f32 %v2768_v42, %v11320_v20 }
 0x421   : > { %v2770_v35 = vpop.f32.mrf.mxu1 }
 0x422   : > { %v9591_v28 = vmax.f32 %v2769_v32, 0.0  ;;  %v2771_v38 = vadd.f32 %v2770_v35, %v11320_v20 }
 0x423   : > { %2971 = vrot.lane.b32.xlu1 %v9569_v29, %s7611_s19  ;;  %2995 = vrot.lane.b32.xlu0 %v9569_v29, %s7612_s21 }
 0x424   : > { %v9627_v37 = vmax.f32 %v2771_v38, 0.0 }
 0x427   : > { %2923 = vrot.lane.b32.xlu1 %v9569_v29, %s7609_s13  ;;  %2947 = vrot.lane.b32.xlu0 %v9569_v29, %s7610_s26  ;;  %v2839_v7 = vpop.f32.mrf.mxu0 }
 0x428   : > { %v2840_v39 = vadd.f32 %v2839_v7, %v11320_v20 }
 0x429   : > { %v2841_v5 = vpop.f32.mrf.mxu0 }
 0x42a   : > { %v9629_v2 = vmax.f32 %v2840_v39, 0.0  ;;  %v2842_v25 = vadd.f32 %v2841_v5, %v11320_v20 }
 0x42b   : > { %3093 = vrot.lane.b32.xlu0 %v9589_v34, %s7616_s1  ;;  %3095 = vrot.lane.b32.xlu1 %v9591_v28, %s7616_s1 }
 0x42c   : > { %v9665_v59 = vmax.f32 %v2842_v25, 0.0 }
 0x42f   : > { %3071 = vrot.lane.b32.xlu0 %v9591_v28, %s7615_s30  ;;  %3069 = vrot.lane.b32.xlu1 %v9589_v34, %s7615_s30 }
 0x433   : > { %3045 = vrot.lane.b32.xlu0 %v9589_v34, %s7614_s20  ;;  %3047 = vrot.lane.b32.xlu1 %v9591_v28, %s7614_s20 }
 0x437   : > { %3023 = vrot.lane.b32.xlu0 %v9591_v28, %s7613_s16  ;;  %3021 = vrot.lane.b32.xlu1 %v9589_v34, %s7613_s16  ;;  %v2910_v41 = vpop.f32.mrf.mxu1 }
 0x438   : > { %v2911_v21 = vadd.f32 %v2910_v41, %v11320_v20 }
 0x439   : > { %v2912_v62 = vpop.f32.mrf.mxu1 }
 0x43a   : > { %v9667_v15 = vmax.f32 %v2911_v21, 0.0  ;;  %v2913_v58 = vadd.f32 %v2912_v62, %v11320_v20 }
 0x43b   : > { %2997 = vrot.lane.b32.xlu0 %v9589_v34, %s7612_s21  ;;  %2999 = vrot.lane.b32.xlu1 %v9591_v28, %s7612_s21 }
 0x43c   : > { %v9702_v46 = vmax.f32 %v2913_v58, 0.0 }
 0x43f   : > { %2975 = vrot.lane.b32.xlu0 %v9591_v28, %s7611_s19  ;;  %2973 = vrot.lane.b32.xlu1 %v9589_v34, %s7611_s19 }
 0x443   : > { %2949 = vrot.lane.b32.xlu0 %v9589_v34, %s7610_s26  ;;  %2951 = vrot.lane.b32.xlu1 %v9591_v28, %s7610_s26 }
 0x447   : > { %2927 = vrot.lane.b32.xlu0 %v9591_v28, %s7609_s13  ;;  %2925 = vrot.lane.b32.xlu1 %v9589_v34, %s7609_s13 }
 0x44b   : > { %3097 = vrot.lane.b32.xlu1 %v9627_v37, %s7616_s1  ;;  %3099 = vrot.lane.b32.xlu0 %v9629_v2, %s7616_s1 }
 0x44f   : > { %3075 = vrot.lane.b32.xlu1 %v9629_v2, %s7615_s30  ;;  %3073 = vrot.lane.b32.xlu0 %v9627_v37, %s7615_s30 }
 0x453   : > { %3049 = vrot.lane.b32.xlu1 %v9627_v37, %s7614_s20  ;;  %3051 = vrot.lane.b32.xlu0 %v9629_v2, %s7614_s20 }
 0x457   : > { %3027 = vrot.lane.b32.xlu1 %v9629_v2, %s7613_s16  ;;  %3025 = vrot.lane.b32.xlu0 %v9627_v37, %s7613_s16 }
 0x45b   : > { %3001 = vrot.lane.b32.xlu1 %v9627_v37, %s7612_s21  ;;  %3003 = vrot.lane.b32.xlu0 %v9629_v2, %s7612_s21 }
 0x45f   : > { %2979 = vrot.lane.b32.xlu1 %v9629_v2, %s7611_s19  ;;  %2977 = vrot.lane.b32.xlu0 %v9627_v37, %s7611_s19 }
 0x463   : > { %2953 = vrot.lane.b32.xlu1 %v9627_v37, %s7610_s26  ;;  %2955 = vrot.lane.b32.xlu0 %v9629_v2, %s7610_s26 }
 0x467   : > { %2931 = vrot.lane.b32.xlu1 %v9629_v2, %s7609_s13  ;;  %2929 = vrot.lane.b32.xlu0 %v9627_v37, %s7609_s13 }
 0x46b   : > { %3101 = vrot.lane.b32.xlu0 %v9665_v59, %s7616_s1  ;;  %3103 = vrot.lane.b32.xlu1 %v9667_v15, %s7616_s1 }
 0x46f   : > { %3077 = vrot.lane.b32.xlu0 %v9665_v59, %s7615_s30  ;;  %3079 = vrot.lane.b32.xlu1 %v9667_v15, %s7615_s30 }
 0x473   : > { %3055 = vrot.lane.b32.xlu0 %v9667_v15, %s7614_s20  ;;  %3053 = vrot.lane.b32.xlu1 %v9665_v59, %s7614_s20 }
 0x477   : > { %3029 = vrot.lane.b32.xlu0 %v9665_v59, %s7613_s16  ;;  %3031 = vrot.lane.b32.xlu1 %v9667_v15, %s7613_s16 }
 0x47b   : > { %3007 = vrot.lane.b32.xlu0 %v9667_v15, %s7612_s21  ;;  %3005 = vrot.lane.b32.xlu1 %v9665_v59, %s7612_s21 }
 0x47f   : > { %2981 = vrot.lane.b32.xlu0 %v9665_v59, %s7611_s19  ;;  %2983 = vrot.lane.b32.xlu1 %v9667_v15, %s7611_s19 }
 0x483   : > { %2959 = vrot.lane.b32.xlu0 %v9667_v15, %s7610_s26  ;;  %2957 = vrot.lane.b32.xlu1 %v9665_v59, %s7610_s26 }
 0x487   : > { %2933 = vrot.lane.b32.xlu0 %v9665_v59, %s7609_s13  ;;  %2935 = vrot.lane.b32.xlu1 %v9667_v15, %s7609_s13 }
 0x48b   : > { %3105 = vrot.lane.b32.xlu0 %v9702_v46, %s7616_s1  ;;  %3081 = vrot.lane.b32.xlu1 %v9702_v46, %s7615_s30 }
 0x48d   : > { %v9708_v6 = vpop.permute.xlu1 %3067  ;;  %v9710_v0 = vpop.permute.xlu0 %3091 }
 0x48f   : > { %3057 = vrot.lane.b32.xlu0 %v9702_v46, %s7614_s20  ;;  %3033 = vrot.lane.b32.xlu1 %v9702_v46, %s7613_s16 }
 0x491   : > { %v9716_v51 = vpop.permute.xlu1 %3019  ;;  %v9718_v19 = vpop.permute.xlu0 %3043 }
 0x493   : > { %3009 = vrot.lane.b32.xlu0 %v9702_v46, %s7612_s21  ;;  %2985 = vrot.lane.b32.xlu1 %v9702_v46, %s7611_s19 }
 0x495   : > { %v9724_v45 = vpop.permute.xlu1 %2971  ;;  %v9726_v9 = vpop.permute.xlu0 %2995 }
 0x497   : > { %2961 = vrot.lane.b32.xlu0 %v9702_v46, %s7610_s26  ;;  %2937 = vrot.lane.b32.xlu1 %v9702_v46, %s7609_s13 }
 0x499   : > { %v9738_v22 = vpop.permute.xlu1 %2923  ;;  %v9740_v43 = vpop.permute.xlu0 %2947 }
 0x49b   : > { %1517 = vperm.xlu0 %7293, %v521_v48   ;;  %1522 = vperm.xlu1 %7294, %v522_v60  }
 0x49d   : > { %v3096_v52 = vpop.permute.xlu1 %3095  ;;  %v3094_v36 = vpop.permute.xlu0 %3093 }
 0x49e   : > { %v3113_v1 = vsel %vm758_vm9, %v9710_v0, %v3094_v36  ;;  %v3112_v26 = vsel %vm758_vm9, %v3094_v36, %v3096_v52 }
 0x49f   : > { %3129 = vmatprep.subr.mxu0 %v3112_v26 }
 0x4a0   : > { %3130 = vmatpush1.msra.mxu0 %v3113_v1 }
 0x4a1   : > { %v3070_v55 = vpop.permute.xlu1 %3069  ;;  %v3072_v47 = vpop.permute.xlu0 %3071 }
 0x4a2   : > { %v3089_v40 = vsel %vm733_vm8, %v9708_v6, %v3070_v55  ;;  %v3088_v8 = vsel %vm733_vm8, %v3070_v55, %v3072_v47  ;;  %v9788_v55 = vld [vmem:[#allocation9] sm:$0xff] }
 0x4a3   : > { %3131 = vmatprep.subr.mxu0 %v3088_v8 }
 0x4a4   : > { %3132 = vmatpush1.msra.mxu0 %v3089_v40  ;;  %v9792_v40 = vld [vmem:[#allocation3] sm:$0xff] }
 0x4a5   : > { %v3048_v17 = vpop.permute.xlu1 %3047  ;;  %v3046_v30 = vpop.permute.xlu0 %3045 }
 0x4a6   : > { %v3065_v23 = vsel %vm708_vm7, %v9718_v19, %v3046_v30  ;;  %v3064_v56 = vsel %vm708_vm7, %v3046_v30, %v3048_v17  ;;  %v9799_v30 = vld [vmem:[#allocation9 + $0x8] sm:$0xff] }
 0x4a7   : > { %3133 = vmatprep.subr.mxu0 %v3064_v56 }
 0x4a8   : > { %3134 = vmatpush1.msra.mxu0 %v3065_v23 }
 0x4a9   : > { %v3022_v24 = vpop.permute.xlu1 %3021  ;;  %v3024_v10 = vpop.permute.xlu0 %3023 }
 0x4aa   : > { %v3041_v33 = vsel %vm683_vm6, %v9716_v51, %v3022_v24  ;;  %v3040_v20 = vsel %vm683_vm6, %v3022_v24, %v3024_v10 }
 0x4ab   : > { %3135 = vmatprep.subr.mxu0 %v3040_v20 }
 0x4ac   : > { %3136 = vmatpush1.msra.mxu0 %v3041_v33 }
 0x4ad   : > { %v3000_v63 = vpop.permute.xlu1 %2999  ;;  %v2998_v13 = vpop.permute.xlu0 %2997 }
 0x4ae   : > { %v3017_v42 = vsel %vm658_vm5, %v9726_v9, %v2998_v13  ;;  %v3016_v14 = vsel %vm658_vm5, %v2998_v13, %v3000_v63 }
 0x4af   : > { %3137 = vmatprep.subr.mxu0 %v3016_v14 }
 0x4b0   : > { %3138 = vmatpush1.msra.mxu0 %v3017_v42 }
 0x4b1   : > { %v2974_v32 = vpop.permute.xlu1 %2973  ;;  %v2976_v35 = vpop.permute.xlu0 %2975 }
 0x4b2   : > { %v2993_v7 = vsel %vm633_vm2, %v9724_v45, %v2974_v32  ;;  %v2992_v38 = vsel %vm633_vm2, %v2974_v32, %v2976_v35 }
 0x4b3   : > { %3139 = vmatprep.subr.mxu0 %v2992_v38 }
 0x4b4   : > { %3140 = vmatpush1.msra.mxu0 %v2993_v7 }
 0x4b5   : > { %v2952_v39 = vpop.permute.xlu1 %2951  ;;  %v2950_v5 = vpop.permute.xlu0 %2949 }
 0x4b6   : > { %v2969_v41 = vsel %vm608_vm1, %v9740_v43, %v2950_v5  ;;  %v2968_v25 = vsel %vm608_vm1, %v2950_v5, %v2952_v39 }
 0x4b7   : > { %3141 = vmatprep.subr.mxu0 %v2968_v25 }
 0x4b8   : > { %3142 = vmatpush1.msra.mxu0 %v2969_v41 }
 0x4b9   : > { %v2926_v21 = vpop.permute.xlu1 %2925  ;;  %v2928_v62 = vpop.permute.xlu0 %2927 }
 0x4ba   : > { %v2945_v58 = vsel %vm583_vm0, %v9738_v22, %v2926_v21  ;;  %v2944_v48 = vsel %vm583_vm0, %v2926_v21, %v2928_v62 }
 0x4bb   : > { %3143 = vmatprep.subr.mxu0 %v2944_v48 }
 0x4bc   : > { %3144 = vmatpush1.msra.mxu0 %v2945_v58 }
 0x4bd   : > { %v3098_v60 = vpop.permute.xlu1 %3097  ;;  %3145 = vmatprep.subr.mxu0 %v9589_v34  ;;  %v3100_v36 = vpop.permute.xlu0 %3099 }
 0x4be   : > { %v3111_v1 = vsel %vm758_vm9, %v3096_v52, %v3098_v60  ;;  %3146 = vmatpush1.msra.mxu0 %v9569_v29  ;;  %v3110_v26 = vsel %vm758_vm9, %v3098_v60, %v3100_v36 }
 0x4bf   : > { %7031 = vmatmul.mubr.msk.f32.vlgmr.msra.gmra.mxu0 %vm11321_vm10, %v9788_v55  ;;  %3206 = vmatprep.subr.mxu1 %v3110_v26 }
 0x4c0   : > { %3207 = vmatpush1.msra.mxu1 %v3111_v1  ;;  %3185 = vmatprep.mubr.f32.mxu0 %v9792_v40 }
 0x4c1   : > { %v3076_v34 = vpop.permute.xlu1 %3075  ;;  %v3074_v8 = vpop.permute.xlu0 %3073 }
 0x4c2   : > { %v3087_v52 = vsel %vm733_vm8, %v3072_v47, %v3074_v8  ;;  %v3086_v29 = vsel %vm733_vm8, %v3074_v8, %v3076_v34 }
 0x4c3   : > { %3208 = vmatprep.subr.mxu1 %v3086_v29  ;;  %7032 = vmatmul.mubr.msk.f32.gmra.mxu0 %vm11322_vm11, %v9799_v30 }
 0x4c4   : > { %3209 = vmatpush1.msra.mxu1 %v3087_v52  ;;  %3333 = vmatprep.mubr.f32.mxu0 %v9792_v40 }
 0x4c5   : > { %v3050_v23 = vpop.permute.xlu1 %3049  ;;  %v3052_v56 = vpop.permute.xlu0 %3051 }
 0x4c6   : > { %v3063_v24 = vsel %vm708_vm7, %v3048_v17, %v3050_v23  ;;  %v3062_v47 = vsel %vm708_vm7, %v3050_v23, %v3052_v56 }
 0x4c7   : > { %3210 = vmatprep.subr.mxu1 %v3062_v47 }
 0x4c8   : > { %3211 = vmatpush1.msra.mxu1 %v3063_v24 }
 0x4c9   : > { %v3028_v33 = vpop.permute.xlu1 %3027  ;;  %v3026_v20 = vpop.permute.xlu0 %3025 }
 0x4ca   : > { %v3039_v13 = vsel %vm683_vm6, %v3024_v10, %v3026_v20  ;;  %v3038_v42 = vsel %vm683_vm6, %v3026_v20, %v3028_v33 }
 0x4cb   : > { %3212 = vmatprep.subr.mxu1 %v3038_v42 }
 0x4cc   : > { %3213 = vmatpush1.msra.mxu1 %v3039_v13 }
 0x4cd   : > { %v3002_v14 = vpop.permute.xlu1 %3001  ;;  %v3004_v32 = vpop.permute.xlu0 %3003 }
 0x4ce   : > { %v3015_v17 = vsel %vm658_vm5, %v3000_v63, %v3002_v14  ;;  %v3014_v7 = vsel %vm658_vm5, %v3002_v14, %v3004_v32 }
 0x4cf   : > { %3214 = vmatprep.subr.mxu1 %v3014_v7 }
 0x4d0   : > { %3215 = vmatpush1.msra.mxu1 %v3015_v17 }
 0x4d1   : > { %v2980_v38 = vpop.permute.xlu1 %2979  ;;  %v2978_v5 = vpop.permute.xlu0 %2977 }
 0x4d2   : > { %v2991_v10 = vsel %vm633_vm2, %v2976_v35, %v2978_v5  ;;  %v2990_v41 = vsel %vm633_vm2, %v2978_v5, %v2980_v38 }
 0x4d3   : > { %3216 = vmatprep.subr.mxu1 %v2990_v41 }
 0x4d4   : > { %3217 = vmatpush1.msra.mxu1 %v2991_v10 }
 0x4d5   : > { %v2954_v25 = vpop.permute.xlu1 %2953  ;;  %v2956_v21 = vpop.permute.xlu0 %2955 }
 0x4d6   : > { %v2967_v63 = vsel %vm608_vm1, %v2952_v39, %v2954_v25  ;;  %v2966_v58 = vsel %vm608_vm1, %v2954_v25, %v2956_v21 }
 0x4d7   : > { %3218 = vmatprep.subr.mxu1 %v2966_v58 }
 0x4d8   : > { %3219 = vmatpush1.msra.mxu1 %v2967_v63 }
 0x4d9   : > { %v2932_v48 = vpop.permute.xlu1 %2931  ;;  %v2930_v60 = vpop.permute.xlu0 %2929 }
 0x4da   : > { %v2943_v35 = vsel %vm583_vm0, %v2928_v62, %v2930_v60  ;;  %v2942_v1 = vsel %vm583_vm0, %v2930_v60, %v2932_v48 }
 0x4db   : > { %3220 = vmatprep.subr.mxu1 %v2942_v1 }
 0x4dc   : > { %3221 = vmatpush1.msra.mxu1 %v2943_v35 }
 0x4dd   : > { %v3104_v26 = vpop.permute.xlu1 %3103  ;;  %3222 = vmatprep.subr.mxu1 %v9627_v37  ;;  %v3102_v8 = vpop.permute.xlu0 %3101 }
 0x4de   : > { %v3109_v39 = vsel %vm758_vm9, %v3100_v36, %v3102_v8  ;;  %3223 = vmatpush1.msra.mxu1 %v9591_v28  ;;  %v3108_v52 = vsel %vm758_vm9, %v3102_v8, %v3104_v26 }
 0x4df   : > { %7033 = vmatmul.mubr.msk.f32.vlgmr.msra.gmra.mxu1 %vm11323_vm12, %v9788_v55  ;;  %3283 = vmatprep.subr.mxu0 %v3108_v52  ;;  %vm1927_vm12 = vsmask.f32 3328 }
 0x4e0   : > { %3284 = vmatpush1.msra.mxu0 %v3109_v39  ;;  %3262 = vmatprep.mubr.f32.mxu1 %v9792_v40 }
 0x4e1   : > { %v3080_v62 = vpop.permute.xlu1 %3079  ;;  %v3078_v29 = vpop.permute.xlu0 %3077 }
 0x4e2   : > { %v3085_v37 = vsel %vm733_vm8, %v3076_v34, %v3078_v29  ;;  %v3084_v36 = vsel %vm733_vm8, %v3078_v29, %v3080_v62 }
 0x4e3   : > { %3285 = vmatprep.subr.mxu0 %v3084_v36  ;;  %7034 = vmatmul.mubr.msk.f32.gmra.mxu1 %vm11324_vm13, %v9799_v30 }
 0x4e4   : > { %3286 = vmatpush1.msra.mxu0 %v3085_v37  ;;  %3410 = vmatprep.mubr.f32.mxu1 %v9792_v40 }
 0x4e5   : > { %v3054_v28 = vpop.permute.xlu1 %3053  ;;  %v3056_v23 = vpop.permute.xlu0 %3055 }
 0x4e6   : > { %v3061_v24 = vsel %vm708_vm7, %v3052_v56, %v3054_v28  ;;  %v3060_v47 = vsel %vm708_vm7, %v3054_v28, %v3056_v23 }
 0x4e7   : > { %3287 = vmatprep.subr.mxu0 %v3060_v47 }
 0x4e8   : > { %3288 = vmatpush1.msra.mxu0 %v3061_v24 }
 0x4e9   : > { %v3032_v34 = vpop.permute.xlu1 %3031  ;;  %v3030_v20 = vpop.permute.xlu0 %3029 }
 0x4ea   : > { %v3037_v13 = vsel %vm683_vm6, %v3028_v33, %v3030_v20  ;;  %v3036_v42 = vsel %vm683_vm6, %v3030_v20, %v3032_v34 }
 0x4eb   : > { %3289 = vmatprep.subr.mxu0 %v3036_v42  ;;  %v7619_v42 = vmov 1966171168  }
 0x4ec   : > { %3290 = vmatpush1.msra.mxu0 %v3037_v13 }
 0x4ed   : > { %v3006_v14 = vpop.permute.xlu1 %3005  ;;  %v3008_v17 = vpop.permute.xlu0 %3007 }
 0x4ee   : > { %v3013_v56 = vsel %vm658_vm5, %v3004_v32, %v3006_v14  ;;  %v3012_v7 = vsel %vm658_vm5, %v3006_v14, %v3008_v17  ;;  %v1870_v14 = vunpack.c.l.s4 %v7619_v42 }
 0x4ef   : > { %3291 = vmatprep.subr.mxu0 %v3012_v7 }
 0x4f0   : > { %3292 = vmatpush1.msra.mxu0 %v3013_v56 }
 0x4f1   : > { %v2984_v5 = vpop.permute.xlu1 %2983  ;;  %v2982_v10 = vpop.permute.xlu0 %2981 }
 0x4f2   : > { %v2989_v33 = vsel %vm633_vm2, %v2980_v38, %v2982_v10  ;;  %v2988_v41 = vsel %vm633_vm2, %v2982_v10, %v2984_v5 }
 0x4f3   : > { %3293 = vmatprep.subr.mxu0 %v2988_v41 }
 0x4f4   : > { %3294 = vmatpush1.msra.mxu0 %v2989_v33 }
 0x4f5   : > { %v2958_v25 = vpop.permute.xlu1 %2957  ;;  %v2960_v63 = vpop.permute.xlu0 %2959 }
 0x4f6   : > { %v2965_v32 = vsel %vm608_vm1, %v2956_v21, %v2958_v25  ;;  %v2964_v58 = vsel %vm608_vm1, %v2958_v25, %v2960_v63 }
 0x4f7   : > { %3295 = vmatprep.subr.mxu0 %v2964_v58 }
 0x4f8   : > { %3296 = vmatpush1.msra.mxu0 %v2965_v32 }
 0x4f9   : > { %v2936_v60 = vpop.permute.xlu1 %2935  ;;  %v2934_v35 = vpop.permute.xlu0 %2933 }
 0x4fa   : > { %v2941_v38 = vsel %vm583_vm0, %v2932_v48, %v2934_v35  ;;  %v2940_v1 = vsel %vm583_vm0, %v2934_v35, %v2936_v60 }
 0x4fb   : > { %3297 = vmatprep.subr.mxu0 %v2940_v1 }
 0x4fc   : > { %3298 = vmatpush1.msra.mxu0 %v2941_v38 }
 0x4fd   : > { %v3082_v8 = vpop.permute.xlu1 %3081  ;;  %3299 = vmatprep.subr.mxu0 %v9665_v59  ;;  %v3106_v39 = vpop.permute.xlu0 %3105 }
 0x4fe   : > { %v3107_v21 = vsel %vm758_vm9, %v3104_v26, %v3106_v39  ;;  %3300 = vmatpush1.msra.mxu0 %v9629_v2  ;;  %v3114_v52 = vsel %vm758_vm9, %v3106_v39, %v9710_v0  ;;  %v3090_v48 = vsel %vm733_vm8, %v3082_v8, %v9708_v6  ;;  %v3083_v59 = vsel %vm733_vm8, %v3080_v62, %v3082_v8  ;;  %vm11326_vm9 = vmmov %vm11321_vm10 }
 0x4ff   : > { %7035 = vmatmul.mubr.msk.f32.vlgmr.msra.gmra.mxu0 %vm11325_vm14, %v9788_v55  ;;  %3360 = vmatprep.subr.mxu1 %v3114_v52  ;;  %vm1919_vm8 = vsmask.f32 1280  ;;  %vm11331_vm11 = vmmov %vm11326_vm9 }
 0x500   : > { %3361 = vmatpush1.msra.mxu1 %v3107_v21  ;;  %3339 = vmatprep.mubr.f32.mxu0 %v9792_v40 }
 0x501   : > { %v3034_v26 = vpop.permute.xlu1 %3033  ;;  %3362 = vmatprep.subr.mxu1 %v3090_v48  ;;  %v3058_v2 = vpop.permute.xlu0 %3057 }
 0x502   : > { %v3059_v0 = vsel %vm708_vm7, %v3056_v23, %v3058_v2  ;;  %3363 = vmatpush1.msra.mxu1 %v3083_v59  ;;  %v3066_v29 = vsel %vm708_vm7, %v3058_v2, %v9718_v19  ;;  %v3042_v6 = vsel %vm683_vm6, %v3034_v26, %v9716_v51  ;;  %v3035_v62 = vsel %vm683_vm6, %v3032_v34, %v3034_v26 }
 0x503   : > { %3364 = vmatprep.subr.mxu1 %v3066_v29  ;;  %7036 = vmatmul.mubr.msk.f32.gmra.mxu0 %vm11326_vm9, %v9799_v30  ;;  %vm1916_vm7 = vsmask.f32 256  ;;  %vm1918_vm6 = vcmask 1041409  }
 0x504   : > { %3365 = vmatpush1.msra.mxu1 %v3059_v0 }
 0x505   : > { %v2986_v37 = vpop.permute.xlu1 %2985  ;;  %3366 = vmatprep.subr.mxu1 %v3042_v6  ;;  %v3010_v36 = vpop.permute.xlu0 %3009 }
 0x506   : > { %v3011_v28 = vsel %vm658_vm5, %v3008_v17, %v3010_v36  ;;  %3367 = vmatpush1.msra.mxu1 %v3035_v62  ;;  %v3018_v19 = vsel %vm658_vm5, %v3010_v36, %v9726_v9  ;;  %v2994_v51 = vsel %vm633_vm2, %v2986_v37, %v9724_v45  ;;  %v2987_v23 = vsel %vm633_vm2, %v2984_v5, %v2986_v37  ;;  %vm9911_vm5 = vmand %vm935_vm3, %vm1916_vm7  ;;  %v1942_v45 = vld [vmem:[#allocation2] sm:$0x7f] }
 0x507   : > { %3368 = vmatprep.subr.mxu1 %v3018_v19  ;;  %vm9919_vm2 = vmand %vm1918_vm6, %vm1919_vm8  ;;  %vm1930_vm7 = vcmask 1044484   ;;  %vm1931_vm8 = vsmask.f32 4352 }
 0x508   : > { %3369 = vmatpush1.msra.mxu1 %v3011_v28  ;;  %vm1921_vm4 = vmor %vm9919_vm2, %vm9911_vm5  ;;  %vm1934_vm5 = vcmask 1045509   ;;  %vm1935_vm2 = vsmask.f32 5376 }
 0x509   : > { %v2938_v24 = vpop.permute.xlu1 %2937  ;;  %3370 = vmatprep.subr.mxu1 %v2994_v51  ;;  %v2962_v47 = vpop.permute.xlu0 %2961 }
 0x50a   : > { %v2963_v34 = vsel %vm608_vm1, %v2960_v63, %v2962_v47  ;;  %3371 = vmatpush1.msra.mxu1 %v2987_v23  ;;  %v2970_v9 = vsel %vm608_vm1, %v2962_v47, %v9740_v43  ;;  %v2946_v20 = vsel %vm583_vm0, %v2938_v24, %v9738_v22  ;;  %v2939_v43 = vsel %vm583_vm0, %v2936_v60, %v2938_v24 }
 0x50b   : > { %3372 = vmatprep.subr.mxu1 %v2970_v9  ;;  %vm1922_vm1 = vcmask 1042434   ;;  %v1871_v22 = vunpack.c.0.s8 %v1870_v14  ;;  %vm1926_vm0 = vcmask 1043459  }
 0x50c   : > { %3373 = vmatpush1.msra.mxu1 %v2963_v34  ;;  %vm1924_vm10 = vmand %vm1922_vm1, %vm1923_vm15  ;;  %vm1938_vm15 = vcmask 1046534  }
 0x50d   : > { %3374 = vmatprep.subr.mxu1 %v2946_v20  ;;  %vm9935_vm13 = vmor %vm1924_vm10, %vm1921_vm4  ;;  %vm1939_vm4 = vsmask.f32 6400  ;;  %v1972_v20 = vld [vmem:[#allocation2 + $0xe] sm:$0x7f] }
 0x50e   : > { %3375 = vmatpush1.msra.mxu1 %v2939_v43  ;;  %vm9940_vm14 = vmand %vm1926_vm0, %vm1927_vm12 }
 0x50f   : > { %3376 = vmatprep.subr.mxu1 %v9702_v46  ;;  %vm1929_vm10 = vmor %vm9940_vm14, %vm9935_vm13 }
 0x510   : > { %3377 = vmatpush1.msra.mxu1 %v9667_v15  ;;  %v11336_v15 = vld [vmem:[#allocation26_spill] sm:$0xff]  ;;  %vm1940_vm14 = vmand %vm1938_vm15, %vm1939_vm4  ;;  %vm3503_vm4 = vsmask.f32 7942 }
 0x511   : > { %7037 = vmatmul.mubr.msk.f32.vlgmr.msra.gmra.mxu1 %vm11331_vm11, %v9788_v55  ;;  %v9945_v17 = vsub.s32 %v1871_v22, %v11336_v15  ;;  %vm1932_vm11 = vmand %vm1930_vm7, %vm1931_vm8  ;;  %v2001_v15 = vld [vmem:[#allocation2 + $0x2a] sm:$0x7f] }
 0x512   : > { %3415 = vmatprep.mubr.f32.mxu1 %v9792_v40  ;;  %vm9982_vm12 = vmor %vm1932_vm11, %vm1929_vm10 }
 0x513   : > { %vm10071_vm11 = vmand %vm1918_vm6, %vm3503_vm4 }
 0x515   : > { %7038 = vmatmul.mubr.msk.f32.gmra.mxu1 %vm11326_vm9, %v9799_v30  ;;  %vm9992_vm9 = vmand %vm1934_vm5, %vm1935_vm2  ;;  %vm3501_vm2 = vsmask.f32 7938 }
 0x516   : > { %v9949_v55 = vpop.permute.xlu1 %1522  ;;  %v9951_v40 = vpop.permute.xlu0 %1517  ;;  %vm1937_vm13 = vmor %vm9992_vm9, %vm9982_vm12  ;;  %vm3506_vm12 = vsmask.f32 7946  ;;  %vm3509_vm9 = vsmask.f32 7950 }
 0x517   : > { %v1599_v56 = vadd.f32 %v9542_v57, %v9951_v40  ;;  %v1601_v7 = vadd.f32 %v9546_v44, %v9951_v40  ;;  %v1676_v5 = vadd.f32 %v9540_v53, %v9951_v40  ;;  %v1678_v30 = vadd.f32 %v9544_v4, %v9951_v40  ;;  %vm10021_vm8 = vmor %vm1940_vm14, %vm1937_vm13 }
 0x518   : > { %v1753_v10 = vadd.f32 %v9558_v11, %v9951_v40  ;;  %v1755_v57 = vadd.f32 %v9562_v31, %v9951_v40  ;;  %v1830_v44 = vadd.f32 %v9556_v27, %v9951_v40  ;;  %v1605_v53 = vadd.f32 %v9550_v61, %v9949_v55  ;;  %vm10066_vm10 = vmand %vm935_vm3, %vm3501_vm2 }
 0x519   : > { %v1838_v4 = vmax.f32 %v1599_v56, 0.0  ;;  %v1839_v33 = vmax.f32 %v1601_v7, 0.0  ;;  %v1840_v41 = vmax.f32 %v1676_v5, 0.0  ;;  %v1841_v25 = vmax.f32 %v1678_v30, 0.0  ;;  %v1951_v56 = vld [vmem:[#allocation2 + $0x7] sm:$0x7f]  ;;  %vm3505_vm3 = vmor %vm10071_vm11, %vm10066_vm10 }
 0x51a   : > { %v1842_v63 = vmax.f32 %v1753_v10, 0.0  ;;  %v1843_v32 = vmax.f32 %v1755_v57, 0.0  ;;  %v1844_v58 = vmax.f32 %v1830_v44, 0.0  ;;  %v1607_v11 = vadd.f32 %v9554_v18, %v9949_v55  ;;  %v1981_v7 = vld [vmem:[#allocation2 + $0x15] sm:$0x7f]  ;;  %vm3507_vm6 = vmand %vm1922_vm1, %vm3506_vm12 }
 0x51b   : > { %v7005_v31 = vpack.c.bf16 %v1839_v33, %v1838_v4  ;;  %v7006_v60 = vpack.c.bf16 %v1841_v25, %v1840_v41  ;;  %v1682_v61 = vadd.f32 %v9548_v50, %v9949_v55  ;;  %v1684_v35 = vadd.f32 %v9552_v54, %v9949_v55  ;;  %v1996_v41 = vld [vmem:[#allocation2 + $0x23] sm:$0x7f]  ;;  %v2010_v25 = vld [vmem:[#allocation2 + $0x31] sm:$0x7f]  ;;  %vm10089_vm13 = vmor %vm3507_vm6, %vm3505_vm3 }
 0x51c   : > { %v1858_v38 = vpack.c.bf16 %v1844_v58, %v1844_v58  ;;  %v7007_v1 = vpack.c.bf16 %v1843_v32, %v1842_v63  ;;  %v1759_v8 = vadd.f32 %v9564_v12, %v9949_v55  ;;  %v1761_v39 = vadd.f32 %v9566_v16, %v9949_v55  ;;  %vm10095_vm1 = vmand %vm1926_vm0, %vm3509_vm9 }
 0x51d   : > { %v1875_v21 = vrot.slane %v7005_v31, %v9945_v17  ;;  %v1882_v50 = vrot.slane %v7006_v60, %v9945_v17  ;;  %v1835_v54 = vadd.f32 %v9560_v49, %v9949_v55  ;;  %v1845_v52 = vmax.f32 %v1605_v53, 0.0  ;;  %vm3511_vm0 = vmor %vm10095_vm1, %vm10089_vm13 }
 0x51e   : > { %v1889_v48 = vrot.slane %v7007_v1, %v9945_v17  ;;  %v1896_v59 = vrot.slane %v1858_v38, %v9945_v17  ;;  %v1846_v26 = vmax.f32 %v1607_v11, 0.0  ;;  %v1847_v2 = vmax.f32 %v1682_v61, 0.0 }
 0x51f   : > { %v1897_v0 = vcombine.low %v1875_v21, %v1882_v50  ;;  %v1954_v12 = vcombine.high %v1875_v21, %v1882_v50  ;;  %v1848_v16 = vmax.f32 %v1684_v35, 0.0  ;;  %v1849_v29 = vmax.f32 %v1759_v8, 0.0  ;;  %v2122_v50 = vld [vmem:[#allocation2 + $0x54] sm:$0x7f] }
 0x520   : > { %v1898_v6 = vcombine.low %v1889_v48, %v1896_v59  ;;  %v1955_v49 = vcombine.high %v1889_v48, %v1896_v59  ;;  %v1850_v62 = vmax.f32 %v1761_v39, 0.0  ;;  %v1851_v37 = vmax.f32 %v1835_v54, 0.0  ;;  %v2077_v39 = vld [vmem:[#allocation2 + $0x38] sm:$0x7f]  ;;  %v2136_v59 = vld [vmem:[#allocation2 + $0x62] sm:$0x7f] }
 0x521   : > { %v1905_v36 = vrot.slane %v1897_v0, %v9945_v17  ;;  %v1962_v28 = vrot.slane %v1954_v12, %v9945_v17  ;;  %v7012_v19 = vpack.c.bf16 %v1846_v26, %v1845_v52  ;;  %v7013_v51 = vpack.c.bf16 %v1848_v16, %v1847_v2  ;;  %v2107_v52 = vld [vmem:[#allocation2 + $0x46] sm:$0x7f]  ;;  %v2086_v26 = vld [vmem:[#allocation2 + $0x3f] sm:$0x7f] }
 0x522   : > { %v1912_v23 = vrot.slane %v1898_v6, %v9945_v17  ;;  %v1969_v24 = vrot.slane %v1955_v49, %v9945_v17  ;;  %v2019_v47 = vpack.c.bf16 %v1851_v37, %v1851_v37  ;;  %v7014_v34 = vpack.c.bf16 %v1850_v62, %v1849_v29  ;;  %v2131_v0 = vld [vmem:[#allocation2 + $0x5b] sm:$0x7f]  ;;  %v2116_v6 = vld [vmem:[#allocation2 + $0x4d] sm:$0x7f] }
 0x523   : > { %v2036_v13 = vrot.slane %v7012_v19, %v9945_v17  ;;  %v2043_v42 = vrot.slane %v7013_v51, %v9945_v17  ;;  %v2145_v37 = vld [vmem:[#allocation2 + $0x69] sm:$0x7f]  ;;  %vm3512_vm14 = vsmask.f32 7954  ;;  %vm3515_vm2 = vsmask.f32 7958 }
 0x524   : > { %v1913_v14 = vcombine.low %v1905_v36, %v1912_v23  ;;  %v1970_v43 = vcombine.low %v1962_v28, %v1969_v24  ;;  %v1984_v22 = vcombine.high %v1905_v36, %v1912_v23  ;;  %v1999_v46 = vcombine.high %v1962_v28, %v1969_v24 }
 0x525   : > { %v2050_v5 = vrot.slane %v7014_v34, %v9945_v17  ;;  %v2057_v30 = vrot.slane %v2019_v47, %v9945_v17  ;;  %v2058_v10 = vcombine.low %v2036_v13, %v2043_v42  ;;  %v2089_v57 = vcombine.high %v2036_v13, %v2043_v42 }
 0x526   : > { %v1943_v44 = vsel %vm10021_vm8, %v1913_v14, %v1942_v45  ;;  %v1946_v53 = vshrl.u32 %v1913_v14, 16  ;;  %v1973_v4 = vsel %vm10021_vm8, %v1970_v43, %v1972_v20  ;;  %v1976_v33 = vshrl.u32 %v1970_v43, 16 }
 0x527   : > { %1944 = vst [vmem:[#allocation2] sm:$0x7f] %v1943_v44  ;;  %1974 = vst [vmem:[#allocation2 + $0xe] sm:$0x7f] %v1973_v4  ;;  %v1988_v63 = vsel %vm10021_vm8, %v1984_v22, %v1987_v3  ;;  %v1991_v32 = vshrl.u32 %v1984_v22, 16  ;;  %v2002_v58 = vsel %vm10021_vm8, %v1999_v46, %v2001_v15  ;;  %v2005_v11 = vshrl.u32 %v1999_v46, 16 }
 0x528   : > { %v1952_v31 = vsel %vm10021_vm8, %v1946_v53, %v1951_v56  ;;  %v1982_v60 = vsel %vm10021_vm8, %v1976_v33, %v1981_v7  ;;  %1989 = vst [vmem:[#allocation2 + $0x1c] sm:$0x7f] %v1988_v63  ;;  %2003 = vst [vmem:[#allocation2 + $0x2a] sm:$0x7f] %v2002_v58  ;;  %v2059_v27 = vcombine.low %v2050_v5, %v2057_v30  ;;  %vm3518_vm10 = vsmask.f32 7962 }
 0x529   : > { %v2066_v61 = vrot.slane %v2058_v10, %v9945_v17  ;;  %1953 = vst [vmem:[#allocation2 + $0x7] sm:$0x7f] %v1952_v31  ;;  %1983 = vst [vmem:[#allocation2 + $0x15] sm:$0x7f] %v1982_v60  ;;  %v1997_v35 = vsel %vm10021_vm8, %v1991_v32, %v1996_v41  ;;  %v2011_v38 = vsel %vm10021_vm8, %v2005_v11, %v2010_v25 }
 0x52a   : > { %v2090_v1 = vcombine.high %v2050_v5, %v2057_v30  ;;  %v2097_v18 = vrot.slane %v2089_v57, %v9945_v17  ;;  %1998 = vst [vmem:[#allocation2 + $0x23] sm:$0x7f] %v1997_v35  ;;  %2012 = vst [vmem:[#allocation2 + $0x31] sm:$0x7f] %v2011_v38  ;;  %v2073_v8 = vrot.slane %v2059_v27, %v9945_v17 }
 0x52b   : > { %vm3519_vm11 = vmand %vm1938_vm15, %vm3518_vm10 }
 0x52c   : > { %v2104_v21 = vrot.slane %v2090_v1, %v9945_v17  ;;  %v2074_v54 = vcombine.low %v2066_v61, %v2073_v8  ;;  %v2119_v48 = vcombine.high %v2066_v61, %v2073_v8 }
 0x52e   : > { %v2105_v2 = vcombine.low %v2097_v18, %v2104_v21  ;;  %v2134_v12 = vcombine.high %v2097_v18, %v2104_v21  ;;  %v2078_v16 = vsel %vm10021_vm8, %v2074_v54, %v2077_v39  ;;  %v2081_v29 = vshrl.u32 %v2074_v54, 16  ;;  %v3521_v61 = vld [vmem:[#allocation2] sm:$0x7f] }
 0x52f   : > { %v2123_v49 = vsel %vm10021_vm8, %v2119_v48, %v2122_v50  ;;  %v2126_v62 = vshrl.u32 %v2119_v48, 16  ;;  %2079 = vst [vmem:[#allocation2 + $0x38] sm:$0x7f] %v2078_v16 }
 0x530   : > { %v2108_v36 = vsel %vm10021_vm8, %v2105_v2, %v2107_v52  ;;  %v2111_v28 = vshrl.u32 %v2105_v2, 16  ;;  %2124 = vst [vmem:[#allocation2 + $0x54] sm:$0x7f] %v2123_v49  ;;  %v2137_v19 = vsel %vm10021_vm8, %v2134_v12, %v2136_v59  ;;  %v2140_v51 = vshrl.u32 %v2134_v12, 16 }
 0x531   : > { %v2087_v23 = vsel %vm10021_vm8, %v2081_v29, %v2086_v26  ;;  %2109 = vst [vmem:[#allocation2 + $0x46] sm:$0x7f] %v2108_v36  ;;  %v2132_v24 = vsel %vm10021_vm8, %v2126_v62, %v2131_v0  ;;  %2138 = vst [vmem:[#allocation2 + $0x62] sm:$0x7f] %v2137_v19 }
 0x532   : > { %2088 = vst [vmem:[#allocation2 + $0x3f] sm:$0x7f] %v2087_v23  ;;  %v2117_v47 = vsel %vm10021_vm8, %v2111_v28, %v2116_v6  ;;  %2133 = vst [vmem:[#allocation2 + $0x5b] sm:$0x7f] %v2132_v24  ;;  %v2146_v34 = vsel %vm10021_vm8, %v2140_v51, %v2145_v37 }
 0x533   : > { %2118 = vst [vmem:[#allocation2 + $0x4d] sm:$0x7f] %v2117_v47  ;;  %2147 = vst [vmem:[#allocation2 + $0x69] sm:$0x7f] %v2146_v34 }
 0x534   : > { %vm3513_vm8 = vmand %vm1930_vm7, %vm3512_vm14 }
 0x535   : > { %vm10109_vm4 = vmor %vm3513_vm8, %vm3511_vm0 }
 0x536   : > { %vm10114_vm7 = vmand %vm1934_vm5, %vm3515_vm2 }
 0x537   : > { %vm3517_vm5 = vmor %vm10114_vm7, %vm10109_vm4 }
 0x538   : > { %vm10134_vm12 = vmor %vm3519_vm11, %vm3517_vm5 }
 0x53a   : > { %v3702_v36 = vld [vmem:[#allocation2 + $0x69] sm:$0x7f] }
 0x57f   : > { %v3181_v45 = vpop.f32.mrf.mxu0 }
 0x580   : > { %v3182_v10 = vadd.f32 %v3181_v45, %v9951_v40 }
 0x581   : > { %v3183_v20 = vpop.f32.mrf.mxu0 }
 0x582   : > { %v3184_v5 = vadd.f32 %v3183_v20, %v9951_v40  ;;  %v3421_v11 = vmax.f32 %v3182_v10, 0.0 }
 0x583   : > { %v3187_v13 = vpop.f32.mrf.mxu0 }
 0x584   : > { %v3188_v57 = vadd.f32 %v3187_v13, %v9949_v55  ;;  %v3422_v63 = vmax.f32 %v3184_v5, 0.0 }
 0x585   : > { %v3189_v14 = vpop.f32.mrf.mxu0 }
 0x586   : > { %v3190_v4 = vadd.f32 %v3189_v14, %v9949_v55  ;;  %v3428_v31 = vmax.f32 %v3188_v57, 0.0  ;;  %v7039_v39 = vpack.c.bf16 %v3422_v63, %v3421_v11 }
 0x588   : > { %v3429_v38 = vmax.f32 %v3190_v4, 0.0  ;;  %v3458_v29 = vrot.slane %v7039_v39, %v9945_v17 }
 0x58a   : > { %v7042_v26 = vpack.c.bf16 %v3429_v38, %v3428_v31 }
 0x58c   : > { %v3603_v51 = vrot.slane %v7042_v26, %v9945_v17 }
 0x59f   : > { %v3258_v42 = vpop.f32.mrf.mxu1 }
 0x5a0   : > { %v3259_v30 = vadd.f32 %v3258_v42, %v9951_v40 }
 0x5a1   : > { %v3260_v43 = vpop.f32.mrf.mxu1 }
 0x5a2   : > { %v3261_v15 = vadd.f32 %v3260_v43, %v9951_v40  ;;  %v3423_v32 = vmax.f32 %v3259_v30, 0.0 }
 0x5a3   : > { %v3264_v3 = vpop.f32.mrf.mxu1 }
 0x5a4   : > { %v3424_v53 = vmax.f32 %v3261_v15, 0.0  ;;  %v3265_v33 = vadd.f32 %v3264_v3, %v9949_v55 }
 0x5a5   : > { %v3266_v7 = vpop.f32.mrf.mxu1 }
 0x5a6   : > { %v3267_v41 = vadd.f32 %v3266_v7, %v9949_v55  ;;  %v7040_v35 = vpack.c.bf16 %v3424_v53, %v3423_v32  ;;  %v3430_v1 = vmax.f32 %v3265_v33, 0.0  ;;  %v3525_v33 = vld [vmem:[#allocation2 + $0x7] sm:$0x7f] }
 0x5a8   : > { %v3431_v18 = vmax.f32 %v3267_v41, 0.0  ;;  %v3465_v59 = vrot.slane %v7040_v35, %v9945_v17  ;;  %v3553_v41 = vld [vmem:[#allocation2 + $0x15] sm:$0x7f]  ;;  %v3549_v35 = vld [vmem:[#allocation2 + $0xe] sm:$0x7f] }
 0x5aa   : > { %v7043_v2 = vpack.c.bf16 %v3431_v18, %v3430_v1  ;;  %v3480_v19 = vcombine.low %v3458_v29, %v3465_v59  ;;  %v3528_v47 = vcombine.high %v3458_v29, %v3465_v59  ;;  %v3650_v29 = vld [vmem:[#allocation2 + $0x3f] sm:$0x7f] }
 0x5ac   : > { %v3610_v23 = vrot.slane %v7043_v2, %v9945_v17  ;;  %v3488_v43 = vrot.slane %v3480_v19, %v9945_v17  ;;  %v3536_v46 = vrot.slane %v3528_v47, %v9945_v17  ;;  %v3674_v19 = vld [vmem:[#allocation2 + $0x46] sm:$0x7f] }
 0x5ae   : > { %v3653_v3 = vcombine.high %v3603_v51, %v3610_v23 }
 0x5b0   : > { %v3661_v4 = vrot.slane %v3653_v3, %v9945_v17 }
 0x5bf   : > { %v3335_v22 = vpop.f32.mrf.mxu0 }
 0x5c0   : > { %v3336_v60 = vadd.f32 %v3335_v22, %v9951_v40  ;;  %v3625_v22 = vcombine.low %v3603_v51, %v3610_v23 }
 0x5c1   : > { %v3337_v56 = vpop.f32.mrf.mxu0 }
 0x5c2   : > { %v3338_v25 = vadd.f32 %v3337_v56, %v9951_v40  ;;  %v3425_v52 = vmax.f32 %v3336_v60, 0.0  ;;  %v3633_v53 = vrot.slane %v3625_v22, %v9945_v17  ;;  %v3565_v60 = vld [vmem:[#allocation2 + $0x23] sm:$0x7f] }
 0x5c3   : > { %v3341_v44 = vpop.f32.mrf.mxu0 }
 0x5c4   : > { %v3426_v8 = vmax.f32 %v3338_v25, 0.0  ;;  %v3342_v21 = vadd.f32 %v3341_v44, %v9949_v55 }
 0x5c5   : > { %v3343_v27 = vpop.f32.mrf.mxu0 }
 0x5c6   : > { %v3344_v50 = vadd.f32 %v3343_v27, %v9949_v55  ;;  %v7041_v12 = vpack.c.bf16 %v3426_v8, %v3425_v52  ;;  %v3432_v6 = vmax.f32 %v3342_v21, 0.0  ;;  %v3577_v27 = vld [vmem:[#allocation2 + $0x31] sm:$0x7f] }
 0x5c8   : > { %v3433_v49 = vmax.f32 %v3344_v50, 0.0  ;;  %v3472_v34 = vrot.slane %v7041_v12, %v9945_v17  ;;  %v3561_v50 = vld [vmem:[#allocation2 + $0x1c] sm:$0x7f] }
 0x5ca   : > { %v7044_v13 = vpack.c.bf16 %v3433_v49, %v3432_v6  ;;  %v3678_v6 = vld [vmem:[#allocation2 + $0x4d] sm:$0x7f] }
 0x5cc   : > { %v3617_v7 = vrot.slane %v7044_v13, %v9945_v17  ;;  %v3698_v13 = vld [vmem:[#allocation2 + $0x62] sm:$0x7f] }
 0x5d1   : > { %v3412_v54 = vpop.f32.mrf.mxu1 }
 0x5d2   : > { %v3413_v48 = vadd.f32 %v3412_v54, %v9951_v40  ;;  %v3573_v54 = vld [vmem:[#allocation2 + $0x2a] sm:$0x7f] }
 0x5d3   : > { %v3414_v0 = vpop.f32.mrf.mxu1 }
 0x5d4   : > { %v3427_v16 = vmax.f32 %v3413_v48, 0.0 }
 0x5d5   : > { %v3417_v37 = vpop.f32.mrf.mxu1 }
 0x5d6   : > { %v3441_v40 = vpack.c.bf16 %v3427_v16, %v3427_v16  ;;  %v3418_v28 = vadd.f32 %v3417_v37, %v9949_v55 }
 0x5d7   : > { %v3419_v24 = vpop.f32.mrf.mxu1 }
 0x5d8   : > { %v3479_v45 = vrot.slane %v3441_v40, %v9945_v17  ;;  %v3434_v20 = vmax.f32 %v3418_v28, 0.0  ;;  %v3690_v40 = vld [vmem:[#allocation2 + $0x5b] sm:$0x7f] }
 0x5d9   : > { %v3646_v28 = vld [vmem:[#allocation2 + $0x38] sm:$0x7f] }
 0x5da   : > { %v3481_v55 = vcombine.low %v3472_v34, %v3479_v45  ;;  %v3529_v42 = vcombine.high %v3472_v34, %v3479_v45  ;;  %v3586_v14 = vpack.c.bf16 %v3434_v20, %v3434_v20  ;;  %v3686_v20 = vld [vmem:[#allocation2 + $0x54] sm:$0x7f] }
 0x5dc   : > { %v3495_v9 = vrot.slane %v3481_v55, %v9945_v17  ;;  %v3543_v15 = vrot.slane %v3529_v42, %v9945_v17  ;;  %v3624_v56 = vrot.slane %v3586_v14, %v9945_v17 }
 0x5de   : > { %v3496_v30 = vcombine.low %v3488_v43, %v3495_v9  ;;  %v3544_v10 = vcombine.low %v3536_v46, %v3543_v15  ;;  %v3556_v57 = vcombine.high %v3488_v43, %v3495_v9  ;;  %v3568_v44 = vcombine.high %v3536_v46, %v3543_v15 }
 0x5df   : > { %v3626_v25 = vcombine.low %v3617_v7, %v3624_v56  ;;  %v3654_v63 = vcombine.high %v3617_v7, %v3624_v56 }
 0x5e0   : > { %v3498_v32 = vshll.u32 %v3496_v30, 16  ;;  %v3526_v58 = vsel %vm10134_vm12, %v3496_v30, %v3525_v33  ;;  %v3546_v11 = vshll.u32 %v3544_v10, 16  ;;  %v3554_v31 = vsel %vm10134_vm12, %v3544_v10, %v3553_v41 }
 0x5e1   : > { %3527 = vst [vmem:[#allocation2 + $0x7] sm:$0x7f] %v3526_v58  ;;  %3555 = vst [vmem:[#allocation2 + $0x15] sm:$0x7f] %v3554_v31  ;;  %v3558_v38 = vshll.u32 %v3556_v57, 16  ;;  %v3566_v1 = vsel %vm10134_vm12, %v3556_v57, %v3565_v60  ;;  %v3570_v18 = vshll.u32 %v3568_v44, 16  ;;  %v3578_v8 = vsel %vm10134_vm12, %v3568_v44, %v3577_v27 }
 0x5e2   : > { %v3522_v39 = vsel %vm10134_vm12, %v3498_v32, %v3521_v61  ;;  %v3550_v21 = vsel %vm10134_vm12, %v3546_v11, %v3549_v35  ;;  %3567 = vst [vmem:[#allocation2 + $0x23] sm:$0x7f] %v3566_v1  ;;  %3579 = vst [vmem:[#allocation2 + $0x31] sm:$0x7f] %v3578_v8  ;;  %v3640_v52 = vrot.slane %v3626_v25, %v9945_v17 }
 0x5e3   : > { %v3668_v48 = vrot.slane %v3654_v63, %v9945_v17  ;;  %3523 = vst [vmem:[#allocation2] sm:$0x7f] %v3522_v39  ;;  %3551 = vst [vmem:[#allocation2 + $0xe] sm:$0x7f] %v3550_v21  ;;  %v3562_v59 = vsel %vm10134_vm12, %v3558_v38, %v3561_v50  ;;  %v3574_v26 = vsel %vm10134_vm12, %v3570_v18, %v3573_v54 }
 0x5e4   : > { %3563 = vst [vmem:[#allocation2 + $0x1c] sm:$0x7f] %v3562_v59  ;;  %3575 = vst [vmem:[#allocation2 + $0x2a] sm:$0x7f] %v3574_v26  ;;  %v3641_v2 = vcombine.low %v3633_v53, %v3640_v52  ;;  %v3681_v12 = vcombine.high %v3633_v53, %v3640_v52 }
 0x5e5   : > { %v3669_v0 = vcombine.low %v3661_v4, %v3668_v48  ;;  %v3693_v16 = vcombine.high %v3661_v4, %v3668_v48 }
 0x5e6   : > { %v3643_v49 = vshll.u32 %v3641_v2, 16  ;;  %v3651_v17 = vsel %vm10134_vm12, %v3641_v2, %v3650_v29  ;;  %v3683_v51 = vshll.u32 %v3681_v12, 16  ;;  %v3691_v23 = vsel %vm10134_vm12, %v3681_v12, %v3690_v40 }
 0x5e7   : > { %v3671_v62 = vshll.u32 %v3669_v0, 16  ;;  %v3679_v37 = vsel %vm10134_vm12, %v3669_v0, %v3678_v6  ;;  %3652 = vst [vmem:[#allocation2 + $0x3f] sm:$0x7f] %v3651_v17  ;;  %v3695_v24 = vshll.u32 %v3693_v16, 16  ;;  %v3703_v47 = vsel %vm10134_vm12, %v3693_v16, %v3702_v36  ;;  %3692 = vst [vmem:[#allocation2 + $0x5b] sm:$0x7f] %v3691_v23 }
 0x5e8   : > { %3680 = vst [vmem:[#allocation2 + $0x4d] sm:$0x7f] %v3679_v37  ;;  %v3647_v34 = vsel %vm10134_vm12, %v3643_v49, %v3646_v28  ;;  %3704 = vst [vmem:[#allocation2 + $0x69] sm:$0x7f] %v3703_v47  ;;  %v3687_v55 = vsel %vm10134_vm12, %v3683_v51, %v3686_v20 }
 0x5e9   : > { %v3675_v45 = vsel %vm10134_vm12, %v3671_v62, %v3674_v19  ;;  %3648 = vst [vmem:[#allocation2 + $0x38] sm:$0x7f] %v3647_v34  ;;  %v3699_v42 = vsel %vm10134_vm12, %v3695_v24, %v3698_v13  ;;  %3688 = vst [vmem:[#allocation2 + $0x54] sm:$0x7f] %v3687_v55 }
 0x5ea   : > { %3676 = vst [vmem:[#allocation2 + $0x46] sm:$0x7f] %v3675_v45  ;;  %3700 = vst [vmem:[#allocation2 + $0x62] sm:$0x7f] %v3699_v42 }
 0x5eb PF: > { %v3724_v14 = vld [vmem:[%s7862_s17 + $0x68] sm:$0xff]  ;;  %v3723_v22 = vld [vmem:[%s7862_s17 + $0x60] sm:$0xff]  ;;  %s3705_s13 = smul.u32 28, %s7711_s27  ;;  %v5064_v18 = vlaneseq  ;;  %v7620_v54 = vmov 1966171168   ;;  %p7046_p2 = scmp.ne.s32.totalorder %s7711_s27, 3 }
 0x5ec   : > { %v3756_v43 = vld [vmem:[%s7862_s17 + $0x168] sm:$0xff]  ;;  %v4184_v3 = vunpack.c.l.s8.bf16 %v3724_v14  ;;  %v4188_v46 = vunpack.c.h.s8.bf16 %v3724_v14  ;;  %v3755_v56 = vld [vmem:[%s7862_s17 + $0x160] sm:$0xff]  ;;  %v4187_v7 = vunpack.c.h.s8.bf16 %v3723_v22  ;;  %v4183_v57 = vunpack.c.l.s8.bf16 %v3723_v22 }
 0x5ed   : > { %v4248_v9 = vunpack.c.l.s8.bf16 %v3756_v43  ;;  %v4252_v15 = vunpack.c.h.s8.bf16 %v3756_v43  ;;  %v4251_v5 = vunpack.c.h.s8.bf16 %v3755_v56  ;;  %v3720_v30 = vld [vmem:[%s7862_s17 + $0x48] sm:$0xff]  ;;  %v4247_v44 = vunpack.c.l.s8.bf16 %v3755_v56  ;;  %v3719_v33 = vld [vmem:[%s7862_s17 + $0x40] sm:$0xff]  ;;  %s10191_s26 = scalar_lea.vmem [#allocation2], %s3705_s13 }
 0x5ee   : > { %v3752_v10 = vld [vmem:[%s7862_s17 + $0x148] sm:$0xff]  ;;  %5259 = vmatprep.subr.bf16.mxu0 %v4188_v46  ;;  %v4180_v53 = vunpack.c.h.s8.bf16 %v3720_v30  ;;  %v3751_v41 = vld [vmem:[%s7862_s17 + $0x140] sm:$0xff]  ;;  %v4179_v25 = vunpack.c.h.s8.bf16 %v3719_v33  ;;  %v4176_v32 = vunpack.c.l.s8.bf16 %v3720_v30  ;;  %v4175_v60 = vunpack.c.l.s8.bf16 %v3719_v33 }
 0x5ef   : > { %5300 = vmatprep.subr.bf16.mxu1 %v4252_v15  ;;  %5260 = vmatpush1.bf16.msra.mxu0 %v4187_v7  ;;  %v4244_v4 = vunpack.c.h.s8.bf16 %v3752_v10  ;;  %v4243_v63 = vunpack.c.h.s8.bf16 %v3751_v41  ;;  %v4240_v58 = vunpack.c.l.s8.bf16 %v3752_v10  ;;  %v3716_v11 = vld [vmem:[%s7862_s17 + $0x28] sm:$0xff]  ;;  %v4239_v27 = vunpack.c.l.s8.bf16 %v3751_v41  ;;  %v3715_v38 = vld [vmem:[%s7862_s17 + $0x20] sm:$0xff] }
 0x5f0   : > { %5301 = vmatpush1.bf16.msra.mxu1 %v4251_v5  ;;  %5261 = vmatprep.subr.bf16.mxu0 %v4184_v3  ;;  %v3748_v31 = vld [vmem:[%s7862_s17 + $0x128] sm:$0xff]  ;;  %v4172_v61 = vunpack.c.h.s8.bf16 %v3716_v11  ;;  %v3747_v1 = vld [vmem:[%s7862_s17 + $0x120] sm:$0xff]  ;;  %v4171_v8 = vunpack.c.h.s8.bf16 %v3715_v38  ;;  %v4168_v21 = vunpack.c.l.s8.bf16 %v3716_v11  ;;  %v5062_v52 = vunpack.c.l.s4 %v7620_v54 }
 0x5f1   : > { %5302 = vmatprep.subr.bf16.mxu1 %v4248_v9  ;;  %v4236_v35 = vunpack.c.h.s8.bf16 %v3748_v31  ;;  %v4235_v39 = vunpack.c.h.s8.bf16 %v3747_v1  ;;  %v4232_v50 = vunpack.c.l.s8.bf16 %v3748_v31  ;;  %v10187_v48 = vshrl.u32 %v5064_v18, 7  ;;  %v3712_v59 = vld [vmem:[%s7862_s17 + $0x8] sm:$0xff]  ;;  %v10194_v16 = vld [vmem:[%s10191_s26] sm:$0xff] }
 0x5f2   : > { %v3744_v26 = vld [vmem:[%s7862_s17 + $0x108] sm:$0xff]  ;;  %v5063_v2 = vunpack.c.0.s8 %v5062_v52  ;;  %v4167_v0 = vunpack.c.l.s8.bf16 %v3715_v38  ;;  %v4231_v12 = vunpack.c.l.s8.bf16 %v3747_v1  ;;  %v4164_v29 = vunpack.c.h.s8.bf16 %v3712_v59  ;;  %v3711_v49 = vld [vmem:[%s7862_s17] sm:$0xff] }
 0x5f3   : > { %5262 = vmatpush1.bf16.msra.mxu0 %v4183_v57  ;;  %v4228_v6 = vunpack.c.h.s8.bf16 %v3744_v26  ;;  %v3743_v17 = vld [vmem:[%s7862_s17 + $0x100] sm:$0xff]  ;;  %v4163_v40 = vunpack.c.h.s8.bf16 %v3711_v49  ;;  %v4160_v28 = vunpack.c.l.s8.bf16 %v3712_v59  ;;  %v4224_v19 = vunpack.c.l.s8.bf16 %v3744_v26  ;;  %v3740_v23 = vld [vmem:[%s7862_s17 + $0xe8] sm:$0xff] }
 0x5f4   : > { %5303 = vmatpush1.bf16.msra.mxu1 %v4247_v44  ;;  %5263 = vmatprep.subr.bf16.mxu0 %v4180_v53  ;;  %v10199_v62 = vsub.s32 %v5063_v2, %v10187_v48  ;;  %v4227_v36 = vunpack.c.h.s8.bf16 %v3743_v17  ;;  %v3772_v24 = vld [vmem:[%s7862_s17 + $0x1e8] sm:$0xff]  ;;  %v4159_v34 = vunpack.c.l.s8.bf16 %v3711_v49  ;;  %v4223_v45 = vunpack.c.l.s8.bf16 %v3743_v17  ;;  %v3739_v55 = vld [vmem:[%s7862_s17 + $0xe0] sm:$0xff] }
 0x5f5   : > { %5304 = vmatprep.subr.bf16.mxu1 %v4244_v4  ;;  %v4220_v20 = vunpack.c.h.s8.bf16 %v3740_v23  ;;  %v4284_v13 = vunpack.c.h.s8.bf16 %v3772_v24  ;;  %v3771_v42 = vld [vmem:[%s7862_s17 + $0x1e0] sm:$0xff]  ;;  %v4219_v43 = vunpack.c.h.s8.bf16 %v3739_v55  ;;  %v4216_v3 = vunpack.c.l.s8.bf16 %v3740_v23  ;;  %v3736_v9 = vld [vmem:[%s7862_s17 + $0xc8] sm:$0xff] }
 0x5f6   : > { %v10203_v37 = vrot.slane %v10194_v16, %v10199_v62  ;;  %v4283_v22 = vunpack.c.h.s8.bf16 %v3771_v42  ;;  %v4280_v46 = vunpack.c.l.s8.bf16 %v3772_v24  ;;  %v3768_v15 = vld [vmem:[%s7862_s17 + $0x1c8] sm:$0xff]  ;;  %v4215_v56 = vunpack.c.l.s8.bf16 %v3739_v55  ;;  %v3735_v10 = vld [vmem:[%s7862_s17 + $0xc0] sm:$0xff] }
 0x5f7   : > { %5264 = vmatpush1.bf16.msra.mxu0 %v4179_v25  ;;  %v4279_v7 = vunpack.c.l.s8.bf16 %v3771_v42  ;;  %v4212_v5 = vunpack.c.h.s8.bf16 %v3736_v9  ;;  %v4276_v30 = vunpack.c.h.s8.bf16 %v3768_v15  ;;  %v3767_v57 = vld [vmem:[%s7862_s17 + $0x1c0] sm:$0xff]  ;;  %v4211_v44 = vunpack.c.h.s8.bf16 %v3735_v10  ;;  %v3732_v41 = vld [vmem:[%s7862_s17 + $0xa8] sm:$0xff] }
 0x5f8   : > { %5305 = vmatpush1.bf16.msra.mxu1 %v4243_v63  ;;  %5265 = vmatprep.subr.bf16.mxu0 %v4176_v32  ;;  %v5075_v51 = vcombine.high %v10203_v37, %v10203_v37  ;;  %v4275_v53 = vunpack.c.h.s8.bf16 %v3767_v57  ;;  %v4208_v4 = vunpack.c.l.s8.bf16 %v3736_v9  ;;  %v4272_v33 = vunpack.c.l.s8.bf16 %v3768_v15  ;;  %v3764_v25 = vld [vmem:[%s7862_s17 + $0x1a8] sm:$0xff]  ;;  %v3731_v31 = vld [vmem:[%s7862_s17 + $0xa0] sm:$0xff] }
 0x5f9   : > { %5306 = vmatprep.subr.bf16.mxu1 %v4240_v58  ;;  %v4207_v63 = vunpack.c.l.s8.bf16 %v3735_v10  ;;  %v4271_v32 = vunpack.c.l.s8.bf16 %v3767_v57  ;;  %v4204_v58 = vunpack.c.h.s8.bf16 %v3732_v41  ;;  %v4268_v11 = vunpack.c.h.s8.bf16 %v3764_v25  ;;  %v3728_v1 = vld [vmem:[%s7862_s17 + $0x88] sm:$0xff]  ;;  %v3727_v52 = vld [vmem:[%s7862_s17 + $0x80] sm:$0xff] }
 0x5fa   : > { %v10210_v47 = vrot.slane %v5075_v51, %v10199_v62  ;;  %v4264_v38 = vunpack.c.l.s8.bf16 %v3764_v25  ;;  %v3760_v18 = vld [vmem:[%s7862_s17 + $0x188] sm:$0xff]  ;;  %v3759_v59 = vld [vmem:[%s7862_s17 + $0x180] sm:$0xff]  ;;  %v4195_v2 = vunpack.c.h.s8.bf16 %v3727_v52  ;;  %v10243_v17 = vrot.slane %v10203_v37, %v10199_v62 }
 0x5fb   : > { %5266 = vmatpush1.bf16.msra.mxu0 %v4175_v60  ;;  %v3763_v60 = vld [vmem:[%s7862_s17 + $0x1a0] sm:$0xff]  ;;  %v4260_v54 = vunpack.c.h.s8.bf16 %v3760_v18  ;;  %v3784_v55 = vld [vmem:[%s7862_s17 + $0x248] sm:$0xff] }
 0x5fc   : > { %5307 = vmatpush1.bf16.msra.mxu1 %v4239_v27  ;;  %5267 = vmatprep.subr.bf16.mxu0 %v4172_v61  ;;  %v10216_v14 = vcombine.high %v10210_v47, %v10210_v47  ;;  %v4203_v27 = vunpack.c.h.s8.bf16 %v3731_v31  ;;  %v4267_v61 = vunpack.c.h.s8.bf16 %v3763_v60  ;;  %v3787_v51 = vld [vmem:[%s7862_s17 + $0x260] sm:$0xff]  ;;  %v3816_v42 = vld [vmem:[%s7862_s17 + $0x348] sm:$0xff] }
 0x5fd   : > { %5308 = vmatprep.subr.bf16.mxu1 %v4236_v35  ;;  %5291 = vmatprep.mubr.bf16.mxu0 %v10210_v47  ;;  %v4200_v35 = vunpack.c.l.s8.bf16 %v3732_v41  ;;  %v3819_v23 = vld [vmem:[%s7862_s17 + $0x360] sm:$0xff]  ;;  %v4315_v37 = vunpack.c.h.s8.bf16 %v3787_v51  ;;  %v4372_v9 = vunpack.c.h.s8.bf16 %v3816_v42  ;;  %v4368_v10 = vunpack.c.l.s8.bf16 %v3816_v42  ;;  %v3780_v57 = vld [vmem:[%s7862_s17 + $0x228] sm:$0xff] }
 0x5fe   : > { %5332 = vmatprep.mubr.bf16.mxu1 %v10216_v14  ;;  %v3783_v15 = vld [vmem:[%s7862_s17 + $0x240] sm:$0xff] }
 0x5ff   : > { %5268 = vmatpush1.bf16.msra.mxu0 %v4171_v8  ;;  %v5060_v8 = vcombine.high %v10194_v16, %v10194_v16  ;;  %v4256_v16 = vunpack.c.l.s8.bf16 %v3760_v18  ;;  %v3779_v25 = vld [vmem:[%s7862_s17 + $0x220] sm:$0xff] }
 0x600   : > { %5309 = vmatpush1.bf16.msra.mxu1 %v4235_v39  ;;  %5269 = vmatprep.subr.bf16.mxu0 %v4168_v21  ;;  %v4199_v39 = vunpack.c.l.s8.bf16 %v3731_v31  ;;  %v4263_v21 = vunpack.c.l.s8.bf16 %v3763_v60  ;;  %v3776_v60 = vld [vmem:[%s7862_s17 + $0x208] sm:$0xff]  ;;  %v3775_v18 = vld [vmem:[%s7862_s17 + $0x200] sm:$0xff] }
 0x601   : > { %5310 = vmatprep.subr.bf16.mxu1 %v4232_v50  ;;  %v4196_v50 = vunpack.c.h.s8.bf16 %v3728_v1  ;;  %v10235_v26 = vrot.slane %v5060_v8, %v10199_v62  ;;  %v3807_v8 = vld [vmem:[%s7862_s17 + $0x300] sm:$0xff] }
 0x603   : > { %5270 = vmatpush1.bf16.msra.mxu0 %v4167_v0  ;;  %v4259_v0 = vunpack.c.h.s8.bf16 %v3759_v59  ;;  %v5076_v49 = vcombine.high %v10235_v26, %v10235_v26 }
 0x604   : > { %5311 = vmatpush1.bf16.msra.mxu1 %v4231_v12  ;;  %5271 = vmatprep.subr.bf16.mxu0 %v4164_v29  ;;  %v4192_v12 = vunpack.c.l.s8.bf16 %v3728_v1  ;;  %v3788_v29 = vld [vmem:[%s7862_s17 + $0x268] sm:$0xff] }
 0x605   : > { %5312 = vmatprep.subr.bf16.mxu1 %v4228_v6  ;;  %v3820_v6 = vld [vmem:[%s7862_s17 + $0x368] sm:$0xff]  ;;  %v10248_v24 = vrot.slane %v5076_v49, %v10199_v62 }
 0x607   : > { %5272 = vmatpush1.bf16.msra.mxu0 %v4163_v40  ;;  %v4191_v40 = vunpack.c.l.s8.bf16 %v3727_v52  ;;  %v3804_v52 = vld [vmem:[%s7862_s17 + $0x2e8] sm:$0xff] }
 0x608   : > { %5313 = vmatpush1.bf16.msra.mxu1 %v4227_v36  ;;  %5273 = vmatprep.subr.bf16.mxu0 %v4160_v28  ;;  %v4255_v36 = vunpack.c.l.s8.bf16 %v3759_v59  ;;  %v4316_v28 = vunpack.c.h.s8.bf16 %v3788_v29  ;;  %v3836_v59 = vld [vmem:[%s7862_s17 + $0x3e8] sm:$0xff] }
 0x609   : > { %5314 = vmatprep.subr.bf16.mxu1 %v4224_v19  ;;  %v4380_v19 = vunpack.c.h.s8.bf16 %v3820_v6 }
 0x60b   : > { %5274 = vmatpush1.bf16.msra.mxu0 %v4159_v34  ;;  %v10252_v34 = vcombine.high %v10243_v17, %v10243_v17 }
 0x60c   : > { %5315 = vmatpush1.bf16.msra.mxu1 %v4223_v45  ;;  %5275 = vmatprep.subr.bf16.mxu0 %v4220_v20  ;;  %v4379_v45 = vunpack.c.h.s8.bf16 %v3819_v23  ;;  %v4312_v20 = vunpack.c.l.s8.bf16 %v3788_v29  ;;  %v3803_v29 = vld [vmem:[%s7862_s17 + $0x2e0] sm:$0xff] }
 0x60d   : > { %5316 = vmatprep.subr.bf16.mxu1 %v4284_v13  ;;  %v4376_v13 = vunpack.c.l.s8.bf16 %v3820_v6  ;;  %v3835_v6 = vld [vmem:[%s7862_s17 + $0x3e0] sm:$0xff]  ;;  %v4347_v49 = vunpack.c.h.s8.bf16 %v3803_v29 }
 0x60f   : > { %5276 = vmatpush2.bf16.msra.mxu0 %v4219_v43  ;;  %v10258_v43 = vcombine.high %v10248_v24, %v10248_v24 }
 0x610   : > { %5317 = vmatpush2.bf16.msra.mxu1 %v4283_v22  ;;  %5277 = vmatprep.subr.bf16.mxu0 %v4216_v3  ;;  %v4311_v22 = vunpack.c.l.s8.bf16 %v3787_v51  ;;  %v4375_v3 = vunpack.c.l.s8.bf16 %v3819_v23  ;;  %v3832_v51 = vld [vmem:[%s7862_s17 + $0x3c8] sm:$0xff]  ;;  %v4343_v23 = vunpack.c.l.s8.bf16 %v3803_v29 }
 0x611   : > { %5318 = vmatprep.subr.bf16.mxu1 %v4280_v46  ;;  %v4308_v46 = vunpack.c.h.s8.bf16 %v3784_v55 }
 0x613   : > { %5278 = vmatpush2.bf16.msra.mxu0 %v4215_v56  ;;  %v3815_v56 = vld [vmem:[%s7862_s17 + $0x340] sm:$0xff] }
 0x614   : > { %5319 = vmatpush2.bf16.msra.mxu1 %v4279_v7  ;;  %5279 = vmatprep.subr.bf16.mxu0 %v4212_v5  ;;  %v4307_v7 = vunpack.c.h.s8.bf16 %v3783_v15  ;;  %v4371_v5 = vunpack.c.h.s8.bf16 %v3815_v56 }
 0x615   : > { %5320 = vmatprep.subr.bf16.mxu1 %v4276_v30  ;;  %v4304_v30 = vunpack.c.l.s8.bf16 %v3784_v55  ;;  %v3831_v55 = vld [vmem:[%s7862_s17 + $0x3c0] sm:$0xff] }
 0x617   : > { %5280 = vmatpush2.bf16.msra.mxu0 %v4211_v44  ;;  %v3812_v44 = vld [vmem:[%s7862_s17 + $0x328] sm:$0xff] }
 0x618   : > { %5321 = vmatpush2.bf16.msra.mxu1 %v4275_v53  ;;  %5281 = vmatprep.subr.bf16.mxu0 %v4208_v4  ;;  %v4303_v53 = vunpack.c.l.s8.bf16 %v3783_v15  ;;  %v4367_v4 = vunpack.c.l.s8.bf16 %v3815_v56  ;;  %v4364_v41 = vunpack.c.h.s8.bf16 %v3812_v44  ;;  %v4360_v31 = vunpack.c.l.s8.bf16 %v3812_v44  ;;  %v3828_v15 = vld [vmem:[%s7862_s17 + $0x3a8] sm:$0xff] }
 0x619   : > { %5322 = vmatprep.subr.bf16.mxu1 %v4272_v33  ;;  %v4300_v33 = vunpack.c.h.s8.bf16 %v3780_v57 }
 0x61b   : > { %5282 = vmatpush2.bf16.msra.mxu0 %v4207_v63  ;;  %v3811_v63 = vld [vmem:[%s7862_s17 + $0x320] sm:$0xff] }
 0x61c   : > { %5323 = vmatpush2.bf16.msra.mxu1 %v4271_v32  ;;  %5283 = vmatprep.subr.bf16.mxu0 %v4204_v58  ;;  %v4299_v32 = vunpack.c.h.s8.bf16 %v3779_v25  ;;  %v4363_v58 = vunpack.c.h.s8.bf16 %v3811_v63 }
 0x61d   : > { %5324 = vmatprep.subr.bf16.mxu1 %v4268_v11  ;;  %v4296_v11 = vunpack.c.l.s8.bf16 %v3780_v57  ;;  %v3827_v57 = vld [vmem:[%s7862_s17 + $0x3a0] sm:$0xff] }
 0x61f   : > { %5284 = vmatpush2.bf16.msra.mxu0 %v4203_v27  ;;  %v3808_v27 = vld [vmem:[%s7862_s17 + $0x308] sm:$0xff] }
 0x620   : > { %5325 = vmatpush2.bf16.msra.mxu1 %v4267_v61  ;;  %5285 = vmatprep.subr.bf16.mxu0 %v4200_v35  ;;  %v4295_v61 = vunpack.c.l.s8.bf16 %v3779_v25  ;;  %v4359_v35 = vunpack.c.l.s8.bf16 %v3811_v63  ;;  %v4356_v1 = vunpack.c.h.s8.bf16 %v3808_v27  ;;  %v3824_v25 = vld [vmem:[%s7862_s17 + $0x388] sm:$0xff] }
 0x621   : > { %5326 = vmatprep.subr.bf16.mxu1 %v4264_v38  ;;  %v4292_v38 = vunpack.c.h.s8.bf16 %v3776_v60  ;;  %v10289_v63 = vld [vmem:[%s10191_s26 + $0x8] sm:$0xff] }
 0x623   : > { %5286 = vmatpush2.bf16.msra.mxu0 %v4199_v39  ;;  %v4291_v39 = vunpack.c.h.s8.bf16 %v3775_v18 }
 0x624   : > { %5327 = vmatpush2.bf16.msra.mxu1 %v4263_v21  ;;  %5287 = vmatprep.subr.bf16.mxu0 %v4196_v50  ;;  %v4355_v21 = vunpack.c.h.s8.bf16 %v3807_v8  ;;  %v4288_v50 = vunpack.c.l.s8.bf16 %v3776_v60  ;;  %v3791_v60 = vld [vmem:[%s7862_s17 + $0x280] sm:$0xff] }
 0x625   : > { %5328 = vmatprep.subr.bf16.mxu1 %v4260_v54  ;;  %v4352_v54 = vunpack.c.l.s8.bf16 %v3808_v27  ;;  %v3823_v27 = vld [vmem:[%s7862_s17 + $0x380] sm:$0xff] }
 0x627   : > { %5288 = vmatpush2.bf16.msra.mxu0 %v4195_v2  ;;  %v4287_v2 = vunpack.c.l.s8.bf16 %v3775_v18  ;;  %v4384_v18 = vunpack.c.l.s8.bf16 %v3824_v25 }
 0x628   : > { %5329 = vmatpush2.bf16.msra.mxu1 %v4259_v0  ;;  %5289 = vmatprep.subr.bf16.mxu0 %v4192_v12  ;;  %v4351_v0 = vunpack.c.l.s8.bf16 %v3807_v8  ;;  %v4348_v12 = vunpack.c.h.s8.bf16 %v3804_v52  ;;  %v3852_v8 = vld [vmem:[%s7862_s17 + $0x468] sm:$0xff] }
 0x629   : > { %5330 = vmatprep.subr.bf16.mxu1 %v4256_v16  ;;  %v4412_v16 = vunpack.c.h.s8.bf16 %v3836_v59 }
 0x62b   : > { %5290 = vmatpush2.bf16.msra.mxu0 %v4191_v40  ;;  %v4411_v40 = vunpack.c.h.s8.bf16 %v3835_v6 }
 0x62c   : > { %5331 = vmatpush2.bf16.msra.mxu1 %v4255_v36  ;;  %5341 = vmatprep.subr.bf16.mxu0 %v4316_v28  ;;  %v4344_v36 = vunpack.c.l.s8.bf16 %v3804_v52  ;;  %v4408_v28 = vunpack.c.l.s8.bf16 %v3836_v59  ;;  %v4383_v52 = vunpack.c.l.s8.bf16 %v3823_v27  ;;  %v4444_v59 = vunpack.c.h.s8.bf16 %v3852_v8 }
 0x62d   : > { %5382 = vmatprep.subr.bf16.mxu1 %v4380_v19  ;;  %v3800_v19 = vld [vmem:[%s7862_s17 + $0x2c8] sm:$0xff] }
 0x62e   : > { %5292 = vmatmul.mubr.bf16.vlgmr.msra.gmra.mxu0 %v10243_v17 }
 0x62f   : > { %5333 = vmatmul.mubr.bf16.vlgmr.msra.gmra.mxu1 %v10252_v34  ;;  %5342 = vmatpush1.bf16.msra.mxu0 %v4315_v37  ;;  %v4407_v37 = vunpack.c.l.s8.bf16 %v3835_v6 }
 0x630   : > { %5383 = vmatpush1.bf16.msra.mxu1 %v4379_v45  ;;  %5343 = vmatprep.subr.bf16.mxu0 %v4312_v20  ;;  %v4340_v45 = vunpack.c.h.s8.bf16 %v3800_v19  ;;  %v4404_v20 = vunpack.c.h.s8.bf16 %v3832_v51 }
 0x631   : > { %5384 = vmatprep.subr.bf16.mxu1 %v4376_v13  ;;  %5373 = vmatprep.mubr.bf16.mxu0 %v10248_v24  ;;  %v3799_v13 = vld [vmem:[%s7862_s17 + $0x2c0] sm:$0xff] }
 0x632   : > { %5414 = vmatprep.mubr.bf16.mxu1 %v10258_v43  ;;  %v4339_v42 = vunpack.c.h.s8.bf16 %v3799_v13  ;;  %v4335_v56 = vunpack.c.l.s8.bf16 %v3799_v13  ;;  %v3879_v13 = vld [vmem:[%s7862_s17 + $0x540] sm:$0xff] }
 0x633   : > { %5344 = vmatpush1.bf16.msra.mxu0 %v4311_v22  ;;  %v4403_v22 = vunpack.c.h.s8.bf16 %v3831_v55 }
 0x634   : > { %5385 = vmatpush1.bf16.msra.mxu1 %v4375_v3  ;;  %5345 = vmatprep.subr.bf16.mxu0 %v4308_v46  ;;  %v4336_v3 = vunpack.c.l.s8.bf16 %v3800_v19  ;;  %v4400_v46 = vunpack.c.l.s8.bf16 %v3832_v51 }
 0x635   : > { %5386 = vmatprep.subr.bf16.mxu1 %v4372_v9  ;;  %v3796_v9 = vld [vmem:[%s7862_s17 + $0x2a8] sm:$0xff] }
 0x637   : > { %5346 = vmatpush1.bf16.msra.mxu0 %v4307_v7  ;;  %v4399_v7 = vunpack.c.l.s8.bf16 %v3831_v55 }
 0x638   : > { %5387 = vmatpush1.bf16.msra.mxu1 %v4371_v5  ;;  %5347 = vmatprep.subr.bf16.mxu0 %v4304_v30  ;;  %v4332_v5 = vunpack.c.h.s8.bf16 %v3796_v9  ;;  %v4396_v30 = vunpack.c.h.s8.bf16 %v3828_v15 }
 0x639   : > { %5388 = vmatprep.subr.bf16.mxu1 %v4368_v10  ;;  %v3795_v10 = vld [vmem:[%s7862_s17 + $0x2a0] sm:$0xff] }
 0x63a   : > { %v4331_v44 = vunpack.c.h.s8.bf16 %v3795_v10 }
 0x63b   : > { %5348 = vmatpush1.bf16.msra.mxu0 %v4303_v53  ;;  %v4395_v53 = vunpack.c.h.s8.bf16 %v3827_v57 }
 0x63c   : > { %5389 = vmatpush1.bf16.msra.mxu1 %v4367_v4  ;;  %5349 = vmatprep.subr.bf16.mxu0 %v4300_v33  ;;  %v4328_v4 = vunpack.c.l.s8.bf16 %v3796_v9  ;;  %v4392_v33 = vunpack.c.l.s8.bf16 %v3828_v15  ;;  %v3876_v9 = vld [vmem:[%s7862_s17 + $0x528] sm:$0xff] }
 0x63d   : > { %5390 = vmatprep.subr.bf16.mxu1 %v4364_v41  ;;  %v3792_v41 = vld [vmem:[%s7862_s17 + $0x288] sm:$0xff] }
 0x63f   : > { %5350 = vmatpush1.bf16.msra.mxu0 %v4299_v32  ;;  %v4327_v32 = vunpack.c.l.s8.bf16 %v3795_v10  ;;  %v3875_v10 = vld [vmem:[%s7862_s17 + $0x520] sm:$0xff] }
 0x640   : > { %5391 = vmatpush1.bf16.msra.mxu1 %v4363_v58  ;;  %5351 = vmatprep.subr.bf16.mxu0 %v4296_v11  ;;  %v4391_v58 = vunpack.c.l.s8.bf16 %v3827_v57  ;;  %v4324_v11 = vunpack.c.h.s8.bf16 %v3792_v41 }
 0x641   : > { %5392 = vmatprep.subr.bf16.mxu1 %v4360_v31  ;;  %v4388_v31 = vunpack.c.h.s8.bf16 %v3824_v25 }
 0x643   : > { %5352 = vmatpush1.bf16.msra.mxu0 %v4295_v61  ;;  %v10295_v61 = vrot.slane %v10289_v63, %v10199_v62 }
 0x644   : > { %5393 = vmatpush1.bf16.msra.mxu1 %v4359_v35  ;;  %5353 = vmatprep.subr.bf16.mxu0 %v4292_v38  ;;  %v4323_v35 = vunpack.c.h.s8.bf16 %v3791_v60  ;;  %v4387_v38 = vunpack.c.h.s8.bf16 %v3823_v27 }
 0x645   : > { %5394 = vmatprep.subr.bf16.mxu1 %v4356_v1  ;;  %v4320_v1 = vunpack.c.l.s8.bf16 %v3792_v41  ;;  %v3872_v41 = vld [vmem:[%s7862_s17 + $0x508] sm:$0xff] }
 0x647   : > { %5354 = vmatpush1.bf16.msra.mxu0 %v4291_v39  ;;  %v3884_v39 = vld [vmem:[%s7862_s17 + $0x568] sm:$0xff] }
 0x648   : > { %5395 = vmatpush1.bf16.msra.mxu1 %v4355_v21  ;;  %5355 = vmatprep.subr.bf16.mxu0 %v4288_v50  ;;  %v5124_v21 = vcombine.high %v10295_v61, %v10295_v61  ;;  %v10303_v50 = vrot.slane %v10235_v26, %v10199_v62 }
 0x649   : > { %5396 = vmatprep.subr.bf16.mxu1 %v4352_v54  ;;  %v4319_v54 = vunpack.c.l.s8.bf16 %v3791_v60  ;;  %v3871_v60 = vld [vmem:[%s7862_s17 + $0x500] sm:$0xff] }
 0x64a   : > { %v10312_v29 = vcombine.high %v10303_v50, %v10303_v50 }
 0x64b   : > { %5356 = vmatpush1.bf16.msra.mxu0 %v4287_v2  ;;  %v4508_v2 = vunpack.c.h.s8.bf16 %v3884_v39 }
 0x64c   : > { %5397 = vmatpush1.bf16.msra.mxu1 %v4351_v0  ;;  %5357 = vmatprep.subr.bf16.mxu0 %v4348_v12  ;;  %v3851_v0 = vld [vmem:[%s7862_s17 + $0x460] sm:$0xff] }
 0x64d   : > { %5398 = vmatprep.subr.bf16.mxu1 %v4412_v16  ;;  %v3883_v12 = vld [vmem:[%s7862_s17 + $0x560] sm:$0xff]  ;;  %v10308_v16 = vrot.slane %v5124_v21, %v10199_v62  ;;  %v4443_v26 = vunpack.c.h.s8.bf16 %v3851_v0  ;;  %v4439_v51 = vunpack.c.l.s8.bf16 %v3851_v0  ;;  %v4479_v21 = vunpack.c.l.s8.bf16 %v3871_v60 }
 0x64e   : > { %v4507_v6 = vunpack.c.h.s8.bf16 %v3883_v12 }
 0x64f   : > { %5358 = vmatpush2.bf16.msra.mxu0 %v4347_v49  ;;  %v4440_v49 = vunpack.c.l.s8.bf16 %v3852_v8  ;;  %v10318_v19 = vcombine.high %v10308_v16, %v10308_v16  ;;  %v3900_v8 = vld [vmem:[%s7862_s17 + $0x5e8] sm:$0xff] }
 0x650   : > { %5399 = vmatpush2.bf16.msra.mxu1 %v4411_v40  ;;  %5359 = vmatprep.subr.bf16.mxu0 %v4344_v36  ;;  %v4504_v40 = vunpack.c.l.s8.bf16 %v3884_v39  ;;  %v3848_v36 = vld [vmem:[%s7862_s17 + $0x448] sm:$0xff] }
 0x651   : > { %5400 = vmatprep.subr.bf16.mxu1 %v4408_v28  ;;  %v3880_v28 = vld [vmem:[%s7862_s17 + $0x548] sm:$0xff] }
 0x653   : > { %5360 = vmatpush2.bf16.msra.mxu0 %v4343_v23  ;;  %v4503_v23 = vunpack.c.l.s8.bf16 %v3883_v12 }
 0x654   : > { %5401 = vmatpush2.bf16.msra.mxu1 %v4407_v37  ;;  %5361 = vmatprep.subr.bf16.mxu0 %v4340_v45  ;;  %v4436_v37 = vunpack.c.h.s8.bf16 %v3848_v36  ;;  %v4500_v45 = vunpack.c.h.s8.bf16 %v3880_v28 }
 0x655   : > { %5402 = vmatprep.subr.bf16.mxu1 %v4404_v20  ;;  %v3847_v20 = vld [vmem:[%s7862_s17 + $0x440] sm:$0xff] }
 0x656   : > { %v4435_v55 = vunpack.c.h.s8.bf16 %v3847_v20  ;;  %v4431_v15 = vunpack.c.l.s8.bf16 %v3847_v20 }
 0x657   : > { %5362 = vmatpush2.bf16.msra.mxu0 %v4339_v42  ;;  %v4499_v42 = vunpack.c.h.s8.bf16 %v3879_v13 }
 0x658   : > { %5403 = vmatpush2.bf16.msra.mxu1 %v4403_v22  ;;  %5363 = vmatprep.subr.bf16.mxu0 %v4336_v3  ;;  %v4432_v22 = vunpack.c.l.s8.bf16 %v3848_v36  ;;  %v4496_v3 = vunpack.c.l.s8.bf16 %v3880_v28 }
 0x659   : > { %5404 = vmatprep.subr.bf16.mxu1 %v4400_v46  ;;  %v3844_v46 = vld [vmem:[%s7862_s17 + $0x428] sm:$0xff] }
 0x65b   : > { %5364 = vmatpush2.bf16.msra.mxu0 %v4335_v56  ;;  %v4495_v56 = vunpack.c.l.s8.bf16 %v3879_v13 }
 0x65c   : > { %5405 = vmatpush2.bf16.msra.mxu1 %v4399_v7  ;;  %5365 = vmatprep.subr.bf16.mxu0 %v4332_v5  ;;  %v4428_v7 = vunpack.c.h.s8.bf16 %v3844_v46  ;;  %v4492_v5 = vunpack.c.h.s8.bf16 %v3876_v9 }
 0x65d   : > { %5406 = vmatprep.subr.bf16.mxu1 %v4396_v30  ;;  %v3843_v30 = vld [vmem:[%s7862_s17 + $0x420] sm:$0xff] }
 0x65e   : > { %v4427_v57 = vunpack.c.h.s8.bf16 %v3843_v30  ;;  %v4423_v25 = vunpack.c.l.s8.bf16 %v3843_v30 }
 0x65f   : > { %5366 = vmatpush2.bf16.msra.mxu0 %v4331_v44  ;;  %v4491_v44 = vunpack.c.h.s8.bf16 %v3875_v10 }
 0x660   : > { %5407 = vmatpush2.bf16.msra.mxu1 %v4395_v53  ;;  %5367 = vmatprep.subr.bf16.mxu0 %v4328_v4  ;;  %v4424_v53 = vunpack.c.l.s8.bf16 %v3844_v46  ;;  %v4488_v4 = vunpack.c.l.s8.bf16 %v3876_v9 }
 0x661   : > { %5408 = vmatprep.subr.bf16.mxu1 %v4392_v33  ;;  %v3840_v33 = vld [vmem:[%s7862_s17 + $0x408] sm:$0xff] }
 0x663   : > { %5368 = vmatpush2.bf16.msra.mxu0 %v4327_v32  ;;  %v4487_v32 = vunpack.c.l.s8.bf16 %v3875_v10 }
 0x664   : > { %5409 = vmatpush2.bf16.msra.mxu1 %v4391_v58  ;;  %5369 = vmatprep.subr.bf16.mxu0 %v4324_v11  ;;  %v4420_v58 = vunpack.c.h.s8.bf16 %v3840_v33  ;;  %v4484_v11 = vunpack.c.h.s8.bf16 %v3872_v41 }
 0x665   : > { %5410 = vmatprep.subr.bf16.mxu1 %v4388_v31  ;;  %v3839_v31 = vld [vmem:[%s7862_s17 + $0x400] sm:$0xff] }
 0x666   : > { %v4419_v27 = vunpack.c.h.s8.bf16 %v3839_v31  ;;  %v4415_v39 = vunpack.c.l.s8.bf16 %v3839_v31  ;;  %v3887_v31 = vld [vmem:[%s7862_s17 + $0x580] sm:$0xff] }
 0x667   : > { %5370 = vmatpush2.bf16.msra.mxu0 %v4323_v35  ;;  %v4483_v35 = vunpack.c.h.s8.bf16 %v3871_v60 }
 0x668   : > { %5411 = vmatpush2.bf16.msra.mxu1 %v4387_v38  ;;  %5371 = vmatprep.subr.bf16.mxu0 %v4320_v1  ;;  %v4416_v38 = vunpack.c.l.s8.bf16 %v3840_v33  ;;  %v4480_v1 = vunpack.c.l.s8.bf16 %v3872_v41  ;;  %v5109_v33 = vcombine.high %v10289_v63, %v10289_v63 }
 0x669   : > { %5412 = vmatprep.subr.bf16.mxu1 %v4384_v18  ;;  %v3868_v18 = vld [vmem:[%s7862_s17 + $0x4e8] sm:$0xff] }
 0x66a   : > { %v10353_v60 = vrot.slane %v5109_v33, %v10199_v62 }
 0x66b   : > { %5372 = vmatpush2.bf16.msra.mxu0 %v4319_v54  ;;  %v4476_v54 = vunpack.c.h.s8.bf16 %v3868_v18 }
 0x66c   : > { %5413 = vmatpush2.bf16.msra.mxu1 %v4383_v52  ;;  %5423 = vmatprep.subr.bf16.mxu0 %v4444_v59  ;;  %v4540_v52 = vunpack.c.h.s8.bf16 %v3900_v8  ;;  %v3867_v59 = vld [vmem:[%s7862_s17 + $0x4e0] sm:$0xff] }
 0x66d   : > { %5464 = vmatprep.subr.bf16.mxu1 %v4508_v2  ;;  %v3899_v2 = vld [vmem:[%s7862_s17 + $0x5e0] sm:$0xff]  ;;  %v4475_v0 = vunpack.c.h.s8.bf16 %v3867_v59  ;;  %v4471_v36 = vunpack.c.l.s8.bf16 %v3867_v59 }
 0x66e   : > { %5374 = vmatmul.mubr.bf16.vlgmr.msra.gmra.mxu0 %v10303_v50  ;;  %v4539_v12 = vunpack.c.h.s8.bf16 %v3899_v2  ;;  %v4535_v28 = vunpack.c.l.s8.bf16 %v3899_v2  ;;  %v3915_v2 = vld [vmem:[%s7862_s17 + $0x660] sm:$0xff] }
 0x66f   : > { %5415 = vmatmul.mubr.bf16.vlgmr.msra.gmra.mxu1 %v10312_v29  ;;  %5424 = vmatpush1.bf16.msra.mxu0 %v4443_v26  ;;  %v4472_v26 = vunpack.c.l.s8.bf16 %v3868_v18  ;;  %v3948_v18 = vld [vmem:[%s7862_s17 + $0x768] sm:$0xff] }
 0x670   : > { %5465 = vmatpush1.bf16.msra.mxu1 %v4507_v6  ;;  %5425 = vmatprep.subr.bf16.mxu0 %v4440_v49  ;;  %v4536_v6 = vunpack.c.l.s8.bf16 %v3900_v8  ;;  %v3864_v49 = vld [vmem:[%s7862_s17 + $0x4c8] sm:$0xff]  ;;  %v5125_v8 = vcombine.high %v10353_v60, %v10353_v60  ;;  %v4636_v59 = vunpack.c.h.s8.bf16 %v3948_v18 }
 0x671   : > { %5466 = vmatprep.subr.bf16.mxu1 %v4504_v40  ;;  %5455 = vmatprep.mubr.bf16.mxu0 %v10308_v16  ;;  %v3896_v40 = vld [vmem:[%s7862_s17 + $0x5c8] sm:$0xff] }
 0x672   : > { %5496 = vmatprep.mubr.bf16.mxu1 %v10318_v19 }
 0x673   : > { %5426 = vmatpush1.bf16.msra.mxu0 %v4439_v51  ;;  %v4468_v51 = vunpack.c.h.s8.bf16 %v3864_v49 }
 0x674   : > { %5467 = vmatpush1.bf16.msra.mxu1 %v4503_v23  ;;  %5427 = vmatprep.subr.bf16.mxu0 %v4436_v37  ;;  %v4532_v23 = vunpack.c.h.s8.bf16 %v3896_v40  ;;  %v3863_v37 = vld [vmem:[%s7862_s17 + $0x4c0] sm:$0xff] }
 0x675   : > { %5468 = vmatprep.subr.bf16.mxu1 %v4500_v45  ;;  %v3895_v45 = vld [vmem:[%s7862_s17 + $0x5c0] sm:$0xff]  ;;  %v4467_v20 = vunpack.c.h.s8.bf16 %v3863_v37  ;;  %v4463_v46 = vunpack.c.l.s8.bf16 %v3863_v37 }
 0x676   : > { %v4531_v13 = vunpack.c.h.s8.bf16 %v3895_v45  ;;  %v4527_v9 = vunpack.c.l.s8.bf16 %v3895_v45 }
 0x677   : > { %5428 = vmatpush1.bf16.msra.mxu0 %v4435_v55  ;;  %v4464_v55 = vunpack.c.l.s8.bf16 %v3864_v49 }
 0x678   : > { %5469 = vmatpush1.bf16.msra.mxu1 %v4499_v42  ;;  %5429 = vmatprep.subr.bf16.mxu0 %v4432_v22  ;;  %v4528_v42 = vunpack.c.l.s8.bf16 %v3896_v40  ;;  %v3860_v22 = vld [vmem:[%s7862_s17 + $0x4a8] sm:$0xff]  ;;  %v4632_v40 = vunpack.c.l.s8.bf16 %v3948_v18 }
 0x679   : > { %5470 = vmatprep.subr.bf16.mxu1 %v4496_v3  ;;  %v3892_v3 = vld [vmem:[%s7862_s17 + $0x5a8] sm:$0xff] }
 0x67b   : > { %5430 = vmatpush1.bf16.msra.mxu0 %v4431_v15  ;;  %v4460_v15 = vunpack.c.h.s8.bf16 %v3860_v22 }
 0x67c   : > { %5471 = vmatpush1.bf16.msra.mxu1 %v4495_v56  ;;  %5431 = vmatprep.subr.bf16.mxu0 %v4428_v7  ;;  %v4524_v56 = vunpack.c.h.s8.bf16 %v3892_v3  ;;  %v3859_v7 = vld [vmem:[%s7862_s17 + $0x4a0] sm:$0xff] }
 0x67d   : > { %5472 = vmatprep.subr.bf16.mxu1 %v4492_v5  ;;  %v3891_v5 = vld [vmem:[%s7862_s17 + $0x5a0] sm:$0xff]  ;;  %v4459_v30 = vunpack.c.h.s8.bf16 %v3859_v7  ;;  %v4455_v41 = vunpack.c.l.s8.bf16 %v3859_v7 }
 0x67e   : > { %v4523_v10 = vunpack.c.h.s8.bf16 %v3891_v5 }
 0x67f   : > { %5432 = vmatpush1.bf16.msra.mxu0 %v4427_v57  ;;  %v4456_v57 = vunpack.c.l.s8.bf16 %v3860_v22 }
 0x680   : > { %5473 = vmatpush1.bf16.msra.mxu1 %v4491_v44  ;;  %5433 = vmatprep.subr.bf16.mxu0 %v4424_v53  ;;  %v4520_v44 = vunpack.c.l.s8.bf16 %v3892_v3  ;;  %v3856_v53 = vld [vmem:[%s7862_s17 + $0x488] sm:$0xff] }
 0x681   : > { %5474 = vmatprep.subr.bf16.mxu1 %v4488_v4  ;;  %v3888_v4 = vld [vmem:[%s7862_s17 + $0x588] sm:$0xff]  ;;  %v4448_v63 = vunpack.c.l.s8.bf16 %v3856_v53 }
 0x683   : > { %5434 = vmatpush1.bf16.msra.mxu0 %v4423_v25  ;;  %v4519_v25 = vunpack.c.l.s8.bf16 %v3891_v5 }
 0x684   : > { %5475 = vmatpush1.bf16.msra.mxu1 %v4487_v32  ;;  %5435 = vmatprep.subr.bf16.mxu0 %v4420_v58  ;;  %v4452_v32 = vunpack.c.h.s8.bf16 %v3856_v53  ;;  %v4516_v58 = vunpack.c.h.s8.bf16 %v3888_v4 }
 0x685   : > { %5476 = vmatprep.subr.bf16.mxu1 %v4484_v11  ;;  %v3855_v11 = vld [vmem:[%s7862_s17 + $0x480] sm:$0xff] }
 0x687   : > { %5436 = vmatpush1.bf16.msra.mxu0 %v4419_v27  ;;  %v4451_v27 = vunpack.c.h.s8.bf16 %v3855_v11 }
 0x688   : > { %5477 = vmatpush1.bf16.msra.mxu1 %v4483_v35  ;;  %5437 = vmatprep.subr.bf16.mxu0 %v4416_v38  ;;  %v4515_v35 = vunpack.c.h.s8.bf16 %v3887_v31  ;;  %v4512_v38 = vunpack.c.l.s8.bf16 %v3888_v4 }
 0x689   : > { %5478 = vmatprep.subr.bf16.mxu1 %v4480_v1  ;;  %v3916_v1 = vld [vmem:[%s7862_s17 + $0x668] sm:$0xff] }
 0x68a   : > { %v4568_v49 = vunpack.c.l.s8.bf16 %v3916_v1 }
 0x68b   : > { %5438 = vmatpush1.bf16.msra.mxu0 %v4415_v39  ;;  %v10361_v39 = vrot.slane %v10295_v61, %v10199_v62  ;;  %v4571_v61 = vunpack.c.h.s8.bf16 %v3915_v2 }
 0x68c   : > { %5479 = vmatpush1.bf16.msra.mxu1 %v4479_v21  ;;  %5439 = vmatprep.subr.bf16.mxu0 %v4476_v54  ;;  %v4447_v21 = vunpack.c.l.s8.bf16 %v3855_v11  ;;  %v4511_v54 = vunpack.c.l.s8.bf16 %v3887_v31 }
 0x68d   : > { %5480 = vmatprep.subr.bf16.mxu1 %v4540_v52  ;;  %v4572_v52 = vunpack.c.h.s8.bf16 %v3916_v1 }
 0x68f   : > { %5440 = vmatpush2.bf16.msra.mxu0 %v4475_v0  ;;  %v3947_v0 = vld [vmem:[%s7862_s17 + $0x760] sm:$0xff] }
 0x690   : > { %5481 = vmatpush2.bf16.msra.mxu1 %v4539_v12  ;;  %5441 = vmatprep.subr.bf16.mxu0 %v4472_v26  ;;  %v10366_v12 = vrot.slane %v5125_v8, %v10199_v62  ;;  %v10370_v26 = vcombine.high %v10361_v39, %v10361_v39  ;;  %v4631_v37 = vunpack.c.l.s8.bf16 %v3947_v0  ;;  %v3932_v8 = vld [vmem:[%s7862_s17 + $0x6e8] sm:$0xff] }
 0x691   : > { %5482 = vmatprep.subr.bf16.mxu1 %v4536_v6  ;;  %v4635_v6 = vunpack.c.h.s8.bf16 %v3947_v0  ;;  %v3931_v0 = vld [vmem:[%s7862_s17 + $0x6e0] sm:$0xff] }
 0x693   : > { %5442 = vmatpush2.bf16.msra.mxu0 %v4471_v36  ;;  %v3912_v36 = vld [vmem:[%s7862_s17 + $0x648] sm:$0xff] }
 0x694   : > { %5483 = vmatpush2.bf16.msra.mxu1 %v4535_v28  ;;  %5443 = vmatprep.subr.bf16.mxu0 %v4468_v51  ;;  %v3944_v28 = vld [vmem:[%s7862_s17 + $0x748] sm:$0xff]  ;;  %v10376_v51 = vcombine.high %v10366_v12, %v10366_v12  ;;  %v4564_v45 = vunpack.c.h.s8.bf16 %v3912_v36  ;;  %v4560_v3 = vunpack.c.l.s8.bf16 %v3912_v36 }
 0x695   : > { %5484 = vmatprep.subr.bf16.mxu1 %v4532_v23  ;;  %v4567_v23 = vunpack.c.l.s8.bf16 %v3915_v2 }
 0x697   : > { %5444 = vmatpush2.bf16.msra.mxu0 %v4467_v20  ;;  %v4628_v20 = vunpack.c.h.s8.bf16 %v3944_v28 }
 0x698   : > { %5485 = vmatpush2.bf16.msra.mxu1 %v4531_v13  ;;  %5445 = vmatprep.subr.bf16.mxu0 %v4464_v55  ;;  %v3911_v13 = vld [vmem:[%s7862_s17 + $0x640] sm:$0xff] }
 0x699   : > { %5486 = vmatprep.subr.bf16.mxu1 %v4528_v42  ;;  %v3943_v55 = vld [vmem:[%s7862_s17 + $0x740] sm:$0xff]  ;;  %v4563_v42 = vunpack.c.h.s8.bf16 %v3911_v13 }
 0x69a   : > { %v4627_v22 = vunpack.c.h.s8.bf16 %v3943_v55  ;;  %v4623_v7 = vunpack.c.l.s8.bf16 %v3943_v55  ;;  %v3927_v55 = vld [vmem:[%s7862_s17 + $0x6c0] sm:$0xff] }
 0x69b   : > { %5446 = vmatpush2.bf16.msra.mxu0 %v4463_v46  ;;  %v4624_v46 = vunpack.c.l.s8.bf16 %v3944_v28  ;;  %v3928_v28 = vld [vmem:[%s7862_s17 + $0x6c8] sm:$0xff] }
 0x69c   : > { %5487 = vmatpush2.bf16.msra.mxu1 %v4527_v9  ;;  %5447 = vmatprep.subr.bf16.mxu0 %v4460_v15  ;;  %v3908_v9 = vld [vmem:[%s7862_s17 + $0x628] sm:$0xff] }
 0x69d   : > { %5488 = vmatprep.subr.bf16.mxu1 %v4524_v56  ;;  %v3940_v15 = vld [vmem:[%s7862_s17 + $0x728] sm:$0xff]  ;;  %v4559_v56 = vunpack.c.l.s8.bf16 %v3911_v13  ;;  %v4556_v5 = vunpack.c.h.s8.bf16 %v3908_v9  ;;  %v4552_v4 = vunpack.c.l.s8.bf16 %v3908_v9 }
 0x69e   : > { %v4616_v33 = vunpack.c.l.s8.bf16 %v3940_v15 }
 0x69f   : > { %5448 = vmatpush2.bf16.msra.mxu0 %v4459_v30  ;;  %v4620_v30 = vunpack.c.h.s8.bf16 %v3940_v15  ;;  %v3924_v15 = vld [vmem:[%s7862_s17 + $0x6a8] sm:$0xff] }
 0x6a0   : > { %5489 = vmatpush2.bf16.msra.mxu1 %v4523_v10  ;;  %5449 = vmatprep.subr.bf16.mxu0 %v4456_v57  ;;  %v3907_v10 = vld [vmem:[%s7862_s17 + $0x620] sm:$0xff] }
 0x6a1   : > { %5490 = vmatprep.subr.bf16.mxu1 %v4520_v44  ;;  %v3939_v57 = vld [vmem:[%s7862_s17 + $0x720] sm:$0xff]  ;;  %v4555_v44 = vunpack.c.h.s8.bf16 %v3907_v10 }
 0x6a2   : > { %v4619_v53 = vunpack.c.h.s8.bf16 %v3939_v57 }
 0x6a3   : > { %5450 = vmatpush2.bf16.msra.mxu0 %v4455_v41  ;;  %v3904_v41 = vld [vmem:[%s7862_s17 + $0x608] sm:$0xff] }
 0x6a4   : > { %5491 = vmatpush2.bf16.msra.mxu1 %v4519_v25  ;;  %5451 = vmatprep.subr.bf16.mxu0 %v4452_v32  ;;  %v3936_v25 = vld [vmem:[%s7862_s17 + $0x708] sm:$0xff]  ;;  %v4551_v32 = vunpack.c.l.s8.bf16 %v3907_v10  ;;  %v4548_v11 = vunpack.c.h.s8.bf16 %v3904_v41  ;;  %v4544_v1 = vunpack.c.l.s8.bf16 %v3904_v41 }
 0x6a5   : > { %5492 = vmatprep.subr.bf16.mxu1 %v4516_v58  ;;  %v4615_v58 = vunpack.c.l.s8.bf16 %v3939_v57  ;;  %v4612_v31 = vunpack.c.h.s8.bf16 %v3936_v25  ;;  %v4608_v18 = vunpack.c.l.s8.bf16 %v3936_v25  ;;  %v3923_v57 = vld [vmem:[%s7862_s17 + $0x6a0] sm:$0xff]  ;;  %v3920_v25 = vld [vmem:[%s7862_s17 + $0x688] sm:$0xff] }
 0x6a7   : > { %5452 = vmatpush2.bf16.msra.mxu0 %v4451_v27  ;;  %v3903_v27 = vld [vmem:[%s7862_s17 + $0x600] sm:$0xff] }
 0x6a8   : > { %5493 = vmatpush2.bf16.msra.mxu1 %v4515_v35  ;;  %5453 = vmatprep.subr.bf16.mxu0 %v4448_v63  ;;  %v3935_v35 = vld [vmem:[%s7862_s17 + $0x700] sm:$0xff]  ;;  %v4547_v63 = vunpack.c.h.s8.bf16 %v3903_v27 }
 0x6a9   : > { %5494 = vmatprep.subr.bf16.mxu1 %v4512_v38  ;;  %v4611_v38 = vunpack.c.h.s8.bf16 %v3935_v35 }
 0x6ab   : > { %5454 = vmatpush2.bf16.msra.mxu0 %v4447_v21  ;;  %v3964_v21 = vld [vmem:[%s7862_s17 + $0x7e8] sm:$0xff] }
 0x6ac   : > { %5495 = vmatpush2.bf16.msra.mxu1 %v4511_v54  ;;  %5505 = vmatprep.subr.bf16.mxu0 %v4572_v52  ;;  %v4543_v54 = vunpack.c.l.s8.bf16 %v3903_v27  ;;  %v4607_v52 = vunpack.c.l.s8.bf16 %v3935_v35  ;;  %v4668_v2 = vunpack.c.h.s8.bf16 %v3964_v21  ;;  %v4664_v36 = vunpack.c.l.s8.bf16 %v3964_v21 }
 0x6ad   : > { %5546 = vmatprep.subr.bf16.mxu1 %v4636_v59  ;;  %v4604_v59 = vunpack.c.h.s8.bf16 %v3932_v8  ;;  %v4580_v27 = vunpack.c.h.s8.bf16 %v3920_v25  ;;  %v4576_v21 = vunpack.c.l.s8.bf16 %v3920_v25 }
 0x6ae   : > { %5456 = vmatmul.mubr.bf16.vlgmr.msra.gmra.mxu0 %v10361_v39 }
 0x6af   : > { %5497 = vmatmul.mubr.bf16.vlgmr.msra.gmra.mxu1 %v10370_v26  ;;  %5506 = vmatpush1.bf16.msra.mxu0 %v4571_v61  ;;  %v3963_v61 = vld [vmem:[%s7862_s17 + $0x7e0] sm:$0xff] }
 0x6b0   : > { %5547 = vmatpush1.bf16.msra.mxu1 %v4635_v6  ;;  %5507 = vmatprep.subr.bf16.mxu0 %v4568_v49  ;;  %v4603_v6 = vunpack.c.h.s8.bf16 %v3931_v0  ;;  %v4667_v49 = vunpack.c.h.s8.bf16 %v3963_v61 }
 0x6b1   : > { %5548 = vmatprep.subr.bf16.mxu1 %v4632_v40  ;;  %5537 = vmatprep.mubr.bf16.mxu0 %v10366_v12  ;;  %v4600_v40 = vunpack.c.l.s8.bf16 %v3932_v8 }
 0x6b2   : > { %5578 = vmatprep.mubr.bf16.mxu1 %v10376_v51 }
 0x6b3   : > { %5508 = vmatpush1.bf16.msra.mxu0 %v4567_v23  ;;  %v3960_v23 = vld [vmem:[%s7862_s17 + $0x7c8] sm:$0xff] }
 0x6b4   : > { %5549 = vmatpush1.bf16.msra.mxu1 %v4631_v37  ;;  %5509 = vmatprep.subr.bf16.mxu0 %v4564_v45  ;;  %v4599_v37 = vunpack.c.l.s8.bf16 %v3931_v0  ;;  %v4663_v45 = vunpack.c.l.s8.bf16 %v3963_v61  ;;  %v4660_v13 = vunpack.c.h.s8.bf16 %v3960_v23  ;;  %v4656_v9 = vunpack.c.l.s8.bf16 %v3960_v23 }
 0x6b5   : > { %5550 = vmatprep.subr.bf16.mxu1 %v4628_v20  ;;  %v4596_v20 = vunpack.c.h.s8.bf16 %v3928_v28  ;;  %v10421_v0 = vrot.slane %v10353_v60, %v10199_v62 }
 0x6b7   : > { %5510 = vmatpush1.bf16.msra.mxu0 %v4563_v42  ;;  %v3959_v42 = vld [vmem:[%s7862_s17 + $0x7c0] sm:$0xff] }
 0x6b8   : > { %5551 = vmatpush1.bf16.msra.mxu1 %v4627_v22  ;;  %5511 = vmatprep.subr.bf16.mxu0 %v4560_v3  ;;  %v4595_v22 = vunpack.c.h.s8.bf16 %v3927_v55  ;;  %v4659_v3 = vunpack.c.h.s8.bf16 %v3959_v42 }
 0x6b9   : > { %5552 = vmatprep.subr.bf16.mxu1 %v4624_v46  ;;  %v4592_v46 = vunpack.c.l.s8.bf16 %v3928_v28  ;;  %v4011_v28 = vld [vmem:[%s7862_s17 + $0x960] sm:$0xff] }
 0x6bb   : > { %5512 = vmatpush1.bf16.msra.mxu0 %v4559_v56  ;;  %v3956_v56 = vld [vmem:[%s7862_s17 + $0x7a8] sm:$0xff] }
 0x6bc   : > { %5553 = vmatpush1.bf16.msra.mxu1 %v4623_v7  ;;  %5513 = vmatprep.subr.bf16.mxu0 %v4556_v5  ;;  %v4591_v7 = vunpack.c.l.s8.bf16 %v3927_v55  ;;  %v4655_v5 = vunpack.c.l.s8.bf16 %v3959_v42  ;;  %v4652_v10 = vunpack.c.h.s8.bf16 %v3956_v56  ;;  %v4648_v41 = vunpack.c.l.s8.bf16 %v3956_v56  ;;  %v3976_v55 = vld [vmem:[%s7862_s17 + $0x848] sm:$0xff] }
 0x6bd   : > { %5554 = vmatprep.subr.bf16.mxu1 %v4620_v30  ;;  %v4588_v30 = vunpack.c.h.s8.bf16 %v3924_v15  ;;  %v4008_v42 = vld [vmem:[%s7862_s17 + $0x948] sm:$0xff]  ;;  %v4759_v56 = vunpack.c.l.s8.bf16 %v4011_v28 }
 0x6bf   : > { %5514 = vmatpush1.bf16.msra.mxu0 %v4555_v44  ;;  %v3955_v44 = vld [vmem:[%s7862_s17 + $0x7a0] sm:$0xff] }
 0x6c0   : > { %5555 = vmatpush1.bf16.msra.mxu1 %v4619_v53  ;;  %5515 = vmatprep.subr.bf16.mxu0 %v4552_v4  ;;  %v4587_v53 = vunpack.c.h.s8.bf16 %v3923_v57  ;;  %v4651_v4 = vunpack.c.h.s8.bf16 %v3955_v44 }
 0x6c1   : > { %5556 = vmatprep.subr.bf16.mxu1 %v4616_v33  ;;  %v4584_v33 = vunpack.c.l.s8.bf16 %v3924_v15 }
 0x6c3   : > { %5516 = vmatpush1.bf16.msra.mxu0 %v4551_v32  ;;  %v3952_v32 = vld [vmem:[%s7862_s17 + $0x788] sm:$0xff] }
 0x6c4   : > { %5557 = vmatpush1.bf16.msra.mxu1 %v4615_v58  ;;  %5517 = vmatprep.subr.bf16.mxu0 %v4548_v11  ;;  %v10407_v58 = vld [vmem:[%s10191_s26 + $0x10] sm:$0xff]  ;;  %v4583_v11 = vunpack.c.l.s8.bf16 %v3923_v57  ;;  %v4644_v35 = vunpack.c.h.s8.bf16 %v3952_v32  ;;  %v3975_v57 = vld [vmem:[%s7862_s17 + $0x840] sm:$0xff] }
 0x6c5   : > { %5558 = vmatprep.subr.bf16.mxu1 %v4612_v31  ;;  %v4647_v31 = vunpack.c.l.s8.bf16 %v3955_v44  ;;  %v4007_v44 = vld [vmem:[%s7862_s17 + $0x940] sm:$0xff] }
 0x6c6   : > { %v4755_v25 = vunpack.c.h.s8.bf16 %v4007_v44 }
 0x6c7   : > { %5518 = vmatpush1.bf16.msra.mxu0 %v4547_v63  ;;  %v3919_v63 = vld [vmem:[%s7862_s17 + $0x680] sm:$0xff] }
 0x6c8   : > { %5559 = vmatpush1.bf16.msra.mxu1 %v4611_v38  ;;  %5519 = vmatprep.subr.bf16.mxu0 %v4544_v1  ;;  %v3951_v38 = vld [vmem:[%s7862_s17 + $0x780] sm:$0xff]  ;;  %v10413_v1 = vrot.slane %v10407_v58, %v10199_v62  ;;  %v4575_v61 = vunpack.c.l.s8.bf16 %v3919_v63 }
 0x6c9   : > { %5560 = vmatprep.subr.bf16.mxu1 %v4608_v18  ;;  %v4579_v18 = vunpack.c.h.s8.bf16 %v3919_v63  ;;  %v4643_v8 = vunpack.c.h.s8.bf16 %v3951_v38  ;;  %v4004_v63 = vld [vmem:[%s7862_s17 + $0x928] sm:$0xff] }
 0x6cb   : > { %5520 = vmatpush1.bf16.msra.mxu0 %v4543_v54  ;;  %v4640_v54 = vunpack.c.l.s8.bf16 %v3952_v32 }
 0x6cc   : > { %5561 = vmatpush1.bf16.msra.mxu1 %v4607_v52  ;;  %5521 = vmatprep.subr.bf16.mxu0 %v4604_v59  ;;  %v3980_v52 = vld [vmem:[%s7862_s17 + $0x868] sm:$0xff] }
 0x6cd   : > { %5562 = vmatprep.subr.bf16.mxu1 %v4668_v2  ;;  %v4012_v59 = vld [vmem:[%s7862_s17 + $0x968] sm:$0xff]  ;;  %v5173_v2 = vcombine.high %v10413_v1, %v10413_v1 }
 0x6cf   : > { %5522 = vmatpush2.bf16.msra.mxu0 %v4603_v6  ;;  %v4639_v6 = vunpack.c.l.s8.bf16 %v3951_v38  ;;  %v10426_v23 = vrot.slane %v5173_v2, %v10199_v62  ;;  %v4687_v38 = vunpack.c.l.s8.bf16 %v3975_v57 }
 0x6d0   : > { %5563 = vmatpush2.bf16.msra.mxu1 %v4667_v49  ;;  %5523 = vmatprep.subr.bf16.mxu0 %v4600_v40  ;;  %v4700_v49 = vunpack.c.h.s8.bf16 %v3980_v52  ;;  %v4764_v40 = vunpack.c.h.s8.bf16 %v4012_v59 }
 0x6d1   : > { %5564 = vmatprep.subr.bf16.mxu1 %v4664_v36  ;;  %v3979_v36 = vld [vmem:[%s7862_s17 + $0x860] sm:$0xff] }
 0x6d2   : > { %v4699_v60 = vunpack.c.h.s8.bf16 %v3979_v36  ;;  %v4695_v15 = vunpack.c.l.s8.bf16 %v3979_v36 }
 0x6d3   : > { %5524 = vmatpush2.bf16.msra.mxu0 %v4599_v37  ;;  %v10430_v37 = vcombine.high %v10421_v0, %v10421_v0 }
 0x6d4   : > { %5565 = vmatpush2.bf16.msra.mxu1 %v4663_v45  ;;  %5525 = vmatprep.subr.bf16.mxu0 %v4596_v20  ;;  %v4763_v45 = vunpack.c.h.s8.bf16 %v4011_v28  ;;  %v4696_v20 = vunpack.c.l.s8.bf16 %v3980_v52  ;;  %v4003_v52 = vld [vmem:[%s7862_s17 + $0x920] sm:$0xff] }
 0x6d5   : > { %5566 = vmatprep.subr.bf16.mxu1 %v4660_v13  ;;  %v4760_v13 = vunpack.c.l.s8.bf16 %v4012_v59  ;;  %v4747_v2 = vunpack.c.h.s8.bf16 %v4003_v52  ;;  %v4743_v28 = vunpack.c.l.s8.bf16 %v4003_v52 }
 0x6d7   : > { %5526 = vmatpush2.bf16.msra.mxu0 %v4595_v22  ;;  %v10436_v22 = vcombine.high %v10426_v23, %v10426_v23 }
 0x6d8   : > { %5567 = vmatpush2.bf16.msra.mxu1 %v4659_v3  ;;  %5527 = vmatprep.subr.bf16.mxu0 %v4592_v46 }
 0x6d9   : > { %5568 = vmatprep.subr.bf16.mxu1 %v4656_v9 }
 0x6db   : > { %5528 = vmatpush2.bf16.msra.mxu0 %v4591_v7 }
 0x6dc   : > { %5569 = vmatpush2.bf16.msra.mxu1 %v4655_v5  ;;  %5529 = vmatprep.subr.bf16.mxu0 %v4588_v30  ;;  %v4692_v30 = vunpack.c.h.s8.bf16 %v3976_v55 }
 0x6dd   : > { %5570 = vmatprep.subr.bf16.mxu1 %v4652_v10  ;;  %v4756_v10 = vunpack.c.h.s8.bf16 %v4008_v42 }
 0x6df   : > { %5530 = vmatpush2.bf16.msra.mxu0 %v4587_v53 }
 0x6e0   : > { %5571 = vmatpush2.bf16.msra.mxu1 %v4651_v4  ;;  %5531 = vmatprep.subr.bf16.mxu0 %v4584_v33 }
 0x6e1   : > { %5572 = vmatprep.subr.bf16.mxu1 %v4648_v41  ;;  %v4691_v41 = vunpack.c.h.s8.bf16 %v3975_v57  ;;  %v3995_v57 = vld [vmem:[%s7862_s17 + $0x8e0] sm:$0xff] }
 0x6e3   : > { %5532 = vmatpush2.bf16.msra.mxu0 %v4583_v11 }
 0x6e4   : > { %5573 = vmatpush2.bf16.msra.mxu1 %v4647_v31  ;;  %5533 = vmatprep.subr.bf16.mxu0 %v4580_v27  ;;  %v4688_v31 = vunpack.c.l.s8.bf16 %v3976_v55  ;;  %v4752_v27 = vunpack.c.l.s8.bf16 %v4008_v42 }
 0x6e5   : > { %5574 = vmatprep.subr.bf16.mxu1 %v4644_v35  ;;  %v3972_v35 = vld [vmem:[%s7862_s17 + $0x828] sm:$0xff] }
 0x6e7   : > { %5534 = vmatpush2.bf16.msra.mxu0 %v4579_v18  ;;  %v4751_v18 = vunpack.c.l.s8.bf16 %v4007_v44  ;;  %v4027_v44 = vld [vmem:[%s7862_s17 + $0x9e0] sm:$0xff] }
 0x6e8   : > { %5575 = vmatpush2.bf16.msra.mxu1 %v4643_v8  ;;  %5535 = vmatprep.subr.bf16.mxu0 %v4576_v21  ;;  %v4684_v8 = vunpack.c.h.s8.bf16 %v3972_v35  ;;  %v4748_v21 = vunpack.c.h.s8.bf16 %v4004_v63 }
 0x6e9   : > { %5576 = vmatprep.subr.bf16.mxu1 %v4640_v54  ;;  %v3971_v54 = vld [vmem:[%s7862_s17 + $0x820] sm:$0xff] }
 0x6ea   : > { %v4683_v59 = vunpack.c.h.s8.bf16 %v3971_v54  ;;  %v4679_v36 = vunpack.c.l.s8.bf16 %v3971_v54 }
 0x6eb   : > { %5536 = vmatpush2.bf16.msra.mxu0 %v4575_v61  ;;  %v4680_v61 = vunpack.c.l.s8.bf16 %v3972_v35 }
 0x6ec   : > { %5577 = vmatpush2.bf16.msra.mxu1 %v4639_v6  ;;  %5587 = vmatprep.subr.bf16.mxu0 %v4700_v49  ;;  %v4744_v6 = vunpack.c.l.s8.bf16 %v4004_v63  ;;  %v3968_v49 = vld [vmem:[%s7862_s17 + $0x808] sm:$0xff] }
 0x6ed   : > { %5628 = vmatprep.subr.bf16.mxu1 %v4764_v40  ;;  %v4000_v40 = vld [vmem:[%s7862_s17 + $0x908] sm:$0xff] }
 0x6ee   : > { %v5293_v3 = vpop.f32.mrf.mxu0  ;;  %5538 = vmatmul.mubr.bf16.vlgmr.msra.gmra.mxu0 %v10421_v0 }
 0x6ef   : > { %v5334_v46 = vpop.f32.mrf.mxu1  ;;  %5579 = vmatmul.mubr.bf16.vlgmr.msra.gmra.mxu1 %v10430_v37  ;;  %5588 = vmatpush1.bf16.msra.mxu0 %v4699_v60  ;;  %v4676_v60 = vunpack.c.h.s8.bf16 %v3968_v49 }
 0x6f0   : > { %v10440_v9 = vadd.f32 %v5334_v46, %v5293_v3  ;;  %5629 = vmatpush1.bf16.msra.mxu1 %v4763_v45  ;;  %v5295_v7 = vpop.f32.mrf.mxu0  ;;  %5589 = vmatprep.subr.bf16.mxu0 %v4696_v20  ;;  %v4740_v45 = vunpack.c.h.s8.bf16 %v4000_v40  ;;  %v3967_v20 = vld [vmem:[%s7862_s17 + $0x800] sm:$0xff]  ;;  %v4672_v3 = vunpack.c.l.s8.bf16 %v3968_v49  ;;  %v4736_v46 = vunpack.c.l.s8.bf16 %v4000_v40 }
 0x6f1   : > { %v5336_v5 = vpop.f32.mrf.mxu1  ;;  %5630 = vmatprep.subr.bf16.mxu1 %v4760_v13  ;;  %5619 = vmatprep.mubr.bf16.mxu0 %v10426_v23  ;;  %v3999_v13 = vld [vmem:[%s7862_s17 + $0x900] sm:$0xff]  ;;  %v4675_v55 = vunpack.c.h.s8.bf16 %v3967_v20 }
 0x6f2   : > { %v10444_v53 = vadd.f32 %v5336_v5, %v5295_v7  ;;  %5660 = vmatprep.mubr.bf16.mxu1 %v10436_v22  ;;  %v5297_v4 = vpop.f32.mrf.mxu0  ;;  %v4739_v42 = vunpack.c.h.s8.bf16 %v3999_v13  ;;  %v4671_v7 = vunpack.c.l.s8.bf16 %v3967_v20  ;;  %v4735_v5 = vunpack.c.l.s8.bf16 %v3999_v13 }
 0x6f3   : > { %v5338_v33 = vpop.f32.mrf.mxu1  ;;  %5590 = vmatpush1.bf16.msra.mxu0 %v4695_v15  ;;  %v3996_v15 = vld [vmem:[%s7862_s17 + $0x8e8] sm:$0xff]  ;;  %v4731_v4 = vunpack.c.h.s8.bf16 %v3995_v57 }
 0x6f4   : > { %5631 = vmatpush1.bf16.msra.mxu1 %v4759_v56  ;;  %v5298_v32 = vpop.f32.mrf.mxu0  ;;  %5591 = vmatprep.subr.bf16.mxu0 %v4692_v30  ;;  %v4028_v56 = vld [vmem:[%s7862_s17 + $0x9e8] sm:$0xff]  ;;  %v4732_v30 = vunpack.c.h.s8.bf16 %v3996_v15  ;;  %v4795_v33 = vunpack.c.h.s8.bf16 %v4027_v44 }
 0x6f5   : > { %v5339_v11 = vpop.f32.mrf.mxu1  ;;  %5632 = vmatprep.subr.bf16.mxu1 %v4756_v10  ;;  %v4796_v10 = vunpack.c.h.s8.bf16 %v4028_v56  ;;  %v3992_v32 = vld [vmem:[%s7862_s17 + $0x8c8] sm:$0xff] }
 0x6f6   : > { %v4024_v11 = vld [vmem:[%s7862_s17 + $0x9c8] sm:$0xff]  ;;  %v4724_v35 = vunpack.c.h.s8.bf16 %v3992_v32  ;;  %v4720_v54 = vunpack.c.l.s8.bf16 %v3992_v32  ;;  %v10483_v32 = vrot.slane %v10413_v1, %v10199_v62 }
 0x6f7   : > { %5592 = vmatpush1.bf16.msra.mxu0 %v4691_v41  ;;  %v4728_v41 = vunpack.c.l.s8.bf16 %v3996_v15  ;;  %v4788_v63 = vunpack.c.h.s8.bf16 %v4024_v11  ;;  %v4784_v52 = vunpack.c.l.s8.bf16 %v4024_v11 }
 0x6f8   : > { %5633 = vmatpush1.bf16.msra.mxu1 %v4755_v25  ;;  %5593 = vmatprep.subr.bf16.mxu0 %v4688_v31  ;;  %v4792_v25 = vunpack.c.l.s8.bf16 %v4028_v56  ;;  %v4727_v31 = vunpack.c.l.s8.bf16 %v3995_v57 }
 0x6f9   : > { %5634 = vmatprep.subr.bf16.mxu1 %v4752_v27  ;;  %v4791_v27 = vunpack.c.l.s8.bf16 %v4027_v44 }
 0x6fb   : > { %5594 = vmatpush1.bf16.msra.mxu0 %v4687_v38  ;;  %v3991_v38 = vld [vmem:[%s7862_s17 + $0x8c0] sm:$0xff] }
 0x6fc   : > { %5635 = vmatpush1.bf16.msra.mxu1 %v4751_v18  ;;  %5595 = vmatprep.subr.bf16.mxu0 %v4684_v8  ;;  %v4023_v18 = vld [vmem:[%s7862_s17 + $0x9c0] sm:$0xff]  ;;  %v4723_v8 = vunpack.c.h.s8.bf16 %v3991_v38 }
 0x6fd   : > { %5636 = vmatprep.subr.bf16.mxu1 %v4748_v21  ;;  %v4787_v21 = vunpack.c.h.s8.bf16 %v4023_v18 }
 0x6ff   : > { %5596 = vmatpush1.bf16.msra.mxu0 %v4683_v59  ;;  %v3988_v59 = vld [vmem:[%s7862_s17 + $0x8a8] sm:$0xff] }
 0x700   : > { %5637 = vmatpush1.bf16.msra.mxu1 %v4747_v2  ;;  %5597 = vmatprep.subr.bf16.mxu0 %v4680_v61  ;;  %v4020_v2 = vld [vmem:[%s7862_s17 + $0x9a8] sm:$0xff]  ;;  %v4719_v61 = vunpack.c.l.s8.bf16 %v3991_v38  ;;  %v4716_v49 = vunpack.c.h.s8.bf16 %v3988_v59  ;;  %v4712_v20 = vunpack.c.l.s8.bf16 %v3988_v59  ;;  %v4075_v38 = vld [vmem:[%s7862_s17 + $0xb60] sm:$0xff] }
 0x701   : > { %5638 = vmatprep.subr.bf16.mxu1 %v4744_v6  ;;  %v4783_v6 = vunpack.c.l.s8.bf16 %v4023_v18  ;;  %v4780_v40 = vunpack.c.h.s8.bf16 %v4020_v2  ;;  %v4776_v13 = vunpack.c.l.s8.bf16 %v4020_v2  ;;  %v4040_v59 = vld [vmem:[%s7862_s17 + $0xa48] sm:$0xff] }
 0x702   : > { %v4072_v2 = vld [vmem:[%s7862_s17 + $0xb48] sm:$0xff] }
 0x703   : > { %5598 = vmatpush1.bf16.msra.mxu0 %v4679_v36  ;;  %v3987_v36 = vld [vmem:[%s7862_s17 + $0x8a0] sm:$0xff] }
 0x704   : > { %5639 = vmatpush1.bf16.msra.mxu1 %v4743_v28  ;;  %5599 = vmatprep.subr.bf16.mxu0 %v4676_v60  ;;  %v4019_v28 = vld [vmem:[%s7862_s17 + $0x9a0] sm:$0xff]  ;;  %v4715_v60 = vunpack.c.h.s8.bf16 %v3987_v36 }
 0x705   : > { %5640 = vmatprep.subr.bf16.mxu1 %v4740_v45  ;;  %v4779_v45 = vunpack.c.h.s8.bf16 %v4019_v28  ;;  %v4775_v15 = vunpack.c.l.s8.bf16 %v4019_v28  ;;  %v4887_v28 = vunpack.c.l.s8.bf16 %v4075_v38 }
 0x707   : > { %5600 = vmatpush1.bf16.msra.mxu0 %v4675_v55  ;;  %v3984_v55 = vld [vmem:[%s7862_s17 + $0x888] sm:$0xff] }
 0x708   : > { %5641 = vmatpush1.bf16.msra.mxu1 %v4739_v42  ;;  %5601 = vmatprep.subr.bf16.mxu0 %v4672_v3  ;;  %v4016_v42 = vld [vmem:[%s7862_s17 + $0x988] sm:$0xff]  ;;  %v5158_v3 = vcombine.high %v10407_v58, %v10407_v58  ;;  %v4708_v56 = vunpack.c.h.s8.bf16 %v3984_v55  ;;  %v4704_v58 = vunpack.c.l.s8.bf16 %v3984_v55  ;;  %v4039_v55 = vld [vmem:[%s7862_s17 + $0xa40] sm:$0xff] }
 0x709   : > { %5642 = vmatprep.subr.bf16.mxu1 %v4736_v46  ;;  %v4711_v46 = vunpack.c.l.s8.bf16 %v3987_v36 }
 0x70b   : > { %5602 = vmatpush1.bf16.msra.mxu0 %v4671_v7  ;;  %v4772_v7 = vunpack.c.h.s8.bf16 %v4016_v42 }
 0x70c   : > { %5643 = vmatpush1.bf16.msra.mxu1 %v4735_v5  ;;  %5603 = vmatprep.subr.bf16.mxu0 %v4732_v30  ;;  %v3983_v5 = vld [vmem:[%s7862_s17 + $0x880] sm:$0xff] }
 0x70d   : > { %5644 = vmatprep.subr.bf16.mxu1 %v4796_v10  ;;  %v4015_v30 = vld [vmem:[%s7862_s17 + $0x980] sm:$0xff]  ;;  %v10475_v10 = vrot.slane %v5158_v3, %v10199_v62  ;;  %v4707_v57 = vunpack.c.h.s8.bf16 %v3983_v5  ;;  %v4703_v11 = vunpack.c.l.s8.bf16 %v3983_v5 }
 0x70e   : > { %v4771_v44 = vunpack.c.h.s8.bf16 %v4015_v30 }
 0x70f   : > { %5604 = vmatpush2.bf16.msra.mxu0 %v4731_v4  ;;  %v4768_v4 = vunpack.c.l.s8.bf16 %v4016_v42  ;;  %v4071_v42 = vld [vmem:[%s7862_s17 + $0xb40] sm:$0xff] }
 0x710   : > { %5645 = vmatpush2.bf16.msra.mxu1 %v4795_v33  ;;  %5605 = vmatprep.subr.bf16.mxu0 %v4728_v41  ;;  %v4044_v33 = vld [vmem:[%s7862_s17 + $0xa68] sm:$0xff]  ;;  %v4883_v5 = vunpack.c.h.s8.bf16 %v4071_v42 }
 0x711   : > { %5646 = vmatprep.subr.bf16.mxu1 %v4792_v25  ;;  %v4076_v41 = vld [vmem:[%s7862_s17 + $0xb68] sm:$0xff]  ;;  %v5174_v25 = vcombine.high %v10475_v10, %v10475_v10 }
 0x713   : > { %5606 = vmatpush2.bf16.msra.mxu0 %v4727_v31  ;;  %v4767_v31 = vunpack.c.l.s8.bf16 %v4015_v30  ;;  %v10488_v18 = vrot.slane %v5174_v25, %v10199_v62 }
 0x714   : > { %5647 = vmatpush2.bf16.msra.mxu1 %v4791_v27  ;;  %5607 = vmatprep.subr.bf16.mxu0 %v4724_v35  ;;  %v4828_v27 = vunpack.c.h.s8.bf16 %v4044_v33  ;;  %v4892_v35 = vunpack.c.h.s8.bf16 %v4076_v41 }
 0x715   : > { %5648 = vmatprep.subr.bf16.mxu1 %v4788_v63  ;;  %v4043_v63 = vld [vmem:[%s7862_s17 + $0xa60] sm:$0xff] }
 0x716   : > { %v4827_v1 = vunpack.c.h.s8.bf16 %v4043_v63  ;;  %v4823_v36 = vunpack.c.l.s8.bf16 %v4043_v63 }
 0x717   : > { %5608 = vmatpush2.bf16.msra.mxu0 %v4723_v8  ;;  %v10492_v8 = vcombine.high %v10483_v32, %v10483_v32 }
 0x718   : > { %5649 = vmatpush2.bf16.msra.mxu1 %v4787_v21  ;;  %5609 = vmatprep.subr.bf16.mxu0 %v4720_v54  ;;  %v4891_v21 = vunpack.c.h.s8.bf16 %v4075_v38  ;;  %v4824_v54 = vunpack.c.l.s8.bf16 %v4044_v33  ;;  %v4815_v33 = vunpack.c.l.s8.bf16 %v4039_v55 }
 0x719   : > { %5650 = vmatprep.subr.bf16.mxu1 %v4784_v52  ;;  %v4888_v52 = vunpack.c.l.s8.bf16 %v4076_v41  ;;  %v4879_v41 = vunpack.c.l.s8.bf16 %v4071_v42 }
 0x71b   : > { %5610 = vmatpush2.bf16.msra.mxu0 %v4719_v61  ;;  %v10498_v61 = vcombine.high %v10488_v18, %v10488_v18 }
 0x71c   : > { %5651 = vmatpush2.bf16.msra.mxu1 %v4783_v6  ;;  %5611 = vmatprep.subr.bf16.mxu0 %v4716_v49 }
 0x71d   : > { %5652 = vmatprep.subr.bf16.mxu1 %v4780_v40 }
 0x71f   : > { %5612 = vmatpush2.bf16.msra.mxu0 %v4715_v60 }
 0x720   : > { %5653 = vmatpush2.bf16.msra.mxu1 %v4779_v45  ;;  %5613 = vmatprep.subr.bf16.mxu0 %v4712_v20  ;;  %v4820_v20 = vunpack.c.h.s8.bf16 %v4040_v59 }
 0x721   : > { %5654 = vmatprep.subr.bf16.mxu1 %v4776_v13  ;;  %v4884_v13 = vunpack.c.h.s8.bf16 %v4072_v2 }
 0x723   : > { %5614 = vmatpush2.bf16.msra.mxu0 %v4711_v46 }
 0x724   : > { %5655 = vmatpush2.bf16.msra.mxu1 %v4775_v15  ;;  %5615 = vmatprep.subr.bf16.mxu0 %v4708_v56 }
 0x725   : > { %5656 = vmatprep.subr.bf16.mxu1 %v4772_v7  ;;  %v4819_v7 = vunpack.c.h.s8.bf16 %v4039_v55 }
 0x727   : > { %5616 = vmatpush2.bf16.msra.mxu0 %v4707_v57 }
 0x728   : > { %5657 = vmatpush2.bf16.msra.mxu1 %v4771_v44  ;;  %5617 = vmatprep.subr.bf16.mxu0 %v4704_v58  ;;  %v4880_v44 = vunpack.c.l.s8.bf16 %v4072_v2  ;;  %v4036_v58 = vld [vmem:[%s7862_s17 + $0xa28] sm:$0xff] }
 0x729   : > { %5658 = vmatprep.subr.bf16.mxu1 %v4768_v4  ;;  %v4068_v4 = vld [vmem:[%s7862_s17 + $0xb28] sm:$0xff]  ;;  %v4812_v25 = vunpack.c.h.s8.bf16 %v4036_v58  ;;  %v4808_v38 = vunpack.c.l.s8.bf16 %v4036_v58 }
 0x72a   : > { %v4088_v58 = vld [vmem:[%s7862_s17 + $0xbc8] sm:$0xff] }
 0x72b   : > { %5618 = vmatpush2.bf16.msra.mxu0 %v4703_v11  ;;  %v4876_v11 = vunpack.c.h.s8.bf16 %v4068_v4 }
 0x72c   : > { %5659 = vmatpush2.bf16.msra.mxu1 %v4767_v31  ;;  %5669 = vmatprep.subr.bf16.mxu0 %v4828_v27  ;;  %v4035_v31 = vld [vmem:[%s7862_s17 + $0xa20] sm:$0xff] }
 0x72d   : > { %5710 = vmatprep.subr.bf16.mxu1 %v4892_v35  ;;  %v4067_v27 = vld [vmem:[%s7862_s17 + $0xb20] sm:$0xff]  ;;  %v4811_v35 = vunpack.c.h.s8.bf16 %v4035_v31 }
 0x72e   : > { %v5375_v6 = vpop.f32.mrf.mxu0  ;;  %5620 = vmatmul.mubr.bf16.vlgmr.msra.gmra.mxu0 %v10483_v32  ;;  %v4875_v63 = vunpack.c.h.s8.bf16 %v4067_v27 }
 0x72f   : > { %v5416_v49 = vpop.f32.mrf.mxu1  ;;  %5661 = vmatmul.mubr.bf16.vlgmr.msra.gmra.mxu1 %v10492_v8  ;;  %v5376_v40 = vadd.f32 %v5375_v6, %v10440_v9  ;;  %5670 = vmatpush1.bf16.msra.mxu0 %v4827_v1  ;;  %v4872_v1 = vunpack.c.l.s8.bf16 %v4068_v4 }
 0x730   : > { %5711 = vmatpush1.bf16.msra.mxu1 %v4891_v21  ;;  %v5377_v60 = vpop.f32.mrf.mxu0  ;;  %5671 = vmatprep.subr.bf16.mxu0 %v4824_v54  ;;  %v4032_v21 = vld [vmem:[%s7862_s17 + $0xa08] sm:$0xff] }
 0x731   : > { %v5418_v45 = vpop.f32.mrf.mxu1  ;;  %5712 = vmatprep.subr.bf16.mxu1 %v4888_v52  ;;  %v10505_v3 = vadd.f32 %v5416_v49, %v5376_v40  ;;  %v5378_v46 = vadd.f32 %v5377_v60, %v10444_v53  ;;  %5701 = vmatprep.mubr.bf16.mxu0 %v10488_v18  ;;  %v4816_v53 = vunpack.c.l.s8.bf16 %v4040_v59  ;;  %v4064_v54 = vld [vmem:[%s7862_s17 + $0xb08] sm:$0xff]  ;;  %v4807_v52 = vunpack.c.l.s8.bf16 %v4035_v31  ;;  %v4031_v49 = vld [vmem:[%s7862_s17 + $0xa00] sm:$0xff] }
 0x732   : > { %5742 = vmatprep.mubr.bf16.mxu1 %v10498_v61  ;;  %v5379_v9 = vpop.f32.mrf.mxu0  ;;  %v4871_v59 = vunpack.c.l.s8.bf16 %v4067_v27  ;;  %v4804_v2 = vunpack.c.h.s8.bf16 %v4032_v21  ;;  %v4868_v6 = vunpack.c.h.s8.bf16 %v4064_v54  ;;  %v4063_v40 = vld [vmem:[%s7862_s17 + $0xb00] sm:$0xff]  ;;  %v4800_v60 = vunpack.c.l.s8.bf16 %v4032_v21  ;;  %v4084_v21 = vld [vmem:[%s7862_s17 + $0xba8] sm:$0xff] }
 0x733   : > { %v5420_v15 = vpop.f32.mrf.mxu1  ;;  %v10510_v56 = vadd.f32 %v5418_v45, %v5378_v46  ;;  %5672 = vmatpush1.bf16.msra.mxu0 %v4823_v36  ;;  %v4803_v36 = vunpack.c.h.s8.bf16 %v4031_v49  ;;  %v4864_v45 = vunpack.c.l.s8.bf16 %v4064_v54  ;;  %v4799_v55 = vunpack.c.l.s8.bf16 %v4031_v49  ;;  %v4087_v31 = vld [vmem:[%s7862_s17 + $0xbc0] sm:$0xff] }
 0x734   : > { %5713 = vmatpush1.bf16.msra.mxu1 %v4887_v28  ;;  %v5380_v30 = vpop.f32.mrf.mxu0  ;;  %5673 = vmatprep.subr.bf16.mxu0 %v4820_v20  ;;  %v4867_v28 = vunpack.c.h.s8.bf16 %v4063_v40  ;;  %v4060_v20 = vld [vmem:[%s7862_s17 + $0xae8] sm:$0xff]  ;;  %v4863_v42 = vunpack.c.l.s8.bf16 %v4063_v40  ;;  %v4059_v15 = vld [vmem:[%s7862_s17 + $0xae0] sm:$0xff] }
 0x735   : > { %v5421_v57 = vpop.f32.mrf.mxu1  ;;  %5714 = vmatprep.subr.bf16.mxu1 %v4884_v13  ;;  %v4092_v13 = vld [vmem:[%s7862_s17 + $0xbe8] sm:$0xff]  ;;  %v4860_v46 = vunpack.c.h.s8.bf16 %v4060_v20  ;;  %v4855_v4 = vunpack.c.l.s8.bf16 %v4059_v15  ;;  %v4083_v49 = vld [vmem:[%s7862_s17 + $0xba0] sm:$0xff] }
 0x736   : > { %v4924_v9 = vunpack.c.h.s8.bf16 %v4092_v13  ;;  %v4856_v57 = vunpack.c.l.s8.bf16 %v4060_v20  ;;  %v4080_v20 = vld [vmem:[%s7862_s17 + $0xb88] sm:$0xff] }
 0x737   : > { %5674 = vmatpush1.bf16.msra.mxu0 %v4819_v7  ;;  %v4091_v7 = vld [vmem:[%s7862_s17 + $0xbe0] sm:$0xff] }
 0x738   : > { %5715 = vmatpush1.bf16.msra.mxu1 %v4883_v5  ;;  %5675 = vmatprep.subr.bf16.mxu0 %v4816_v53  ;;  %v4859_v5 = vunpack.c.h.s8.bf16 %v4059_v15  ;;  %v4923_v30 = vunpack.c.h.s8.bf16 %v4091_v7  ;;  %v4920_v53 = vunpack.c.l.s8.bf16 %v4092_v13  ;;  %v4079_v15 = vld [vmem:[%s7862_s17 + $0xb80] sm:$0xff] }
 0x739   : > { %5716 = vmatprep.subr.bf16.mxu1 %v4880_v44  ;;  %v4056_v44 = vld [vmem:[%s7862_s17 + $0xac8] sm:$0xff] }
 0x73b   : > { %5676 = vmatpush1.bf16.msra.mxu0 %v4815_v33  ;;  %v4919_v33 = vunpack.c.l.s8.bf16 %v4091_v7  ;;  %v10537_v7 = vld.sshfl [vmem:[%s10191_s26 + $0x18] sm:$0x33 pattern:$0x75316420] }
 0x73c   : > { %5717 = vmatpush1.bf16.msra.mxu1 %v4879_v41  ;;  %5677 = vmatprep.subr.bf16.mxu0 %v4812_v25  ;;  %v4852_v41 = vunpack.c.h.s8.bf16 %v4056_v44  ;;  %v4916_v25 = vunpack.c.h.s8.bf16 %v4088_v58 }
 0x73d   : > { %5718 = vmatprep.subr.bf16.mxu1 %v4876_v11  ;;  %v4055_v11 = vld [vmem:[%s7862_s17 + $0xac0] sm:$0xff] }
 0x73e   : > { %v4851_v27 = vunpack.c.h.s8.bf16 %v4055_v11  ;;  %v4847_v54 = vunpack.c.l.s8.bf16 %v4055_v11 }
 0x73f   : > { %5678 = vmatpush1.bf16.msra.mxu0 %v4811_v35  ;;  %v4915_v35 = vunpack.c.h.s8.bf16 %v4087_v31 }
 0x740   : > { %5719 = vmatpush1.bf16.msra.mxu1 %v4875_v63  ;;  %5679 = vmatprep.subr.bf16.mxu0 %v4808_v38  ;;  %v4848_v63 = vunpack.c.l.s8.bf16 %v4056_v44  ;;  %v4912_v38 = vunpack.c.l.s8.bf16 %v4088_v58  ;;  %v4108_v44 = vld [vmem:[%s7862_s17 + $0xc68] sm:$0xff] }
 0x741   : > { %5720 = vmatprep.subr.bf16.mxu1 %v4872_v1  ;;  %v4052_v1 = vld [vmem:[%s7862_s17 + $0xaa8] sm:$0xff]  ;;  %v4956_v11 = vunpack.c.h.s8.bf16 %v4108_v44 }
 0x742   : > { %v4140_v58 = vld [vmem:[%s7862_s17 + $0xd68] sm:$0xff] }
 0x743   : > { %5680 = vmatpush1.bf16.msra.mxu0 %v4807_v52  ;;  %v4911_v52 = vunpack.c.l.s8.bf16 %v4087_v31  ;;  %v5020_v31 = vunpack.c.h.s8.bf16 %v4140_v58 }
 0x744   : > { %5721 = vmatpush1.bf16.msra.mxu1 %v4871_v59  ;;  %5681 = vmatprep.subr.bf16.mxu0 %v4804_v2  ;;  %v4844_v59 = vunpack.c.h.s8.bf16 %v4052_v1  ;;  %v4908_v2 = vunpack.c.h.s8.bf16 %v4084_v21 }
 0x745   : > { %5722 = vmatprep.subr.bf16.mxu1 %v4868_v6  ;;  %v4051_v6 = vld [vmem:[%s7862_s17 + $0xaa0] sm:$0xff] }
 0x746   : > { %v4843_v40 = vunpack.c.h.s8.bf16 %v4051_v6  ;;  %v4839_v13 = vunpack.c.l.s8.bf16 %v4051_v6 }
 0x747   : > { %5682 = vmatpush1.bf16.msra.mxu0 %v4803_v36  ;;  %v4907_v36 = vunpack.c.h.s8.bf16 %v4083_v49 }
 0x748   : > { %5723 = vmatpush1.bf16.msra.mxu1 %v4867_v28  ;;  %5683 = vmatprep.subr.bf16.mxu0 %v4800_v60  ;;  %v4840_v28 = vunpack.c.l.s8.bf16 %v4052_v1  ;;  %v4904_v60 = vunpack.c.l.s8.bf16 %v4084_v21  ;;  %v4952_v21 = vunpack.c.l.s8.bf16 %v4108_v44 }
 0x749   : > { %5724 = vmatprep.subr.bf16.mxu1 %v4864_v45  ;;  %v4048_v45 = vld [vmem:[%s7862_s17 + $0xa88] sm:$0xff] }
 0x74b   : > { %5684 = vmatpush1.bf16.msra.mxu0 %v4799_v55  ;;  %v4903_v55 = vunpack.c.l.s8.bf16 %v4083_v49 }
 0x74c   : > { %5725 = vmatpush1.bf16.msra.mxu1 %v4863_v42  ;;  %5685 = vmatprep.subr.bf16.mxu0 %v4860_v46  ;;  %v4836_v42 = vunpack.c.h.s8.bf16 %v4048_v45  ;;  %v4900_v46 = vunpack.c.h.s8.bf16 %v4080_v20 }
 0x74d   : > { %5726 = vmatprep.subr.bf16.mxu1 %v4924_v9  ;;  %v4047_v9 = vld [vmem:[%s7862_s17 + $0xa80] sm:$0xff] }
 0x74f   : > { %5686 = vmatpush2.bf16.msra.mxu0 %v4859_v5  ;;  %v4835_v5 = vunpack.c.h.s8.bf16 %v4047_v9 }
 0x750   : > { %5727 = vmatpush2.bf16.msra.mxu1 %v4923_v30  ;;  %5687 = vmatprep.subr.bf16.mxu0 %v4856_v57  ;;  %v4899_v30 = vunpack.c.h.s8.bf16 %v4079_v15  ;;  %v4832_v57 = vunpack.c.l.s8.bf16 %v4048_v45 }
 0x751   : > { %5728 = vmatprep.subr.bf16.mxu1 %v4920_v53  ;;  %v4896_v53 = vunpack.c.l.s8.bf16 %v4080_v20 }
 0x753   : > { %5688 = vmatpush2.bf16.msra.mxu0 %v4855_v4  ;;  %v5214_v4 = vcombine.high %v10537_v7, %v10537_v7 }
 0x754   : > { %5729 = vmatpush2.bf16.msra.mxu1 %v4919_v33  ;;  %5689 = vmatprep.subr.bf16.mxu0 %v4852_v41  ;;  %v10545_v33 = vrot.slane %v10475_v10, %v10199_v62  ;;  %v4831_v41 = vunpack.c.l.s8.bf16 %v4047_v9 }
 0x755   : > { %5730 = vmatprep.subr.bf16.mxu1 %v4916_v25  ;;  %v4895_v25 = vunpack.c.l.s8.bf16 %v4079_v15 }
 0x757   : > { %5690 = vmatpush2.bf16.msra.mxu0 %v4851_v27  ;;  %v4107_v27 = vld [vmem:[%s7862_s17 + $0xc60] sm:$0xff] }
 0x758   : > { %5731 = vmatpush2.bf16.msra.mxu1 %v4915_v35  ;;  %5691 = vmatprep.subr.bf16.mxu0 %v4848_v63  ;;  %v4139_v35 = vld [vmem:[%s7862_s17 + $0xd60] sm:$0xff]  ;;  %v10550_v63 = vrot.slane %v5214_v4, %v10199_v62  ;;  %v4955_v10 = vunpack.c.h.s8.bf16 %v4107_v27  ;;  %v4100_v4 = vld [vmem:[%s7862_s17 + $0xc28] sm:$0xff] }
 0x759   : > { %5732 = vmatprep.subr.bf16.mxu1 %v4912_v38  ;;  %v10554_v38 = vcombine.high %v10545_v33, %v10545_v33  ;;  %v5019_v1 = vunpack.c.h.s8.bf16 %v4139_v35 }
 0x75b   : > { %5692 = vmatpush2.bf16.msra.mxu0 %v4847_v54  ;;  %v5016_v54 = vunpack.c.l.s8.bf16 %v4140_v58 }
 0x75c   : > { %5733 = vmatpush2.bf16.msra.mxu1 %v4911_v52  ;;  %5693 = vmatprep.subr.bf16.mxu0 %v4844_v59  ;;  %v4104_v52 = vld [vmem:[%s7862_s17 + $0xc48] sm:$0xff] }
 0x75d   : > { %5734 = vmatprep.subr.bf16.mxu1 %v4908_v2  ;;  %v4136_v59 = vld [vmem:[%s7862_s17 + $0xd48] sm:$0xff]  ;;  %v10560_v2 = vcombine.high %v10550_v63, %v10550_v63  ;;  %v4948_v20 = vunpack.c.h.s8.bf16 %v4104_v52 }
 0x75e   : > { %v5008_v58 = vunpack.c.l.s8.bf16 %v4136_v59 }
 0x75f   : > { %5694 = vmatpush2.bf16.msra.mxu0 %v4843_v40 }
 0x760   : > { %5735 = vmatpush2.bf16.msra.mxu1 %v4907_v36  ;;  %5695 = vmatprep.subr.bf16.mxu0 %v4840_v28  ;;  %v4951_v36 = vunpack.c.l.s8.bf16 %v4107_v27  ;;  %v5015_v28 = vunpack.c.l.s8.bf16 %v4139_v35  ;;  %v4099_v35 = vld [vmem:[%s7862_s17 + $0xc20] sm:$0xff] }
 0x761   : > { %5736 = vmatprep.subr.bf16.mxu1 %v4904_v60 }
 0x763   : > { %5696 = vmatpush2.bf16.msra.mxu0 %v4839_v13  ;;  %v5012_v13 = vunpack.c.h.s8.bf16 %v4136_v59  ;;  %v4096_v59 = vld [vmem:[%s7862_s17 + $0xc08] sm:$0xff] }
 0x764   : > { %5737 = vmatpush2.bf16.msra.mxu1 %v4903_v55  ;;  %5697 = vmatprep.subr.bf16.mxu0 %v4836_v42  ;;  %v4103_v55 = vld [vmem:[%s7862_s17 + $0xc40] sm:$0xff] }
 0x765   : > { %5738 = vmatprep.subr.bf16.mxu1 %v4900_v46  ;;  %v4135_v42 = vld [vmem:[%s7862_s17 + $0xd40] sm:$0xff] }
 0x767   : > { %5698 = vmatpush2.bf16.msra.mxu0 %v4835_v5 }
 0x768   : > { %5739 = vmatpush2.bf16.msra.mxu1 %v4899_v30  ;;  %5699 = vmatprep.subr.bf16.mxu0 %v4832_v57  ;;  %v4947_v30 = vunpack.c.h.s8.bf16 %v4103_v55  ;;  %v5011_v57 = vunpack.c.h.s8.bf16 %v4135_v42 }
 0x769   : > { %5740 = vmatprep.subr.bf16.mxu1 %v4896_v53 }
 0x76b   : > { %5700 = vmatpush2.bf16.msra.mxu0 %v4831_v41  ;;  %v4132_v41 = vld [vmem:[%s7862_s17 + $0xd28] sm:$0xff] }
 0x76c   : > { %5741 = vmatpush2.bf16.msra.mxu1 %v4895_v25  ;;  %5751 = vmatprep.subr.bf16.mxu0 %v4956_v11  ;;  %v4943_v25 = vunpack.c.l.s8.bf16 %v4103_v55  ;;  %v5007_v11 = vunpack.c.l.s8.bf16 %v4135_v42  ;;  %v5004_v27 = vunpack.c.h.s8.bf16 %v4132_v41  ;;  %v4928_v55 = vunpack.c.l.s8.bf16 %v4096_v59 }
 0x76d   : > { %5792 = vmatprep.subr.bf16.mxu1 %v5020_v31  ;;  %v4940_v31 = vunpack.c.h.s8.bf16 %v4100_v4 }
 0x76e   : > { %v5457_v6 = vpop.f32.mrf.mxu0  ;;  %5702 = vmatmul.mubr.bf16.vlgmr.msra.gmra.mxu0 %v10545_v33 }
 0x76f   : > { %v5498_v49 = vpop.f32.mrf.mxu1  ;;  %5743 = vmatmul.mubr.bf16.vlgmr.msra.gmra.mxu1 %v10554_v38  ;;  %v5458_v40 = vadd.f32 %v5457_v6, %v10505_v3  ;;  %5752 = vmatpush1.bf16.msra.mxu0 %v4955_v10  ;;  %v4131_v10 = vld [vmem:[%s7862_s17 + $0xd20] sm:$0xff]  ;;  %v4128_v6 = vld [vmem:[%s7862_s17 + $0xd08] sm:$0xff] }
 0x770   : > { %5793 = vmatpush1.bf16.msra.mxu1 %v5019_v1  ;;  %v5459_v60 = vpop.f32.mrf.mxu0  ;;  %5753 = vmatprep.subr.bf16.mxu0 %v4952_v21  ;;  %v4939_v1 = vunpack.c.h.s8.bf16 %v4099_v35  ;;  %v5003_v21 = vunpack.c.h.s8.bf16 %v4131_v10  ;;  %v4992_v42 = vunpack.c.l.s8.bf16 %v4128_v6 }
 0x771   : > { %v5500_v45 = vpop.f32.mrf.mxu1  ;;  %5794 = vmatprep.subr.bf16.mxu1 %v5016_v54  ;;  %v10567_v46 = vadd.f32 %v5498_v49, %v5458_v40  ;;  %v5460_v9 = vadd.f32 %v5459_v60, %v10510_v56  ;;  %5783 = vmatprep.mubr.bf16.mxu0 %v10550_v63  ;;  %v4944_v56 = vunpack.c.l.s8.bf16 %v4104_v52  ;;  %v4936_v54 = vunpack.c.l.s8.bf16 %v4100_v4  ;;  %v4095_v60 = vld [vmem:[%s7862_s17 + $0xc00] sm:$0xff] }
 0x772   : > { %5824 = vmatprep.mubr.bf16.mxu1 %v10560_v2  ;;  %v5461_v3 = vpop.f32.mrf.mxu0  ;;  %v5000_v52 = vunpack.c.l.s8.bf16 %v4132_v41  ;;  %v4935_v49 = vunpack.c.l.s8.bf16 %v4099_v35  ;;  %v4999_v40 = vunpack.c.l.s8.bf16 %v4131_v10 }
 0x773   : > { %v5502_v15 = vpop.f32.mrf.mxu1  ;;  %v10572_v5 = vadd.f32 %v5500_v45, %v5460_v9  ;;  %5754 = vmatpush1.bf16.msra.mxu0 %v4951_v36  ;;  %v4932_v36 = vunpack.c.h.s8.bf16 %v4096_v59  ;;  %v4127_v45 = vld [vmem:[%s7862_s17 + $0xd00] sm:$0xff]  ;;  %v4124_v9 = vld [vmem:[%s7862_s17 + $0xce8] sm:$0xff] }
 0x774   : > { %5795 = vmatpush1.bf16.msra.mxu1 %v5015_v28  ;;  %v5462_v53 = vpop.f32.mrf.mxu0  ;;  %5755 = vmatprep.subr.bf16.mxu0 %v4948_v20  ;;  %v4996_v28 = vunpack.c.h.s8.bf16 %v4128_v6  ;;  %v4931_v20 = vunpack.c.h.s8.bf16 %v4095_v60  ;;  %v4156_v3 = vld [vmem:[%s7862_s17 + $0xde8] sm:$0xff]  ;;  %v4927_v15 = vunpack.c.l.s8.bf16 %v4095_v60  ;;  %v4984_v41 = vunpack.c.l.s8.bf16 %v4124_v9 }
 0x775   : > { %v5503_v44 = vpop.f32.mrf.mxu1  ;;  %5796 = vmatprep.subr.bf16.mxu1 %v5012_v13  ;;  %v4995_v13 = vunpack.c.h.s8.bf16 %v4127_v45  ;;  %v5052_v53 = vunpack.c.h.s8.bf16 %v4156_v3 }
 0x776   : > { %v4123_v44 = vld [vmem:[%s7862_s17 + $0xce0] sm:$0xff] }
 0x777   : > { %5756 = vmatpush1.bf16.msra.mxu0 %v4947_v30  ;;  %v4991_v30 = vunpack.c.l.s8.bf16 %v4127_v45 }
 0x778   : > { %5797 = vmatpush1.bf16.msra.mxu1 %v5011_v57  ;;  %5757 = vmatprep.subr.bf16.mxu0 %v4944_v56  ;;  %v4988_v57 = vunpack.c.h.s8.bf16 %v4124_v9  ;;  %v4155_v56 = vld [vmem:[%s7862_s17 + $0xde0] sm:$0xff] }
 0x779   : > { %5798 = vmatprep.subr.bf16.mxu1 %v5008_v58  ;;  %v4987_v58 = vunpack.c.h.s8.bf16 %v4123_v44  ;;  %v5051_v4 = vunpack.c.h.s8.bf16 %v4155_v56  ;;  %v5047_v35 = vunpack.c.l.s8.bf16 %v4155_v56 }
 0x77b   : > { %5758 = vmatpush1.bf16.msra.mxu0 %v4943_v25  ;;  %v5048_v25 = vunpack.c.l.s8.bf16 %v4156_v3 }
 0x77c   : > { %5799 = vmatpush1.bf16.msra.mxu1 %v5007_v11  ;;  %5759 = vmatprep.subr.bf16.mxu0 %v4940_v31  ;;  %v4120_v11 = vld [vmem:[%s7862_s17 + $0xcc8] sm:$0xff] }
 0x77d   : > { %5800 = vmatprep.subr.bf16.mxu1 %v5004_v27  ;;  %v4152_v31 = vld [vmem:[%s7862_s17 + $0xdc8] sm:$0xff]  ;;  %v4983_v27 = vunpack.c.l.s8.bf16 %v4123_v44  ;;  %v4980_v10 = vunpack.c.h.s8.bf16 %v4120_v11  ;;  %v4976_v6 = vunpack.c.l.s8.bf16 %v4120_v11 }
 0x77f   : > { %5760 = vmatpush1.bf16.msra.mxu0 %v4939_v1  ;;  %v5044_v1 = vunpack.c.h.s8.bf16 %v4152_v31 }
 0x780   : > { %5801 = vmatpush1.bf16.msra.mxu1 %v5003_v21  ;;  %5761 = vmatprep.subr.bf16.mxu0 %v4936_v54  ;;  %v4119_v21 = vld [vmem:[%s7862_s17 + $0xcc0] sm:$0xff] }
 0x781   : > { %5802 = vmatprep.subr.bf16.mxu1 %v5000_v52  ;;  %v4151_v54 = vld [vmem:[%s7862_s17 + $0xdc0] sm:$0xff]  ;;  %v4979_v52 = vunpack.c.h.s8.bf16 %v4119_v21 }
 0x782   : > { %v5043_v59 = vunpack.c.h.s8.bf16 %v4151_v54  ;;  %v5039_v60 = vunpack.c.l.s8.bf16 %v4151_v54 }
 0x783   : > { %5762 = vmatpush1.bf16.msra.mxu0 %v4935_v49  ;;  %v5040_v49 = vunpack.c.l.s8.bf16 %v4152_v31 }
 0x784   : > { %5803 = vmatpush1.bf16.msra.mxu1 %v4999_v40  ;;  %5763 = vmatprep.subr.bf16.mxu0 %v4932_v36  ;;  %v4116_v40 = vld [vmem:[%s7862_s17 + $0xca8] sm:$0xff] }
 0x785   : > { %5804 = vmatprep.subr.bf16.mxu1 %v4996_v28  ;;  %v4148_v36 = vld [vmem:[%s7862_s17 + $0xda8] sm:$0xff]  ;;  %v4975_v28 = vunpack.c.l.s8.bf16 %v4119_v21  ;;  %v4972_v45 = vunpack.c.h.s8.bf16 %v4116_v40  ;;  %v4968_v3 = vunpack.c.l.s8.bf16 %v4116_v40 }
 0x787   : > { %5764 = vmatpush1.bf16.msra.mxu0 %v4931_v20  ;;  %v5036_v20 = vunpack.c.h.s8.bf16 %v4148_v36 }
 0x788   : > { %5805 = vmatpush1.bf16.msra.mxu1 %v4995_v13  ;;  %5765 = vmatprep.subr.bf16.mxu0 %v4928_v55  ;;  %v4115_v13 = vld [vmem:[%s7862_s17 + $0xca0] sm:$0xff] }
 0x789   : > { %5806 = vmatprep.subr.bf16.mxu1 %v4992_v42  ;;  %v4147_v55 = vld [vmem:[%s7862_s17 + $0xda0] sm:$0xff]  ;;  %v4971_v42 = vunpack.c.h.s8.bf16 %v4115_v13 }
 0x78a   : > { %v5035_v9 = vunpack.c.h.s8.bf16 %v4147_v55  ;;  %v5031_v44 = vunpack.c.l.s8.bf16 %v4147_v55 }
 0x78b   : > { %5766 = vmatpush1.bf16.msra.mxu0 %v4927_v15  ;;  %v5032_v15 = vunpack.c.l.s8.bf16 %v4148_v36 }
 0x78c   : > { %5807 = vmatpush1.bf16.msra.mxu1 %v4991_v30  ;;  %5767 = vmatprep.subr.bf16.mxu0 %v4988_v57  ;;  %v4112_v30 = vld [vmem:[%s7862_s17 + $0xc88] sm:$0xff] }
 0x78d   : > { %5808 = vmatprep.subr.bf16.mxu1 %v5052_v53  ;;  %v4144_v57 = vld [vmem:[%s7862_s17 + $0xd88] sm:$0xff]  ;;  %v4967_v53 = vunpack.c.l.s8.bf16 %v4115_v13  ;;  %v4964_v56 = vunpack.c.h.s8.bf16 %v4112_v30  ;;  %v4960_v31 = vunpack.c.l.s8.bf16 %v4112_v30 }
 0x78f   : > { %5768 = vmatpush2.bf16.msra.mxu0 %v4987_v58  ;;  %v5028_v58 = vunpack.c.h.s8.bf16 %v4144_v57 }
 0x790   : > { %5809 = vmatpush2.bf16.msra.mxu1 %v5051_v4  ;;  %5769 = vmatprep.subr.bf16.mxu0 %v4984_v41  ;;  %v4111_v4 = vld [vmem:[%s7862_s17 + $0xc80] sm:$0xff] }
 0x791   : > { %5810 = vmatprep.subr.bf16.mxu1 %v5048_v25  ;;  %v4143_v41 = vld [vmem:[%s7862_s17 + $0xd80] sm:$0xff]  ;;  %v4963_v25 = vunpack.c.h.s8.bf16 %v4111_v4  ;;  %v4959_v21 = vunpack.c.l.s8.bf16 %v4111_v4 }
 0x792   : > { %v5027_v11 = vunpack.c.h.s8.bf16 %v4143_v41  ;;  %v5023_v54 = vunpack.c.l.s8.bf16 %v4143_v41 }
 0x793   : > { %5770 = vmatpush2.bf16.msra.mxu0 %v4983_v27  ;;  %v5024_v27 = vunpack.c.l.s8.bf16 %v4144_v57 }
 0x794   : > { %5811 = vmatpush2.bf16.msra.mxu1 %v5047_v35  ;;  %5771 = vmatprep.subr.bf16.mxu0 %v4980_v10  ;;  %v3726_v35 = vld [vmem:[%s7862_s17 + $0x78] sm:$0xff] }
 0x795   : > { %5812 = vmatprep.subr.bf16.mxu1 %v5044_v1  ;;  %v3758_v10 = vld [vmem:[%s7862_s17 + $0x178] sm:$0xff]  ;;  %v10602_v1 = vrot.slane %v10537_v7, %v10199_v62  ;;  %v4186_v36 = vunpack.c.l.s8.bf16 %v3726_v35 }
 0x797   : > { %5772 = vmatpush2.bf16.msra.mxu0 %v4979_v52  ;;  %v4190_v52 = vunpack.c.h.s8.bf16 %v3726_v35  ;;  %v10608_v40 = vcombine.high %v10602_v1, %v10602_v1 }
 0x798   : > { %5813 = vmatpush2.bf16.msra.mxu1 %v5043_v59  ;;  %5773 = vmatprep.subr.bf16.mxu0 %v4976_v6  ;;  %v4254_v59 = vunpack.c.h.s8.bf16 %v3758_v10  ;;  %v3725_v6 = vld [vmem:[%s7862_s17 + $0x70] sm:$0xff] }
 0x799   : > { %5814 = vmatprep.subr.bf16.mxu1 %v5040_v49  ;;  %v3757_v49 = vld [vmem:[%s7862_s17 + $0x170] sm:$0xff]  ;;  %v4189_v62 = vunpack.c.h.s8.bf16 %v3725_v6 }
 0x79a   : > { %v4253_v7 = vunpack.c.h.s8.bf16 %v3757_v49 }
 0x79b   : > { %5774 = vmatpush2.bf16.msra.mxu0 %v4975_v28  ;;  %v4250_v28 = vunpack.c.l.s8.bf16 %v3758_v10  ;;  %v3750_v10 = vld [vmem:[%s7862_s17 + $0x138] sm:$0xff] }
 0x79c   : > { %5815 = vmatpush2.bf16.msra.mxu1 %v5039_v60  ;;  %5775 = vmatprep.subr.bf16.mxu0 %v4972_v45  ;;  %v3722_v60 = vld [vmem:[%s7862_s17 + $0x58] sm:$0xff] }
 0x79d   : > { %5816 = vmatprep.subr.bf16.mxu1 %v5036_v20  ;;  %v3754_v45 = vld [vmem:[%s7862_s17 + $0x158] sm:$0xff]  ;;  %v4182_v30 = vunpack.c.h.s8.bf16 %v3722_v60 }
 0x79e   : > { %v4246_v57 = vunpack.c.h.s8.bf16 %v3754_v45  ;;  %v4242_v35 = vunpack.c.l.s8.bf16 %v3754_v45 }
 0x79f   : > { %5776 = vmatpush2.bf16.msra.mxu0 %v4971_v42  ;;  %v4185_v42 = vunpack.c.l.s8.bf16 %v3725_v6  ;;  %v3749_v6 = vld [vmem:[%s7862_s17 + $0x130] sm:$0xff] }
 0x7a0   : > { %5817 = vmatpush2.bf16.msra.mxu1 %v5035_v9  ;;  %5777 = vmatprep.subr.bf16.mxu0 %v4968_v3  ;;  %v4249_v9 = vunpack.c.l.s8.bf16 %v3757_v49 }
 0x7a1   : > { %5818 = vmatprep.subr.bf16.mxu1 %v5032_v15 }
 0x7a3   : > { %5778 = vmatpush2.bf16.msra.mxu0 %v4967_v53  ;;  %v3721_v53 = vld [vmem:[%s7862_s17 + $0x50] sm:$0xff] }
 0x7a4   : > { %5819 = vmatpush2.bf16.msra.mxu1 %v5031_v44  ;;  %5779 = vmatprep.subr.bf16.mxu0 %v4964_v56  ;;  %v3753_v44 = vld [vmem:[%s7862_s17 + $0x150] sm:$0xff] }
 0x7a5   : > { %5820 = vmatprep.subr.bf16.mxu1 %v5028_v58 }
 0x7a7   : > { %5780 = vmatpush2.bf16.msra.mxu0 %v4963_v25  ;;  %v4181_v25 = vunpack.c.h.s8.bf16 %v3721_v53 }
 0x7a8   : > { %5821 = vmatpush2.bf16.msra.mxu1 %v5027_v11  ;;  %5781 = vmatprep.subr.bf16.mxu0 %v4960_v31  ;;  %v4245_v11 = vunpack.c.h.s8.bf16 %v3753_v44 }
 0x7a9   : > { %5822 = vmatprep.subr.bf16.mxu1 %v5024_v27 }
 0x7ab   : > { %5782 = vmatpush2.bf16.msra.mxu0 %v4959_v21  ;;  %v4241_v21 = vunpack.c.l.s8.bf16 %v3753_v44  ;;  %v3774_v44 = vld [vmem:[%s7862_s17 + $0x1f8] sm:$0xff] }
 0x7ac   : > { %5823 = vmatpush2.bf16.msra.mxu1 %v5023_v54  ;;  %5833 = vmatprep.subr.bf16.mxu0 %v4190_v52  ;;  %v4238_v52 = vunpack.c.h.s8.bf16 %v3750_v10 }
 0x7ad   : > { %5874 = vmatprep.subr.bf16.mxu1 %v4254_v59  ;;  %v3717_v59 = vld [vmem:[%s7862_s17 + $0x30] sm:$0xff] }
 0x7ae   : > { %v5539_v20 = vpop.f32.mrf.mxu0  ;;  %5784 = vmatmul.mubr.bf16.vlgmr.msra.gmra.mxu0 %v10602_v1  ;;  %v4173_v49 = vunpack.c.h.s8.bf16 %v3717_v59  ;;  %v4169_v45 = vunpack.c.l.s8.bf16 %v3717_v59 }
 0x7af   : > { %v5580_v13 = vpop.f32.mrf.mxu1  ;;  %5825 = vmatmul.mubr.bf16.vlgmr.msra.gmra.mxu1 %v10608_v40  ;;  %v5540_v55 = vadd.f32 %v5539_v20, %v10567_v46  ;;  %5834 = vmatpush1.bf16.msra.mxu0 %v4189_v62  ;;  %v4237_v62 = vunpack.c.h.s8.bf16 %v3749_v6  ;;  %v4233_v20 = vunpack.c.l.s8.bf16 %v3749_v6  ;;  %v3737_v6 = vld [vmem:[%s7862_s17 + $0xd0] sm:$0xff] }
 0x7b0   : > { %5875 = vmatpush1.bf16.msra.mxu1 %v4253_v7  ;;  %v5541_v3 = vpop.f32.mrf.mxu0  ;;  %5835 = vmatprep.subr.bf16.mxu0 %v4186_v36  ;;  %v4234_v36 = vunpack.c.l.s8.bf16 %v3750_v10  ;;  %v3738_v10 = vld [vmem:[%s7862_s17 + $0xd8] sm:$0xff] }
 0x7b1   : > { %v5582_v15 = vpop.f32.mrf.mxu1  ;;  %5876 = vmatprep.subr.bf16.mxu1 %v4250_v28  ;;  %v10617_v56 = vadd.f32 %v5580_v13, %v5540_v55  ;;  %v5542_v58 = vadd.f32 %v5541_v3, %v10572_v5  ;;  %5865 = vmatprep.mubr.bf16.mxu0 %v10210_v47  ;;  %v4178_v5 = vunpack.c.l.s8.bf16 %v3722_v60  ;;  %v3718_v47 = vld [vmem:[%s7862_s17 + $0x38] sm:$0xff] }
 0x7b2   : > { %5906 = vmatprep.mubr.bf16.mxu1 %v10216_v14  ;;  %v5543_v46 = vpop.f32.mrf.mxu0  ;;  %v4177_v14 = vunpack.c.l.s8.bf16 %v3721_v53  ;;  %v4174_v54 = vunpack.c.h.s8.bf16 %v3718_v47  ;;  %v4170_v7 = vunpack.c.l.s8.bf16 %v3718_v47  ;;  %v3714_v28 = vld [vmem:[%s7862_s17 + $0x18] sm:$0xff]  ;;  %v4282_v47 = vunpack.c.l.s8.bf16 %v3774_v44 }
 0x7b3   : > { %v5584_v4 = vpop.f32.mrf.mxu1  ;;  %v10622_v41 = vadd.f32 %v5582_v15, %v5542_v58  ;;  %5836 = vmatpush1.bf16.msra.mxu0 %v4185_v42  ;;  %v3746_v60 = vld [vmem:[%s7862_s17 + $0x118] sm:$0xff]  ;;  %v4166_v13 = vunpack.c.h.s8.bf16 %v3714_v28  ;;  %v3713_v42 = vld [vmem:[%s7862_s17 + $0x10] sm:$0xff] }
 0x7b4   : > { %5877 = vmatpush1.bf16.msra.mxu1 %v4249_v9  ;;  %v5544_v31 = vpop.f32.mrf.mxu0  ;;  %5837 = vmatprep.subr.bf16.mxu0 %v4182_v30  ;;  %v4230_v55 = vunpack.c.h.s8.bf16 %v3746_v60  ;;  %v3745_v9 = vld [vmem:[%s7862_s17 + $0x110] sm:$0xff]  ;;  %v4165_v3 = vunpack.c.h.s8.bf16 %v3713_v42  ;;  %v4162_v30 = vunpack.c.l.s8.bf16 %v3714_v28  ;;  %v3742_v53 = vld [vmem:[%s7862_s17 + $0xf8] sm:$0xff]  ;;  %v4161_v58 = vunpack.c.l.s8.bf16 %v3713_v42 }
 0x7b5   : > { %v5585_v27 = vpop.f32.mrf.mxu1  ;;  %5878 = vmatprep.subr.bf16.mxu1 %v4246_v57  ;;  %v4229_v15 = vunpack.c.h.s8.bf16 %v3745_v9  ;;  %v4226_v57 = vunpack.c.l.s8.bf16 %v3746_v60  ;;  %v4225_v46 = vunpack.c.l.s8.bf16 %v3745_v9  ;;  %v4222_v4 = vunpack.c.h.s8.bf16 %v3742_v53  ;;  %v3773_v31 = vld [vmem:[%s7862_s17 + $0x1f0] sm:$0xff]  ;;  %v3734_v60 = vld [vmem:[%s7862_s17 + $0xb8] sm:$0xff] }
 0x7b6   : > { %v3733_v9 = vld [vmem:[%s7862_s17 + $0xb0] sm:$0xff] }
 0x7b7   : > { %5838 = vmatpush1.bf16.msra.mxu0 %v4181_v25  ;;  %v4286_v25 = vunpack.c.h.s8.bf16 %v3774_v44  ;;  %v3730_v44 = vld [vmem:[%s7862_s17 + $0x98] sm:$0xff] }
 0x7b8   : > { %5879 = vmatpush1.bf16.msra.mxu1 %v4245_v11  ;;  %5839 = vmatprep.subr.bf16.mxu0 %v4178_v5  ;;  %v3741_v11 = vld [vmem:[%s7862_s17 + $0xf0] sm:$0xff]  ;;  %v4285_v5 = vunpack.c.h.s8.bf16 %v3773_v31 }
 0x7b9   : > { %5880 = vmatprep.subr.bf16.mxu1 %v4242_v35  ;;  %v4221_v27 = vunpack.c.h.s8.bf16 %v3741_v11  ;;  %v4218_v35 = vunpack.c.l.s8.bf16 %v3742_v53 }
 0x7bb   : > { %5840 = vmatpush1.bf16.msra.mxu0 %v4177_v14  ;;  %v3770_v14 = vld [vmem:[%s7862_s17 + $0x1d8] sm:$0xff] }
 0x7bc   : > { %5881 = vmatpush1.bf16.msra.mxu1 %v4241_v21  ;;  %5841 = vmatprep.subr.bf16.mxu0 %v4174_v54  ;;  %v4217_v21 = vunpack.c.l.s8.bf16 %v3741_v11  ;;  %v4281_v54 = vunpack.c.l.s8.bf16 %v3773_v31  ;;  %v4278_v59 = vunpack.c.h.s8.bf16 %v3770_v14  ;;  %v4274_v28 = vunpack.c.l.s8.bf16 %v3770_v14  ;;  %v3729_v31 = vld [vmem:[%s7862_s17 + $0x90] sm:$0xff]  ;;  %v3790_v14 = vld [vmem:[%s7862_s17 + $0x278] sm:$0xff] }
 0x7bd   : > { %5882 = vmatprep.subr.bf16.mxu1 %v4238_v52  ;;  %v4214_v52 = vunpack.c.h.s8.bf16 %v3738_v10 }
 0x7bf   : > { %5842 = vmatpush1.bf16.msra.mxu0 %v4173_v49  ;;  %v3769_v49 = vld [vmem:[%s7862_s17 + $0x1d0] sm:$0xff] }
 0x7c0   : > { %5883 = vmatpush1.bf16.msra.mxu1 %v4237_v62  ;;  %5843 = vmatprep.subr.bf16.mxu0 %v4170_v7  ;;  %v4213_v62 = vunpack.c.h.s8.bf16 %v3737_v6  ;;  %v4277_v7 = vunpack.c.h.s8.bf16 %v3769_v49 }
 0x7c1   : > { %5884 = vmatprep.subr.bf16.mxu1 %v4234_v36  ;;  %v4210_v36 = vunpack.c.l.s8.bf16 %v3738_v10 }
 0x7c3   : > { %5844 = vmatpush1.bf16.msra.mxu0 %v4169_v45  ;;  %v3766_v45 = vld [vmem:[%s7862_s17 + $0x1b8] sm:$0xff] }
 0x7c4   : > { %5885 = vmatpush1.bf16.msra.mxu1 %v4233_v20  ;;  %5845 = vmatprep.subr.bf16.mxu0 %v4166_v13  ;;  %v4209_v20 = vunpack.c.l.s8.bf16 %v3737_v6  ;;  %v4273_v13 = vunpack.c.l.s8.bf16 %v3769_v49  ;;  %v4270_v42 = vunpack.c.h.s8.bf16 %v3766_v45  ;;  %v4266_v53 = vunpack.c.l.s8.bf16 %v3766_v45  ;;  %v3789_v49 = vld [vmem:[%s7862_s17 + $0x270] sm:$0xff]  ;;  %v3786_v45 = vld [vmem:[%s7862_s17 + $0x258] sm:$0xff] }
 0x7c5   : > { %5886 = vmatprep.subr.bf16.mxu1 %v4230_v55  ;;  %v4206_v55 = vunpack.c.h.s8.bf16 %v3734_v60 }
 0x7c7   : > { %5846 = vmatpush1.bf16.msra.mxu0 %v4165_v3  ;;  %v3765_v3 = vld [vmem:[%s7862_s17 + $0x1b0] sm:$0xff] }
 0x7c8   : > { %5887 = vmatpush1.bf16.msra.mxu1 %v4229_v15  ;;  %5847 = vmatprep.subr.bf16.mxu0 %v4162_v30  ;;  %v4205_v15 = vunpack.c.h.s8.bf16 %v3733_v9  ;;  %v4269_v30 = vunpack.c.h.s8.bf16 %v3765_v3 }
 0x7c9   : > { %5888 = vmatprep.subr.bf16.mxu1 %v4226_v57  ;;  %v4202_v57 = vunpack.c.l.s8.bf16 %v3734_v60 }
 0x7cb   : > { %5848 = vmatpush1.bf16.msra.mxu0 %v4161_v58  ;;  %v3762_v58 = vld [vmem:[%s7862_s17 + $0x198] sm:$0xff] }
 0x7cc   : > { %5889 = vmatpush1.bf16.msra.mxu1 %v4225_v46  ;;  %5849 = vmatprep.subr.bf16.mxu0 %v4222_v4  ;;  %v4201_v46 = vunpack.c.l.s8.bf16 %v3733_v9  ;;  %v4265_v4 = vunpack.c.l.s8.bf16 %v3765_v3  ;;  %v4262_v11 = vunpack.c.h.s8.bf16 %v3762_v58  ;;  %v4258_v10 = vunpack.c.l.s8.bf16 %v3762_v58  ;;  %v3817_v58 = vld [vmem:[%s7862_s17 + $0x350] sm:$0xff] }
 0x7cd   : > { %5890 = vmatprep.subr.bf16.mxu1 %v4286_v25  ;;  %v4198_v25 = vunpack.c.h.s8.bf16 %v3730_v44  ;;  %v4313_v9 = vunpack.c.l.s8.bf16 %v3789_v49 }
 0x7cf   : > { %5850 = vmatpush2.bf16.msra.mxu0 %v4221_v27  ;;  %v3761_v27 = vld [vmem:[%s7862_s17 + $0x190] sm:$0xff] }
 0x7d0   : > { %5891 = vmatpush2.bf16.msra.mxu1 %v4285_v5  ;;  %5851 = vmatprep.subr.bf16.mxu0 %v4218_v35  ;;  %v4197_v5 = vunpack.c.h.s8.bf16 %v3729_v31  ;;  %v4261_v35 = vunpack.c.h.s8.bf16 %v3761_v27 }
 0x7d1   : > { %5892 = vmatprep.subr.bf16.mxu1 %v4282_v47  ;;  %v4194_v47 = vunpack.c.l.s8.bf16 %v3730_v44  ;;  %v3785_v44 = vld [vmem:[%s7862_s17 + $0x250] sm:$0xff] }
 0x7d3   : > { %5852 = vmatpush2.bf16.msra.mxu0 %v4217_v21  ;;  %v3822_v21 = vld [vmem:[%s7862_s17 + $0x378] sm:$0xff] }
 0x7d4   : > { %5893 = vmatpush2.bf16.msra.mxu1 %v4281_v54  ;;  %5853 = vmatprep.subr.bf16.mxu0 %v4214_v52  ;;  %v4193_v54 = vunpack.c.l.s8.bf16 %v3729_v31  ;;  %v4257_v52 = vunpack.c.l.s8.bf16 %v3761_v27  ;;  %v4382_v6 = vunpack.c.h.s8.bf16 %v3822_v21  ;;  %v4378_v60 = vunpack.c.l.s8.bf16 %v3822_v21  ;;  %v3781_v21 = vld [vmem:[%s7862_s17 + $0x230] sm:$0xff] }
 0x7d5   : > { %5894 = vmatprep.subr.bf16.mxu1 %v4278_v59  ;;  %v4318_v59 = vunpack.c.h.s8.bf16 %v3790_v14 }
 0x7d7   : > { %5854 = vmatpush2.bf16.msra.mxu0 %v4213_v62  ;;  %v3821_v62 = vld [vmem:[%s7862_s17 + $0x370] sm:$0xff] }
 0x7d8   : > { %5895 = vmatpush2.bf16.msra.mxu1 %v4277_v7  ;;  %5855 = vmatprep.subr.bf16.mxu0 %v4210_v36  ;;  %v4317_v7 = vunpack.c.h.s8.bf16 %v3789_v49  ;;  %v4381_v36 = vunpack.c.h.s8.bf16 %v3821_v62  ;;  %v4377_v3 = vunpack.c.l.s8.bf16 %v3821_v62  ;;  %v3778_v62 = vld [vmem:[%s7862_s17 + $0x218] sm:$0xff] }
 0x7d9   : > { %5896 = vmatprep.subr.bf16.mxu1 %v4274_v28  ;;  %v4314_v28 = vunpack.c.l.s8.bf16 %v3790_v14 }
 0x7db   : > { %5856 = vmatpush2.bf16.msra.mxu0 %v4209_v20  ;;  %v3818_v20 = vld [vmem:[%s7862_s17 + $0x358] sm:$0xff] }
 0x7dc   : > { %5897 = vmatpush2.bf16.msra.mxu1 %v4273_v13  ;;  %5857 = vmatprep.subr.bf16.mxu0 %v4206_v55 }
 0x7dd   : > { %5898 = vmatprep.subr.bf16.mxu1 %v4270_v42 }
 0x7df   : > { %5858 = vmatpush2.bf16.msra.mxu0 %v4205_v15 }
 0x7e0   : > { %5899 = vmatpush2.bf16.msra.mxu1 %v4269_v30  ;;  %5859 = vmatprep.subr.bf16.mxu0 %v4202_v57  ;;  %v4310_v57 = vunpack.c.h.s8.bf16 %v3786_v45 }
 0x7e1   : > { %5900 = vmatprep.subr.bf16.mxu1 %v4266_v53  ;;  %v4374_v53 = vunpack.c.h.s8.bf16 %v3818_v20 }
 0x7e3   : > { %5860 = vmatpush2.bf16.msra.mxu0 %v4201_v46 }
 0x7e4   : > { %5901 = vmatpush2.bf16.msra.mxu1 %v4265_v4  ;;  %5861 = vmatprep.subr.bf16.mxu0 %v4198_v25  ;;  %v4309_v25 = vunpack.c.h.s8.bf16 %v3785_v44 }
 0x7e5   : > { %5902 = vmatprep.subr.bf16.mxu1 %v4262_v11  ;;  %v4373_v11 = vunpack.c.h.s8.bf16 %v3817_v58 }
 0x7e7   : > { %5862 = vmatpush2.bf16.msra.mxu0 %v4197_v5  ;;  %v4370_v5 = vunpack.c.l.s8.bf16 %v3818_v20  ;;  %v3777_v20 = vld [vmem:[%s7862_s17 + $0x210] sm:$0xff] }
 0x7e8   : > { %5903 = vmatpush2.bf16.msra.mxu1 %v4261_v35  ;;  %5863 = vmatprep.subr.bf16.mxu0 %v4194_v47  ;;  %v3814_v35 = vld [vmem:[%s7862_s17 + $0x338] sm:$0xff]  ;;  %v4369_v47 = vunpack.c.l.s8.bf16 %v3817_v58 }
 0x7e9   : > { %5904 = vmatprep.subr.bf16.mxu1 %v4258_v10  ;;  %v4366_v14 = vunpack.c.h.s8.bf16 %v3814_v35  ;;  %v4362_v49 = vunpack.c.l.s8.bf16 %v3814_v35 }
 0x7eb   : > { %5864 = vmatpush2.bf16.msra.mxu0 %v4193_v54  ;;  %v3813_v54 = vld [vmem:[%s7862_s17 + $0x330] sm:$0xff] }
 0x7ec   : > { %5905 = vmatpush2.bf16.msra.mxu1 %v4257_v52  ;;  %5915 = vmatprep.subr.bf16.mxu0 %v4318_v59  ;;  %v4301_v52 = vunpack.c.h.s8.bf16 %v3781_v21  ;;  %v4365_v59 = vunpack.c.h.s8.bf16 %v3813_v54 }
 0x7ed   : > { %5956 = vmatprep.subr.bf16.mxu1 %v4382_v6 }
 0x7ee   : > { %v5621_v13 = vpop.f32.mrf.mxu0  ;;  %5866 = vmatmul.mubr.bf16.vlgmr.msra.gmra.mxu0 %v10243_v17 }
 0x7ef   : > { %v5662_v55 = vpop.f32.mrf.mxu1  ;;  %5907 = vmatmul.mubr.bf16.vlgmr.msra.gmra.mxu1 %v10252_v34  ;;  %v5622_v42 = vadd.f32 %v5621_v13, %v10617_v56  ;;  %5916 = vmatpush1.bf16.msra.mxu0 %v4317_v7  ;;  %v3810_v7 = vld [vmem:[%s7862_s17 + $0x318] sm:$0xff]  ;;  %v3809_v13 = vld [vmem:[%s7862_s17 + $0x310] sm:$0xff] }
 0x7f0   : > { %5957 = vmatpush1.bf16.msra.mxu1 %v4381_v36  ;;  %v5623_v15 = vpop.f32.mrf.mxu0  ;;  %5917 = vmatprep.subr.bf16.mxu0 %v4314_v28  ;;  %v4297_v36 = vunpack.c.l.s8.bf16 %v3781_v21  ;;  %v4361_v28 = vunpack.c.l.s8.bf16 %v3813_v54 }
 0x7f1   : > { %v5664_v30 = vpop.f32.mrf.mxu1  ;;  %5958 = vmatprep.subr.bf16.mxu1 %v4378_v60  ;;  %v10659_v46 = vadd.f32 %v5662_v55, %v5622_v42  ;;  %v5624_v17 = vadd.f32 %v5623_v15, %v10622_v41  ;;  %5947 = vmatprep.mubr.bf16.mxu0 %v10248_v24  ;;  %v4306_v41 = vunpack.c.l.s8.bf16 %v3786_v45  ;;  %v3782_v24 = vld [vmem:[%s7862_s17 + $0x238] sm:$0xff]  ;;  %v4294_v60 = vunpack.c.h.s8.bf16 %v3778_v62 }
 0x7f2   : > { %5988 = vmatprep.mubr.bf16.mxu1 %v10258_v43  ;;  %v5625_v34 = vpop.f32.mrf.mxu0  ;;  %v4305_v43 = vunpack.c.l.s8.bf16 %v3785_v44  ;;  %v4302_v10 = vunpack.c.h.s8.bf16 %v3782_v24  ;;  %v4298_v6 = vunpack.c.l.s8.bf16 %v3782_v24  ;;  %v4358_v45 = vunpack.c.h.s8.bf16 %v3810_v7  ;;  %v3806_v15 = vld [vmem:[%s7862_s17 + $0x2f8] sm:$0xff] }
 0x7f3   : > { %v5666_v56 = vpop.f32.mrf.mxu1  ;;  %v10664_v4 = vadd.f32 %v5664_v30, %v5624_v17  ;;  %5918 = vmatpush1.bf16.msra.mxu0 %v4313_v9  ;;  %v4293_v55 = vunpack.c.h.s8.bf16 %v3777_v20  ;;  %v4357_v42 = vunpack.c.h.s8.bf16 %v3809_v13  ;;  %v4290_v9 = vunpack.c.l.s8.bf16 %v3778_v62  ;;  %v3838_v30 = vld [vmem:[%s7862_s17 + $0x3f8] sm:$0xff]  ;;  %v3805_v17 = vld [vmem:[%s7862_s17 + $0x2f0] sm:$0xff] }
 0x7f4   : > { %5959 = vmatpush1.bf16.msra.mxu1 %v4377_v3  ;;  %v5626_v31 = vpop.f32.mrf.mxu0  ;;  %5919 = vmatprep.subr.bf16.mxu0 %v4310_v57  ;;  %v4354_v3 = vunpack.c.l.s8.bf16 %v3810_v7  ;;  %v4289_v57 = vunpack.c.l.s8.bf16 %v3777_v20  ;;  %v4350_v44 = vunpack.c.h.s8.bf16 %v3806_v15  ;;  %v4414_v58 = vunpack.c.h.s8.bf16 %v3838_v30  ;;  %v3837_v34 = vld [vmem:[%s7862_s17 + $0x3f0] sm:$0xff] }
 0x7f5   : > { %v5667_v27 = vpop.f32.mrf.mxu1  ;;  %5960 = vmatprep.subr.bf16.mxu1 %v4374_v53  ;;  %v4353_v53 = vunpack.c.l.s8.bf16 %v3809_v13  ;;  %v4349_v56 = vunpack.c.h.s8.bf16 %v3805_v17  ;;  %v4410_v31 = vunpack.c.l.s8.bf16 %v3838_v30  ;;  %v4409_v24 = vunpack.c.l.s8.bf16 %v3837_v34 }
 0x7f6   : > { %v3802_v27 = vld [vmem:[%s7862_s17 + $0x2d8] sm:$0xff] }
 0x7f7   : > { %5920 = vmatpush1.bf16.msra.mxu0 %v4309_v25  ;;  %v4413_v25 = vunpack.c.h.s8.bf16 %v3837_v34  ;;  %v4342_v35 = vunpack.c.h.s8.bf16 %v3802_v27  ;;  %v4338_v54 = vunpack.c.l.s8.bf16 %v3802_v27 }
 0x7f8   : > { %5961 = vmatpush1.bf16.msra.mxu1 %v4373_v11  ;;  %5921 = vmatprep.subr.bf16.mxu0 %v4306_v41  ;;  %v4346_v11 = vunpack.c.l.s8.bf16 %v3806_v15  ;;  %v3834_v41 = vld [vmem:[%s7862_s17 + $0x3d8] sm:$0xff] }
 0x7f9   : > { %5962 = vmatprep.subr.bf16.mxu1 %v4370_v5  ;;  %v4345_v5 = vunpack.c.l.s8.bf16 %v3805_v17 }
 0x7fb   : > { %5922 = vmatpush1.bf16.msra.mxu0 %v4305_v43  ;;  %v4406_v43 = vunpack.c.h.s8.bf16 %v3834_v41 }
 0x7fc   : > { %5963 = vmatpush1.bf16.msra.mxu1 %v4369_v47  ;;  %5923 = vmatprep.subr.bf16.mxu0 %v4302_v10  ;;  %v3801_v47 = vld [vmem:[%s7862_s17 + $0x2d0] sm:$0xff] }
 0x7fd   : > { %5964 = vmatprep.subr.bf16.mxu1 %v4366_v14  ;;  %v3833_v10 = vld [vmem:[%s7862_s17 + $0x3d0] sm:$0xff]  ;;  %v4341_v14 = vunpack.c.h.s8.bf16 %v3801_v47 }
 0x7fe   : > { %v4405_v21 = vunpack.c.h.s8.bf16 %v3833_v10  ;;  %v4401_v62 = vunpack.c.l.s8.bf16 %v3833_v10 }
 0x7ff   : > { %5924 = vmatpush1.bf16.msra.mxu0 %v4301_v52  ;;  %v4402_v52 = vunpack.c.l.s8.bf16 %v3834_v41 }
 0x800   : > { %5965 = vmatpush1.bf16.msra.mxu1 %v4365_v59  ;;  %5925 = vmatprep.subr.bf16.mxu0 %v4298_v6  ;;  %v3798_v59 = vld [vmem:[%s7862_s17 + $0x2b8] sm:$0xff] }
 0x801   : > { %5966 = vmatprep.subr.bf16.mxu1 %v4362_v49  ;;  %v3830_v6 = vld [vmem:[%s7862_s17 + $0x3b8] sm:$0xff]  ;;  %v4337_v49 = vunpack.c.l.s8.bf16 %v3801_v47  ;;  %v4334_v7 = vunpack.c.h.s8.bf16 %v3798_v59  ;;  %v4330_v13 = vunpack.c.l.s8.bf16 %v3798_v59 }
 0x803   : > { %5926 = vmatpush1.bf16.msra.mxu0 %v4297_v36  ;;  %v4398_v36 = vunpack.c.h.s8.bf16 %v3830_v6 }
 0x804   : > { %5967 = vmatpush1.bf16.msra.mxu1 %v4361_v28  ;;  %5927 = vmatprep.subr.bf16.mxu0 %v4294_v60  ;;  %v3797_v28 = vld [vmem:[%s7862_s17 + $0x2b0] sm:$0xff] }
 0x805   : > { %5968 = vmatprep.subr.bf16.mxu1 %v4358_v45  ;;  %v3829_v60 = vld [vmem:[%s7862_s17 + $0x3b0] sm:$0xff]  ;;  %v4333_v45 = vunpack.c.h.s8.bf16 %v3797_v28 }
 0x806   : > { %v4397_v20 = vunpack.c.h.s8.bf16 %v3829_v60  ;;  %v4393_v15 = vunpack.c.l.s8.bf16 %v3829_v60 }
 0x807   : > { %5928 = vmatpush1.bf16.msra.mxu0 %v4293_v55  ;;  %v4394_v55 = vunpack.c.l.s8.bf16 %v3830_v6 }
 0x808   : > { %5969 = vmatpush1.bf16.msra.mxu1 %v4357_v42  ;;  %5929 = vmatprep.subr.bf16.mxu0 %v4290_v9  ;;  %v3794_v42 = vld [vmem:[%s7862_s17 + $0x298] sm:$0xff] }
 0x809   : > { %5970 = vmatprep.subr.bf16.mxu1 %v4354_v3  ;;  %v3826_v9 = vld [vmem:[%s7862_s17 + $0x398] sm:$0xff]  ;;  %v4329_v3 = vunpack.c.l.s8.bf16 %v3797_v28  ;;  %v4326_v30 = vunpack.c.h.s8.bf16 %v3794_v42  ;;  %v4322_v34 = vunpack.c.l.s8.bf16 %v3794_v42 }
 0x80b   : > { %5930 = vmatpush1.bf16.msra.mxu0 %v4289_v57  ;;  %v4390_v57 = vunpack.c.h.s8.bf16 %v3826_v9 }
 0x80c   : > { %5971 = vmatpush1.bf16.msra.mxu1 %v4353_v53  ;;  %5931 = vmatprep.subr.bf16.mxu0 %v4350_v44  ;;  %v3793_v53 = vld [vmem:[%s7862_s17 + $0x290] sm:$0xff] }
 0x80d   : > { %5972 = vmatprep.subr.bf16.mxu1 %v4414_v58  ;;  %v3825_v44 = vld [vmem:[%s7862_s17 + $0x390] sm:$0xff]  ;;  %v4325_v58 = vunpack.c.h.s8.bf16 %v3793_v53 }
 0x80e   : > { %v4389_v17 = vunpack.c.h.s8.bf16 %v3825_v44  ;;  %v4385_v27 = vunpack.c.l.s8.bf16 %v3825_v44 }
 0x80f   : > { %5932 = vmatpush2.bf16.msra.mxu0 %v4349_v56  ;;  %v4386_v56 = vunpack.c.l.s8.bf16 %v3826_v9 }
 0x810   : > { %5973 = vmatpush2.bf16.msra.mxu1 %v4413_v25  ;;  %5933 = vmatprep.subr.bf16.mxu0 %v4346_v11  ;;  %v3854_v25 = vld [vmem:[%s7862_s17 + $0x478] sm:$0xff] }
 0x811   : > { %5974 = vmatprep.subr.bf16.mxu1 %v4410_v31  ;;  %v3886_v11 = vld [vmem:[%s7862_s17 + $0x578] sm:$0xff]  ;;  %v4321_v31 = vunpack.c.l.s8.bf16 %v3793_v53  ;;  %v4446_v41 = vunpack.c.h.s8.bf16 %v3854_v25  ;;  %v4442_v10 = vunpack.c.l.s8.bf16 %v3854_v25 }
 0x813   : > { %5934 = vmatpush2.bf16.msra.mxu0 %v4345_v5  ;;  %v4510_v5 = vunpack.c.h.s8.bf16 %v3886_v11 }
 0x814   : > { %5975 = vmatpush2.bf16.msra.mxu1 %v4409_v24  ;;  %5935 = vmatprep.subr.bf16.mxu0 %v4342_v35  ;;  %v3853_v24 = vld [vmem:[%s7862_s17 + $0x470] sm:$0xff] }
 0x815   : > { %5976 = vmatprep.subr.bf16.mxu1 %v4406_v43  ;;  %v3885_v35 = vld [vmem:[%s7862_s17 + $0x570] sm:$0xff]  ;;  %v4445_v43 = vunpack.c.h.s8.bf16 %v3853_v24 }
 0x816   : > { %v4509_v47 = vunpack.c.h.s8.bf16 %v3885_v35 }
 0x817   : > { %5936 = vmatpush2.bf16.msra.mxu0 %v4341_v14  ;;  %v4506_v14 = vunpack.c.l.s8.bf16 %v3886_v11 }
 0x818   : > { %5977 = vmatpush2.bf16.msra.mxu1 %v4405_v21  ;;  %5937 = vmatprep.subr.bf16.mxu0 %v4338_v54  ;;  %v3850_v21 = vld [vmem:[%s7862_s17 + $0x458] sm:$0xff] }
 0x819   : > { %5978 = vmatprep.subr.bf16.mxu1 %v4402_v52  ;;  %v3882_v54 = vld [vmem:[%s7862_s17 + $0x558] sm:$0xff]  ;;  %v4438_v28 = vunpack.c.h.s8.bf16 %v3850_v21 }
 0x81a   : > { %v4502_v60 = vunpack.c.h.s8.bf16 %v3882_v54 }
 0x81b   : > { %5938 = vmatpush2.bf16.msra.mxu0 %v4337_v49  ;;  %v4441_v49 = vunpack.c.l.s8.bf16 %v3853_v24 }
 0x81c   : > { %5979 = vmatpush2.bf16.msra.mxu1 %v4401_v62  ;;  %5939 = vmatprep.subr.bf16.mxu0 %v4334_v7  ;;  %v4505_v62 = vunpack.c.l.s8.bf16 %v3885_v35 }
 0x81d   : > { %5980 = vmatprep.subr.bf16.mxu1 %v4398_v36 }
 0x81f   : > { %5940 = vmatpush2.bf16.msra.mxu0 %v4333_v45  ;;  %v3849_v45 = vld [vmem:[%s7862_s17 + $0x450] sm:$0xff] }
 0x820   : > { %5981 = vmatpush2.bf16.msra.mxu1 %v4397_v20  ;;  %5941 = vmatprep.subr.bf16.mxu0 %v4330_v13  ;;  %v3881_v20 = vld [vmem:[%s7862_s17 + $0x550] sm:$0xff]  ;;  %v4437_v42 = vunpack.c.h.s8.bf16 %v3849_v45 }
 0x821   : > { %5982 = vmatprep.subr.bf16.mxu1 %v4394_v55  ;;  %v4501_v9 = vunpack.c.h.s8.bf16 %v3881_v20  ;;  %v4497_v53 = vunpack.c.l.s8.bf16 %v3881_v20 }
 0x823   : > { %5942 = vmatpush2.bf16.msra.mxu0 %v4329_v3 }
 0x824   : > { %5983 = vmatpush2.bf16.msra.mxu1 %v4393_v15  ;;  %5943 = vmatprep.subr.bf16.mxu0 %v4326_v30  ;;  %v4498_v30 = vunpack.c.l.s8.bf16 %v3882_v54 }
 0x825   : > { %5984 = vmatprep.subr.bf16.mxu1 %v4390_v57  ;;  %v3878_v57 = vld [vmem:[%s7862_s17 + $0x538] sm:$0xff] }
 0x827   : > { %5944 = vmatpush2.bf16.msra.mxu0 %v4325_v58  ;;  %v4494_v58 = vunpack.c.h.s8.bf16 %v3878_v57 }
 0x828   : > { %5985 = vmatpush2.bf16.msra.mxu1 %v4389_v17  ;;  %5945 = vmatprep.subr.bf16.mxu0 %v4322_v34  ;;  %v3845_v17 = vld [vmem:[%s7862_s17 + $0x430] sm:$0xff] }
 0x829   : > { %5986 = vmatprep.subr.bf16.mxu1 %v4386_v56  ;;  %v3877_v34 = vld [vmem:[%s7862_s17 + $0x530] sm:$0xff]  ;;  %v4429_v56 = vunpack.c.h.s8.bf16 %v3845_v17 }
 0x82a   : > { %v4493_v25 = vunpack.c.h.s8.bf16 %v3877_v34  ;;  %v4489_v24 = vunpack.c.l.s8.bf16 %v3877_v34 }
 0x82b   : > { %5946 = vmatpush2.bf16.msra.mxu0 %v4321_v31  ;;  %v4490_v31 = vunpack.c.l.s8.bf16 %v3878_v57 }
 0x82c   : > { %5987 = vmatpush2.bf16.msra.mxu1 %v4385_v27  ;;  %5997 = vmatprep.subr.bf16.mxu0 %v4446_v41  ;;  %v3842_v27 = vld [vmem:[%s7862_s17 + $0x418] sm:$0xff] }
 0x82d   : > { %6038 = vmatprep.subr.bf16.mxu1 %v4510_v5  ;;  %v3874_v41 = vld [vmem:[%s7862_s17 + $0x518] sm:$0xff]  ;;  %v4425_v5 = vunpack.c.l.s8.bf16 %v3845_v17  ;;  %v4422_v35 = vunpack.c.h.s8.bf16 %v3842_v27  ;;  %v4418_v54 = vunpack.c.l.s8.bf16 %v3842_v27  ;;  %v3893_v27 = vld [vmem:[%s7862_s17 + $0x5b0] sm:$0xff] }
 0x82e   : > { %v5703_v52 = vpop.f32.mrf.mxu0  ;;  %5948 = vmatmul.mubr.bf16.vlgmr.msra.gmra.mxu0 %v10303_v50  ;;  %v3894_v17 = vld [vmem:[%s7862_s17 + $0x5b8] sm:$0xff] }
 0x82f   : > { %v5744_v59 = vpop.f32.mrf.mxu1  ;;  %5989 = vmatmul.mubr.bf16.vlgmr.msra.gmra.mxu1 %v10312_v29  ;;  %v5704_v6 = vadd.f32 %v5703_v52, %v10659_v46  ;;  %5998 = vmatpush1.bf16.msra.mxu0 %v4445_v43  ;;  %v4486_v43 = vunpack.c.h.s8.bf16 %v3874_v41  ;;  %v4482_v52 = vunpack.c.l.s8.bf16 %v3874_v41 }
 0x830   : > { %6039 = vmatpush1.bf16.msra.mxu1 %v4509_v47  ;;  %v5705_v7 = vpop.f32.mrf.mxu0  ;;  %5999 = vmatprep.subr.bf16.mxu0 %v4442_v10  ;;  %v3841_v47 = vld [vmem:[%s7862_s17 + $0x410] sm:$0xff] }
 0x831   : > { %v5746_v36 = vpop.f32.mrf.mxu1  ;;  %6040 = vmatprep.subr.bf16.mxu1 %v4506_v14  ;;  %v10701_v13 = vadd.f32 %v5744_v59, %v5704_v6  ;;  %v5706_v50 = vadd.f32 %v5705_v7, %v10664_v4  ;;  %6029 = vmatprep.mubr.bf16.mxu0 %v10308_v16  ;;  %v4434_v4 = vunpack.c.l.s8.bf16 %v3850_v21  ;;  %v3846_v16 = vld [vmem:[%s7862_s17 + $0x438] sm:$0xff]  ;;  %v3873_v10 = vld [vmem:[%s7862_s17 + $0x510] sm:$0xff]  ;;  %v4421_v14 = vunpack.c.h.s8.bf16 %v3841_v47 }
 0x832   : > { %6070 = vmatprep.mubr.bf16.mxu1 %v10318_v19  ;;  %v5707_v29 = vpop.f32.mrf.mxu0  ;;  %v4433_v19 = vunpack.c.l.s8.bf16 %v3849_v45  ;;  %v4430_v44 = vunpack.c.h.s8.bf16 %v3846_v16  ;;  %v4426_v11 = vunpack.c.l.s8.bf16 %v3846_v16  ;;  %v4485_v21 = vunpack.c.h.s8.bf16 %v3873_v10  ;;  %v3870_v59 = vld [vmem:[%s7862_s17 + $0x4f8] sm:$0xff]  ;;  %v3897_v16 = vld [vmem:[%s7862_s17 + $0x5d0] sm:$0xff] }
 0x833   : > { %v5748_v46 = vpop.f32.mrf.mxu1  ;;  %v10706_v55 = vadd.f32 %v5746_v36, %v5706_v50  ;;  %6000 = vmatpush1.bf16.msra.mxu0 %v4441_v49  ;;  %v3902_v6 = vld [vmem:[%s7862_s17 + $0x5f8] sm:$0xff]  ;;  %v4417_v49 = vunpack.c.l.s8.bf16 %v3841_v47  ;;  %v4478_v7 = vunpack.c.h.s8.bf16 %v3870_v59  ;;  %v4474_v50 = vunpack.c.l.s8.bf16 %v3870_v59  ;;  %v3889_v59 = vld [vmem:[%s7862_s17 + $0x590] sm:$0xff] }
 0x834   : > { %6041 = vmatpush1.bf16.msra.mxu1 %v4505_v62  ;;  %v5708_v3 = vpop.f32.mrf.mxu0  ;;  %6001 = vmatprep.subr.bf16.mxu0 %v4438_v28  ;;  %v4481_v62 = vunpack.c.l.s8.bf16 %v3873_v10  ;;  %v4542_v36 = vunpack.c.h.s8.bf16 %v3902_v6  ;;  %v3869_v28 = vld [vmem:[%s7862_s17 + $0x4f0] sm:$0xff]  ;;  %v4538_v29 = vunpack.c.l.s8.bf16 %v3902_v6  ;;  %v3866_v46 = vld [vmem:[%s7862_s17 + $0x4d8] sm:$0xff] }
 0x835   : > { %v5749_v15 = vpop.f32.mrf.mxu1  ;;  %6042 = vmatprep.subr.bf16.mxu1 %v4502_v60  ;;  %v3901_v60 = vld [vmem:[%s7862_s17 + $0x5f0] sm:$0xff]  ;;  %v4477_v45 = vunpack.c.h.s8.bf16 %v3869_v28  ;;  %v3890_v47 = vld [vmem:[%s7862_s17 + $0x598] sm:$0xff] }
 0x836   : > { %v4541_v20 = vunpack.c.h.s8.bf16 %v3901_v60  ;;  %v4537_v3 = vunpack.c.l.s8.bf16 %v3901_v60  ;;  %v4470_v15 = vunpack.c.h.s8.bf16 %v3866_v46 }
 0x837   : > { %6002 = vmatpush1.bf16.msra.mxu0 %v4437_v42  ;;  %v3898_v42 = vld [vmem:[%s7862_s17 + $0x5d8] sm:$0xff] }
 0x838   : > { %6043 = vmatpush1.bf16.msra.mxu1 %v4501_v9  ;;  %6003 = vmatprep.subr.bf16.mxu0 %v4434_v4  ;;  %v4473_v9 = vunpack.c.l.s8.bf16 %v3869_v28  ;;  %v4534_v4 = vunpack.c.h.s8.bf16 %v3898_v42  ;;  %v3950_v28 = vld [vmem:[%s7862_s17 + $0x778] sm:$0xff] }
 0x839   : > { %6044 = vmatprep.subr.bf16.mxu1 %v4498_v30  ;;  %v3865_v30 = vld [vmem:[%s7862_s17 + $0x4d0] sm:$0xff] }
 0x83a   : > { %v4469_v57 = vunpack.c.h.s8.bf16 %v3865_v30  ;;  %v4465_v34 = vunpack.c.l.s8.bf16 %v3865_v30  ;;  %v3946_v30 = vld [vmem:[%s7862_s17 + $0x758] sm:$0xff] }
 0x83b   : > { %6004 = vmatpush1.bf16.msra.mxu0 %v4433_v19  ;;  %v4533_v19 = vunpack.c.h.s8.bf16 %v3897_v16 }
 0x83c   : > { %6045 = vmatpush1.bf16.msra.mxu1 %v4497_v53  ;;  %6005 = vmatprep.subr.bf16.mxu0 %v4430_v44  ;;  %v4466_v53 = vunpack.c.l.s8.bf16 %v3866_v46  ;;  %v4530_v44 = vunpack.c.l.s8.bf16 %v3898_v42  ;;  %v3949_v46 = vld [vmem:[%s7862_s17 + $0x770] sm:$0xff] }
 0x83d   : > { %6046 = vmatprep.subr.bf16.mxu1 %v4494_v58  ;;  %v3862_v58 = vld [vmem:[%s7862_s17 + $0x4b8] sm:$0xff] }
 0x83f   : > { %6006 = vmatpush1.bf16.msra.mxu0 %v4429_v56  ;;  %v4529_v56 = vunpack.c.l.s8.bf16 %v3897_v16 }
 0x840   : > { %6047 = vmatpush1.bf16.msra.mxu1 %v4493_v25  ;;  %6007 = vmatprep.subr.bf16.mxu0 %v4426_v11  ;;  %v4462_v25 = vunpack.c.h.s8.bf16 %v3862_v58  ;;  %v4526_v11 = vunpack.c.h.s8.bf16 %v3894_v17 }
 0x841   : > { %6048 = vmatprep.subr.bf16.mxu1 %v4490_v31  ;;  %v3861_v31 = vld [vmem:[%s7862_s17 + $0x4b0] sm:$0xff] }
 0x842   : > { %v4461_v41 = vunpack.c.h.s8.bf16 %v3861_v31  ;;  %v4457_v10 = vunpack.c.l.s8.bf16 %v3861_v31 }
 0x843   : > { %6008 = vmatpush1.bf16.msra.mxu0 %v4425_v5  ;;  %v4525_v5 = vunpack.c.h.s8.bf16 %v3893_v27 }
 0x844   : > { %6049 = vmatpush1.bf16.msra.mxu1 %v4489_v24  ;;  %6009 = vmatprep.subr.bf16.mxu0 %v4422_v35  ;;  %v4458_v24 = vunpack.c.l.s8.bf16 %v3862_v58  ;;  %v4522_v35 = vunpack.c.l.s8.bf16 %v3894_v17 }
 0x845   : > { %6050 = vmatprep.subr.bf16.mxu1 %v4486_v43  ;;  %v3858_v43 = vld [vmem:[%s7862_s17 + $0x498] sm:$0xff] }
 0x847   : > { %6010 = vmatpush1.bf16.msra.mxu0 %v4421_v14  ;;  %v4521_v14 = vunpack.c.l.s8.bf16 %v3893_v27 }
 0x848   : > { %6051 = vmatpush1.bf16.msra.mxu1 %v4485_v21  ;;  %6011 = vmatprep.subr.bf16.mxu0 %v4418_v54  ;;  %v4454_v21 = vunpack.c.h.s8.bf16 %v3858_v43  ;;  %v4518_v54 = vunpack.c.h.s8.bf16 %v3890_v47 }
 0x849   : > { %6052 = vmatprep.subr.bf16.mxu1 %v4482_v52  ;;  %v3857_v52 = vld [vmem:[%s7862_s17 + $0x490] sm:$0xff] }
 0x84a   : > { %v4453_v6 = vunpack.c.h.s8.bf16 %v3857_v52  ;;  %v4449_v60 = vunpack.c.l.s8.bf16 %v3857_v52  ;;  %v3909_v52 = vld [vmem:[%s7862_s17 + $0x630] sm:$0xff] }
 0x84b   : > { %6012 = vmatpush1.bf16.msra.mxu0 %v4417_v49  ;;  %v4517_v49 = vunpack.c.h.s8.bf16 %v3889_v59 }
 0x84c   : > { %6053 = vmatpush1.bf16.msra.mxu1 %v4481_v62  ;;  %6013 = vmatprep.subr.bf16.mxu0 %v4478_v7  ;;  %v4450_v62 = vunpack.c.l.s8.bf16 %v3858_v43  ;;  %v4514_v7 = vunpack.c.l.s8.bf16 %v3890_v47  ;;  %v3910_v43 = vld [vmem:[%s7862_s17 + $0x638] sm:$0xff] }
 0x84d   : > { %6054 = vmatprep.subr.bf16.mxu1 %v4542_v36  ;;  %v3918_v36 = vld [vmem:[%s7862_s17 + $0x678] sm:$0xff] }
 0x84e   : > { %v3942_v47 = vld [vmem:[%s7862_s17 + $0x738] sm:$0xff] }
 0x84f   : > { %6014 = vmatpush2.bf16.msra.mxu0 %v4477_v45  ;;  %v4513_v45 = vunpack.c.l.s8.bf16 %v3889_v59  ;;  %v3941_v59 = vld [vmem:[%s7862_s17 + $0x730] sm:$0xff] }
 0x850   : > { %6055 = vmatpush2.bf16.msra.mxu1 %v4541_v20  ;;  %6015 = vmatprep.subr.bf16.mxu0 %v4474_v50  ;;  %v4574_v20 = vunpack.c.h.s8.bf16 %v3918_v36  ;;  %v4638_v50 = vunpack.c.h.s8.bf16 %v3950_v28 }
 0x851   : > { %6056 = vmatprep.subr.bf16.mxu1 %v4538_v29  ;;  %v3917_v29 = vld [vmem:[%s7862_s17 + $0x670] sm:$0xff] }
 0x852   : > { %v4573_v42 = vunpack.c.h.s8.bf16 %v3917_v29 }
 0x853   : > { %6016 = vmatpush2.bf16.msra.mxu0 %v4473_v9  ;;  %v4637_v9 = vunpack.c.h.s8.bf16 %v3949_v46 }
 0x854   : > { %6057 = vmatpush2.bf16.msra.mxu1 %v4537_v3  ;;  %6017 = vmatprep.subr.bf16.mxu0 %v4470_v15  ;;  %v4570_v3 = vunpack.c.l.s8.bf16 %v3918_v36  ;;  %v4634_v15 = vunpack.c.l.s8.bf16 %v3950_v28  ;;  %v3906_v36 = vld [vmem:[%s7862_s17 + $0x618] sm:$0xff] }
 0x855   : > { %6058 = vmatprep.subr.bf16.mxu1 %v4534_v4  ;;  %v3914_v4 = vld [vmem:[%s7862_s17 + $0x658] sm:$0xff] }
 0x856   : > { %v3938_v28 = vld [vmem:[%s7862_s17 + $0x718] sm:$0xff] }
 0x857   : > { %6018 = vmatpush2.bf16.msra.mxu0 %v4469_v57 }
 0x858   : > { %6059 = vmatpush2.bf16.msra.mxu1 %v4533_v19  ;;  %6019 = vmatprep.subr.bf16.mxu0 %v4466_v53  ;;  %v4569_v53 = vunpack.c.l.s8.bf16 %v3917_v29  ;;  %v3905_v29 = vld [vmem:[%s7862_s17 + $0x610] sm:$0xff] }
 0x859   : > { %6060 = vmatprep.subr.bf16.mxu1 %v4530_v44  ;;  %v4633_v44 = vunpack.c.l.s8.bf16 %v3949_v46  ;;  %v3937_v46 = vld [vmem:[%s7862_s17 + $0x710] sm:$0xff] }
 0x85b   : > { %6020 = vmatpush2.bf16.msra.mxu0 %v4465_v34  ;;  %v4566_v34 = vunpack.c.h.s8.bf16 %v3914_v4 }
 0x85c   : > { %6061 = vmatpush2.bf16.msra.mxu1 %v4529_v56  ;;  %6021 = vmatprep.subr.bf16.mxu0 %v4462_v25  ;;  %v4630_v56 = vunpack.c.h.s8.bf16 %v3946_v30  ;;  %v3913_v25 = vld [vmem:[%s7862_s17 + $0x650] sm:$0xff] }
 0x85d   : > { %6062 = vmatprep.subr.bf16.mxu1 %v4526_v11  ;;  %v3945_v11 = vld [vmem:[%s7862_s17 + $0x750] sm:$0xff] }
 0x85f   : > { %6022 = vmatpush2.bf16.msra.mxu0 %v4461_v41  ;;  %v4565_v41 = vunpack.c.h.s8.bf16 %v3913_v25 }
 0x860   : > { %6063 = vmatpush2.bf16.msra.mxu1 %v4525_v5  ;;  %6023 = vmatprep.subr.bf16.mxu0 %v4458_v24  ;;  %v4629_v5 = vunpack.c.h.s8.bf16 %v3945_v11 }
 0x861   : > { %6064 = vmatprep.subr.bf16.mxu1 %v4522_v35 }
 0x863   : > { %6024 = vmatpush2.bf16.msra.mxu0 %v4457_v10  ;;  %v4561_v10 = vunpack.c.l.s8.bf16 %v3913_v25 }
 0x864   : > { %6065 = vmatpush2.bf16.msra.mxu1 %v4521_v14  ;;  %6025 = vmatprep.subr.bf16.mxu0 %v4454_v21  ;;  %v4625_v14 = vunpack.c.l.s8.bf16 %v3945_v11  ;;  %v4558_v21 = vunpack.c.h.s8.bf16 %v3910_v43  ;;  %v3930_v11 = vld [vmem:[%s7862_s17 + $0x6d8] sm:$0xff] }
 0x865   : > { %6066 = vmatprep.subr.bf16.mxu1 %v4518_v54  ;;  %v4622_v54 = vunpack.c.h.s8.bf16 %v3942_v47 }
 0x867   : > { %6026 = vmatpush2.bf16.msra.mxu0 %v4453_v6  ;;  %v4557_v6 = vunpack.c.h.s8.bf16 %v3909_v52 }
 0x868   : > { %6067 = vmatpush2.bf16.msra.mxu1 %v4517_v49  ;;  %6027 = vmatprep.subr.bf16.mxu0 %v4450_v62  ;;  %v4621_v49 = vunpack.c.h.s8.bf16 %v3941_v59  ;;  %v4554_v62 = vunpack.c.l.s8.bf16 %v3910_v43  ;;  %v4594_v43 = vunpack.c.l.s8.bf16 %v3930_v11 }
 0x869   : > { %6068 = vmatprep.subr.bf16.mxu1 %v4514_v7  ;;  %v4618_v7 = vunpack.c.l.s8.bf16 %v3942_v47 }
 0x86b   : > { %6028 = vmatpush2.bf16.msra.mxu0 %v4449_v60  ;;  %v4553_v60 = vunpack.c.l.s8.bf16 %v3909_v52 }
 0x86c   : > { %6069 = vmatpush2.bf16.msra.mxu1 %v4513_v45  ;;  %6079 = vmatprep.subr.bf16.mxu0 %v4574_v20  ;;  %v4617_v45 = vunpack.c.l.s8.bf16 %v3941_v59  ;;  %v4550_v20 = vunpack.c.h.s8.bf16 %v3906_v36 }
 0x86d   : > { %6120 = vmatprep.subr.bf16.mxu1 %v4638_v50  ;;  %v4614_v50 = vunpack.c.h.s8.bf16 %v3938_v28 }
 0x86e   : > { %v5785_v16 = vpop.f32.mrf.mxu0  ;;  %6030 = vmatmul.mubr.bf16.vlgmr.msra.gmra.mxu0 %v10361_v39 }
 0x86f   : > { %v5826_v57 = vpop.f32.mrf.mxu1  ;;  %6071 = vmatmul.mubr.bf16.vlgmr.msra.gmra.mxu1 %v10370_v26  ;;  %v5786_v19 = vadd.f32 %v5785_v16, %v10701_v13  ;;  %6080 = vmatpush1.bf16.msra.mxu0 %v4573_v42  ;;  %v4549_v42 = vunpack.c.h.s8.bf16 %v3905_v29  ;;  %v4545_v16 = vunpack.c.l.s8.bf16 %v3905_v29 }
 0x870   : > { %6121 = vmatpush1.bf16.msra.mxu1 %v4637_v9  ;;  %v5787_v58 = vpop.f32.mrf.mxu0  ;;  %6081 = vmatprep.subr.bf16.mxu0 %v4570_v3  ;;  %v4613_v9 = vunpack.c.h.s8.bf16 %v3937_v46  ;;  %v4546_v3 = vunpack.c.l.s8.bf16 %v3906_v36 }
 0x871   : > { %v5828_v17 = vpop.f32.mrf.mxu1  ;;  %6122 = vmatprep.subr.bf16.mxu1 %v4634_v15  ;;  %v10743_v31 = vadd.f32 %v5826_v57, %v5786_v19  ;;  %v5788_v39 = vadd.f32 %v5787_v58, %v10706_v55  ;;  %6111 = vmatprep.mubr.bf16.mxu0 %v10366_v12  ;;  %v4562_v55 = vunpack.c.l.s8.bf16 %v3914_v4  ;;  %v4626_v12 = vunpack.c.l.s8.bf16 %v3946_v30  ;;  %v3934_v4 = vld [vmem:[%s7862_s17 + $0x6f8] sm:$0xff]  ;;  %v3965_v58 = vld [vmem:[%s7862_s17 + $0x7f0] sm:$0xff] }
 0x872   : > { %6152 = vmatprep.mubr.bf16.mxu1 %v10376_v51  ;;  %v5789_v26 = vpop.f32.mrf.mxu0  ;;  %v4610_v15 = vunpack.c.l.s8.bf16 %v3938_v28  ;;  %v3966_v30 = vld [vmem:[%s7862_s17 + $0x7f8] sm:$0xff]  ;;  %v4609_v57 = vunpack.c.l.s8.bf16 %v3937_v46  ;;  %v4606_v19 = vunpack.c.h.s8.bf16 %v3934_v4 }
 0x873   : > { %v5830_v13 = vpop.f32.mrf.mxu1  ;;  %v10748_v27 = vadd.f32 %v5828_v17, %v5788_v39  ;;  %6082 = vmatpush1.bf16.msra.mxu0 %v4569_v53  ;;  %v4670_v53 = vunpack.c.h.s8.bf16 %v3966_v30  ;;  %v4666_v25 = vunpack.c.l.s8.bf16 %v3966_v30  ;;  %v3962_v39 = vld [vmem:[%s7862_s17 + $0x7d8] sm:$0xff] }
 0x874   : > { %6123 = vmatpush1.bf16.msra.mxu1 %v4633_v44  ;;  %v5790_v24 = vpop.f32.mrf.mxu0  ;;  %6083 = vmatprep.subr.bf16.mxu0 %v4566_v34  ;;  %v3933_v44 = vld [vmem:[%s7862_s17 + $0x6f0] sm:$0xff]  ;;  %v4669_v34 = vunpack.c.h.s8.bf16 %v3965_v58  ;;  %v4665_v13 = vunpack.c.l.s8.bf16 %v3965_v58  ;;  %v4658_v47 = vunpack.c.l.s8.bf16 %v3962_v39 }
 0x875   : > { %v5831_v35 = vpop.f32.mrf.mxu1  ;;  %6124 = vmatprep.subr.bf16.mxu1 %v4630_v56  ;;  %v6411_v51 = vcombine.low %v10743_v31, %v10748_v27  ;;  %v4605_v17 = vunpack.c.h.s8.bf16 %v3933_v44  ;;  %v4602_v56 = vunpack.c.l.s8.bf16 %v3934_v4  ;;  %v4601_v26 = vunpack.c.l.s8.bf16 %v3933_v44  ;;  %v3929_v24 = vld [vmem:[%s7862_s17 + $0x6d0] sm:$0xff] }
 0x876   : > { %v3961_v35 = vld [vmem:[%s7862_s17 + $0x7d0] sm:$0xff] }
 0x877   : > { %6084 = vmatpush1.bf16.msra.mxu0 %v4565_v41  ;;  %v4598_v41 = vunpack.c.h.s8.bf16 %v3930_v11 }
 0x878   : > { %6125 = vmatpush1.bf16.msra.mxu1 %v4629_v5  ;;  %6085 = vmatprep.subr.bf16.mxu0 %v4562_v55  ;;  %v4662_v5 = vunpack.c.h.s8.bf16 %v3962_v39  ;;  %v4597_v55 = vunpack.c.h.s8.bf16 %v3929_v24 }
 0x879   : > { %6126 = vmatprep.subr.bf16.mxu1 %v4626_v12  ;;  %v4661_v12 = vunpack.c.h.s8.bf16 %v3961_v35 }
 0x87b   : > { %6086 = vmatpush1.bf16.msra.mxu0 %v4561_v10  ;;  %v3926_v10 = vld [vmem:[%s7862_s17 + $0x6b8] sm:$0xff] }
 0x87c   : > { %6127 = vmatpush1.bf16.msra.mxu1 %v4625_v14  ;;  %6087 = vmatprep.subr.bf16.mxu0 %v4558_v21  ;;  %v3958_v14 = vld [vmem:[%s7862_s17 + $0x7b8] sm:$0xff]  ;;  %v4593_v21 = vunpack.c.l.s8.bf16 %v3929_v24  ;;  %v4590_v52 = vunpack.c.h.s8.bf16 %v3926_v10  ;;  %v4586_v36 = vunpack.c.l.s8.bf16 %v3926_v10 }
 0x87d   : > { %6128 = vmatprep.subr.bf16.mxu1 %v4622_v54  ;;  %v4657_v54 = vunpack.c.l.s8.bf16 %v3961_v35  ;;  %v4654_v59 = vunpack.c.h.s8.bf16 %v3958_v14  ;;  %v4650_v28 = vunpack.c.l.s8.bf16 %v3958_v14  ;;  %v3977_v14 = vld [vmem:[%s7862_s17 + $0x850] sm:$0xff] }
 0x87f   : > { %6088 = vmatpush1.bf16.msra.mxu0 %v4557_v6  ;;  %v3925_v6 = vld [vmem:[%s7862_s17 + $0x6b0] sm:$0xff] }
 0x880   : > { %6129 = vmatpush1.bf16.msra.mxu1 %v4621_v49  ;;  %6089 = vmatprep.subr.bf16.mxu0 %v4554_v62  ;;  %v3957_v49 = vld [vmem:[%s7862_s17 + $0x7b0] sm:$0xff]  ;;  %v4589_v62 = vunpack.c.h.s8.bf16 %v3925_v6 }
 0x881   : > { %6130 = vmatprep.subr.bf16.mxu1 %v4618_v7  ;;  %v4653_v7 = vunpack.c.h.s8.bf16 %v3957_v49 }
 0x883   : > { %6090 = vmatpush1.bf16.msra.mxu0 %v4553_v60  ;;  %v3922_v60 = vld [vmem:[%s7862_s17 + $0x698] sm:$0xff] }
 0x884   : > { %6131 = vmatpush1.bf16.msra.mxu1 %v4617_v45  ;;  %6091 = vmatprep.subr.bf16.mxu0 %v4550_v20  ;;  %v3954_v45 = vld [vmem:[%s7862_s17 + $0x798] sm:$0xff]  ;;  %v4585_v20 = vunpack.c.l.s8.bf16 %v3925_v6  ;;  %v4582_v29 = vunpack.c.h.s8.bf16 %v3922_v60  ;;  %v4578_v4 = vunpack.c.l.s8.bf16 %v3922_v60 }
 0x885   : > { %6132 = vmatprep.subr.bf16.mxu1 %v4614_v50  ;;  %v4649_v50 = vunpack.c.l.s8.bf16 %v3957_v49  ;;  %v4646_v46 = vunpack.c.h.s8.bf16 %v3954_v45  ;;  %v4642_v30 = vunpack.c.l.s8.bf16 %v3954_v45 }
 0x887   : > { %6092 = vmatpush1.bf16.msra.mxu0 %v4549_v42  ;;  %v3921_v42 = vld [vmem:[%s7862_s17 + $0x690] sm:$0xff] }
 0x888   : > { %6133 = vmatpush1.bf16.msra.mxu1 %v4613_v9  ;;  %6093 = vmatprep.subr.bf16.mxu0 %v4546_v3  ;;  %v3953_v9 = vld [vmem:[%s7862_s17 + $0x790] sm:$0xff]  ;;  %v4581_v3 = vunpack.c.h.s8.bf16 %v3921_v42 }
 0x889   : > { %6134 = vmatprep.subr.bf16.mxu1 %v4610_v15  ;;  %v4645_v15 = vunpack.c.h.s8.bf16 %v3953_v9 }
 0x88b   : > { %6094 = vmatpush1.bf16.msra.mxu0 %v4545_v16  ;;  %v3982_v16 = vld [vmem:[%s7862_s17 + $0x878] sm:$0xff] }
 0x88c   : > { %6135 = vmatpush1.bf16.msra.mxu1 %v4609_v57  ;;  %6095 = vmatprep.subr.bf16.mxu0 %v4606_v19  ;;  %v4014_v57 = vld [vmem:[%s7862_s17 + $0x978] sm:$0xff]  ;;  %v4577_v19 = vunpack.c.l.s8.bf16 %v3921_v42  ;;  %v4702_v44 = vunpack.c.h.s8.bf16 %v3982_v16  ;;  %v4698_v11 = vunpack.c.l.s8.bf16 %v3982_v16 }
 0x88d   : > { %6136 = vmatprep.subr.bf16.mxu1 %v4670_v53  ;;  %v4641_v53 = vunpack.c.l.s8.bf16 %v3953_v9  ;;  %v4766_v58 = vunpack.c.h.s8.bf16 %v4014_v57  ;;  %v4762_v39 = vunpack.c.l.s8.bf16 %v4014_v57 }
 0x88f   : > { %6096 = vmatpush2.bf16.msra.mxu0 %v4605_v17  ;;  %v3981_v17 = vld [vmem:[%s7862_s17 + $0x870] sm:$0xff] }
 0x890   : > { %6137 = vmatpush2.bf16.msra.mxu1 %v4669_v34  ;;  %6097 = vmatprep.subr.bf16.mxu0 %v4602_v56  ;;  %v4013_v34 = vld [vmem:[%s7862_s17 + $0x970] sm:$0xff]  ;;  %v4701_v56 = vunpack.c.h.s8.bf16 %v3981_v17  ;;  %v4697_v35 = vunpack.c.l.s8.bf16 %v3981_v17 }
 0x891   : > { %6138 = vmatprep.subr.bf16.mxu1 %v4666_v25  ;;  %v4765_v25 = vunpack.c.h.s8.bf16 %v4013_v34 }
 0x893   : > { %6098 = vmatpush2.bf16.msra.mxu0 %v4601_v26  ;;  %v3978_v26 = vld [vmem:[%s7862_s17 + $0x858] sm:$0xff] }
 0x894   : > { %6139 = vmatpush2.bf16.msra.mxu1 %v4665_v13  ;;  %6099 = vmatprep.subr.bf16.mxu0 %v4598_v41  ;;  %v4010_v13 = vld [vmem:[%s7862_s17 + $0x958] sm:$0xff] }
 0x895   : > { %6140 = vmatprep.subr.bf16.mxu1 %v4662_v5  ;;  %v4758_v10 = vunpack.c.h.s8.bf16 %v4010_v13 }
 0x897   : > { %6100 = vmatpush2.bf16.msra.mxu0 %v4597_v55  ;;  %v4761_v55 = vunpack.c.l.s8.bf16 %v4013_v34 }
 0x898   : > { %6141 = vmatpush2.bf16.msra.mxu1 %v4661_v12  ;;  %6101 = vmatprep.subr.bf16.mxu0 %v4594_v43 }
 0x899   : > { %6142 = vmatprep.subr.bf16.mxu1 %v4658_v47  ;;  %v4694_v47 = vunpack.c.h.s8.bf16 %v3978_v26 }
 0x89b   : > { %6102 = vmatpush2.bf16.msra.mxu0 %v4593_v21  ;;  %v4009_v21 = vld [vmem:[%s7862_s17 + $0x950] sm:$0xff] }
 0x89c   : > { %6143 = vmatpush2.bf16.msra.mxu1 %v4657_v54  ;;  %6103 = vmatprep.subr.bf16.mxu0 %v4590_v52  ;;  %v4693_v52 = vunpack.c.h.s8.bf16 %v3977_v14 }
 0x89d   : > { %6144 = vmatprep.subr.bf16.mxu1 %v4654_v59  ;;  %v4757_v59 = vunpack.c.h.s8.bf16 %v4009_v21 }
 0x89f   : > { %6104 = vmatpush2.bf16.msra.mxu0 %v4589_v62  ;;  %v4690_v62 = vunpack.c.l.s8.bf16 %v3978_v26 }
 0x8a0   : > { %6145 = vmatpush2.bf16.msra.mxu1 %v4653_v7  ;;  %6105 = vmatprep.subr.bf16.mxu0 %v4586_v36  ;;  %v4754_v7 = vunpack.c.l.s8.bf16 %v4010_v13  ;;  %v3974_v36 = vld [vmem:[%s7862_s17 + $0x838] sm:$0xff] }
 0x8a1   : > { %6146 = vmatprep.subr.bf16.mxu1 %v4650_v28  ;;  %v4006_v28 = vld [vmem:[%s7862_s17 + $0x938] sm:$0xff]  ;;  %v4686_v60 = vunpack.c.h.s8.bf16 %v3974_v36  ;;  %v4682_v42 = vunpack.c.l.s8.bf16 %v3974_v36 }
 0x8a2   : > { %v4750_v45 = vunpack.c.h.s8.bf16 %v4006_v28  ;;  %v4746_v9 = vunpack.c.l.s8.bf16 %v4006_v28  ;;  %v3990_v36 = vld [vmem:[%s7862_s17 + $0x8b8] sm:$0xff] }
 0x8a3   : > { %6106 = vmatpush2.bf16.msra.mxu0 %v4585_v20  ;;  %v3973_v20 = vld [vmem:[%s7862_s17 + $0x830] sm:$0xff]  ;;  %v4022_v28 = vld [vmem:[%s7862_s17 + $0x9b8] sm:$0xff] }
 0x8a4   : > { %6147 = vmatpush2.bf16.msra.mxu1 %v4649_v50  ;;  %6107 = vmatprep.subr.bf16.mxu0 %v4582_v29  ;;  %v4005_v50 = vld [vmem:[%s7862_s17 + $0x930] sm:$0xff]  ;;  %v4685_v29 = vunpack.c.h.s8.bf16 %v3973_v20 }
 0x8a5   : > { %6148 = vmatprep.subr.bf16.mxu1 %v4646_v46  ;;  %v4749_v46 = vunpack.c.h.s8.bf16 %v4005_v50 }
 0x8a7   : > { %6108 = vmatpush2.bf16.msra.mxu0 %v4581_v3  ;;  %v3970_v3 = vld [vmem:[%s7862_s17 + $0x818] sm:$0xff] }
 0x8a8   : > { %6149 = vmatpush2.bf16.msra.mxu1 %v4645_v15  ;;  %6109 = vmatprep.subr.bf16.mxu0 %v4578_v4  ;;  %v4002_v15 = vld [vmem:[%s7862_s17 + $0x918] sm:$0xff]  ;;  %v4681_v4 = vunpack.c.l.s8.bf16 %v3973_v20  ;;  %v4678_v16 = vunpack.c.h.s8.bf16 %v3970_v3  ;;  %v4674_v17 = vunpack.c.l.s8.bf16 %v3970_v3  ;;  %v3989_v20 = vld [vmem:[%s7862_s17 + $0x8b0] sm:$0xff] }
 0x8a9   : > { %6150 = vmatprep.subr.bf16.mxu1 %v4642_v30  ;;  %v4745_v30 = vunpack.c.l.s8.bf16 %v4005_v50  ;;  %v4742_v57 = vunpack.c.h.s8.bf16 %v4002_v15  ;;  %v4738_v34 = vunpack.c.l.s8.bf16 %v4002_v15  ;;  %v4021_v50 = vld [vmem:[%s7862_s17 + $0x9b0] sm:$0xff]  ;;  %v3986_v3 = vld [vmem:[%s7862_s17 + $0x898] sm:$0xff] }
 0x8aa   : > { %v4018_v15 = vld [vmem:[%s7862_s17 + $0x998] sm:$0xff] }
 0x8ab   : > { %6110 = vmatpush2.bf16.msra.mxu0 %v4577_v19  ;;  %v3969_v19 = vld [vmem:[%s7862_s17 + $0x810] sm:$0xff] }
 0x8ac   : > { %6151 = vmatpush2.bf16.msra.mxu1 %v4641_v53  ;;  %6161 = vmatprep.subr.bf16.mxu0 %v4702_v44  ;;  %v4001_v53 = vld [vmem:[%s7862_s17 + $0x910] sm:$0xff]  ;;  %v4677_v44 = vunpack.c.h.s8.bf16 %v3969_v19 }
 0x8ad   : > { %6202 = vmatprep.subr.bf16.mxu1 %v4766_v58  ;;  %v4741_v58 = vunpack.c.h.s8.bf16 %v4001_v53 }
 0x8ae   : > { %v5867_v41 = vpop.f32.mrf.mxu0  ;;  %6112 = vmatmul.mubr.bf16.vlgmr.msra.gmra.mxu0 %v10421_v0 }
 0x8af   : > { %v5908_v5 = vpop.f32.mrf.mxu1  ;;  %6153 = vmatmul.mubr.bf16.vlgmr.msra.gmra.mxu1 %v10430_v37  ;;  %6162 = vmatpush1.bf16.msra.mxu0 %v4701_v56  ;;  %v3998_v56 = vld [vmem:[%s7862_s17 + $0x8f8] sm:$0xff] }
 0x8b0   : > { %v10784_v24 = vadd.f32 %v5908_v5, %v5867_v41  ;;  %6203 = vmatpush1.bf16.msra.mxu1 %v4765_v25  ;;  %v5869_v12 = vpop.f32.mrf.mxu0  ;;  %6163 = vmatprep.subr.bf16.mxu0 %v4698_v11  ;;  %v4030_v25 = vld [vmem:[%s7862_s17 + $0x9f8] sm:$0xff]  ;;  %v4673_v11 = vunpack.c.l.s8.bf16 %v3969_v19  ;;  %v4734_v26 = vunpack.c.h.s8.bf16 %v3998_v56  ;;  %v3997_v41 = vld [vmem:[%s7862_s17 + $0x8f0] sm:$0xff] }
 0x8b1   : > { %v5910_v43 = vpop.f32.mrf.mxu1  ;;  %6204 = vmatprep.subr.bf16.mxu1 %v4762_v39  ;;  %6193 = vmatprep.mubr.bf16.mxu0 %v10426_v23  ;;  %v4689_v23 = vunpack.c.l.s8.bf16 %v3977_v14  ;;  %v4737_v39 = vunpack.c.l.s8.bf16 %v4001_v53  ;;  %v4798_v13 = vunpack.c.h.s8.bf16 %v4030_v25  ;;  %v4029_v5 = vld [vmem:[%s7862_s17 + $0x9f0] sm:$0xff]  ;;  %v4729_v14 = vunpack.c.l.s8.bf16 %v3997_v41 }
 0x8b2   : > { %v10788_v54 = vadd.f32 %v5910_v43, %v5869_v12  ;;  %6234 = vmatprep.mubr.bf16.mxu1 %v10436_v22  ;;  %v5871_v0 = vpop.f32.mrf.mxu0  ;;  %v4753_v22 = vunpack.c.l.s8.bf16 %v4009_v21  ;;  %v4730_v12 = vunpack.c.l.s8.bf16 %v3998_v56  ;;  %v4794_v43 = vunpack.c.l.s8.bf16 %v4030_v25  ;;  %v3985_v19 = vld [vmem:[%s7862_s17 + $0x890] sm:$0xff]  ;;  %v4046_v56 = vld [vmem:[%s7862_s17 + $0xa78] sm:$0xff] }
 0x8b3   : > { %v5912_v37 = vpop.f32.mrf.mxu1  ;;  %6164 = vmatpush1.bf16.msra.mxu0 %v4697_v35  ;;  %v4733_v35 = vunpack.c.h.s8.bf16 %v3997_v41  ;;  %v4793_v21 = vunpack.c.l.s8.bf16 %v4029_v5  ;;  %v4017_v53 = vld [vmem:[%s7862_s17 + $0x990] sm:$0xff]  ;;  %v4078_v25 = vld [vmem:[%s7862_s17 + $0xb78] sm:$0xff] }
 0x8b4   : > { %6205 = vmatpush1.bf16.msra.mxu1 %v4761_v55  ;;  %v5872_v6 = vpop.f32.mrf.mxu0  ;;  %6165 = vmatprep.subr.bf16.mxu0 %v4694_v47  ;;  %v4797_v55 = vunpack.c.h.s8.bf16 %v4029_v5  ;;  %v3994_v47 = vld [vmem:[%s7862_s17 + $0x8d8] sm:$0xff]  ;;  %v4045_v41 = vld [vmem:[%s7862_s17 + $0xa70] sm:$0xff] }
 0x8b5   : > { %v5913_v49 = vpop.f32.mrf.mxu1  ;;  %6206 = vmatprep.subr.bf16.mxu1 %v4758_v10  ;;  %v4026_v10 = vld [vmem:[%s7862_s17 + $0x9d8] sm:$0xff]  ;;  %v4726_v0 = vunpack.c.h.s8.bf16 %v3994_v47  ;;  %v4077_v5 = vld [vmem:[%s7862_s17 + $0xb70] sm:$0xff] }
 0x8b6   : > { %v4790_v37 = vunpack.c.h.s8.bf16 %v4026_v10 }
 0x8b7   : > { %6166 = vmatpush1.bf16.msra.mxu0 %v4693_v52  ;;  %v3993_v52 = vld [vmem:[%s7862_s17 + $0x8d0] sm:$0xff] }
 0x8b8   : > { %6207 = vmatpush1.bf16.msra.mxu1 %v4757_v59  ;;  %6167 = vmatprep.subr.bf16.mxu0 %v4690_v62  ;;  %v4025_v59 = vld [vmem:[%s7862_s17 + $0x9d0] sm:$0xff]  ;;  %v4725_v6 = vunpack.c.h.s8.bf16 %v3993_v52  ;;  %v4722_v62 = vunpack.c.l.s8.bf16 %v3994_v47  ;;  %v4042_v47 = vld [vmem:[%s7862_s17 + $0xa58] sm:$0xff] }
 0x8b9   : > { %6208 = vmatprep.subr.bf16.mxu1 %v4754_v7  ;;  %v4789_v49 = vunpack.c.h.s8.bf16 %v4025_v59  ;;  %v4786_v7 = vunpack.c.l.s8.bf16 %v4026_v10  ;;  %v4074_v10 = vld [vmem:[%s7862_s17 + $0xb58] sm:$0xff] }
 0x8bb   : > { %6168 = vmatpush1.bf16.msra.mxu0 %v4689_v23  ;;  %v4721_v23 = vunpack.c.l.s8.bf16 %v3993_v52  ;;  %v4889_v52 = vunpack.c.l.s8.bf16 %v4077_v5 }
 0x8bc   : > { %6209 = vmatpush1.bf16.msra.mxu1 %v4753_v22  ;;  %6169 = vmatprep.subr.bf16.mxu0 %v4686_v60  ;;  %v4785_v22 = vunpack.c.l.s8.bf16 %v4025_v59  ;;  %v4718_v60 = vunpack.c.h.s8.bf16 %v3990_v36 }
 0x8bd   : > { %6210 = vmatprep.subr.bf16.mxu1 %v4750_v45  ;;  %v4782_v45 = vunpack.c.h.s8.bf16 %v4022_v28 }
 0x8bf   : > { %6170 = vmatpush1.bf16.msra.mxu0 %v4685_v29  ;;  %v4717_v29 = vunpack.c.h.s8.bf16 %v3989_v20 }
 0x8c0   : > { %6211 = vmatpush1.bf16.msra.mxu1 %v4749_v46  ;;  %6171 = vmatprep.subr.bf16.mxu0 %v4682_v42  ;;  %v4781_v46 = vunpack.c.h.s8.bf16 %v4021_v50  ;;  %v4714_v42 = vunpack.c.l.s8.bf16 %v3990_v36  ;;  %v4073_v36 = vld [vmem:[%s7862_s17 + $0xb50] sm:$0xff] }
 0x8c1   : > { %6212 = vmatprep.subr.bf16.mxu1 %v4746_v9  ;;  %v4778_v9 = vunpack.c.l.s8.bf16 %v4022_v28 }
 0x8c3   : > { %6172 = vmatpush1.bf16.msra.mxu0 %v4681_v4  ;;  %v4713_v4 = vunpack.c.l.s8.bf16 %v3989_v20 }
 0x8c4   : > { %6213 = vmatpush1.bf16.msra.mxu1 %v4745_v30  ;;  %6173 = vmatprep.subr.bf16.mxu0 %v4678_v16  ;;  %v4777_v30 = vunpack.c.l.s8.bf16 %v4021_v50  ;;  %v4710_v16 = vunpack.c.h.s8.bf16 %v3986_v3  ;;  %v4882_v50 = vunpack.c.l.s8.bf16 %v4074_v10 }
 0x8c5   : > { %6214 = vmatprep.subr.bf16.mxu1 %v4742_v57  ;;  %v4774_v57 = vunpack.c.h.s8.bf16 %v4018_v15 }
 0x8c7   : > { %6174 = vmatpush1.bf16.msra.mxu0 %v4677_v44  ;;  %v4709_v44 = vunpack.c.h.s8.bf16 %v3985_v19 }
 0x8c8   : > { %6215 = vmatpush1.bf16.msra.mxu1 %v4741_v58  ;;  %6175 = vmatprep.subr.bf16.mxu0 %v4674_v17  ;;  %v4773_v58 = vunpack.c.h.s8.bf16 %v4017_v53  ;;  %v4706_v17 = vunpack.c.l.s8.bf16 %v3986_v3  ;;  %v4037_v3 = vld [vmem:[%s7862_s17 + $0xa30] sm:$0xff] }
 0x8c9   : > { %6216 = vmatprep.subr.bf16.mxu1 %v4738_v34  ;;  %v4770_v34 = vunpack.c.l.s8.bf16 %v4018_v15  ;;  %v4069_v15 = vld [vmem:[%s7862_s17 + $0xb30] sm:$0xff] }
 0x8cb   : > { %6176 = vmatpush1.bf16.msra.mxu0 %v4673_v11  ;;  %v4705_v11 = vunpack.c.l.s8.bf16 %v3985_v19  ;;  %v4034_v19 = vld [vmem:[%s7862_s17 + $0xa18] sm:$0xff] }
 0x8cc   : > { %6217 = vmatpush1.bf16.msra.mxu1 %v4737_v39  ;;  %6177 = vmatprep.subr.bf16.mxu0 %v4734_v26  ;;  %v4769_v39 = vunpack.c.l.s8.bf16 %v4017_v53  ;;  %v4830_v26 = vunpack.c.h.s8.bf16 %v4046_v56  ;;  %v4066_v53 = vld [vmem:[%s7862_s17 + $0xb18] sm:$0xff] }
 0x8cd   : > { %6218 = vmatprep.subr.bf16.mxu1 %v4798_v13  ;;  %v4894_v13 = vunpack.c.h.s8.bf16 %v4078_v25 }
 0x8cf   : > { %6178 = vmatpush2.bf16.msra.mxu0 %v4733_v35  ;;  %v4829_v35 = vunpack.c.h.s8.bf16 %v4045_v41 }
 0x8d0   : > { %6219 = vmatpush2.bf16.msra.mxu1 %v4797_v55  ;;  %6179 = vmatprep.subr.bf16.mxu0 %v4730_v12  ;;  %v4893_v55 = vunpack.c.h.s8.bf16 %v4077_v5  ;;  %v4826_v12 = vunpack.c.l.s8.bf16 %v4046_v56  ;;  %v4033_v56 = vld [vmem:[%s7862_s17 + $0xa10] sm:$0xff]  ;;  %v4094_v5 = vld [vmem:[%s7862_s17 + $0xbf8] sm:$0xff] }
 0x8d1   : > { %6220 = vmatprep.subr.bf16.mxu1 %v4794_v43  ;;  %v4890_v43 = vunpack.c.l.s8.bf16 %v4078_v25  ;;  %v4065_v25 = vld [vmem:[%s7862_s17 + $0xb10] sm:$0xff] }
 0x8d3   : > { %6180 = vmatpush2.bf16.msra.mxu0 %v4729_v14 }
 0x8d4   : > { %6221 = vmatpush2.bf16.msra.mxu1 %v4793_v21  ;;  %6181 = vmatprep.subr.bf16.mxu0 %v4726_v0 }
 0x8d5   : > { %6222 = vmatprep.subr.bf16.mxu1 %v4790_v37  ;;  %v4825_v37 = vunpack.c.l.s8.bf16 %v4045_v41  ;;  %v4062_v41 = vld [vmem:[%s7862_s17 + $0xaf8] sm:$0xff] }
 0x8d7   : > { %6182 = vmatpush2.bf16.msra.mxu0 %v4725_v6 }
 0x8d8   : > { %6223 = vmatpush2.bf16.msra.mxu1 %v4789_v49  ;;  %6183 = vmatprep.subr.bf16.mxu0 %v4722_v62  ;;  %v4822_v49 = vunpack.c.h.s8.bf16 %v4042_v47  ;;  %v4886_v62 = vunpack.c.h.s8.bf16 %v4074_v10  ;;  %v4093_v10 = vld [vmem:[%s7862_s17 + $0xbf0] sm:$0xff] }
 0x8d9   : > { %6224 = vmatprep.subr.bf16.mxu1 %v4786_v7  ;;  %v4041_v7 = vld [vmem:[%s7862_s17 + $0xa50] sm:$0xff] }
 0x8db   : > { %6184 = vmatpush2.bf16.msra.mxu0 %v4721_v23 }
 0x8dc   : > { %6225 = vmatpush2.bf16.msra.mxu1 %v4785_v22  ;;  %6185 = vmatprep.subr.bf16.mxu0 %v4718_v60  ;;  %v4821_v22 = vunpack.c.h.s8.bf16 %v4041_v7  ;;  %v4885_v60 = vunpack.c.h.s8.bf16 %v4073_v36 }
 0x8dd   : > { %6226 = vmatprep.subr.bf16.mxu1 %v4782_v45 }
 0x8df   : > { %6186 = vmatpush2.bf16.msra.mxu0 %v4717_v29  ;;  %v4070_v29 = vld [vmem:[%s7862_s17 + $0xb38] sm:$0xff] }
 0x8e0   : > { %6227 = vmatpush2.bf16.msra.mxu1 %v4781_v46  ;;  %6187 = vmatprep.subr.bf16.mxu0 %v4714_v42  ;;  %v4881_v46 = vunpack.c.l.s8.bf16 %v4073_v36  ;;  %v4057_v36 = vld [vmem:[%s7862_s17 + $0xad0] sm:$0xff] }
 0x8e1   : > { %6228 = vmatprep.subr.bf16.mxu1 %v4778_v9  ;;  %v4878_v9 = vunpack.c.h.s8.bf16 %v4070_v29 }
 0x8e3   : > { %6188 = vmatpush2.bf16.msra.mxu0 %v4713_v4  ;;  %v4813_v4 = vunpack.c.h.s8.bf16 %v4037_v3 }
 0x8e4   : > { %6229 = vmatpush2.bf16.msra.mxu1 %v4777_v30  ;;  %6189 = vmatprep.subr.bf16.mxu0 %v4710_v16  ;;  %v4877_v30 = vunpack.c.h.s8.bf16 %v4069_v15 }
 0x8e5   : > { %6230 = vmatprep.subr.bf16.mxu1 %v4774_v57  ;;  %v4874_v57 = vunpack.c.l.s8.bf16 %v4070_v29 }
 0x8e7   : > { %6190 = vmatpush2.bf16.msra.mxu0 %v4709_v44  ;;  %v4809_v44 = vunpack.c.l.s8.bf16 %v4037_v3 }
 0x8e8   : > { %6231 = vmatpush2.bf16.msra.mxu1 %v4773_v58  ;;  %6191 = vmatprep.subr.bf16.mxu0 %v4706_v17  ;;  %v4873_v58 = vunpack.c.l.s8.bf16 %v4069_v15  ;;  %v4806_v17 = vunpack.c.h.s8.bf16 %v4034_v19 }
 0x8e9   : > { %6232 = vmatprep.subr.bf16.mxu1 %v4770_v34  ;;  %v4870_v34 = vunpack.c.h.s8.bf16 %v4066_v53 }
 0x8eb   : > { %6192 = vmatpush2.bf16.msra.mxu0 %v4705_v11  ;;  %v4805_v11 = vunpack.c.h.s8.bf16 %v4033_v56 }
 0x8ec   : > { %6233 = vmatpush2.bf16.msra.mxu1 %v4769_v39  ;;  %6243 = vmatprep.subr.bf16.mxu0 %v4830_v26  ;;  %v4869_v39 = vunpack.c.h.s8.bf16 %v4065_v25  ;;  %v4802_v26 = vunpack.c.l.s8.bf16 %v4034_v19 }
 0x8ed   : > { %6284 = vmatprep.subr.bf16.mxu1 %v4894_v13  ;;  %v4866_v13 = vunpack.c.l.s8.bf16 %v4066_v53 }
 0x8ee   : > { %v5949_v14 = vpop.f32.mrf.mxu0  ;;  %6194 = vmatmul.mubr.bf16.vlgmr.msra.gmra.mxu0 %v10483_v32 }
 0x8ef   : > { %v5990_v21 = vpop.f32.mrf.mxu1  ;;  %6235 = vmatmul.mubr.bf16.vlgmr.msra.gmra.mxu1 %v10492_v8  ;;  %v5950_v0 = vadd.f32 %v5949_v14, %v10784_v24  ;;  %6244 = vmatpush1.bf16.msra.mxu0 %v4829_v35  ;;  %v4801_v35 = vunpack.c.l.s8.bf16 %v4033_v56 }
 0x8f0   : > { %6285 = vmatpush1.bf16.msra.mxu1 %v4893_v55  ;;  %v5951_v59 = vpop.f32.mrf.mxu0  ;;  %6245 = vmatprep.subr.bf16.mxu0 %v4826_v12  ;;  %v4865_v55 = vunpack.c.l.s8.bf16 %v4065_v25  ;;  %v4862_v12 = vunpack.c.h.s8.bf16 %v4062_v41 }
 0x8f1   : > { %v5992_v6 = vpop.f32.mrf.mxu1  ;;  %6286 = vmatprep.subr.bf16.mxu1 %v4890_v43  ;;  %v10827_v28 = vadd.f32 %v5990_v21, %v5950_v0  ;;  %v5952_v32 = vadd.f32 %v5951_v59, %v10788_v54  ;;  %6275 = vmatprep.mubr.bf16.mxu0 %v10488_v18  ;;  %v4818_v54 = vunpack.c.l.s8.bf16 %v4042_v47  ;;  %v4038_v18 = vld [vmem:[%s7862_s17 + $0xa38] sm:$0xff]  ;;  %v4926_v43 = vunpack.c.h.s8.bf16 %v4094_v5  ;;  %v4061_v47 = vld [vmem:[%s7862_s17 + $0xaf0] sm:$0xff] }
 0x8f2   : > { %6316 = vmatprep.mubr.bf16.mxu1 %v10498_v61  ;;  %v5953_v8 = vpop.f32.mrf.mxu0  ;;  %v4817_v61 = vunpack.c.l.s8.bf16 %v4041_v7  ;;  %v4814_v42 = vunpack.c.h.s8.bf16 %v4038_v18  ;;  %v4810_v16 = vunpack.c.l.s8.bf16 %v4038_v18  ;;  %v4861_v14 = vunpack.c.h.s8.bf16 %v4061_v47  ;;  %v4090_v59 = vld [vmem:[%s7862_s17 + $0xbd8] sm:$0xff] }
 0x8f3   : > { %v5994_v24 = vpop.f32.mrf.mxu1  ;;  %v10832_v23 = vadd.f32 %v5992_v6, %v5952_v32  ;;  %6246 = vmatpush1.bf16.msra.mxu0 %v4825_v37  ;;  %v4925_v21 = vunpack.c.h.s8.bf16 %v4093_v10  ;;  %v4858_v0 = vunpack.c.l.s8.bf16 %v4062_v41  ;;  %v4922_v37 = vunpack.c.l.s8.bf16 %v4094_v5  ;;  %v4089_v32 = vld [vmem:[%s7862_s17 + $0xbd0] sm:$0xff] }
 0x8f4   : > { %6287 = vmatpush1.bf16.msra.mxu1 %v4889_v52  ;;  %v5954_v45 = vpop.f32.mrf.mxu0  ;;  %6247 = vmatprep.subr.bf16.mxu0 %v4822_v49  ;;  %v4058_v52 = vld [vmem:[%s7862_s17 + $0xad8] sm:$0xff]  ;;  %v4857_v6 = vunpack.c.l.s8.bf16 %v4061_v47  ;;  %v4921_v49 = vunpack.c.l.s8.bf16 %v4093_v10  ;;  %v4918_v7 = vunpack.c.h.s8.bf16 %v4090_v59  ;;  %v4853_v8 = vunpack.c.h.s8.bf16 %v4057_v36 }
 0x8f5   : > { %v5995_v20 = vpop.f32.mrf.mxu1  ;;  %6288 = vmatprep.subr.bf16.mxu1 %v4886_v62  ;;  %v4854_v62 = vunpack.c.h.s8.bf16 %v4058_v52  ;;  %v4917_v24 = vunpack.c.h.s8.bf16 %v4089_v32  ;;  %v4054_v45 = vld [vmem:[%s7862_s17 + $0xab8] sm:$0xff] }
 0x8f6   : > { %v4086_v20 = vld [vmem:[%s7862_s17 + $0xbb8] sm:$0xff]  ;;  %v4846_v18 = vunpack.c.h.s8.bf16 %v4054_v45  ;;  %v4842_v3 = vunpack.c.l.s8.bf16 %v4054_v45 }
 0x8f7   : > { %6248 = vmatpush1.bf16.msra.mxu0 %v4821_v22  ;;  %v4850_v22 = vunpack.c.l.s8.bf16 %v4058_v52  ;;  %v4910_v29 = vunpack.c.h.s8.bf16 %v4086_v20  ;;  %v4906_v15 = vunpack.c.l.s8.bf16 %v4086_v20 }
 0x8f8   : > { %6289 = vmatpush1.bf16.msra.mxu1 %v4885_v60  ;;  %6249 = vmatprep.subr.bf16.mxu0 %v4818_v54  ;;  %v4914_v60 = vunpack.c.l.s8.bf16 %v4090_v59  ;;  %v4849_v54 = vunpack.c.l.s8.bf16 %v4057_v36 }
 0x8f9   : > { %6290 = vmatprep.subr.bf16.mxu1 %v4882_v50  ;;  %v4913_v50 = vunpack.c.l.s8.bf16 %v4089_v32  ;;  %v4105_v32 = vld [vmem:[%s7862_s17 + $0xc50] sm:$0xff] }
 0x8fb   : > { %6250 = vmatpush1.bf16.msra.mxu0 %v4817_v61  ;;  %v4053_v61 = vld [vmem:[%s7862_s17 + $0xab0] sm:$0xff] }
 0x8fc   : > { %6291 = vmatpush1.bf16.msra.mxu1 %v4881_v46  ;;  %6251 = vmatprep.subr.bf16.mxu0 %v4814_v42  ;;  %v4085_v46 = vld [vmem:[%s7862_s17 + $0xbb0] sm:$0xff]  ;;  %v4845_v42 = vunpack.c.h.s8.bf16 %v4053_v61 }
 0x8fd   : > { %6292 = vmatprep.subr.bf16.mxu1 %v4878_v9  ;;  %v4909_v9 = vunpack.c.h.s8.bf16 %v4085_v46 }
 0x8ff   : > { %6252 = vmatpush1.bf16.msra.mxu0 %v4813_v4  ;;  %v4050_v4 = vld [vmem:[%s7862_s17 + $0xa98] sm:$0xff] }
 0x900   : > { %6293 = vmatpush1.bf16.msra.mxu1 %v4877_v30  ;;  %6253 = vmatprep.subr.bf16.mxu0 %v4810_v16  ;;  %v4082_v30 = vld [vmem:[%s7862_s17 + $0xb98] sm:$0xff]  ;;  %v4841_v16 = vunpack.c.l.s8.bf16 %v4053_v61  ;;  %v4838_v19 = vunpack.c.h.s8.bf16 %v4050_v4  ;;  %v4834_v56 = vunpack.c.l.s8.bf16 %v4050_v4 }
 0x901   : > { %6294 = vmatprep.subr.bf16.mxu1 %v4874_v57  ;;  %v4905_v57 = vunpack.c.l.s8.bf16 %v4085_v46  ;;  %v4902_v53 = vunpack.c.h.s8.bf16 %v4082_v30  ;;  %v4898_v25 = vunpack.c.l.s8.bf16 %v4082_v30 }
 0x903   : > { %6254 = vmatpush1.bf16.msra.mxu0 %v4809_v44  ;;  %v4049_v44 = vld [vmem:[%s7862_s17 + $0xa90] sm:$0xff] }
 0x904   : > { %6295 = vmatpush1.bf16.msra.mxu1 %v4873_v58  ;;  %6255 = vmatprep.subr.bf16.mxu0 %v4806_v17  ;;  %v4081_v58 = vld [vmem:[%s7862_s17 + $0xb90] sm:$0xff]  ;;  %v4837_v17 = vunpack.c.h.s8.bf16 %v4049_v44 }
 0x905   : > { %6296 = vmatprep.subr.bf16.mxu1 %v4870_v34  ;;  %v4901_v34 = vunpack.c.h.s8.bf16 %v4081_v58 }
 0x907   : > { %6256 = vmatpush1.bf16.msra.mxu0 %v4805_v11  ;;  %v4110_v11 = vld [vmem:[%s7862_s17 + $0xc78] sm:$0xff] }
 0x908   : > { %6297 = vmatpush1.bf16.msra.mxu1 %v4869_v39  ;;  %6257 = vmatprep.subr.bf16.mxu0 %v4802_v26  ;;  %v4142_v39 = vld [vmem:[%s7862_s17 + $0xd78] sm:$0xff]  ;;  %v4833_v26 = vunpack.c.l.s8.bf16 %v4049_v44  ;;  %v4958_v41 = vunpack.c.h.s8.bf16 %v4110_v11  ;;  %v4954_v47 = vunpack.c.l.s8.bf16 %v4110_v11 }
 0x909   : > { %6298 = vmatprep.subr.bf16.mxu1 %v4866_v13  ;;  %v4897_v13 = vunpack.c.l.s8.bf16 %v4081_v58  ;;  %v5022_v5 = vunpack.c.h.s8.bf16 %v4142_v39  ;;  %v5018_v10 = vunpack.c.l.s8.bf16 %v4142_v39 }
 0x90b   : > { %6258 = vmatpush1.bf16.msra.mxu0 %v4801_v35  ;;  %v4109_v35 = vld [vmem:[%s7862_s17 + $0xc70] sm:$0xff] }
 0x90c   : > { %6299 = vmatpush1.bf16.msra.mxu1 %v4865_v55  ;;  %6259 = vmatprep.subr.bf16.mxu0 %v4862_v12  ;;  %v4141_v55 = vld [vmem:[%s7862_s17 + $0xd70] sm:$0xff]  ;;  %v4957_v12 = vunpack.c.h.s8.bf16 %v4109_v35  ;;  %v4953_v59 = vunpack.c.l.s8.bf16 %v4109_v35 }
 0x90d   : > { %6300 = vmatprep.subr.bf16.mxu1 %v4926_v43  ;;  %v5021_v43 = vunpack.c.h.s8.bf16 %v4141_v55 }
 0x90f   : > { %6260 = vmatpush2.bf16.msra.mxu0 %v4861_v14  ;;  %v4106_v14 = vld [vmem:[%s7862_s17 + $0xc58] sm:$0xff] }
 0x910   : > { %6301 = vmatpush2.bf16.msra.mxu1 %v4925_v21  ;;  %6261 = vmatprep.subr.bf16.mxu0 %v4858_v0  ;;  %v4138_v21 = vld [vmem:[%s7862_s17 + $0xd58] sm:$0xff] }
 0x911   : > { %6302 = vmatprep.subr.bf16.mxu1 %v4922_v37  ;;  %v5014_v36 = vunpack.c.h.s8.bf16 %v4138_v21 }
 0x913   : > { %6262 = vmatpush2.bf16.msra.mxu0 %v4857_v6  ;;  %v5017_v6 = vunpack.c.l.s8.bf16 %v4141_v55 }
 0x914   : > { %6303 = vmatpush2.bf16.msra.mxu1 %v4921_v49  ;;  %6263 = vmatprep.subr.bf16.mxu0 %v4854_v62 }
 0x915   : > { %6304 = vmatprep.subr.bf16.mxu1 %v4918_v7  ;;  %v4950_v7 = vunpack.c.h.s8.bf16 %v4106_v14 }
 0x917   : > { %6264 = vmatpush2.bf16.msra.mxu0 %v4853_v8  ;;  %v4137_v8 = vld [vmem:[%s7862_s17 + $0xd50] sm:$0xff] }
 0x918   : > { %6305 = vmatpush2.bf16.msra.mxu1 %v4917_v24  ;;  %6265 = vmatprep.subr.bf16.mxu0 %v4850_v22  ;;  %v5013_v45 = vunpack.c.h.s8.bf16 %v4137_v8 }
 0x919   : > { %6306 = vmatprep.subr.bf16.mxu1 %v4914_v60  ;;  %v4949_v60 = vunpack.c.h.s8.bf16 %v4105_v32 }
 0x91b   : > { %6266 = vmatpush2.bf16.msra.mxu0 %v4849_v54 }
 0x91c   : > { %6307 = vmatpush2.bf16.msra.mxu1 %v4913_v50  ;;  %6267 = vmatprep.subr.bf16.mxu0 %v4846_v18  ;;  %v5010_v50 = vunpack.c.l.s8.bf16 %v4138_v21  ;;  %v4134_v18 = vld [vmem:[%s7862_s17 + $0xd38] sm:$0xff] }
 0x91d   : > { %6308 = vmatprep.subr.bf16.mxu1 %v4910_v29  ;;  %v5009_v29 = vunpack.c.l.s8.bf16 %v4137_v8  ;;  %v5006_v46 = vunpack.c.h.s8.bf16 %v4134_v18  ;;  %v5002_v30 = vunpack.c.l.s8.bf16 %v4134_v18 }
 0x91f   : > { %6268 = vmatpush2.bf16.msra.mxu0 %v4845_v42  ;;  %v4101_v42 = vld [vmem:[%s7862_s17 + $0xc30] sm:$0xff] }
 0x920   : > { %6309 = vmatpush2.bf16.msra.mxu1 %v4909_v9  ;;  %6269 = vmatprep.subr.bf16.mxu0 %v4842_v3  ;;  %v4133_v9 = vld [vmem:[%s7862_s17 + $0xd30] sm:$0xff]  ;;  %v4941_v3 = vunpack.c.h.s8.bf16 %v4101_v42 }
 0x921   : > { %6310 = vmatprep.subr.bf16.mxu1 %v4906_v15  ;;  %v5005_v15 = vunpack.c.h.s8.bf16 %v4133_v9 }
 0x923   : > { %6270 = vmatpush2.bf16.msra.mxu0 %v4841_v16  ;;  %v4098_v16 = vld [vmem:[%s7862_s17 + $0xc18] sm:$0xff] }
 0x924   : > { %6311 = vmatpush2.bf16.msra.mxu1 %v4905_v57  ;;  %6271 = vmatprep.subr.bf16.mxu0 %v4838_v19  ;;  %v4130_v57 = vld [vmem:[%s7862_s17 + $0xd18] sm:$0xff]  ;;  %v4937_v19 = vunpack.c.l.s8.bf16 %v4101_v42  ;;  %v4934_v44 = vunpack.c.h.s8.bf16 %v4098_v16  ;;  %v4930_v11 = vunpack.c.l.s8.bf16 %v4098_v16 }
 0x925   : > { %6312 = vmatprep.subr.bf16.mxu1 %v4902_v53  ;;  %v5001_v53 = vunpack.c.l.s8.bf16 %v4133_v9  ;;  %v4998_v58 = vunpack.c.h.s8.bf16 %v4130_v57  ;;  %v4994_v39 = vunpack.c.l.s8.bf16 %v4130_v57 }
 0x927   : > { %6272 = vmatpush2.bf16.msra.mxu0 %v4837_v17  ;;  %v4097_v17 = vld [vmem:[%s7862_s17 + $0xc10] sm:$0xff] }
 0x928   : > { %6313 = vmatpush2.bf16.msra.mxu1 %v4901_v34  ;;  %6273 = vmatprep.subr.bf16.mxu0 %v4834_v56  ;;  %v4129_v34 = vld [vmem:[%s7862_s17 + $0xd10] sm:$0xff]  ;;  %v4933_v56 = vunpack.c.h.s8.bf16 %v4097_v17 }
 0x929   : > { %6314 = vmatprep.subr.bf16.mxu1 %v4898_v25  ;;  %v4997_v25 = vunpack.c.h.s8.bf16 %v4129_v34 }
 0x92b   : > { %6274 = vmatpush2.bf16.msra.mxu0 %v4833_v26  ;;  %v4126_v26 = vld [vmem:[%s7862_s17 + $0xcf8] sm:$0xff] }
 0x92c   : > { %6315 = vmatpush2.bf16.msra.mxu1 %v4897_v13  ;;  %6325 = vmatprep.subr.bf16.mxu0 %v4958_v41  ;;  %v4158_v13 = vld [vmem:[%s7862_s17 + $0xdf8] sm:$0xff]  ;;  %v4929_v41 = vunpack.c.l.s8.bf16 %v4097_v17  ;;  %v4990_v35 = vunpack.c.h.s8.bf16 %v4126_v26 }
 0x92d   : > { %6366 = vmatprep.subr.bf16.mxu1 %v5022_v5  ;;  %v4993_v5 = vunpack.c.l.s8.bf16 %v4129_v34  ;;  %v5054_v55 = vunpack.c.h.s8.bf16 %v4158_v13  ;;  %v5050_v21 = vunpack.c.l.s8.bf16 %v4158_v13 }
 0x92e   : > { %v6031_v0 = vpop.f32.mrf.mxu0  ;;  %6276 = vmatmul.mubr.bf16.vlgmr.msra.gmra.mxu0 %v10545_v33 }
 0x92f   : > { %v6072_v37 = vpop.f32.mrf.mxu1  ;;  %6317 = vmatmul.mubr.bf16.vlgmr.msra.gmra.mxu1 %v10554_v38  ;;  %v6032_v52 = vadd.f32 %v6031_v0, %v10827_v28  ;;  %6326 = vmatpush1.bf16.msra.mxu0 %v4957_v12  ;;  %v4125_v12 = vld [vmem:[%s7862_s17 + $0xcf0] sm:$0xff]  ;;  %v4122_v0 = vld [vmem:[%s7862_s17 + $0xcd8] sm:$0xff] }
 0x930   : > { %6367 = vmatpush1.bf16.msra.mxu1 %v5021_v43  ;;  %v6033_v49 = vpop.f32.mrf.mxu0  ;;  %6327 = vmatprep.subr.bf16.mxu0 %v4954_v47  ;;  %v4157_v43 = vld [vmem:[%s7862_s17 + $0xdf0] sm:$0xff]  ;;  %v4989_v47 = vunpack.c.h.s8.bf16 %v4125_v12  ;;  %v4978_v8 = vunpack.c.l.s8.bf16 %v4122_v0 }
 0x931   : > { %v6074_v62 = vpop.f32.mrf.mxu1  ;;  %6368 = vmatprep.subr.bf16.mxu1 %v5018_v10  ;;  %v10869_v24 = vadd.f32 %v6072_v37, %v6032_v52  ;;  %v6034_v33 = vadd.f32 %v6033_v49, %v10832_v23  ;;  %6357 = vmatprep.mubr.bf16.mxu0 %v10550_v63  ;;  %v4946_v23 = vunpack.c.l.s8.bf16 %v4106_v14  ;;  %v4102_v63 = vld [vmem:[%s7862_s17 + $0xc38] sm:$0xff]  ;;  %v5053_v10 = vunpack.c.h.s8.bf16 %v4157_v43 }
 0x932   : > { %6398 = vmatprep.mubr.bf16.mxu1 %v10560_v2  ;;  %v6035_v38 = vpop.f32.mrf.mxu0  ;;  %v4945_v2 = vunpack.c.l.s8.bf16 %v4105_v32  ;;  %v4942_v61 = vunpack.c.h.s8.bf16 %v4102_v63  ;;  %v4938_v4 = vunpack.c.l.s8.bf16 %v4102_v63  ;;  %v4986_v14 = vunpack.c.l.s8.bf16 %v4126_v26  ;;  %v4154_v37 = vld [vmem:[%s7862_s17 + $0xdd8] sm:$0xff] }
 0x933   : > { %v6076_v28 = vpop.f32.mrf.mxu1  ;;  %v10874_v22 = vadd.f32 %v6074_v62, %v6034_v33  ;;  %6328 = vmatpush1.bf16.msra.mxu0 %v4953_v59  ;;  %v4985_v52 = vunpack.c.l.s8.bf16 %v4125_v12  ;;  %v5049_v59 = vunpack.c.l.s8.bf16 %v4157_v43  ;;  %v5046_v49 = vunpack.c.h.s8.bf16 %v4154_v37  ;;  %v4121_v62 = vld [vmem:[%s7862_s17 + $0xcd0] sm:$0xff]  ;;  %v4118_v38 = vld [vmem:[%s7862_s17 + $0xcb8] sm:$0xff] }
 0x934   : > { %6369 = vmatpush1.bf16.msra.mxu1 %v5017_v6  ;;  %v6036_v20 = vpop.f32.mrf.mxu0  ;;  %6329 = vmatprep.subr.bf16.mxu0 %v4950_v7  ;;  %v4982_v6 = vunpack.c.h.s8.bf16 %v4122_v0  ;;  %v4153_v7 = vld [vmem:[%s7862_s17 + $0xdd0] sm:$0xff]  ;;  %v5042_v33 = vunpack.c.l.s8.bf16 %v4154_v37  ;;  %v4150_v28 = vld [vmem:[%s7862_s17 + $0xdb8] sm:$0xff] }
 0x935   : > { %v6077_v54 = vpop.f32.mrf.mxu1  ;;  %6370 = vmatprep.subr.bf16.mxu1 %v5014_v36  ;;  %v4981_v36 = vunpack.c.h.s8.bf16 %v4121_v62  ;;  %v5045_v32 = vunpack.c.h.s8.bf16 %v4153_v7  ;;  %v4974_v20 = vunpack.c.h.s8.bf16 %v4118_v38 }
 0x936   : > { %v5038_v54 = vunpack.c.h.s8.bf16 %v4150_v28 }
 0x937   : > { %6330 = vmatpush1.bf16.msra.mxu0 %v4949_v60  ;;  %v4977_v60 = vunpack.c.l.s8.bf16 %v4121_v62 }
 0x938   : > { %6371 = vmatpush1.bf16.msra.mxu1 %v5013_v45  ;;  %6331 = vmatprep.subr.bf16.mxu0 %v4946_v23  ;;  %v5041_v45 = vunpack.c.l.s8.bf16 %v4153_v7  ;;  %v4117_v23 = vld [vmem:[%s7862_s17 + $0xcb0] sm:$0xff] }
 0x939   : > { %6372 = vmatprep.subr.bf16.mxu1 %v5010_v50  ;;  %v4149_v50 = vld [vmem:[%s7862_s17 + $0xdb0] sm:$0xff]  ;;  %v4973_v63 = vunpack.c.h.s8.bf16 %v4117_v23  ;;  %v4969_v42 = vunpack.c.l.s8.bf16 %v4117_v23 }
 0x93a   : > { %v5037_v18 = vunpack.c.h.s8.bf16 %v4149_v50  ;;  %v5033_v9 = vunpack.c.l.s8.bf16 %v4149_v50 }
 0x93b   : > { %6332 = vmatpush1.bf16.msra.mxu0 %v4945_v2  ;;  %v4970_v2 = vunpack.c.l.s8.bf16 %v4118_v38  ;;  %v7621_v38 = vmov 1983009808  }
 0x93c   : > { %6373 = vmatpush1.bf16.msra.mxu1 %v5009_v29  ;;  %6333 = vmatprep.subr.bf16.mxu0 %v4942_v61  ;;  %v5034_v29 = vunpack.c.l.s8.bf16 %v4150_v28  ;;  %v4114_v61 = vld [vmem:[%s7862_s17 + $0xc98] sm:$0xff]  ;;  %v6414_v28 = vunpack.c.l.s4 %v7621_v38 }
 0x93d   : > { %6374 = vmatprep.subr.bf16.mxu1 %v5006_v46  ;;  %v4146_v46 = vld [vmem:[%s7862_s17 + $0xd98] sm:$0xff] }
 0x93f   : > { %6334 = vmatpush1.bf16.msra.mxu0 %v4941_v3  ;;  %v4966_v3 = vunpack.c.h.s8.bf16 %v4114_v61 }
 0x940   : > { %6375 = vmatpush1.bf16.msra.mxu1 %v5005_v15  ;;  %6335 = vmatprep.subr.bf16.mxu0 %v4938_v4  ;;  %v5030_v15 = vunpack.c.h.s8.bf16 %v4146_v46  ;;  %v4113_v4 = vld [vmem:[%s7862_s17 + $0xc90] sm:$0xff] }
 0x941   : > { %6376 = vmatprep.subr.bf16.mxu1 %v5002_v30  ;;  %v4145_v30 = vld [vmem:[%s7862_s17 + $0xd90] sm:$0xff]  ;;  %v4965_v16 = vunpack.c.h.s8.bf16 %v4113_v4 }
 0x942   : > { %v5029_v57 = vunpack.c.h.s8.bf16 %v4145_v30 }
 0x943   : > { %6336 = vmatpush1.bf16.msra.mxu0 %v4937_v19  ;;  %v4962_v19 = vunpack.c.l.s8.bf16 %v4114_v61 }
 0x944   : > { %6377 = vmatpush1.bf16.msra.mxu1 %v5001_v53  ;;  %6337 = vmatprep.subr.bf16.mxu0 %v4934_v44  ;;  %v5026_v53 = vunpack.c.l.s8.bf16 %v4146_v46  ;;  %v4961_v44 = vunpack.c.l.s8.bf16 %v4113_v4 }
 0x945   : > { %6378 = vmatprep.subr.bf16.mxu1 %v4998_v58  ;;  %v5025_v58 = vunpack.c.l.s8.bf16 %v4145_v30 }
 0x947   : > { %6338 = vmatpush1.bf16.msra.mxu0 %v4933_v56 }
 0x948   : > { %6379 = vmatpush1.bf16.msra.mxu1 %v4997_v25  ;;  %6339 = vmatprep.subr.bf16.mxu0 %v4930_v11 }
 0x949   : > { %6380 = vmatprep.subr.bf16.mxu1 %v4994_v39 }
 0x94b   : > { %6340 = vmatpush1.bf16.msra.mxu0 %v4929_v41 }
 0x94c   : > { %6381 = vmatpush1.bf16.msra.mxu1 %v4993_v5  ;;  %6341 = vmatprep.subr.bf16.mxu0 %v4990_v35 }
 0x94d   : > { %6382 = vmatprep.subr.bf16.mxu1 %v5054_v55 }
 0x94f   : > { %6342 = vmatpush2.bf16.msra.mxu0 %v4989_v47 }
 0x950   : > { %6383 = vmatpush2.bf16.msra.mxu1 %v5053_v10  ;;  %6343 = vmatprep.subr.bf16.mxu0 %v4986_v14 }
 0x951   : > { %6384 = vmatprep.subr.bf16.mxu1 %v5050_v21 }
 0x953   : > { %6344 = vmatpush2.bf16.msra.mxu0 %v4985_v52 }
 0x954   : > { %6385 = vmatpush2.bf16.msra.mxu1 %v5049_v59  ;;  %6345 = vmatprep.subr.bf16.mxu0 %v4982_v6 }
 0x955   : > { %6386 = vmatprep.subr.bf16.mxu1 %v5046_v49 }
 0x957   : > { %6346 = vmatpush2.bf16.msra.mxu0 %v4981_v36 }
 0x958   : > { %6387 = vmatpush2.bf16.msra.mxu1 %v5045_v32  ;;  %6347 = vmatprep.subr.bf16.mxu0 %v4978_v8 }
 0x959   : > { %6388 = vmatprep.subr.bf16.mxu1 %v5042_v33 }
 0x95b   : > { %6348 = vmatpush2.bf16.msra.mxu0 %v4977_v60 }
 0x95c   : > { %6389 = vmatpush2.bf16.msra.mxu1 %v5041_v45  ;;  %6349 = vmatprep.subr.bf16.mxu0 %v4974_v20 }
 0x95d   : > { %6390 = vmatprep.subr.bf16.mxu1 %v5038_v54  ;;  %v6415_v54 = vunpack.c.0.s8 %v6414_v28 }
 0x95f   : > { %6350 = vmatpush2.bf16.msra.mxu0 %v4973_v63  ;;  %v10905_v46 = vsub.s32 %v6415_v54, %v10187_v48 }
 0x960   : > { %6391 = vmatpush2.bf16.msra.mxu1 %v5037_v18  ;;  %6351 = vmatprep.subr.bf16.mxu0 %v4970_v2 }
 0x961   : > { %6392 = vmatprep.subr.bf16.mxu1 %v5034_v29  ;;  %v6419_v30 = vrot.slane %v6411_v51, %v10905_v46 }
 0x963   : > { %6352 = vmatpush2.bf16.msra.mxu0 %v4969_v42 }
 0x964   : > { %6393 = vmatpush2.bf16.msra.mxu1 %v5033_v9  ;;  %6353 = vmatprep.subr.bf16.mxu0 %v4966_v3 }
 0x965   : > { %6394 = vmatprep.subr.bf16.mxu1 %v5030_v15 }
 0x967   : > { %6354 = vmatpush2.bf16.msra.mxu0 %v4965_v16 }
 0x968   : > { %6395 = vmatpush2.bf16.msra.mxu1 %v5029_v57  ;;  %6355 = vmatprep.subr.bf16.mxu0 %v4962_v19  ;;  %v5055_v57 = vld [vmem:[#allocation3] sm:$0xff] }
 0x969   : > { %6396 = vmatprep.subr.bf16.mxu1 %v5026_v53 }
 0x96b   : > { %6356 = vmatpush2.bf16.msra.mxu0 %v4961_v44 }
 0x96c   : > { %6397 = vmatpush2.bf16.msra.mxu1 %v5025_v58 }
 0x96e   : > { %v6113_v17 = vpop.f32.mrf.mxu0  ;;  %6358 = vmatmul.mubr.bf16.vlgmr.msra.gmra.mxu0 %v10602_v1 }
 0x96f   : > { %v6154_v34 = vpop.f32.mrf.mxu1  ;;  %6399 = vmatmul.mubr.bf16.vlgmr.msra.gmra.mxu1 %v10608_v40  ;;  %v6114_v56 = vadd.f32 %v6113_v17, %v10869_v24 }
 0x970   : > { %v6115_v25 = vpop.f32.mrf.mxu0 }
 0x971   : > { %v6156_v11 = vpop.f32.mrf.mxu1  ;;  %v6155_v39 = vadd.f32 %v6154_v34, %v6114_v56  ;;  %v6116_v26 = vadd.f32 %v6115_v25, %v10874_v22 }
 0x972   : > { %v6117_v13 = vpop.f32.mrf.mxu0 }
 0x973   : > { %v6158_v41 = vpop.f32.mrf.mxu1  ;;  %v6157_v5 = vadd.f32 %v6156_v11, %v6116_v26 }
 0x974   : > { %v6118_v35 = vpop.f32.mrf.mxu0 }
 0x975   : > { %v6159_v55 = vpop.f32.mrf.mxu1 }
 0x9ae   : > { %v6195_v12 = vpop.f32.mrf.mxu0 }
 0x9af   : > { %v6236_v43 = vpop.f32.mrf.mxu1  ;;  %v6196_v47 = vadd.f32 %v6195_v12, %v6155_v39 }
 0x9b0   : > { %v6197_v10 = vpop.f32.mrf.mxu0 }
 0x9b1   : > { %v6238_v14 = vpop.f32.mrf.mxu1  ;;  %v6237_v1 = vadd.f32 %v6236_v43, %v6196_v47  ;;  %v6198_v21 = vadd.f32 %v6197_v10, %v6157_v5 }
 0x9b2   : > { %v6199_v40 = vpop.f32.mrf.mxu0 }
 0x9b3   : > { %v6240_v0 = vpop.f32.mrf.mxu1  ;;  %v6239_v24 = vadd.f32 %v6238_v14, %v6198_v21 }
 0x9b4   : > { %v6200_v37 = vpop.f32.mrf.mxu0 }
 0x9b5   : > { %v6241_v52 = vpop.f32.mrf.mxu1 }
 0x9ee   : > { %v6277_v59 = vpop.f32.mrf.mxu0 }
 0x9ef   : > { %v6318_v6 = vpop.f32.mrf.mxu1  ;;  %v6278_v22 = vadd.f32 %v6277_v59, %v6237_v1 }
 0x9f0   : > { %v6279_v49 = vpop.f32.mrf.mxu0 }
 0x9f1   : > { %v6320_v62 = vpop.f32.mrf.mxu1  ;;  %v6319_v7 = vadd.f32 %v6318_v6, %v6278_v22  ;;  %v6280_v60 = vadd.f32 %v6279_v49, %v6239_v24 }
 0x9f2   : > { %v6281_v36 = vpop.f32.mrf.mxu0 }
 0x9f3   : > { %v6322_v32 = vpop.f32.mrf.mxu1  ;;  %v6321_v23 = vadd.f32 %v6320_v62, %v6280_v60 }
 0x9f4   : > { %v6282_v8 = vpop.f32.mrf.mxu0 }
 0x9f5   : > { %v6323_v33 = vpop.f32.mrf.mxu1 }
 0xa2e   : > { %v6359_v45 = vpop.f32.mrf.mxu0 }
 0xa2f   : > { %v6400_v20 = vpop.f32.mrf.mxu1  ;;  %v6360_v50 = vadd.f32 %v6359_v45, %v6319_v7 }
 0xa30   : > { %v6361_v63 = vpop.f32.mrf.mxu0 }
 0xa31   : > { %v6402_v18 = vpop.f32.mrf.mxu1  ;;  %v6362_v2 = vadd.f32 %v6361_v63, %v6321_v23  ;;  %v6401_v42 = vadd.f32 %v6400_v20, %v6360_v50 }
 0xa32   : > { %v6363_v29 = vpop.f32.mrf.mxu0 }
 0xa33   : > { %v6404_v61 = vpop.f32.mrf.mxu1  ;;  %v6403_v9 = vadd.f32 %v6402_v18, %v6362_v2 }
 0xa34   : > { %v6364_v3 = vpop.f32.mrf.mxu0 }
 0xa35   : > { %v6405_v15 = vpop.f32.mrf.mxu1  ;;  %v6412_v4 = vcombine.low %v6401_v42, %v6403_v9 }
 0xa37   : > { %v6426_v16 = vrot.slane %v6412_v4, %v10905_v46 }
 0xa39   : > { %v6427_v19 = vcombine.low %v6419_v30, %v6426_v16  ;;  %6434 = sbr.rel (%p7046_p2) target bundleno = 3058 (0xbf2), region = 108 }
 0xa3b   : > { %v6429_v53 = vadd.f32 %v6427_v19, %v5055_v57 }
 0xa3d   : > { %6430 = vst [vmem:[#allocation3] sm:$0xff] %v6429_v53 }
 0xa3e   : > { %v6542_v44 = vld [vmem:[%s11172_s8 + $0xf8] sm:$0xff]  ;;  %v6541_v51 = vld [vmem:[%s11172_s8 + $0xf0] sm:$0xff]  ;;  %v6540_v25 = vld [vmem:[%s11172_s8 + $0xe8] sm:$0xff]  ;;  %v6440_v45 = vsub.s32 0, %v10187_v48  ;;  %v6444_v20 = vsub.s32 1, %v10187_v48  ;;  %v6448_v54 = vsub.s32 2, %v10187_v48 }
 0xa3f   : > { %v6574_v58 = vld [vmem:[%s11172_s8 + $0x1f8] sm:$0xff]  ;;  %7057 = vmatprep.subr.mxu0 %v6542_v44  ;;  %v6573_v17 = vld [vmem:[%s11172_s8 + $0x1f0] sm:$0xff]  ;;  %v6572_v11 = vld [vmem:[%s11172_s8 + $0x1e8] sm:$0xff]  ;;  %v6452_v63 = vsub.s32 3, %v10187_v48  ;;  %vm7623_vm15 = vmmov 0   ;;  %vm6760_vm3 = vcmask 523264  }
 0xa40   : > { %v6526_v31 = vld [vmem:[%s11172_s8 + $0x78] sm:$0xff]  ;;  %7092 = vmatprep.subr.mxu1 %v6574_v58  ;;  %v6525_v34 = vld [vmem:[%s11172_s8 + $0x70] sm:$0xff]  ;;  %v6524_v39 = vld [vmem:[%s11172_s8 + $0x68] sm:$0xff]  ;;  %vm6834_vm6 = vcmask 9216  }
 0xa41   : > { %v6558_v27 = vld [vmem:[%s11172_s8 + $0x178] sm:$0xff]  ;;  %7058 = vmatpush3.msra.mxu0 %v6526_v31  ;;  %v6557_v56 = vld [vmem:[%s11172_s8 + $0x170] sm:$0xff]  ;;  %v6556_v26 = vld [vmem:[%s11172_s8 + $0x168] sm:$0xff] }
 0xa42   : > { %7093 = vmatpush3.msra.mxu1 %v6558_v27  ;;  %7059 = vmatprep.subr.mxu0 %v6541_v51  ;;  %v6539_v13 = vld [vmem:[%s11172_s8 + $0xe0] sm:$0xff]  ;;  %v6538_v55 = vld [vmem:[%s11172_s8 + $0xd8] sm:$0xff]  ;;  %v6537_v10 = vld [vmem:[%s11172_s8 + $0xd0] sm:$0xff] }
 0xa43   : > { %7094 = vmatprep.subr.mxu1 %v6573_v17  ;;  %7060 = vmatpush3.msra.mxu0 %v6525_v34  ;;  %v6571_v41 = vld [vmem:[%s11172_s8 + $0x1e0] sm:$0xff]  ;;  %v6570_v12 = vld [vmem:[%s11172_s8 + $0x1d8] sm:$0xff]  ;;  %v6569_v14 = vld [vmem:[%s11172_s8 + $0x1d0] sm:$0xff] }
 0xa44   : > { %7095 = vmatpush3.msra.mxu1 %v6557_v56  ;;  %7061 = vmatprep.subr.mxu0 %v6540_v25  ;;  %v6523_v5 = vld [vmem:[%s11172_s8 + $0x60] sm:$0xff]  ;;  %v6522_v43 = vld [vmem:[%s11172_s8 + $0x58] sm:$0xff]  ;;  %v6521_v1 = vld [vmem:[%s11172_s8 + $0x50] sm:$0xff] }
 0xa45   : > { %7096 = vmatprep.subr.mxu1 %v6572_v11  ;;  %v6555_v35 = vld [vmem:[%s11172_s8 + $0x160] sm:$0xff]  ;;  %7062 = vmatpush3.msra.mxu0 %v6524_v39  ;;  %v6554_v47 = vld [vmem:[%s11172_s8 + $0x158] sm:$0xff]  ;;  %v6553_v21 = vld [vmem:[%s11172_s8 + $0x150] sm:$0xff] }
 0xa46   : > { %7097 = vmatpush3.msra.mxu1 %v6556_v26  ;;  %7063 = vmatprep.subr.mxu0 %v6539_v13  ;;  %v6536_v40 = vld [vmem:[%s11172_s8 + $0xc8] sm:$0xff]  ;;  %v6535_v52 = vld [vmem:[%s11172_s8 + $0xc0] sm:$0xff]  ;;  %v6534_v49 = vld [vmem:[%s11172_s8 + $0xb8] sm:$0xff] }
 0xa47   : > { %7098 = vmatprep.subr.mxu1 %v6571_v41  ;;  %7064 = vmatpush3.msra.mxu0 %v6523_v5  ;;  %v6568_v0 = vld [vmem:[%s11172_s8 + $0x1c8] sm:$0xff]  ;;  %v6567_v59 = vld [vmem:[%s11172_s8 + $0x1c0] sm:$0xff]  ;;  %v6566_v62 = vld [vmem:[%s11172_s8 + $0x1b8] sm:$0xff] }
 0xa48   : > { %7099 = vmatpush3.msra.mxu1 %v6555_v35  ;;  %7065 = vmatprep.subr.mxu0 %v6538_v55  ;;  %v6520_v24 = vld [vmem:[%s11172_s8 + $0x48] sm:$0xff]  ;;  %v6519_v6 = vld [vmem:[%s11172_s8 + $0x40] sm:$0xff]  ;;  %v6518_v7 = vld [vmem:[%s11172_s8 + $0x38] sm:$0xff] }
 0xa49   : > { %7100 = vmatprep.subr.mxu1 %v6570_v12  ;;  %7066 = vmatpush3.msra.mxu0 %v6522_v43  ;;  %v6552_v37 = vld [vmem:[%s11172_s8 + $0x148] sm:$0xff]  ;;  %v6551_v22 = vld [vmem:[%s11172_s8 + $0x140] sm:$0xff]  ;;  %v6550_v36 = vld [vmem:[%s11172_s8 + $0x138] sm:$0xff] }
 0xa4a   : > { %7101 = vmatpush3.msra.mxu1 %v6554_v47  ;;  %7067 = vmatprep.subr.mxu0 %v6537_v10  ;;  %v6533_v32 = vld [vmem:[%s11172_s8 + $0xb0] sm:$0xff]  ;;  %v6532_v28 = vld [vmem:[%s11172_s8 + $0xa8] sm:$0xff]  ;;  %v6531_v18 = vld [vmem:[%s11172_s8 + $0xa0] sm:$0xff] }
 0xa4b   : > { %7102 = vmatprep.subr.mxu1 %v6569_v14  ;;  %7068 = vmatpush3.msra.mxu0 %v6521_v1  ;;  %v6565_v8 = vld [vmem:[%s11172_s8 + $0x1b0] sm:$0xff]  ;;  %v6564_v60 = vld [vmem:[%s11172_s8 + $0x1a8] sm:$0xff]  ;;  %v6563_v2 = vld [vmem:[%s11172_s8 + $0x1a0] sm:$0xff] }
 0xa4c   : > { %7103 = vmatpush3.msra.mxu1 %v6553_v21  ;;  %7069 = vmatprep.subr.mxu0 %v6536_v40  ;;  %v6517_v33 = vld [vmem:[%s11172_s8 + $0x30] sm:$0xff]  ;;  %v6516_v23 = vld [vmem:[%s11172_s8 + $0x28] sm:$0xff]  ;;  %v6515_v29 = vld [vmem:[%s11172_s8 + $0x20] sm:$0xff] }
 0xa4d   : > { %7104 = vmatprep.subr.mxu1 %v6568_v0  ;;  %7070 = vmatpush3.msra.mxu0 %v6520_v24  ;;  %v6549_v38 = vld [vmem:[%s11172_s8 + $0x130] sm:$0xff]  ;;  %v6548_v50 = vld [vmem:[%s11172_s8 + $0x128] sm:$0xff]  ;;  %v6547_v48 = vld [vmem:[%s11172_s8 + $0x120] sm:$0xff] }
 0xa4e   : > { %7105 = vmatpush3.msra.mxu1 %v6552_v37  ;;  %7071 = vmatprep.subr.mxu0 %v6535_v52  ;;  %v6436_v61 = vld [vmem:[#allocation12] sm:$0xf]  ;;  %v6473_v42 = vld [vmem:[#allocation13] sm:$0xf]  ;;  %v6530_v9 = vld [vmem:[%s11172_s8 + $0x98] sm:$0xff]  ;;  %v7622_v52 = vmov 0.0  }
 0xa4f   : > { %7106 = vmatprep.subr.mxu1 %v6567_v59  ;;  %7072 = vmatpush3.msra.mxu0 %v6519_v6  ;;  %v6562_v3 = vld [vmem:[%s11172_s8 + $0x198] sm:$0xff]  ;;  %v6441_v15 = vrot.slane %v6436_v61, %v6440_v45  ;;  %v6445_v4 = vrot.slane %v6436_v61, %v6444_v20  ;;  %v6449_v30 = vrot.slane %v6436_v61, %v6448_v54  ;;  %v6529_v58 = vld [vmem:[%s11172_s8 + $0x90] sm:$0xff]  ;;  %v6528_v39 = vld [vmem:[%s11172_s8 + $0x88] sm:$0xff] }
 0xa50   : > { %7107 = vmatpush3.msra.mxu1 %v6551_v22  ;;  %7073 = vmatprep.subr.mxu0 %v6534_v49  ;;  %v6514_v16 = vld [vmem:[%s11172_s8 + $0x18] sm:$0xff]  ;;  %v6453_v19 = vrot.slane %v6436_v61, %v6452_v63  ;;  %v6478_v53 = vrot.slane %v6473_v42, %v6440_v45  ;;  %v6482_v44 = vrot.slane %v6473_v42, %v6444_v20  ;;  %v6561_v31 = vld [vmem:[%s11172_s8 + $0x190] sm:$0xff]  ;;  %v6560_v26 = vld [vmem:[%s11172_s8 + $0x188] sm:$0xff] }
 0xa51   : > { %7108 = vmatprep.subr.mxu1 %v6566_v62  ;;  %7074 = vmatpush3.msra.mxu0 %v6518_v7  ;;  %v6546_v57 = vld [vmem:[%s11172_s8 + $0x118] sm:$0xff]  ;;  %v6454_v27 = vcombine.low %v6441_v15, %v6445_v4  ;;  %v6486_v51 = vrot.slane %v6473_v42, %v6448_v54  ;;  %v6490_v17 = vrot.slane %v6473_v42, %v6452_v63  ;;  %v6513_v34 = vld [vmem:[%s11172_s8 + $0x10] sm:$0xff]  ;;  %v6512_v5 = vld [vmem:[%s11172_s8 + $0x8] sm:$0xff] }
 0xa52   : > { %7109 = vmatpush3.msra.mxu1 %v6550_v36  ;;  %7075 = vmatprep.subr.mxu0 %v6533_v32  ;;  %v6545_v56 = vld [vmem:[%s11172_s8 + $0x110] sm:$0xff]  ;;  %v6455_v25 = vcombine.low %v6449_v30, %v6453_v19  ;;  %v6491_v11 = vcombine.low %v6478_v53, %v6482_v44  ;;  %v6544_v35 = vld [vmem:[%s11172_s8 + $0x108] sm:$0xff]  ;;  %v6527_v43 = vld [vmem:[%s11172_s8 + $0x80] sm:$0xff] }
 0xa53   : > { %7110 = vmatprep.subr.mxu1 %v6565_v8  ;;  %7076 = vmatpush3.msra.mxu0 %v6517_v33  ;;  %v6462_v13 = vrot.slane %v6454_v27, %v10905_v46  ;;  %v6492_v41 = vcombine.low %v6486_v51, %v6490_v17  ;;  %v6559_v47 = vld [vmem:[%s11172_s8 + $0x180] sm:$0xff]  ;;  %v6435_v10 = vld [vmem:[#allocation3] sm:$0xff]  ;;  %v6752_v7 = vld [vmem:[%s11174_s10 + $0x38] sm:$0xff] }
 0xa54   : > { %7111 = vmatpush3.msra.mxu1 %v6549_v38  ;;  %7077 = vmatprep.subr.mxu0 %v6532_v28  ;;  %v6469_v55 = vrot.slane %v6455_v25, %v10905_v46  ;;  %v6499_v12 = vrot.slane %v6491_v11, %v10905_v46  ;;  %v6511_v1 = vld [vmem:[%s11172_s8] sm:$0xff]  ;;  %v6751_v32 = vld [vmem:[%s11174_s10 + $0x30] sm:$0xff]  ;;  %v6748_v33 = vld [vmem:[%s11174_s10 + $0x18] sm:$0xff] }
 0xa55   : > { %7112 = vmatprep.subr.mxu1 %v6564_v60  ;;  %7078 = vmatpush3.msra.mxu0 %v6516_v23  ;;  %v6506_v14 = vrot.slane %v6492_v41, %v10905_v46  ;;  %v6543_v40 = vld [vmem:[%s11172_s8 + $0x100] sm:$0xff]  ;;  %v6747_v38 = vld [vmem:[%s11174_s10 + $0x10] sm:$0xff]  ;;  %v6746_v28 = vld [vmem:[%s11174_s10 + $0x8] sm:$0xff] }
 0xa56   : > { %7113 = vmatpush3.msra.mxu1 %v6548_v50  ;;  %7079 = vmatprep.subr.mxu0 %v6531_v18  ;;  %v6470_v21 = vcombine.low %v6462_v13, %v6469_v55  ;;  %v6749_v8 = vld [vmem:[%s11174_s10 + $0x20] sm:$0xff]  ;;  %v7047_v54 = vld [vmem:[#allocation15] ss:$0 sm:$0xff]  ;;  %v7048_v61 = vld [vmem:[#allocation16] ss:$0 sm:$0xff] }
 0xa57   : > { %7114 = vmatprep.subr.mxu1 %v6563_v2  ;;  %7080 = vmatpush3.msra.mxu0 %v6515_v29  ;;  %v6507_v0 = vcombine.low %v6499_v12, %v6506_v14  ;;  %v6745_v60 = vld [vmem:[%s11174_s10] sm:$0xff] }
 0xa58   : > { %7115 = vmatpush3.msra.mxu1 %v6547_v48  ;;  %7081 = vmatprep.subr.mxu0 %v6530_v9  ;;  %v6472_v24 = vmul.f32 %v6470_v21, %v6435_v10 }
 0xa59   : > { %7116 = vmatprep.subr.mxu1 %v6562_v3  ;;  %7082 = vmatpush3.msra.mxu0 %v6514_v16 }
 0xa5a   : > { %7117 = vmatpush3.msra.mxu1 %v6546_v57  ;;  %7083 = vmatprep.subr.mxu0 %v6529_v58  ;;  %v6509_v37 = vadd.f32 %v6507_v0, %v6472_v24 }
 0xa5b   : > { %7118 = vmatprep.subr.mxu1 %v6561_v31  ;;  %7084 = vmatpush3.msra.mxu0 %v6513_v34 }
 0xa5c   : > { %7119 = vmatpush3.msra.mxu1 %v6545_v56  ;;  %7085 = vmatprep.subr.mxu0 %v6528_v39  ;;  %v6510_v59 = vmax.f32 %v6509_v37, 0.0 }
 0xa5d   : > { %7120 = vmatprep.subr.mxu1 %v6560_v26  ;;  %7086 = vmatpush3.msra.mxu0 %v6512_v5 }
 0xa5e   : > { %7121 = vmatpush3.msra.mxu1 %v6544_v35  ;;  %7087 = vmatprep.subr.mxu0 %v6527_v43  ;;  %v6590_v6 = vrot.slane %v6510_v59, %v10905_v46  ;;  %v6583_v22 = vcombine.high %v6510_v59, %v6510_v59 }
 0xa5f   : > { %7122 = vmatprep.subr.mxu1 %v6559_v47  ;;  %7088 = vmatpush3.msra.mxu0 %v6511_v1 }
 0xa60   : > { %7123 = vmatpush3.msra.mxu1 %v6543_v40  ;;  %7136 = vmatprep.subr.mxu0 %v7622_v52  ;;  %v6598_v49 = vcombine.high %v6590_v6, %v6590_v6  ;;  %v6597_v62 = vrot.slane %v6583_v22, %v10905_v46  ;;  %v6750_v46 = vld [vmem:[%s11174_s10 + $0x28] sm:$0xff] }
 0xa62   : > { %6668 = vmatprep.mubr.f32.mxu0 %v6598_v49  ;;  %v6599_v36 = vcombine.high %v6597_v62, %v6597_v62 }
 0xa63   : > { %6669 = vmatmul.mubr.f32.vlgmr.msra.gmra.mxu0 %v6590_v6 }
 0xa64   : > { %6738 = vmatprep.mubr.f32.mxu1 %v6599_v36  ;;  %7137 = vmatpush3.msra.mxu0 %v6752_v7 }
 0xa65   : > { %6739 = vmatmul.mubr.f32.vlgmr.msra.gmra.mxu1 %v6597_v62  ;;  %7138 = vmatprep.subr.mxu0 %v7622_v52 }
 0xa66   : > { %7139 = vmatpush3.msra.mxu0 %v6751_v32  ;;  %7152 = vmatprep.mubr.msk.f32.mxu0 %vm7623_vm15, %v7622_v52 }
 0xa67   : > { %7140 = vmatprep.subr.mxu0 %v7622_v52 }
 0xa68   : > { %7141 = vmatpush3.msra.mxu0 %v6750_v46 }
 0xa69   : > { %7142 = vmatprep.subr.mxu0 %v7622_v52 }
 0xa6a   : > { %7143 = vmatpush3.msra.mxu0 %v6749_v8 }
 0xa6b   : > { %7144 = vmatprep.subr.mxu0 %v7622_v52 }
 0xa6c   : > { %7145 = vmatpush3.msra.mxu0 %v6748_v33 }
 0xa6d   : > { %7146 = vmatprep.subr.mxu0 %v7622_v52 }
 0xa6e   : > { %7147 = vmatpush3.msra.mxu0 %v6747_v38 }
 0xa6f   : > { %7148 = vmatprep.subr.mxu0 %v7622_v52 }
 0xa70   : > { %7149 = vmatpush3.msra.mxu0 %v6746_v28 }
 0xa71   : > { %7150 = vmatprep.subr.mxu0 %v7622_v52 }
 0xa72   : > { %7151 = vmatpush3.msra.mxu0 %v6745_v60 }
 0xb23   : > { %v7089_v45 = vpop.f32.mrf.mxu0 }
 0xb25   : > { %v7124_v20 = vpop.f32.mrf.mxu1  ;;  %v7090_v23 = vpop.f32.mrf.mxu0 }
 0xb26   : > { %v7091_v50 = vadd.f32 %v7090_v23, %v7089_v45 }
 0xb27   : > { %v7125_v63 = vpop.f32.mrf.mxu1 }
 0xb28   : > { %v6671_v18 = vadd.f32 %v7091_v50, %v7047_v54  ;;  %v7126_v2 = vadd.f32 %v7125_v63, %v7124_v20 }
 0xb2a   : > { %v6741_v29 = vadd.f32 %v7126_v2, %v6671_v18 }
 0xb2c   : > { %v6744_v48 = vmax.f32 %v6741_v29, 0.0 }
 0xb2e   : > { %7153 = vmatmul.mubr.msk.f32.vlgmr.msra.gmra.mxu0 %vm6760_vm3, %v6744_v48 }
 0xbee   : > { %v6830_v42 = vpop.f32.mrf.mxu0 }
 0xbef   : > { %v6831_v9 = vadd.f32 %v7048_v61, %v6830_v42 }
 0xbf0   : > { %v7154_v3 = vpop.f32.mrf.mxu0 }
 0xbf1   : > { %6835 = vst.msk [vmem:[#allocation18] sm:$0x3] %vm6834_vm6, %v6831_v9 }
 0xbf2 PF: > { %p7232_p0 = scmp.eq.s32.totalorder %s7711_s27, 3  ;;  %s7624_s25 = smov [#allocation18]  }
 0xbf3   : > { %s6843_s0 = sshll.u32 %s7624_s25, 4  ;;  %s6844_s0 = int_to_ptr.vmem [resolvable:$true] %s6843_s0 }
 0xbf4   : > { %s7513_s15 = scalar_lea.vmem %s6844_s0, 32  ;;  %p7520_p1 = scmp.lt.s32.totalorder %s6844_s0, %s6844_s0 }
 0xbf5   : > { %p7514_p5 = scmp.ne.s32.totalorder %s6844_s0, %s7513_s15  ;;  %p7521_p6 = scmp.lt.s32.totalorder %s7513_s15, %s7513_s15 }
 0xbf7   : > { %p7515_p8 = pnand %p7514_p5, %p7232_p0  ;;  %p7522_p9 = por %p7521_p6, %p7520_p1 }
 0xbf9   : > { %p7516_p7 = pneg %p7515_p8 }
 0xbfb   : > { %p7523_p10 = pnand %p7522_p9, %p7516_p7 }
 0xbfd   : > { %7526 = shalt.err (!%p7523_p10)
}
 0xbfe   : > { %7188 = dma.vmem_to_hbm [thread:$0]  (%p7232_p0), %s6844_s0, 32, %s11176_s12, [#allocation6]  }
 0xbff   : > { %7578 = dma.done.wait (%p7232_p0), [#allocation6], 32  }
 0xc00   : > { %7580 = vsyncadd (%p7232_p0), [#allocation6], 4294967264 }
 0xc01 PF: > { %p27_p11 = scmp.ge.s32.totalorder %s7795_s18, 6   ;;  %s11357_s21 = smov %s7587_s22 }
 0xc02   : > { %s11358_s22 = smov %s7591_s23  ;;  %s11359_s23 = smov %s7806_s29 }
 0xc03   : > { %s11360_s24 = smov %s7795_s18  ;;  %29 = sbr.rel (!%p27_p11) target bundleno = 11 (0xb), region = 147 }
 0xc08   :  { %6856 = vsyncpa [#allocation5], 1 }
 0xc09   :  { %6858 = vsyncpa [#allocation5 + $0x1], 1 }
 0xc0a   :  { %6859 = vsyncpa [#allocation8], 1 }
 0xc0b   :  { %6860 = vsyncpa [#allocation11], 1 }
 0xc0c   :  { %6862 = vsyncpa [#allocation11 + $0x1], 1 }
 0xc0d   :  { %6863 = vsyncpa [#allocation14], 1 }
 0xc0e   :  { %6864 = vsyncpa [#allocation17], 1 }
 0xc0f   :  { %6865 = vsyncpa [#allocation6], 1 }
 0xc10   :  { %6867 = vsyncpa [#allocation6 + $0x1], 1 }

</bundles_post_ra>
